<compile_context>
chip_gen: v7x
topology: tpu7x:2x2x1
jax: 0.10.0
libtpu: 0.0.40
codegen_flags: <defaults>
</compile_context>

<pallas_src>
import functools

import jax
import jax.numpy as jnp
from jax.experimental import pallas as pl
from jax.experimental.pallas import tpu as pltpu

D_IN, D1, D2, D3, D_OUT = 256, 512, 1024, 2048, 512


def _round_up(n, m):
    return ((n + m - 1) // m) * m


def decoder_kernel(x_ref, w1_ref, b1_ref, w2_ref, b2_ref,
                   w3_ref, b3_ref, w4_ref, b4_ref, o_ref, h3_ref):
    bf16 = jnp.bfloat16
    f32 = jnp.float32
    # fc1: bf16 x bf16 operands, f32 MXU accumulate, f32 bias add.
    h = jnp.dot(x_ref[...], w1_ref[...], preferred_element_type=f32)
    h = h + b1_ref[...]
    # fc2
    h = jnp.dot(h.astype(bf16), w2_ref[...], preferred_element_type=f32)
    h = h + b2_ref[...]
    # fc3 — stage the (tile, 2048) intermediate in VMEM scratch (bf16) instead
    # of leaving a 2 MiB f32 live value for the register allocator to spill.
    h = jnp.dot(h.astype(bf16), w3_ref[...], preferred_element_type=f32)
    h3_ref[...] = (h + b3_ref[...]).astype(bf16)
    # fc4
    h = jnp.dot(h3_ref[...], w4_ref[...], preferred_element_type=f32)
    h = h + b4_ref[...]
    o_ref[...] = h.astype(o_ref.dtype)


@functools.partial(jax.jit, static_argnames=("max_batch_tile",))
def decoder_forward(x, params, *, max_batch_tile=256):
    """x: (B, 256) f32.  params: f32 (in,out) weights + (1,out) biases."""
    B = x.shape[0]
    w1, b1, w2, b2, w3, b3, w4, b4 = params

    # MXU-friendly batch tile: up to 256 rows, multiple of 8 (f32/bf16 sublanes).
    tile = min(max_batch_tile, _round_up(B, 8))
    Bp = _round_up(B, tile)

    # bf16 operands for the MXU (accumulation stays f32 inside the kernel).
    xq = x.astype(jnp.bfloat16)
    if Bp != B:
        xq = jnp.pad(xq, ((0, Bp - B), (0, 0)))
    w1q, w2q, w3q, w4q = (w.astype(jnp.bfloat16) for w in (w1, w2, w3, w4))

    def w_spec(shape):
        # Resident weight / bias blocks: whole array, same block every grid step.
        return pl.BlockSpec(shape, lambda i: (0, 0))

    grid = (Bp // tile,)
    out = pl.pallas_call(
        decoder_kernel,
        out_shape=jax.ShapeDtypeStruct((Bp, D_OUT), jnp.float32),
        grid_spec=pltpu.PrefetchScalarGridSpec(
            num_scalar_prefetch=0,
            grid=grid,
            in_specs=[
                pl.BlockSpec((tile, D_IN), lambda i: (i, 0)),
                w_spec((D_IN, D1)), w_spec((1, D1)),
                w_spec((D1, D2)), w_spec((1, D2)),
                w_spec((D2, D3)), w_spec((1, D3)),
                w_spec((D3, D_OUT)), w_spec((1, D_OUT)),
            ],
            out_specs=pl.BlockSpec((tile, D_OUT), lambda i: (i, 0)),
            scratch_shapes=[pltpu.VMEM((tile, D3), jnp.bfloat16)],
        ),
        compiler_params=pltpu.CompilerParams(
            # Batch tiles are independent -> megacore sharding on v7x when
            # B >= 2 * tile.
            dimension_semantics=("parallel",),
            # ~7.6 MiB bf16 weights double-buffered + activation tiles + scratch
            # stays well under this; fits v7x's 64 MiB physical VMEM.
            vmem_limit_bytes=40 << 20,
        ),
    )(xq, w1q, b1, w2q, b2, w3q, b3, w4q, b4)
    return out[:B]


def init_params(key):
    # Deterministic synthetic init (PyTorch-like uniform fan-in scaling), f32.
    dims = [(D_IN, D1), (D1, D2), (D2, D3), (D3, D_OUT)]
    params = []
    for fan_in, fan_out in dims:
        kw, kb, key = jax.random.split(key, 3)
        bound = 1.0 / jnp.sqrt(fan_in)
        w = jax.random.uniform(kw, (fan_in, fan_out), jnp.float32, -bound, bound)
        b = jax.random.uniform(kb, (1, fan_out), jnp.float32, -bound, bound)
        params += [w, b]
    return tuple(params)


def decoder_reference_f32(x, params):
    # Original-module semantics (full f32).
    w1, b1, w2, b2, w3, b3, w4, b4 = params
    h = x @ w1 + b1
    h = h @ w2 + b2
    h = h @ w3 + b3
    return h @ w4 + b4


def decoder_reference_bf16(x, params):
    # Mirrors the kernel's math exactly: bf16 operands, f32 accumulate + bias,
    # fc3 output rounded to bf16 at the scratch staging point.
    w1, b1, w2, b2, w3, b3, w4, b4 = params
    bf16, f32 = jnp.bfloat16, jnp.float32
    h = jnp.dot(x.astype(bf16), w1.astype(bf16), preferred_element_type=f32) + b1
    h = jnp.dot(h.astype(bf16), w2.astype(bf16), preferred_element_type=f32) + b2
    h = jnp.dot(h.astype(bf16), w3.astype(bf16), preferred_element_type=f32) + b3
    h = jnp.dot(h.astype(bf16), w4.astype(bf16), preferred_element_type=f32) + b4
    return h


if __name__ == "__main__":
    key = jax.random.PRNGKey(0)
    kx, kp = jax.random.split(key)
    B = 8
    x = jax.random.normal(kx, (B, D_IN), jnp.float32)
    params = init_params(kp)

    out = decoder_forward(x, params)
    out = jax.block_until_ready(out)
    assert out.shape == (B, D_OUT), out.shape

    # Tight check against a reference that uses the same bf16/f32 mixed precision.
    ref_mixed = decoder_reference_bf16(x, params)
    assert jnp.allclose(out, ref_mixed, atol=1e-3, rtol=1e-3), "mismatch vs bf16 reference"

    # Looser check against the original full-f32 module semantics.
    ref_f32 = decoder_reference_f32(x, params)
    assert jnp.allclose(out, ref_f32, atol=5e-2, rtol=5e-2), "mismatch vs f32 reference"

    print("KERNEL_OK")
</pallas_src>

<mosaic_0001>
module attributes {stable_mosaic.version = 11 : i64} {
  func.func @decoder_kernel(%arg0: i32, %arg1: memref<8x256xbf16, #tpu.memory_space<vmem>>, %arg2: memref<256x512xbf16, #tpu.memory_space<vmem>>, %arg3: memref<1x512xf32, #tpu.memory_space<vmem>>, %arg4: memref<512x1024xbf16, #tpu.memory_space<vmem>>, %arg5: memref<1x1024xf32, #tpu.memory_space<vmem>>, %arg6: memref<1024x2048xbf16, #tpu.memory_space<vmem>>, %arg7: memref<1x2048xf32, #tpu.memory_space<vmem>>, %arg8: memref<2048x512xbf16, #tpu.memory_space<vmem>>, %arg9: memref<1x512xf32, #tpu.memory_space<vmem>>, %arg10: memref<8x512xf32, #tpu.memory_space<vmem>>, %arg11: memref<8x2048xbf16, #tpu.memory_space<vmem>>) attributes {dimension_semantics = [#tpu.dimension_semantics<parallel>], iteration_bounds = array<i64: 1>, scalar_prefetch = 0 : i64, scratch_operands = 1 : i64, tpu.core_type = #tpu.core_type<tc>, window_params = [{transform_indices = @transform_0, window_bounds = array<i64: 8, 256>}, {pipeline_mode = #tpu.pipeline_mode<synchronous>, transform_indices = @transform_1, window_bounds = array<i64: 256, 512>}, {pipeline_mode = #tpu.pipeline_mode<synchronous>, transform_indices = @transform_2, window_bounds = array<i64: 1, 512>}, {pipeline_mode = #tpu.pipeline_mode<synchronous>, transform_indices = @transform_3, window_bounds = array<i64: 512, 1024>}, {pipeline_mode = #tpu.pipeline_mode<synchronous>, transform_indices = @transform_4, window_bounds = array<i64: 1, 1024>}, {pipeline_mode = #tpu.pipeline_mode<synchronous>, transform_indices = @transform_5, window_bounds = array<i64: 1024, 2048>}, {pipeline_mode = #tpu.pipeline_mode<synchronous>, transform_indices = @transform_6, window_bounds = array<i64: 1, 2048>}, {pipeline_mode = #tpu.pipeline_mode<synchronous>, transform_indices = @transform_7, window_bounds = array<i64: 2048, 512>}, {pipeline_mode = #tpu.pipeline_mode<synchronous>, transform_indices = @transform_8, window_bounds = array<i64: 1, 512>}, {transform_indices = @transform_9, window_bounds = array<i64: 8, 512>}]} {
    %c0 = arith.constant 0 : index
    %c0_0 = arith.constant 0 : index
    %0 = vector.load %arg1[%c0, %c0_0] : memref<8x256xbf16, #tpu.memory_space<vmem>>, vector<8x256xbf16>
    %c0_1 = arith.constant 0 : index
    %c0_2 = arith.constant 0 : index
    %1 = vector.load %arg2[%c0_1, %c0_2] : memref<256x512xbf16, #tpu.memory_space<vmem>>, vector<256x512xbf16>
    %cst = arith.constant dense<0.000000e+00> : vector<8x512xf32>
    %2 = tpu.matmul %0, %1, %cst {dimension_numbers = #tpu.dot_dimension_numbers<[1], [0], [0], [1], [0, 0, 1, 1], [], []>} : vector<8x256xbf16>, vector<256x512xbf16>, vector<8x512xf32> -> vector<8x512xf32>
    %c0_3 = arith.constant 0 : index
    %c0_4 = arith.constant 0 : index
    %3 = vector.load %arg3[%c0_3, %c0_4] : memref<1x512xf32, #tpu.memory_space<vmem>>, vector<1x512xf32>
    %4 = vector.broadcast %3 : vector<1x512xf32> to vector<8x512xf32>
    %5 = arith.addf %2, %4 : vector<8x512xf32>
    %6 = arith.truncf %5 : vector<8x512xf32> to vector<8x512xbf16>
    %c0_5 = arith.constant 0 : index
    %c0_6 = arith.constant 0 : index
    %7 = vector.load %arg4[%c0_5, %c0_6] : memref<512x1024xbf16, #tpu.memory_space<vmem>>, vector<512x1024xbf16>
    %cst_7 = arith.constant dense<0.000000e+00> : vector<8x1024xf32>
    %8 = tpu.matmul %6, %7, %cst_7 {dimension_numbers = #tpu.dot_dimension_numbers<[1], [0], [0], [1], [0, 0, 1, 1], [], []>} : vector<8x512xbf16>, vector<512x1024xbf16>, vector<8x1024xf32> -> vector<8x1024xf32>
    %c0_8 = arith.constant 0 : index
    %c0_9 = arith.constant 0 : index
    %9 = vector.load %arg5[%c0_8, %c0_9] : memref<1x1024xf32, #tpu.memory_space<vmem>>, vector<1x1024xf32>
    %10 = vector.broadcast %9 : vector<1x1024xf32> to vector<8x1024xf32>
    %11 = arith.addf %8, %10 : vector<8x1024xf32>
    %12 = arith.truncf %11 : vector<8x1024xf32> to vector<8x1024xbf16>
    %c0_10 = arith.constant 0 : index
    %c0_11 = arith.constant 0 : index
    %13 = vector.load %arg6[%c0_10, %c0_11] : memref<1024x2048xbf16, #tpu.memory_space<vmem>>, vector<1024x2048xbf16>
    %cst_12 = arith.constant dense<0.000000e+00> : vector<8x2048xf32>
    %14 = tpu.matmul %12, %13, %cst_12 {dimension_numbers = #tpu.dot_dimension_numbers<[1], [0], [0], [1], [0, 0, 1, 1], [], []>} : vector<8x1024xbf16>, vector<1024x2048xbf16>, vector<8x2048xf32> -> vector<8x2048xf32>
    %c0_13 = arith.constant 0 : index
    %c0_14 = arith.constant 0 : index
    %15 = vector.load %arg7[%c0_13, %c0_14] : memref<1x2048xf32, #tpu.memory_space<vmem>>, vector<1x2048xf32>
    %16 = vector.broadcast %15 : vector<1x2048xf32> to vector<8x2048xf32>
    %17 = arith.addf %14, %16 : vector<8x2048xf32>
    %18 = arith.truncf %17 : vector<8x2048xf32> to vector<8x2048xbf16>
    %c0_15 = arith.constant 0 : index
    %c0_16 = arith.constant 0 : index
    %19 = vector.load %arg11[%c0_15, %c0_16] : memref<8x2048xbf16, #tpu.memory_space<vmem>>, vector<8x2048xbf16>
    tpu.vector_store %arg11[%c0_15, %c0_16], %18 {strides = array<i32>} : memref<8x2048xbf16, #tpu.memory_space<vmem>>, vector<8x2048xbf16>,
    %c0_17 = arith.constant 0 : index
    %c0_18 = arith.constant 0 : index
    %20 = vector.load %arg11[%c0_17, %c0_18] : memref<8x2048xbf16, #tpu.memory_space<vmem>>, vector<8x2048xbf16>
    %c0_19 = arith.constant 0 : index
    %c0_20 = arith.constant 0 : index
    %21 = vector.load %arg8[%c0_19, %c0_20] : memref<2048x512xbf16, #tpu.memory_space<vmem>>, vector<2048x512xbf16>
    %cst_21 = arith.constant dense<0.000000e+00> : vector<8x512xf32>
    %22 = tpu.matmul %20, %21, %cst_21 {dimension_numbers = #tpu.dot_dimension_numbers<[1], [0], [0], [1], [0, 0, 1, 1], [], []>} : vector<8x2048xbf16>, vector<2048x512xbf16>, vector<8x512xf32> -> vector<8x512xf32>
    %c0_22 = arith.constant 0 : index
    %c0_23 = arith.constant 0 : index
    %23 = vector.load %arg9[%c0_22, %c0_23] : memref<1x512xf32, #tpu.memory_space<vmem>>, vector<1x512xf32>
    %24 = vector.broadcast %23 : vector<1x512xf32> to vector<8x512xf32>
    %25 = arith.addf %22, %24 : vector<8x512xf32>
    %c0_24 = arith.constant 0 : index
    %c0_25 = arith.constant 0 : index
    %26 = vector.load %arg10[%c0_24, %c0_25] : memref<8x512xf32, #tpu.memory_space<vmem>>, vector<8x512xf32>
    tpu.vector_store %arg10[%c0_24, %c0_25], %25 {strides = array<i32>} : memref<8x512xf32, #tpu.memory_space<vmem>>, vector<8x512xf32>,
    return
  }
  func.func @transform_0(%arg0: i32) -> (i32, i32) {
    %c0_i32 = arith.constant 0 : i32
    %c0_i32_0 = arith.constant 0 : i32
    return %arg0, %c0_i32 : i32, i32
  }
  func.func @transform_1(%arg0: i32) -> (i32, i32) {
    %c0_i32 = arith.constant 0 : i32
    %c0_i32_0 = arith.constant 0 : i32
    %c0_i32_1 = arith.constant 0 : i32
    return %c0_i32, %c0_i32_0 : i32, i32
  }
  func.func @transform_2(%arg0: i32) -> (i32, i32) {
    %c0_i32 = arith.constant 0 : i32
    %c0_i32_0 = arith.constant 0 : i32
    %c0_i32_1 = arith.constant 0 : i32
    return %c0_i32, %c0_i32_0 : i32, i32
  }
  func.func @transform_3(%arg0: i32) -> (i32, i32) {
    %c0_i32 = arith.constant 0 : i32
    %c0_i32_0 = arith.constant 0 : i32
    %c0_i32_1 = arith.constant 0 : i32
    return %c0_i32, %c0_i32_0 : i32, i32
  }
  func.func @transform_4(%arg0: i32) -> (i32, i32) {
    %c0_i32 = arith.constant 0 : i32
    %c0_i32_0 = arith.constant 0 : i32
    %c0_i32_1 = arith.constant 0 : i32
    return %c0_i32, %c0_i32_0 : i32, i32
  }
  func.func @transform_5(%arg0: i32) -> (i32, i32) {
    %c0_i32 = arith.constant 0 : i32
    %c0_i32_0 = arith.constant 0 : i32
    %c0_i32_1 = arith.constant 0 : i32
    return %c0_i32, %c0_i32_0 : i32, i32
  }
  func.func @transform_6(%arg0: i32) -> (i32, i32) {
    %c0_i32 = arith.constant 0 : i32
    %c0_i32_0 = arith.constant 0 : i32
    %c0_i32_1 = arith.constant 0 : i32
    return %c0_i32, %c0_i32_0 : i32, i32
  }
  func.func @transform_7(%arg0: i32) -> (i32, i32) {
    %c0_i32 = arith.constant 0 : i32
    %c0_i32_0 = arith.constant 0 : i32
    %c0_i32_1 = arith.constant 0 : i32
    return %c0_i32, %c0_i32_0 : i32, i32
  }
  func.func @transform_8(%arg0: i32) -> (i32, i32) {
    %c0_i32 = arith.constant 0 : i32
    %c0_i32_0 = arith.constant 0 : i32
    %c0_i32_1 = arith.constant 0 : i32
    return %c0_i32, %c0_i32_0 : i32, i32
  }
  func.func @transform_9(%arg0: i32) -> (i32, i32) {
    %c0_i32 = arith.constant 0 : i32
    %c0_i32_0 = arith.constant 0 : i32
    return %arg0, %c0_i32 : i32, i32
  }
}

</mosaic_0001>

<bundles_post_ra>
// kernel: decoder_forward.1
= control target key start
LH: loop header
LB: loop body
LE: loop exit
PB: predicated region body
PF: predicated region fallthrough
CT: control target
= control target key end

     0   :  { %s22807_s0 = inlined_call_operand.vmem [shape: bf16[8,256], index: 0, kind: input, shape index: {}]   ;;  %s22808_s1 = inlined_call_operand.vmem [shape: bf16[256,512], index: 1, kind: input, shape index: {}]   ;;  %s22809_s2 = inlined_call_operand.vmem [shape: f32[1,512], index: 2, kind: input, shape index: {}]   ;;  %s22810_s3 = inlined_call_operand.vmem [shape: bf16[512,1024], index: 3, kind: input, shape index: {}]   ;;  %s22811_s4 = inlined_call_operand.vmem [shape: f32[1,1024], index: 4, kind: input, shape index: {}]   ;;  %s22812_s5 = inlined_call_operand.vmem [shape: bf16[1024,2048], index: 5, kind: input, shape index: {}]   ;;  %s22813_s6 = inlined_call_operand.vmem [shape: f32[1,2048], index: 6, kind: input, shape index: {}]   ;;  %s22814_s7 = inlined_call_operand.vmem [shape: bf16[2048,512], index: 7, kind: input, shape index: {}]   ;;  %s22815_s8 = inlined_call_operand.vmem [shape: f32[1,512], index: 8, kind: input, shape index: {}]   ;;  %s22816_s9 = inlined_call_operand.hbm [shape: f32[8,512], index: 9, kind: output, shape index: {}]  }
   0x1   :  { %v15994_v0 = vld [vmem:[%s22808_s1 + $0x4] ss:$16 sps:$4 sm:$0xff]   ;;  %v15996_v1 = vld [vmem:[%s22808_s1] ss:$16 sps:$4 sm:$0xff]   ;;  %v16041_v14 = vld [vmem:[%s22808_s1 + $0xc] ss:$16 sps:$4 sm:$0xff]  }
   0x2   :  { %447 = vmatprep.subr.bf16.mxu0 %v15994_v0  ;;  %v15997_v2 = vld [vmem:[%s22808_s1 + $0x24] ss:$16 sps:$4 sm:$0xff]   ;;  %v15999_v3 = vld [vmem:[%s22808_s1 + $0x20] ss:$16 sps:$4 sm:$0xff]   ;;  %v16044_v16 = vld [vmem:[%s22808_s1 + $0x8] ss:$16 sps:$4 sm:$0xff]   ;;  %488 = vmatprep.subr.bf16.mxu1 %v16041_v14 }
   0x3   :  { %448 = vmatpush1.bf16.msra.mxu0 %v15996_v1  ;;  %v16000_v4 = vld [vmem:[%s22808_s1 + $0x44] ss:$16 sps:$4 sm:$0xff]   ;;  %v16002_v5 = vld [vmem:[%s22808_s1 + $0x40] ss:$16 sps:$4 sm:$0xff]   ;;  %v16047_v19 = vld [vmem:[%s22808_s1 + $0x2c] ss:$16 sps:$4 sm:$0xff]   ;;  %489 = vmatpush1.bf16.msra.mxu1 %v16044_v16 }
   0x4   :  { %449 = vmatprep.subr.bf16.mxu0 %v15997_v2  ;;  %v16003_v6 = vld [vmem:[%s22808_s1 + $0x64] ss:$16 sps:$4 sm:$0xff]   ;;  %v16005_v7 = vld [vmem:[%s22808_s1 + $0x60] ss:$16 sps:$4 sm:$0xff]   ;;  %v16049_v20 = vld [vmem:[%s22808_s1 + $0x28] ss:$16 sps:$4 sm:$0xff]   ;;  %490 = vmatprep.subr.bf16.mxu1 %v16047_v19 }
   0x5   :  { %v16006_v8 = vld [vmem:[%s22808_s1 + $0x84] ss:$16 sps:$4 sm:$0xff]   ;;  %v16008_v9 = vld [vmem:[%s22808_s1 + $0x80] ss:$16 sps:$4 sm:$0xff]   ;;  %v16050_v21 = vld [vmem:[%s22808_s1 + $0x4c] ss:$16 sps:$4 sm:$0xff]  }
   0x6   :  { %v16009_v10 = vld [vmem:[%s22808_s1 + $0xa4] ss:$16 sps:$4 sm:$0xff]   ;;  %v16011_v11 = vld [vmem:[%s22808_s1 + $0xa0] ss:$16 sps:$4 sm:$0xff]   ;;  %v16052_v24 = vld [vmem:[%s22808_s1 + $0x48] ss:$16 sps:$4 sm:$0xff]  }
   0x7   :  { %450 = vmatpush1.bf16.msra.mxu0 %v15999_v3  ;;  %v16012_v12 = vld [vmem:[%s22808_s1 + $0xc4] ss:$16 sps:$4 sm:$0xff]   ;;  %v16014_v13 = vld [vmem:[%s22808_s1 + $0xc0] ss:$16 sps:$4 sm:$0xff]   ;;  %491 = vmatpush1.bf16.msra.mxu1 %v16049_v20  ;;  %v16053_v25 = vld [vmem:[%s22808_s1 + $0x6c] ss:$16 sps:$4 sm:$0xff]  }
   0x8   :  { %451 = vmatprep.subr.bf16.mxu0 %v16000_v4  ;;  %v16015_v15 = vld [vmem:[%s22808_s1 + $0xe4] ss:$16 sps:$4 sm:$0xff]   ;;  %v16017_v22 = vld [vmem:[%s22808_s1 + $0xe0] ss:$16 sps:$4 sm:$0xff]   ;;  %492 = vmatprep.subr.bf16.mxu1 %v16050_v21  ;;  %v16055_v28 = vld [vmem:[%s22808_s1 + $0x68] ss:$16 sps:$4 sm:$0xff]  }
   0x9   :  { %v16992_v17 = vld [vmem:[%s22807_s0] sm:$0xff]  ;;  %v16056_v29 = vld [vmem:[%s22808_s1 + $0x8c] ss:$16 sps:$4 sm:$0xff]   ;;  %v16058_v32 = vld [vmem:[%s22808_s1 + $0x88] ss:$16 sps:$4 sm:$0xff]  }
   0xa   :  { %v13892_v18 = vcombine.high %v16992_v17, %v16992_v17  ;;  %v16018_v23 = vld [vmem:[%s22808_s1 + $0x104] ss:$16 sps:$4 sm:$0xff]   ;;  %v16020_v26 = vld [vmem:[%s22808_s1 + $0x100] ss:$16 sps:$4 sm:$0xff]   ;;  %v16059_v33 = vld [vmem:[%s22808_s1 + $0xac] ss:$16 sps:$4 sm:$0xff]   ;;  %v17124_v62 = vcombine.low %v16992_v17, %v16992_v17 }
   0xb   :  { %452 = vmatpush1.bf16.msra.mxu0 %v16002_v5  ;;  %v16021_v27 = vld [vmem:[%s22808_s1 + $0x124] ss:$16 sps:$4 sm:$0xff]   ;;  %493 = vmatpush1.bf16.msra.mxu1 %v16052_v24  ;;  %v16023_v30 = vld [vmem:[%s22808_s1 + $0x120] ss:$16 sps:$4 sm:$0xff]   ;;  %v16061_v36 = vld [vmem:[%s22808_s1 + $0xa8] ss:$16 sps:$4 sm:$0xff]  }
   0xc   :  { %453 = vmatprep.subr.bf16.mxu0 %v16003_v6  ;;  %479 = vmatprep.mubr.bf16.mxu0 %v13892_v18  ;;  %v16024_v31 = vld [vmem:[%s22808_s1 + $0x144] ss:$16 sps:$4 sm:$0xff]   ;;  %v16026_v34 = vld [vmem:[%s22808_s1 + $0x140] ss:$16 sps:$4 sm:$0xff]   ;;  %v16062_v37 = vld [vmem:[%s22808_s1 + $0xcc] ss:$16 sps:$4 sm:$0xff]  }
   0xd   :  { %520 = vmatprep.mubr.bf16.mxu1 %v13892_v18  ;;  %494 = vmatprep.subr.bf16.mxu1 %v16053_v25  ;;  %v16027_v35 = vld [vmem:[%s22808_s1 + $0x164] ss:$16 sps:$4 sm:$0xff]   ;;  %v16029_v38 = vld [vmem:[%s22808_s1 + $0x160] ss:$16 sps:$4 sm:$0xff]   ;;  %v16064_v40 = vld [vmem:[%s22808_s1 + $0xc8] ss:$16 sps:$4 sm:$0xff]  }
   0xe   :  { %v16030_v39 = vld [vmem:[%s22808_s1 + $0x184] ss:$16 sps:$4 sm:$0xff]   ;;  %v16065_v41 = vld [vmem:[%s22808_s1 + $0xec] ss:$16 sps:$4 sm:$0xff]   ;;  %v16032_v42 = vld [vmem:[%s22808_s1 + $0x180] ss:$16 sps:$4 sm:$0xff]  }
   0xf   :  { %454 = vmatpush1.bf16.msra.mxu0 %v16005_v7  ;;  %495 = vmatpush1.bf16.msra.mxu1 %v16055_v28  ;;  %v16033_v43 = vld [vmem:[%s22808_s1 + $0x1a4] ss:$16 sps:$4 sm:$0xff]   ;;  %v16067_v44 = vld [vmem:[%s22808_s1 + $0xe8] ss:$16 sps:$4 sm:$0xff]   ;;  %v16068_v45 = vld [vmem:[%s22808_s1 + $0x10c] ss:$16 sps:$4 sm:$0xff]  }
  0x10   :  { %455 = vmatprep.subr.bf16.mxu0 %v16006_v8  ;;  %496 = vmatprep.subr.bf16.mxu1 %v16056_v29  ;;  %v16035_v46 = vld [vmem:[%s22808_s1 + $0x1a0] ss:$16 sps:$4 sm:$0xff]   ;;  %v16036_v47 = vld [vmem:[%s22808_s1 + $0x1c4] ss:$16 sps:$4 sm:$0xff]   ;;  %v16070_v48 = vld [vmem:[%s22808_s1 + $0x108] ss:$16 sps:$4 sm:$0xff]  }
  0x11   :  { %v16071_v49 = vld [vmem:[%s22808_s1 + $0x12c] ss:$16 sps:$4 sm:$0xff]   ;;  %v16038_v50 = vld [vmem:[%s22808_s1 + $0x1c0] ss:$16 sps:$4 sm:$0xff]   ;;  %v16039_v51 = vld [vmem:[%s22808_s1 + $0x1e4] ss:$16 sps:$4 sm:$0xff]  }
  0x12   :  { %v16073_v52 = vld [vmem:[%s22808_s1 + $0x128] ss:$16 sps:$4 sm:$0xff]   ;;  %v16074_v53 = vld [vmem:[%s22808_s1 + $0x14c] ss:$16 sps:$4 sm:$0xff]   ;;  %v533_v54 = vld [vmem:[%s22810_s3] sm:$0xff] }
  0x13   :  { %456 = vmatpush1.bf16.msra.mxu0 %v16008_v9  ;;  %497 = vmatpush1.bf16.msra.mxu1 %v16058_v32  ;;  %v537_v55 = vld [vmem:[%s22810_s3 + $0x20] sm:$0xff]  ;;  %v16076_v57 = vld [vmem:[%s22808_s1 + $0x148] ss:$16 sps:$4 sm:$0xff]   ;;  %v16077_v59 = vld [vmem:[%s22808_s1 + $0x16c] ss:$16 sps:$4 sm:$0xff]  }
  0x14   :  { %457 = vmatprep.subr.bf16.mxu0 %v16009_v10  ;;  %498 = vmatprep.subr.bf16.mxu1 %v16059_v33  ;;  %v16043_v56 = vld [vmem:[%s22808_s1 + $0x1e0] ss:$16 sps:$4 sm:$0xff]   ;;  %v13958_v58 = vcombine.high %v533_v54, %v537_v55  ;;  %v16079_v63 = vld [vmem:[%s22808_s1 + $0x168] ss:$16 sps:$4 sm:$0xff]   ;;  %v16080_v0 = vld [vmem:[%s22808_s1 + $0x18c] ss:$16 sps:$4 sm:$0xff]   ;;  %v13957_v1 = vcombine.low %v533_v54, %v537_v55 }
  0x15   :  { %v541_v60 = vld [vmem:[%s22810_s3 + $0x40] sm:$0xff]  ;;  %v16082_v5 = vld [vmem:[%s22808_s1 + $0x188] ss:$16 sps:$4 sm:$0xff]   ;;  %v16083_v6 = vld [vmem:[%s22808_s1 + $0x1ac] ss:$16 sps:$4 sm:$0xff]  }
  0x16   :  { %v545_v61 = vld [vmem:[%s22810_s3 + $0x60] sm:$0xff]  ;;  %v16088_v17 = vld [vmem:[%s22808_s1 + $0x1c8] ss:$16 sps:$4 sm:$0xff]   ;;  %v16089_v18 = vld [vmem:[%s22808_s1 + $0x1ec] ss:$16 sps:$4 sm:$0xff]  }
  0x17   :  { %458 = vmatpush1.bf16.msra.mxu0 %v16011_v11  ;;  %499 = vmatpush1.bf16.msra.mxu1 %v16061_v36  ;;  %v549_v2 = vld [vmem:[%s22810_s3 + $0x80] sm:$0xff]  ;;  %v13966_v4 = vcombine.high %v541_v60, %v545_v61  ;;  %v13965_v7 = vcombine.low %v541_v60, %v545_v61  ;;  %v16085_v11 = vld [vmem:[%s22808_s1 + $0x1a8] ss:$16 sps:$4 sm:$0xff]  }
  0x18   :  { %459 = vmatprep.subr.bf16.mxu0 %v16012_v12  ;;  %500 = vmatprep.subr.bf16.mxu1 %v16062_v37  ;;  %v553_v3 = vld [vmem:[%s22810_s3 + $0xa0] sm:$0xff]  ;;  %v16086_v12 = vld [vmem:[%s22808_s1 + $0x1cc] ss:$16 sps:$4 sm:$0xff]   ;;  %v16091_v25 = vld [vmem:[%s22808_s1 + $0x1e8] ss:$16 sps:$4 sm:$0xff]  }
  0x19   :  { %v557_v8 = vld [vmem:[%s22810_s3 + $0xc0] sm:$0xff]  ;;  %v13974_v10 = vcombine.high %v549_v2, %v553_v3  ;;  %v542_v29 = vld [vmem:[%s22810_s3 + $0x48] sm:$0xff] }
  0x1a   :  { %v561_v9 = vld [vmem:[%s22810_s3 + $0xe0] sm:$0xff]  ;;  %v550_v37 = vld [vmem:[%s22810_s3 + $0x88] sm:$0xff] }
  0x1b   :  { %460 = vmatpush1.bf16.msra.mxu0 %v16014_v13  ;;  %501 = vmatpush1.bf16.msra.mxu1 %v16064_v40  ;;  %v13973_v13 = vcombine.low %v549_v2, %v553_v3  ;;  %v565_v14 = vld [vmem:[%s22810_s3 + $0x100] sm:$0xff]  ;;  %v13982_v16 = vcombine.high %v557_v8, %v561_v9  ;;  %v13981_v19 = vcombine.low %v557_v8, %v561_v9  ;;  %v570_v54 = vld [vmem:[%s22810_s3 + $0x128] sm:$0xff] }
  0x1c   :  { %461 = vmatprep.subr.bf16.mxu0 %v16015_v15  ;;  %502 = vmatprep.subr.bf16.mxu1 %v16065_v41  ;;  %v569_v15 = vld [vmem:[%s22810_s3 + $0x120] sm:$0xff]  ;;  %v574_v61 = vld [vmem:[%s22810_s3 + $0x148] sm:$0xff] }
  0x1d   :  { %v573_v20 = vld [vmem:[%s22810_s3 + $0x140] sm:$0xff]  ;;  %v13990_v24 = vcombine.high %v565_v14, %v569_v15 }
  0x1e   :  { %v577_v21 = vld [vmem:[%s22810_s3 + $0x160] sm:$0xff] }
  0x1f   :  { %462 = vmatpush1.bf16.msra.mxu0 %v16017_v22  ;;  %503 = vmatpush1.bf16.msra.mxu1 %v16067_v44  ;;  %v534_v22 = vld [vmem:[%s22810_s3 + $0x8] sm:$0xff]  ;;  %v585_v28 = vld [vmem:[%s22810_s3 + $0x1a0] sm:$0xff]  ;;  %v13997_v33 = vcombine.low %v573_v20, %v577_v21 }
  0x20   :  { %463 = vmatprep.subr.bf16.mxu0 %v16018_v23  ;;  %504 = vmatprep.subr.bf16.mxu1 %v16068_v45  ;;  %v538_v23 = vld [vmem:[%s22810_s3 + $0x28] sm:$0xff]  ;;  %v621_v2 = vld [vmem:[%s22810_s3 + $0x2c0] sm:$0xff] }
  0x21   :  { %v13960_v32 = vcombine.high %v534_v22, %v538_v23  ;;  %v13959_v36 = vcombine.low %v534_v22, %v538_v23  ;;  %v558_v45 = vld [vmem:[%s22810_s3 + $0xc8] sm:$0xff]  ;;  %v625_v3 = vld [vmem:[%s22810_s3 + $0x2e0] sm:$0xff] }
  0x22   :  { %v602_v22 = vld [vmem:[%s22810_s3 + $0x228] sm:$0xff] }
  0x23   :  { %464 = vmatpush1.bf16.msra.mxu0 %v16020_v26  ;;  %505 = vmatpush1.bf16.msra.mxu1 %v16070_v48  ;;  %v13989_v26 = vcombine.low %v565_v14, %v569_v15  ;;  %v594_v14 = vld [vmem:[%s22810_s3 + $0x1e8] sm:$0xff]  ;;  %v14046_v15 = vcombine.high %v621_v2, %v625_v3 }
  0x24   :  { %465 = vmatprep.subr.bf16.mxu0 %v16021_v27  ;;  %506 = vmatprep.subr.bf16.mxu1 %v16071_v49  ;;  %v581_v27 = vld [vmem:[%s22810_s3 + $0x180] sm:$0xff] }
  0x25   :  { %v14005_v41 = vcombine.low %v581_v27, %v585_v28 }
  0x27   :  { %466 = vmatpush1.bf16.msra.mxu0 %v16023_v30  ;;  %507 = vmatpush1.bf16.msra.mxu1 %v16073_v52  ;;  %v546_v30 = vld [vmem:[%s22810_s3 + $0x68] sm:$0xff] }
  0x28   :  { %467 = vmatprep.subr.bf16.mxu0 %v16024_v31  ;;  %508 = vmatprep.subr.bf16.mxu1 %v16074_v53  ;;  %v13998_v31 = vcombine.high %v573_v20, %v577_v21  ;;  %v13968_v40 = vcombine.high %v542_v29, %v546_v30  ;;  %v13967_v44 = vcombine.low %v542_v29, %v546_v30  ;;  %v566_v53 = vld [vmem:[%s22810_s3 + $0x108] sm:$0xff] }
  0x29   :  { %v598_v21 = vld [vmem:[%s22810_s3 + $0x208] sm:$0xff] }
  0x2a   :  { %v606_v29 = vld [vmem:[%s22810_s3 + $0x248] sm:$0xff] }
  0x2b   :  { %468 = vmatpush1.bf16.msra.mxu0 %v16026_v34  ;;  %509 = vmatpush1.bf16.msra.mxu1 %v16076_v57  ;;  %v589_v34 = vld [vmem:[%s22810_s3 + $0x1c0] sm:$0xff]  ;;  %v610_v30 = vld [vmem:[%s22810_s3 + $0x268] sm:$0xff] }
  0x2c   :  { %469 = vmatprep.subr.bf16.mxu0 %v16027_v35  ;;  %510 = vmatprep.subr.bf16.mxu1 %v16077_v59  ;;  %v593_v35 = vld [vmem:[%s22810_s3 + $0x1e0] sm:$0xff] }
  0x2d   :  { %v14013_v49 = vcombine.low %v589_v34, %v593_v35  ;;  %v617_v59 = vld [vmem:[%s22810_s3 + $0x2a0] sm:$0xff] }
  0x2f   :  { %470 = vmatpush1.bf16.msra.mxu0 %v16029_v38  ;;  %511 = vmatpush1.bf16.msra.mxu1 %v16079_v63  ;;  %v554_v38 = vld [vmem:[%s22810_s3 + $0xa8] sm:$0xff] }
  0x30   :  { %471 = vmatprep.subr.bf16.mxu0 %v16030_v39  ;;  %512 = vmatprep.subr.bf16.mxu1 %v16080_v0  ;;  %v14006_v39 = vcombine.high %v581_v27, %v585_v28  ;;  %v13976_v48 = vcombine.high %v550_v37, %v554_v38  ;;  %v13975_v52 = vcombine.low %v550_v37, %v554_v38  ;;  %v649_v27 = vld [vmem:[%s22810_s3 + $0x3a0] sm:$0xff] }
  0x31   :  { %v13992_v0 = vcombine.high %v566_v53, %v570_v54  ;;  %v14032_v38 = vcombine.high %v606_v29, %v610_v30 }
  0x33   :  { %472 = vmatpush1.bf16.msra.mxu0 %v16032_v42  ;;  %513 = vmatpush1.bf16.msra.mxu1 %v16082_v5  ;;  %v597_v42 = vld [vmem:[%s22810_s3 + $0x200] sm:$0xff]  ;;  %v582_v5 = vld [vmem:[%s22810_s3 + $0x188] sm:$0xff] }
  0x34   :  { %473 = vmatprep.subr.bf16.mxu0 %v16033_v43  ;;  %514 = vmatprep.subr.bf16.mxu1 %v16083_v6  ;;  %v601_v43 = vld [vmem:[%s22810_s3 + $0x220] sm:$0xff]  ;;  %v586_v6 = vld [vmem:[%s22810_s3 + $0x1a8] sm:$0xff] }
  0x35   :  { %v14022_v55 = vcombine.high %v597_v42, %v601_v43  ;;  %v14021_v57 = vcombine.low %v597_v42, %v601_v43  ;;  %v14007_v20 = vcombine.low %v582_v5, %v586_v6  ;;  %v626_v42 = vld [vmem:[%s22810_s3 + $0x2e8] sm:$0xff] }
  0x37   :  { %474 = vmatpush1.bf16.msra.mxu0 %v16035_v46  ;;  %515 = vmatpush1.bf16.msra.mxu1 %v16085_v11  ;;  %v562_v46 = vld [vmem:[%s22810_s3 + $0xe8] sm:$0xff]  ;;  %v633_v11 = vld [vmem:[%s22810_s3 + $0x320] sm:$0xff] }
  0x38   :  { %475 = vmatprep.subr.bf16.mxu0 %v16036_v47  ;;  %516 = vmatprep.subr.bf16.mxu1 %v16086_v12  ;;  %v14014_v47 = vcombine.high %v589_v34, %v593_v35  ;;  %v13983_v60 = vcombine.low %v558_v45, %v562_v46  ;;  %v14023_v34 = vcombine.low %v598_v21, %v602_v22  ;;  %v614_v35 = vld [vmem:[%s22810_s3 + $0x288] sm:$0xff] }
  0x3b   :  { %476 = vmatpush1.bf16.msra.mxu0 %v16038_v50  ;;  %517 = vmatpush1.bf16.msra.mxu1 %v16088_v17  ;;  %v605_v50 = vld [vmem:[%s22810_s3 + $0x240] sm:$0xff]  ;;  %v14045_v17 = vcombine.low %v621_v2, %v625_v3 }
  0x3c   :  { %477 = vmatprep.subr.bf16.mxu0 %v16039_v51  ;;  %518 = vmatprep.subr.bf16.mxu1 %v16089_v18  ;;  %v609_v51 = vld [vmem:[%s22810_s3 + $0x260] sm:$0xff] }
  0x3d   :  { %v14030_v63 = vcombine.high %v605_v50, %v609_v51  ;;  %v637_v18 = vld [vmem:[%s22810_s3 + $0x340] sm:$0xff] }
  0x3e   :  { %v661_v3 = vld [vmem:[%s22810_s3 + $0x400] sm:$0xff] }
  0x3f   :  { %478 = vmatpush1.bf16.msra.mxu0 %v16043_v56  ;;  %519 = vmatpush1.bf16.msra.mxu1 %v16091_v25  ;;  %v13984_v56 = vcombine.high %v558_v45, %v562_v46  ;;  %v630_v45 = vld [vmem:[%s22810_s3 + $0x308] sm:$0xff] }
  0x40   :  { %2111 = vmatprep.subr.bf16.mxu0 %v13958_v58  ;;  %2193 = vmatprep.subr.bf16.mxu1 %v13960_v32  ;;  %v613_v58 = vld [vmem:[%s22810_s3 + $0x280] sm:$0xff]  ;;  %v14024_v32 = vcombine.high %v598_v21, %v602_v22  ;;  %v634_v46 = vld [vmem:[%s22810_s3 + $0x328] sm:$0xff] }
  0x41   :  { %v14037_v9 = vcombine.low %v613_v58, %v617_v59 }
  0x42   :  { %480 = vmatmul.mubr.bf16.vlgmr.msra.gmra.mrb[0].mxu0 %v17124_v62  ;;  %521 = vmatmul.mubr.bf16.vlgmr.msra.gmra.mrb[0].mxu1 %v17124_v62  ;;  %v578_v62 = vld [vmem:[%s22810_s3 + $0x168] sm:$0xff] }
  0x43   :  { %2112 = vmatpush1.bf16.msra.mxu0 %v13957_v1  ;;  %2194 = vmatpush1.bf16.msra.mxu1 %v13959_v36  ;;  %v14029_v1 = vcombine.low %v605_v50, %v609_v51  ;;  %v14000_v8 = vcombine.high %v574_v61, %v578_v62  ;;  %v13999_v12 = vcombine.low %v574_v61, %v578_v62  ;;  %v618_v36 = vld [vmem:[%s22810_s3 + $0x2a8] sm:$0xff] }
  0x44   :  { %2113 = vmatprep.subr.bf16.mxu0 %v13966_v4  ;;  %2195 = vmatprep.subr.bf16.mxu1 %v13968_v40  ;;  %v13991_v4 = vcombine.low %v566_v53, %v570_v54  ;;  %v14031_v40 = vcombine.low %v606_v29, %v610_v30  ;;  %v14040_v43 = vcombine.high %v614_v35, %v618_v36  ;;  %v642_v50 = vld [vmem:[%s22810_s3 + $0x368] sm:$0xff] }
  0x45   :  { %v14056_v51 = vcombine.high %v630_v45, %v634_v46  ;;  %v646_v53 = vld [vmem:[%s22810_s3 + $0x388] sm:$0xff] }
  0x46   :  { %v650_v54 = vld [vmem:[%s22810_s3 + $0x3a8] sm:$0xff] }
  0x47   :  { %2114 = vmatpush1.bf16.msra.mxu0 %v13965_v7  ;;  %2196 = vmatpush1.bf16.msra.mxu1 %v13967_v44  ;;  %v14038_v7 = vcombine.high %v613_v58, %v617_v59  ;;  %v14039_v44 = vcombine.low %v614_v35, %v618_v36  ;;  %v14071_v58 = vcombine.low %v646_v53, %v650_v54  ;;  %v653_v59 = vld [vmem:[%s22810_s3 + $0x3c0] sm:$0xff]  ;;  %v654_v61 = vld [vmem:[%s22810_s3 + $0x3c8] sm:$0xff] }
  0x48   :  { %2115 = vmatprep.subr.bf16.mxu0 %v13974_v10  ;;  %2197 = vmatprep.subr.bf16.mxu1 %v13976_v48  ;;  %v629_v10 = vld [vmem:[%s22810_s3 + $0x300] sm:$0xff] }
  0x49   :  { %v14054_v23 = vcombine.high %v629_v10, %v633_v11  ;;  %v14053_v25 = vcombine.low %v629_v10, %v633_v11  ;;  %v100_v11 = vlaneseq }
  0x4b   :  { %2116 = vmatpush1.bf16.msra.mxu0 %v13973_v13  ;;  %2198 = vmatpush1.bf16.msra.mxu1 %v13975_v52  ;;  %v590_v13 = vld [vmem:[%s22810_s3 + $0x1c8] sm:$0xff]  ;;  %v14055_v52 = vcombine.low %v630_v45, %v634_v46 }
  0x4c   :  { %2117 = vmatprep.subr.bf16.mxu0 %v13982_v16  ;;  %2199 = vmatprep.subr.bf16.mxu1 %v13984_v56  ;;  %v14008_v16 = vcombine.high %v582_v5, %v586_v6  ;;  %v14015_v28 = vcombine.low %v590_v13, %v594_v14  ;;  %v662_v5 = vld [vmem:[%s22810_s3 + $0x408] sm:$0xff] }
  0x4f   :  { %2118 = vmatpush1.bf16.msra.mxu0 %v13981_v19  ;;  %2200 = vmatpush1.bf16.msra.mxu1 %v13983_v60  ;;  %v641_v19 = vld [vmem:[%s22810_s3 + $0x360] sm:$0xff] }
  0x50   :  { %2119 = vmatprep.subr.bf16.mxu0 %v13990_v24  ;;  %2201 = vmatprep.subr.bf16.mxu1 %v13992_v0  ;;  %v14016_v24 = vcombine.high %v590_v13, %v594_v14  ;;  %v657_v60 = vld [vmem:[%s22810_s3 + $0x3e0] sm:$0xff] }
  0x51   :  { %v14078_v62 = vcombine.high %v653_v59, %v657_v60  ;;  %v14077_v0 = vcombine.low %v653_v59, %v657_v60  ;;  %v17355_v14 = vld [vmem:[%s22809_s2] sm:$0xf] }
  0x53   :  { %2120 = vmatpush1.bf16.msra.mxu0 %v13989_v26  ;;  %2202 = vmatpush1.bf16.msra.mxu1 %v13991_v4  ;;  %v645_v26 = vld [vmem:[%s22810_s3 + $0x380] sm:$0xff] }
  0x54   :  { %2121 = vmatprep.subr.bf16.mxu0 %v13998_v31  ;;  %2203 = vmatprep.subr.bf16.mxu1 %v14000_v8  ;;  %v14062_v31 = vcombine.high %v637_v18, %v641_v19  ;;  %v14070_v37 = vcombine.high %v645_v26, %v649_v27  ;;  %v665_v4 = vld [vmem:[%s22810_s3 + $0x420] sm:$0xff] }
  0x55   :  { %v14086_v6 = vcombine.high %v661_v3, %v665_v4  ;;  %v14085_v8 = vcombine.low %v661_v3, %v665_v4 }
  0x57   :  { %2122 = vmatpush1.bf16.msra.mxu0 %v13997_v33  ;;  %2204 = vmatpush1.bf16.msra.mxu1 %v13999_v12  ;;  %v14061_v33 = vcombine.low %v637_v18, %v641_v19  ;;  %v17347_v12 = vshrl.u32 %v100_v11, 7 }
  0x58   :  { %2123 = vmatprep.subr.bf16.mxu0 %v14006_v39  ;;  %2205 = vmatprep.subr.bf16.mxu1 %v14008_v16  ;;  %v14069_v39 = vcombine.low %v645_v26, %v649_v27 }
  0x59   :  { %v17350_v13 = vsub.s32 0, %v17347_v12 }
  0x5b   :  { %2124 = vmatpush1.bf16.msra.mxu0 %v14005_v41  ;;  %2206 = vmatpush1.bf16.msra.mxu1 %v14007_v20  ;;  %v622_v41 = vld [vmem:[%s22810_s3 + $0x2c8] sm:$0xff]  ;;  %v103_v16 = vrot.slane %v17355_v14, %v17350_v13 }
  0x5c   :  { %2125 = vmatprep.subr.bf16.mxu0 %v14014_v47  ;;  %2207 = vmatprep.subr.bf16.mxu1 %v14016_v24  ;;  %v14048_v47 = vcombine.high %v622_v41, %v626_v42  ;;  %v14047_v48 = vcombine.low %v622_v41, %v626_v42 }
  0x5f   :  { %2126 = vmatpush1.bf16.msra.mxu0 %v14013_v49  ;;  %2208 = vmatpush1.bf16.msra.mxu1 %v14015_v28  ;;  %v638_v49 = vld [vmem:[%s22810_s3 + $0x348] sm:$0xff] }
  0x60   :  { %2127 = vmatprep.subr.bf16.mxu0 %v14022_v55  ;;  %2209 = vmatprep.subr.bf16.mxu1 %v14024_v32  ;;  %v14064_v55 = vcombine.high %v638_v49, %v642_v50  ;;  %v14063_v56 = vcombine.low %v638_v49, %v642_v50 }
  0x63   :  { %2128 = vmatpush1.bf16.msra.mxu0 %v14021_v57  ;;  %2210 = vmatpush1.bf16.msra.mxu1 %v14023_v34  ;;  %v14072_v57 = vcombine.high %v646_v53, %v650_v54 }
  0x64   :  { %2129 = vmatprep.subr.bf16.mxu0 %v14030_v63  ;;  %2211 = vmatprep.subr.bf16.mxu1 %v14032_v38  ;;  %v658_v63 = vld [vmem:[%s22810_s3 + $0x3e8] sm:$0xff] }
  0x65   :  { %v14080_v2 = vcombine.high %v654_v61, %v658_v63 }
  0x67   :  { %2130 = vmatpush1.bf16.msra.mxu0 %v14029_v1  ;;  %2212 = vmatpush1.bf16.msra.mxu1 %v14031_v40  ;;  %v14079_v1 = vcombine.low %v654_v61, %v658_v63 }
  0x68   :  { %2131 = vmatprep.subr.bf16.mxu0 %v14038_v7  ;;  %2213 = vmatprep.subr.bf16.mxu1 %v14040_v43  ;;  %v666_v7 = vld [vmem:[%s22810_s3 + $0x428] sm:$0xff] }
  0x69   :  { %v14088_v10 = vcombine.high %v662_v5, %v666_v7 }
  0x6b   :  { %2132 = vmatpush1.bf16.msra.mxu0 %v14037_v9  ;;  %2214 = vmatpush1.bf16.msra.mxu1 %v14039_v44  ;;  %v14087_v9 = vcombine.low %v662_v5, %v666_v7 }
  0x6c   :  { %2133 = vmatprep.subr.bf16.mxu0 %v14046_v15  ;;  %2215 = vmatprep.subr.bf16.mxu1 %v14048_v47  ;;  %v17358_v15 = vsub.s32 1, %v17347_v12 }
  0x6f   :  { %2134 = vmatpush1.bf16.msra.mxu0 %v14045_v17  ;;  %2216 = vmatpush1.bf16.msra.mxu1 %v14047_v48  ;;  %v107_v17 = vrot.slane %v17355_v14, %v17358_v15 }
  0x70   :  { %2135 = vmatprep.subr.bf16.mxu0 %v14054_v23  ;;  %2217 = vmatprep.subr.bf16.mxu1 %v14056_v51 }
  0x73   :  { %2136 = vmatpush1.bf16.msra.mxu0 %v14053_v25  ;;  %2218 = vmatpush1.bf16.msra.mxu1 %v14055_v52 }
  0x74   :  { %2137 = vmatprep.subr.bf16.mxu0 %v14062_v31  ;;  %2219 = vmatprep.subr.bf16.mxu1 %v14064_v55 }
  0x77   :  { %2138 = vmatpush1.bf16.msra.mxu0 %v14061_v33  ;;  %2220 = vmatpush1.bf16.msra.mxu1 %v14063_v56 }
  0x78   :  { %2139 = vmatprep.subr.bf16.mxu0 %v14070_v37  ;;  %2221 = vmatprep.subr.bf16.mxu1 %v14072_v57 }
  0x7b   :  { %2140 = vmatpush1.bf16.msra.mxu0 %v14069_v39  ;;  %2222 = vmatpush1.bf16.msra.mxu1 %v14071_v58 }
  0x7c   :  { %2141 = vmatprep.subr.bf16.mxu0 %v14078_v62  ;;  %2223 = vmatprep.subr.bf16.mxu1 %v14080_v2 }
  0x7f   :  { %2142 = vmatpush1.bf16.msra.mxu0 %v14077_v0  ;;  %2224 = vmatpush1.bf16.msra.mxu1 %v14079_v1 }
  0x80   :  { %2152 = vmatprep.subr.bf16.mxu0 %v14086_v6  ;;  %2234 = vmatprep.subr.bf16.mxu1 %v14088_v10 }
  0x81   :  { %14 = vsyncpa [#allocation4], 0  ;;  %v669_v21 = vld [vmem:[%s22810_s3 + $0x440] sm:$0xff]  ;;  %v670_v25 = vld [vmem:[%s22810_s3 + $0x448] sm:$0xff]  ;;  %v17421_v52 = vsub.s32 3, %v17347_v12 }
  0x82   :  { %v673_v24 = vld [vmem:[%s22810_s3 + $0x460] sm:$0xff]  ;;  %v674_v26 = vld [vmem:[%s22810_s3 + $0x468] sm:$0xff] }
  0x83   :  { %v14094_v30 = vcombine.high %v669_v21, %v673_v24  ;;  %v14096_v31 = vcombine.high %v670_v25, %v674_v26  ;;  %v677_v32 = vld [vmem:[%s22810_s3 + $0x480] sm:$0xff]  ;;  %v678_v34 = vld [vmem:[%s22810_s3 + $0x488] sm:$0xff]  ;;  %v14093_v36 = vcombine.low %v669_v21, %v673_v24  ;;  %v14095_v37 = vcombine.low %v670_v25, %v674_v26 }
  0x84   :  { %v681_v33 = vld [vmem:[%s22810_s3 + $0x4a0] sm:$0xff]  ;;  %v682_v35 = vld [vmem:[%s22810_s3 + $0x4a8] sm:$0xff]  ;;  %v115_v61 = vrot.slane %v17355_v14, %v17421_v52 }
  0x85   :  { %v14102_v38 = vcombine.high %v677_v32, %v681_v33  ;;  %v14104_v39 = vcombine.high %v678_v34, %v682_v35  ;;  %v685_v40 = vld [vmem:[%s22810_s3 + $0x4c0] sm:$0xff]  ;;  %v686_v42 = vld [vmem:[%s22810_s3 + $0x4c8] sm:$0xff]  ;;  %v14101_v44 = vcombine.low %v677_v32, %v681_v33  ;;  %v14103_v45 = vcombine.low %v678_v34, %v682_v35 }
  0x86   :  { %v689_v41 = vld [vmem:[%s22810_s3 + $0x4e0] sm:$0xff]  ;;  %v690_v43 = vld [vmem:[%s22810_s3 + $0x4e8] sm:$0xff] }
  0x87   :  { %v14110_v46 = vcombine.high %v685_v40, %v689_v41  ;;  %v14112_v47 = vcombine.high %v686_v42, %v690_v43  ;;  %v693_v48 = vld [vmem:[%s22810_s3 + $0x500] sm:$0xff]  ;;  %v694_v50 = vld [vmem:[%s22810_s3 + $0x508] sm:$0xff]  ;;  %v14109_v53 = vcombine.low %v685_v40, %v689_v41  ;;  %v14111_v54 = vcombine.low %v686_v42, %v690_v43 }
  0x88   :  { %v697_v49 = vld [vmem:[%s22810_s3 + $0x520] sm:$0xff]  ;;  %v698_v51 = vld [vmem:[%s22810_s3 + $0x528] sm:$0xff] }
  0x89   :  { %v14118_v55 = vcombine.high %v693_v48, %v697_v49  ;;  %v14120_v56 = vcombine.high %v694_v50, %v698_v51  ;;  %v701_v57 = vld [vmem:[%s22810_s3 + $0x540] sm:$0xff]  ;;  %v702_v59 = vld [vmem:[%s22810_s3 + $0x548] sm:$0xff]  ;;  %v14117_v62 = vcombine.low %v693_v48, %v697_v49  ;;  %v14119_v63 = vcombine.low %v694_v50, %v698_v51 }
  0x8a   :  { %v705_v58 = vld [vmem:[%s22810_s3 + $0x560] sm:$0xff]  ;;  %v706_v60 = vld [vmem:[%s22810_s3 + $0x568] sm:$0xff] }
  0x8b   :  { %v14126_v0 = vcombine.high %v701_v57, %v705_v58  ;;  %v14128_v1 = vcombine.high %v702_v59, %v706_v60  ;;  %v709_v2 = vld [vmem:[%s22810_s3 + $0x580] sm:$0xff]  ;;  %v710_v5 = vld [vmem:[%s22810_s3 + $0x588] sm:$0xff]  ;;  %v14125_v10 = vcombine.low %v701_v57, %v705_v58  ;;  %v14127_v11 = vcombine.low %v702_v59, %v706_v60 }
  0x8c   :  { %v713_v4 = vld [vmem:[%s22810_s3 + $0x5a0] sm:$0xff]  ;;  %v714_v6 = vld [vmem:[%s22810_s3 + $0x5a8] sm:$0xff] }
  0x8d   :  { %v721_v21 = vld [vmem:[%s22810_s3 + $0x5e0] sm:$0xff]  ;;  %v14133_v24 = vcombine.low %v709_v2, %v713_v4  ;;  %v14135_v25 = vcombine.low %v710_v5, %v714_v6  ;;  %v726_v32 = vld [vmem:[%s22810_s3 + $0x608] sm:$0xff] }
  0x8e   :  { %v730_v33 = vld [vmem:[%s22810_s3 + $0x628] sm:$0xff] }
  0x8f   :  { %v734_v40 = vld [vmem:[%s22810_s3 + $0x648] sm:$0xff]  ;;  %v14151_v43 = vcombine.low %v726_v32, %v730_v33 }
  0x90   :  { %v738_v41 = vld [vmem:[%s22810_s3 + $0x668] sm:$0xff] }
  0x91   :  { %v742_v48 = vld [vmem:[%s22810_s3 + $0x688] sm:$0xff]  ;;  %v14159_v51 = vcombine.low %v734_v40, %v738_v41 }
  0x92   :  { %v746_v49 = vld [vmem:[%s22810_s3 + $0x6a8] sm:$0xff] }
  0x93   :  { %v750_v57 = vld [vmem:[%s22810_s3 + $0x6c8] sm:$0xff]  ;;  %v14167_v60 = vcombine.low %v742_v48, %v746_v49 }
  0x94   :  { %v754_v58 = vld [vmem:[%s22810_s3 + $0x6e8] sm:$0xff] }
 0x115   :  { %v481_v18 = vpop.f32.mrb[0].mxu0  ;;  %v17440_v3 = vpop.f32.mrb[0].mxu1 }
 0x116   :  { %v482_v19 = vadd.f32 %v481_v18, %v103_v16  ;;  %v483_v20 = vpop.f32.mrb[1].mxu0  ;;  %v524_v7 = vpop.f32.mrb[1].mxu1  ;;  %v14136_v18 = vcombine.high %v710_v5, %v714_v6  ;;  %v14175_v5 = vcombine.low %v750_v57, %v754_v58 }
 0x117   :  { %v484_v22 = vadd.f32 %v483_v20, %v107_v17  ;;  %v485_v23 = vpop.f32.mrb[2].mxu0  ;;  %v14134_v17 = vcombine.high %v709_v2, %v713_v4  ;;  %v762_v2 = vld [vmem:[%s22810_s3 + $0x728] sm:$0xff] }
 0x118   :  { %v486_v27 = vpop.f32.mrb[3].mxu0  ;;  %v17378_v29 = vpack.c.bf16 %v482_v19, %v482_v19  ;;  %v717_v19 = vld [vmem:[%s22810_s3 + $0x5c0] sm:$0xff]  ;;  %v722_v23 = vld [vmem:[%s22810_s3 + $0x5e8] sm:$0xff] }
 0x119   :  { %v17376_v28 = vpack.c.bf16 %v484_v22, %v484_v22  ;;  %v718_v22 = vld [vmem:[%s22810_s3 + $0x5c8] sm:$0xff]  ;;  %v14142_v26 = vcombine.high %v717_v19, %v721_v21  ;;  %v14141_v34 = vcombine.low %v717_v19, %v721_v21  ;;  %v773_v21 = vld [vmem:[%s22810_s3 + $0x780] sm:$0xff] }
 0x11a   :  { %v14144_v27 = vcombine.high %v718_v22, %v722_v23  ;;  %v14143_v35 = vcombine.low %v718_v22, %v722_v23  ;;  %v777_v22 = vld [vmem:[%s22810_s3 + $0x7a0] sm:$0xff]  ;;  %v774_v23 = vld [vmem:[%s22810_s3 + $0x788] sm:$0xff] }
 0x11b   :  { %2143 = vmatprep.mubr.bf16.mxu0 %v17376_v28  ;;  %2225 = vmatprep.mubr.bf16.mxu1 %v17376_v28 }
 0x11c   :  { %2144 = vmatmul.mubr.bf16.vlgmr.msra.gmra.mrb[4].mxu0 %v17378_v29  ;;  %2226 = vmatmul.mubr.bf16.vlgmr.msra.gmra.mrb[4].mxu1 %v17378_v29 }
 0x11d   :  { %2153 = vmatpush1.bf16.msra.mxu0 %v14085_v8  ;;  %2235 = vmatpush1.bf16.msra.mxu1 %v14087_v9  ;;  %v525_v8 = vadd.f32 %v524_v7, %v115_v61  ;;  %v526_v9 = vpop.f32.mrb[2].mxu1 }
 0x11e   :  { %2154 = vmatprep.subr.bf16.mxu0 %v14094_v30  ;;  %2236 = vmatprep.subr.bf16.mxu1 %v14096_v31  ;;  %v527_v16 = vpop.f32.mrb[3].mxu1  ;;  %v725_v30 = vld [vmem:[%s22810_s3 + $0x600] sm:$0xff] }
 0x11f   :  { %v17454_v20 = vpack.c.bf16 %v525_v8, %v525_v8  ;;  %v729_v31 = vld [vmem:[%s22810_s3 + $0x620] sm:$0xff] }
 0x120   :  { %v14149_v42 = vcombine.low %v725_v30, %v729_v31  ;;  %v765_v8 = vld [vmem:[%s22810_s3 + $0x740] sm:$0xff] }
 0x121   :  { %2155 = vmatpush1.bf16.msra.mxu0 %v14093_v36  ;;  %2237 = vmatpush1.bf16.msra.mxu1 %v14095_v37  ;;  %v14150_v36 = vcombine.high %v725_v30, %v729_v31  ;;  %v14152_v37 = vcombine.high %v726_v32, %v730_v33  ;;  %v769_v9 = vld [vmem:[%s22810_s3 + $0x760] sm:$0xff]  ;;  %v14198_v30 = vcombine.high %v773_v21, %v777_v22 }
 0x122   :  { %2156 = vmatprep.subr.bf16.mxu0 %v14102_v38  ;;  %2238 = vmatprep.subr.bf16.mxu1 %v14104_v39  ;;  %v733_v38 = vld [vmem:[%s22810_s3 + $0x640] sm:$0xff] }
 0x123   :  { %2184 = vmatprep.mubr.bf16.mxu0 %v17454_v20  ;;  %2266 = vmatprep.mubr.bf16.mxu1 %v17454_v20  ;;  %v737_v39 = vld [vmem:[%s22810_s3 + $0x660] sm:$0xff] }
 0x124   :  { %v14157_v50 = vcombine.low %v733_v38, %v737_v39  ;;  %v781_v32 = vld [vmem:[%s22810_s3 + $0x7c0] sm:$0xff] }
 0x125   :  { %2157 = vmatpush1.bf16.msra.mxu0 %v14101_v44  ;;  %2239 = vmatpush1.bf16.msra.mxu1 %v14103_v45  ;;  %v14158_v44 = vcombine.high %v733_v38, %v737_v39  ;;  %v14160_v45 = vcombine.high %v734_v40, %v738_v41  ;;  %v785_v33 = vld [vmem:[%s22810_s3 + $0x7e0] sm:$0xff]  ;;  %v535_v41 = vld [vmem:[%s22810_s3 + $0x10] sm:$0xff] }
 0x126   :  { %2158 = vmatprep.subr.bf16.mxu0 %v14110_v46  ;;  %2240 = vmatprep.subr.bf16.mxu1 %v14112_v47  ;;  %v741_v46 = vld [vmem:[%s22810_s3 + $0x680] sm:$0xff]  ;;  %v14206_v39 = vcombine.high %v781_v32, %v785_v33 }
 0x127   :  { %v745_v47 = vld [vmem:[%s22810_s3 + $0x6a0] sm:$0xff] }
 0x128   :  { %v14165_v59 = vcombine.low %v741_v46, %v745_v47 }
 0x129   :  { %2159 = vmatpush1.bf16.msra.mxu0 %v14109_v53  ;;  %2241 = vmatpush1.bf16.msra.mxu1 %v14111_v54  ;;  %v14166_v53 = vcombine.high %v741_v46, %v745_v47  ;;  %v14168_v54 = vcombine.high %v742_v48, %v746_v49  ;;  %v543_v49 = vld [vmem:[%s22810_s3 + $0x50] sm:$0xff] }
 0x12a   :  { %2160 = vmatprep.subr.bf16.mxu0 %v14118_v55  ;;  %2242 = vmatprep.subr.bf16.mxu1 %v14120_v56  ;;  %v749_v55 = vld [vmem:[%s22810_s3 + $0x6c0] sm:$0xff] }
 0x12b   :  { %v753_v56 = vld [vmem:[%s22810_s3 + $0x6e0] sm:$0xff] }
 0x12c   :  { %v14174_v61 = vcombine.high %v749_v55, %v753_v56  ;;  %v14173_v4 = vcombine.low %v749_v55, %v753_v56 }
 0x12d   :  { %2161 = vmatpush1.bf16.msra.mxu0 %v14117_v62  ;;  %2243 = vmatpush1.bf16.msra.mxu1 %v14119_v63  ;;  %v14176_v62 = vcombine.high %v750_v57, %v754_v58  ;;  %v757_v63 = vld [vmem:[%s22810_s3 + $0x700] sm:$0xff]  ;;  %v551_v58 = vld [vmem:[%s22810_s3 + $0x90] sm:$0xff] }
 0x12e   :  { %2162 = vmatprep.subr.bf16.mxu0 %v14126_v0  ;;  %2244 = vmatprep.subr.bf16.mxu1 %v14128_v1  ;;  %v761_v0 = vld [vmem:[%s22810_s3 + $0x720] sm:$0xff]  ;;  %v758_v1 = vld [vmem:[%s22810_s3 + $0x708] sm:$0xff] }
 0x12f   :  { %v14182_v6 = vcombine.high %v757_v63, %v761_v0  ;;  %v14184_v7 = vcombine.high %v758_v1, %v762_v2  ;;  %v14181_v16 = vcombine.low %v757_v63, %v761_v0 }
 0x131   :  { %2163 = vmatpush1.bf16.msra.mxu0 %v14125_v10  ;;  %2245 = vmatpush1.bf16.msra.mxu1 %v14127_v11  ;;  %v766_v10 = vld [vmem:[%s22810_s3 + $0x748] sm:$0xff] }
 0x132   :  { %2164 = vmatprep.subr.bf16.mxu0 %v14134_v17  ;;  %2246 = vmatprep.subr.bf16.mxu1 %v14136_v18  ;;  %v770_v11 = vld [vmem:[%s22810_s3 + $0x768] sm:$0xff]  ;;  %v14183_v17 = vcombine.low %v758_v1, %v762_v2  ;;  %v14190_v18 = vcombine.high %v765_v8, %v769_v9  ;;  %v559_v2 = vld [vmem:[%s22810_s3 + $0xd0] sm:$0xff] }
 0x133   :  { %v14192_v19 = vcombine.high %v766_v10, %v770_v11 }
 0x135   :  { %2165 = vmatpush1.bf16.msra.mxu0 %v14133_v24  ;;  %2247 = vmatpush1.bf16.msra.mxu1 %v14135_v25  ;;  %v778_v24 = vld [vmem:[%s22810_s3 + $0x7a8] sm:$0xff]  ;;  %v14189_v25 = vcombine.low %v765_v8, %v769_v9 }
 0x136   :  { %2166 = vmatprep.subr.bf16.mxu0 %v14142_v26  ;;  %2248 = vmatprep.subr.bf16.mxu1 %v14144_v27  ;;  %v14191_v26 = vcombine.low %v766_v10, %v770_v11  ;;  %v17552_v27 = vsub.s32 2, %v17347_v12  ;;  %v14200_v31 = vcombine.high %v774_v23, %v778_v24  ;;  %v567_v10 = vld [vmem:[%s22810_s3 + $0x110] sm:$0xff] }
 0x137   :  { %v571_v11 = vld [vmem:[%s22810_s3 + $0x130] sm:$0xff] }
 0x138   :  { %v111_v38 = vrot.slane %v17355_v14, %v17552_v27  ;;  %v540_v14 = vld [vmem:[%s22810_s3 + $0x38] sm:$0xff] }
 0x139   :  { %2167 = vmatpush1.bf16.msra.mxu0 %v14141_v34  ;;  %2249 = vmatpush1.bf16.msra.mxu1 %v14143_v35  ;;  %v782_v34 = vld [vmem:[%s22810_s3 + $0x7c8] sm:$0xff] }
 0x13a   :  { %2168 = vmatprep.subr.bf16.mxu0 %v14150_v36  ;;  %2250 = vmatprep.subr.bf16.mxu1 %v14152_v37  ;;  %v786_v35 = vld [vmem:[%s22810_s3 + $0x7e8] sm:$0xff]  ;;  %v14197_v36 = vcombine.low %v773_v21, %v777_v22  ;;  %v14199_v37 = vcombine.low %v774_v23, %v778_v24  ;;  %v523_v46 = vadd.f32 %v17440_v3, %v111_v38  ;;  %v548_v3 = vld [vmem:[%s22810_s3 + $0x78] sm:$0xff]  ;;  %v575_v23 = vld [vmem:[%s22810_s3 + $0x150] sm:$0xff] }
 0x13b   :  { %v14208_v40 = vcombine.high %v782_v34, %v786_v35  ;;  %v13994_v21 = vcombine.high %v567_v10, %v571_v11  ;;  %v579_v24 = vld [vmem:[%s22810_s3 + $0x170] sm:$0xff] }
 0x13c   :  { %v14001_v38 = vcombine.low %v575_v23, %v579_v24 }
 0x13d   :  { %2169 = vmatpush1.bf16.msra.mxu0 %v14149_v42  ;;  %2251 = vmatpush1.bf16.msra.mxu1 %v14151_v43  ;;  %v539_v42 = vld [vmem:[%s22810_s3 + $0x30] sm:$0xff]  ;;  %v536_v43 = vld [vmem:[%s22810_s3 + $0x18] sm:$0xff] }
 0x13e   :  { %2170 = vmatprep.subr.bf16.mxu0 %v14158_v44  ;;  %2252 = vmatprep.subr.bf16.mxu1 %v14160_v45  ;;  %v14205_v44 = vcombine.low %v781_v32, %v785_v33  ;;  %v14207_v45 = vcombine.low %v782_v34, %v786_v35  ;;  %v13962_v47 = vcombine.high %v535_v41, %v539_v42  ;;  %v583_v34 = vld [vmem:[%s22810_s3 + $0x190] sm:$0xff] }
 0x13f   :  { %v13964_v48 = vcombine.high %v536_v43, %v540_v14  ;;  %v13963_v55 = vcombine.low %v536_v43, %v540_v14  ;;  %v14002_v32 = vcombine.high %v575_v23, %v579_v24  ;;  %v587_v35 = vld [vmem:[%s22810_s3 + $0x1b0] sm:$0xff]  ;;  %v592_v14 = vld [vmem:[%s22810_s3 + $0x1d8] sm:$0xff] }
 0x140   :  { %v595_v43 = vld [vmem:[%s22810_s3 + $0x1f0] sm:$0xff] }
 0x141   :  { %2171 = vmatpush1.bf16.msra.mxu0 %v14157_v50  ;;  %2253 = vmatpush1.bf16.msra.mxu1 %v14159_v51  ;;  %v547_v50 = vld [vmem:[%s22810_s3 + $0x70] sm:$0xff]  ;;  %v544_v51 = vld [vmem:[%s22810_s3 + $0x58] sm:$0xff] }
 0x142   :  { %2172 = vmatprep.subr.bf16.mxu0 %v14166_v53  ;;  %2254 = vmatprep.subr.bf16.mxu1 %v14168_v54  ;;  %v13961_v53 = vcombine.low %v535_v41, %v539_v42  ;;  %v17593_v54 = vpack.c.bf16 %v523_v46, %v523_v46  ;;  %v13970_v56 = vcombine.high %v543_v49, %v547_v50  ;;  %v591_v42 = vld [vmem:[%s22810_s3 + $0x1d0] sm:$0xff] }
 0x143   :  { %v13972_v57 = vcombine.high %v544_v51, %v548_v3  ;;  %v13971_v63 = vcombine.low %v544_v51, %v548_v3  ;;  %v600_v51 = vld [vmem:[%s22810_s3 + $0x218] sm:$0xff]  ;;  %v631_v23 = vld [vmem:[%s22810_s3 + $0x310] sm:$0xff] }
 0x144   :  { %v604_v3 = vld [vmem:[%s22810_s3 + $0x238] sm:$0xff]  ;;  %v635_v24 = vld [vmem:[%s22810_s3 + $0x330] sm:$0xff] }
 0x145   :  { %2173 = vmatpush1.bf16.msra.mxu0 %v14165_v59  ;;  %2255 = vmatpush1.bf16.msra.mxu1 %v14167_v60  ;;  %v555_v59 = vld [vmem:[%s22810_s3 + $0xb0] sm:$0xff]  ;;  %v552_v60 = vld [vmem:[%s22810_s3 + $0x98] sm:$0xff] }
 0x146   :  { %2174 = vmatprep.subr.bf16.mxu0 %v14174_v61  ;;  %2256 = vmatprep.subr.bf16.mxu1 %v14176_v62  ;;  %v556_v61 = vld [vmem:[%s22810_s3 + $0xb8] sm:$0xff]  ;;  %v13969_v62 = vcombine.low %v543_v49, %v547_v50  ;;  %v13978_v0 = vcombine.high %v551_v58, %v555_v59  ;;  %v599_v49 = vld [vmem:[%s22810_s3 + $0x210] sm:$0xff] }
 0x147   :  { %v13980_v1 = vcombine.high %v552_v60, %v556_v61  ;;  %v603_v50 = vld [vmem:[%s22810_s3 + $0x230] sm:$0xff] }
 0x149   :  { %2175 = vmatpush1.bf16.msra.mxu0 %v14173_v4  ;;  %2257 = vmatpush1.bf16.msra.mxu1 %v14175_v5  ;;  %v563_v4 = vld [vmem:[%s22810_s3 + $0xf0] sm:$0xff]  ;;  %v560_v5 = vld [vmem:[%s22810_s3 + $0xd8] sm:$0xff] }
 0x14a   :  { %2176 = vmatprep.subr.bf16.mxu0 %v14182_v6  ;;  %2258 = vmatprep.subr.bf16.mxu1 %v14184_v7  ;;  %v13977_v6 = vcombine.low %v551_v58, %v555_v59  ;;  %v13979_v7 = vcombine.low %v552_v60, %v556_v61  ;;  %v13986_v8 = vcombine.high %v559_v2, %v563_v4  ;;  %v607_v58 = vld [vmem:[%s22810_s3 + $0x250] sm:$0xff]  ;;  %v608_v60 = vld [vmem:[%s22810_s3 + $0x258] sm:$0xff] }
 0x14b   :  { %v611_v59 = vld [vmem:[%s22810_s3 + $0x270] sm:$0xff]  ;;  %v612_v61 = vld [vmem:[%s22810_s3 + $0x278] sm:$0xff] }
 0x14d   :  { %2177 = vmatpush1.bf16.msra.mxu0 %v14181_v16  ;;  %2259 = vmatpush1.bf16.msra.mxu1 %v14183_v17  ;;  %v568_v16 = vld [vmem:[%s22810_s3 + $0x118] sm:$0xff] }
 0x14e   :  { %2178 = vmatprep.subr.bf16.mxu0 %v14190_v18  ;;  %2260 = vmatprep.subr.bf16.mxu1 %v14192_v19  ;;  %v572_v17 = vld [vmem:[%s22810_s3 + $0x138] sm:$0xff]  ;;  %v13985_v18 = vcombine.low %v559_v2, %v563_v4  ;;  %v615_v2 = vld [vmem:[%s22810_s3 + $0x290] sm:$0xff] }
 0x14f   :  { %v13996_v22 = vcombine.high %v568_v16, %v572_v17  ;;  %v619_v4 = vld [vmem:[%s22810_s3 + $0x2b0] sm:$0xff] }
 0x151   :  { %2179 = vmatpush1.bf16.msra.mxu0 %v14189_v25  ;;  %2261 = vmatpush1.bf16.msra.mxu1 %v14191_v26  ;;  %v576_v25 = vld [vmem:[%s22810_s3 + $0x158] sm:$0xff] }
 0x152   :  { %2180 = vmatprep.subr.bf16.mxu0 %v14198_v30  ;;  %2262 = vmatprep.subr.bf16.mxu1 %v14200_v31  ;;  %v580_v26 = vld [vmem:[%s22810_s3 + $0x178] sm:$0xff]  ;;  %v13993_v30 = vcombine.low %v567_v10, %v571_v11  ;;  %v13995_v31 = vcombine.low %v568_v16, %v572_v17  ;;  %v623_v10 = vld [vmem:[%s22810_s3 + $0x2d0] sm:$0xff] }
 0x153   :  { %v14004_v33 = vcombine.high %v576_v25, %v580_v26  ;;  %v627_v11 = vld [vmem:[%s22810_s3 + $0x2f0] sm:$0xff]  ;;  %v624_v16 = vld [vmem:[%s22810_s3 + $0x2d8] sm:$0xff] }
 0x154   :  { %v628_v17 = vld [vmem:[%s22810_s3 + $0x2f8] sm:$0xff] }
 0x155   :  { %2181 = vmatpush1.bf16.msra.mxu0 %v14197_v36  ;;  %2263 = vmatpush1.bf16.msra.mxu1 %v14199_v37  ;;  %v584_v36 = vld [vmem:[%s22810_s3 + $0x198] sm:$0xff] }
 0x156   :  { %2182 = vmatprep.subr.bf16.mxu0 %v14206_v39  ;;  %2264 = vmatprep.subr.bf16.mxu1 %v14208_v40  ;;  %v588_v37 = vld [vmem:[%s22810_s3 + $0x1b8] sm:$0xff]  ;;  %v14003_v39 = vcombine.low %v576_v25, %v580_v26  ;;  %v14010_v40 = vcombine.high %v583_v34, %v587_v35 }
 0x157   :  { %v14012_v41 = vcombine.high %v584_v36, %v588_v37  ;;  %v14011_v46 = vcombine.low %v584_v36, %v588_v37  ;;  %v632_v25 = vld [vmem:[%s22810_s3 + $0x318] sm:$0xff] }
 0x158   :  { %v636_v26 = vld [vmem:[%s22810_s3 + $0x338] sm:$0xff] }
 0x159   :  { %2183 = vmatpush1.bf16.msra.mxu0 %v14205_v44  ;;  %2265 = vmatpush1.bf16.msra.mxu1 %v14207_v45  ;;  %v596_v44 = vld [vmem:[%s22810_s3 + $0x1f8] sm:$0xff]  ;;  %v14009_v45 = vcombine.low %v583_v34, %v587_v35  ;;  %v639_v34 = vld [vmem:[%s22810_s3 + $0x350] sm:$0xff] }
 0x15a   :  { %2275 = vmatprep.subr.bf16.mxu0 %v13962_v47  ;;  %2357 = vmatprep.subr.bf16.mxu1 %v13964_v48  ;;  %v14018_v47 = vcombine.high %v591_v42, %v595_v43  ;;  %v14020_v48 = vcombine.high %v592_v14, %v596_v44  ;;  %v643_v35 = vld [vmem:[%s22810_s3 + $0x370] sm:$0xff]  ;;  %v640_v36 = vld [vmem:[%s22810_s3 + $0x358] sm:$0xff] }
 0x15b   :  { %v644_v37 = vld [vmem:[%s22810_s3 + $0x378] sm:$0xff] }
 0x15c   :  { %2185 = vmatmul.mubr.bf16.vlgmr.msra.gmra.mrb[4].mxu0 %v17593_v54  ;;  %2267 = vmatmul.mubr.bf16.vlgmr.msra.gmra.mrb[4].mxu1 %v17593_v54 }
 0x15d   :  { %2276 = vmatpush1.bf16.msra.mxu0 %v13961_v53  ;;  %2307 = vmatprep.mubr.bf16.mxu0 %v17376_v28  ;;  %v14017_v53 = vcombine.low %v591_v42, %v595_v43  ;;  %v647_v42 = vld [vmem:[%s22810_s3 + $0x390] sm:$0xff] }
 0x15e   :  { %2358 = vmatpush1.bf16.msra.mxu1 %v13963_v55  ;;  %2389 = vmatprep.mubr.bf16.mxu1 %v17376_v28  ;;  %v564_v28 = vld [vmem:[%s22810_s3 + $0xf8] sm:$0xff]  ;;  %v14019_v55 = vcombine.low %v592_v14, %v596_v44  ;;  %v651_v43 = vld [vmem:[%s22810_s3 + $0x3b0] sm:$0xff] }
 0x15f   :  { %2277 = vmatprep.subr.bf16.mxu0 %v13970_v56  ;;  %2359 = vmatprep.subr.bf16.mxu1 %v13972_v57  ;;  %v13988_v9 = vcombine.high %v560_v5, %v564_v28  ;;  %v13987_v19 = vcombine.low %v560_v5, %v564_v28  ;;  %v14026_v56 = vcombine.high %v599_v49, %v603_v50  ;;  %v616_v5 = vld [vmem:[%s22810_s3 + $0x298] sm:$0xff] }
 0x160   :  { %v14028_v57 = vcombine.high %v600_v51, %v604_v3  ;;  %v620_v28 = vld [vmem:[%s22810_s3 + $0x2b8] sm:$0xff] }
 0x161   :  { %2278 = vmatpush1.bf16.msra.mxu0 %v13969_v62  ;;  %v14025_v62 = vcombine.low %v599_v49, %v603_v50  ;;  %v648_v14 = vld [vmem:[%s22810_s3 + $0x398] sm:$0xff]  ;;  %v655_v49 = vld [vmem:[%s22810_s3 + $0x3d0] sm:$0xff] }
 0x162   :  { %2360 = vmatpush1.bf16.msra.mxu1 %v13971_v63  ;;  %2279 = vmatprep.subr.bf16.mxu0 %v13978_v0  ;;  %v14027_v63 = vcombine.low %v600_v51, %v604_v3  ;;  %v14034_v0 = vcombine.high %v607_v58, %v611_v59  ;;  %v652_v44 = vld [vmem:[%s22810_s3 + $0x3b8] sm:$0xff]  ;;  %v659_v50 = vld [vmem:[%s22810_s3 + $0x3f0] sm:$0xff] }
 0x163   :  { %2361 = vmatprep.subr.bf16.mxu1 %v13980_v1  ;;  %v14036_v1 = vcombine.high %v608_v60, %v612_v61  ;;  %v656_v51 = vld [vmem:[%s22810_s3 + $0x3d8] sm:$0xff] }
 0x164   :  { %v660_v3 = vld [vmem:[%s22810_s3 + $0x3f8] sm:$0xff] }
 0x165   :  { %2280 = vmatpush1.bf16.msra.mxu0 %v13977_v6  ;;  %v14033_v6 = vcombine.low %v607_v58, %v611_v59  ;;  %v663_v58 = vld [vmem:[%s22810_s3 + $0x410] sm:$0xff] }
 0x166   :  { %2362 = vmatpush1.bf16.msra.mxu1 %v13979_v7  ;;  %2281 = vmatprep.subr.bf16.mxu0 %v13986_v8  ;;  %v14035_v7 = vcombine.low %v608_v60, %v612_v61  ;;  %v14042_v8 = vcombine.high %v615_v2, %v619_v4  ;;  %v667_v59 = vld [vmem:[%s22810_s3 + $0x430] sm:$0xff]  ;;  %v664_v60 = vld [vmem:[%s22810_s3 + $0x418] sm:$0xff] }
 0x167   :  { %2363 = vmatprep.subr.bf16.mxu1 %v13988_v9  ;;  %v14044_v9 = vcombine.high %v616_v5, %v620_v28  ;;  %v668_v61 = vld [vmem:[%s22810_s3 + $0x438] sm:$0xff] }
 0x169   :  { %2282 = vmatpush1.bf16.msra.mxu0 %v13985_v18  ;;  %v14041_v18 = vcombine.low %v615_v2, %v619_v4  ;;  %v671_v2 = vld [vmem:[%s22810_s3 + $0x450] sm:$0xff] }
 0x16a   :  { %2364 = vmatpush1.bf16.msra.mxu1 %v13987_v19  ;;  %2283 = vmatprep.subr.bf16.mxu0 %v13994_v21  ;;  %v14043_v19 = vcombine.low %v616_v5, %v620_v28  ;;  %v14050_v21 = vcombine.high %v623_v10, %v627_v11  ;;  %v675_v4 = vld [vmem:[%s22810_s3 + $0x470] sm:$0xff]  ;;  %v14089_v5 = vcombine.low %v663_v58, %v667_v59  ;;  %v672_v28 = vld [vmem:[%s22810_s3 + $0x458] sm:$0xff] }
 0x16b   :  { %2365 = vmatprep.subr.bf16.mxu1 %v13996_v22  ;;  %v14052_v22 = vcombine.high %v624_v16, %v628_v17 }
 0x16d   :  { %2284 = vmatpush1.bf16.msra.mxu0 %v13993_v30  ;;  %v14049_v30 = vcombine.low %v623_v10, %v627_v11  ;;  %v683_v10 = vld [vmem:[%s22810_s3 + $0x4b0] sm:$0xff] }
 0x16e   :  { %2366 = vmatpush1.bf16.msra.mxu1 %v13995_v31  ;;  %2285 = vmatprep.subr.bf16.mxu0 %v14002_v32  ;;  %v14051_v31 = vcombine.low %v624_v16, %v628_v17  ;;  %v14058_v32 = vcombine.high %v631_v23, %v635_v24  ;;  %v680_v16 = vld [vmem:[%s22810_s3 + $0x498] sm:$0xff] }
 0x16f   :  { %2367 = vmatprep.subr.bf16.mxu1 %v14004_v33  ;;  %v14060_v33 = vcombine.high %v632_v25, %v636_v26  ;;  %v684_v17 = vld [vmem:[%s22810_s3 + $0x4b8] sm:$0xff] }
 0x171   :  { %2286 = vmatpush1.bf16.msra.mxu0 %v14001_v38  ;;  %v14057_v38 = vcombine.low %v631_v23, %v635_v24  ;;  %v687_v23 = vld [vmem:[%s22810_s3 + $0x4d0] sm:$0xff] }
 0x172   :  { %2368 = vmatpush1.bf16.msra.mxu1 %v14003_v39  ;;  %2287 = vmatprep.subr.bf16.mxu0 %v14010_v40  ;;  %v14059_v39 = vcombine.low %v632_v25, %v636_v26  ;;  %v14066_v40 = vcombine.high %v639_v34, %v643_v35  ;;  %v691_v24 = vld [vmem:[%s22810_s3 + $0x4f0] sm:$0xff]  ;;  %v692_v25 = vld [vmem:[%s22810_s3 + $0x4f8] sm:$0xff]  ;;  %v14107_v26 = vcombine.low %v680_v16, %v684_v17 }
 0x173   :  { %2369 = vmatprep.subr.bf16.mxu1 %v14012_v41  ;;  %v14068_v41 = vcombine.high %v640_v36, %v644_v37 }
 0x175   :  { %2288 = vmatpush1.bf16.msra.mxu0 %v14009_v45  ;;  %v14065_v45 = vcombine.low %v639_v34, %v643_v35  ;;  %v696_v34 = vld [vmem:[%s22810_s3 + $0x518] sm:$0xff] }
 0x176   :  { %2370 = vmatpush1.bf16.msra.mxu1 %v14011_v46  ;;  %2289 = vmatprep.subr.bf16.mxu0 %v14018_v47  ;;  %v14067_v46 = vcombine.low %v640_v36, %v644_v37  ;;  %v14074_v47 = vcombine.high %v647_v42, %v651_v43  ;;  %v700_v35 = vld [vmem:[%s22810_s3 + $0x538] sm:$0xff]  ;;  %v14113_v36 = vcombine.low %v687_v23, %v691_v24 }
 0x177   :  { %2371 = vmatprep.subr.bf16.mxu1 %v14020_v48  ;;  %v14076_v48 = vcombine.high %v648_v14, %v652_v44 }
 0x179   :  { %2290 = vmatpush1.bf16.msra.mxu0 %v14017_v53  ;;  %v14073_v53 = vcombine.low %v647_v42, %v651_v43  ;;  %v704_v42 = vld [vmem:[%s22810_s3 + $0x558] sm:$0xff] }
 0x17a   :  { %2372 = vmatpush1.bf16.msra.mxu1 %v14019_v55  ;;  %2291 = vmatprep.subr.bf16.mxu0 %v14026_v56  ;;  %v14075_v55 = vcombine.low %v648_v14, %v652_v44  ;;  %v14082_v56 = vcombine.high %v655_v49, %v659_v50  ;;  %v708_v43 = vld [vmem:[%s22810_s3 + $0x578] sm:$0xff]  ;;  %v14123_v44 = vcombine.low %v696_v34, %v700_v35 }
 0x17b   :  { %2373 = vmatprep.subr.bf16.mxu1 %v14028_v57  ;;  %v14084_v57 = vcombine.high %v656_v51, %v660_v3 }
 0x17d   :  { %2292 = vmatpush1.bf16.msra.mxu0 %v14025_v62  ;;  %v14081_v62 = vcombine.low %v655_v49, %v659_v50  ;;  %v712_v49 = vld [vmem:[%s22810_s3 + $0x598] sm:$0xff] }
 0x17e   :  { %2374 = vmatpush1.bf16.msra.mxu1 %v14027_v63  ;;  %2293 = vmatprep.subr.bf16.mxu0 %v14034_v0  ;;  %v14083_v63 = vcombine.low %v656_v51, %v660_v3  ;;  %v14090_v0 = vcombine.high %v663_v58, %v667_v59  ;;  %v716_v50 = vld [vmem:[%s22810_s3 + $0x5b8] sm:$0xff]  ;;  %v14131_v3 = vcombine.low %v704_v42, %v708_v43 }
 0x17f   :  { %2375 = vmatprep.subr.bf16.mxu1 %v14036_v1  ;;  %v14092_v1 = vcombine.high %v664_v60, %v668_v61  ;;  %v720_v58 = vld [vmem:[%s22810_s3 + $0x5d8] sm:$0xff] }
 0x180   :  { %v724_v59 = vld [vmem:[%s22810_s3 + $0x5f8] sm:$0xff] }
 0x181   :  { %2294 = vmatpush1.bf16.msra.mxu0 %v14033_v6  ;;  %v676_v6 = vld [vmem:[%s22810_s3 + $0x478] sm:$0xff] }
 0x182   :  { %2376 = vmatpush1.bf16.msra.mxu1 %v14035_v7  ;;  %2295 = vmatprep.subr.bf16.mxu0 %v14042_v8  ;;  %v14091_v7 = vcombine.low %v664_v60, %v668_v61  ;;  %v14098_v8 = vcombine.high %v671_v2, %v675_v4  ;;  %v14100_v11 = vcombine.high %v672_v28, %v676_v6 }
 0x183   :  { %2377 = vmatprep.subr.bf16.mxu1 %v14044_v9  ;;  %v679_v9 = vld [vmem:[%s22810_s3 + $0x490] sm:$0xff]  ;;  %v14139_v61 = vcombine.low %v712_v49, %v716_v50 }
 0x185   :  { %2296 = vmatpush1.bf16.msra.mxu0 %v14041_v18  ;;  %v14097_v18 = vcombine.low %v671_v2, %v675_v4  ;;  %v728_v2 = vld [vmem:[%s22810_s3 + $0x618] sm:$0xff] }
 0x186   :  { %2378 = vmatpush1.bf16.msra.mxu1 %v14043_v19  ;;  %2297 = vmatprep.subr.bf16.mxu0 %v14050_v21  ;;  %v14099_v19 = vcombine.low %v672_v28, %v676_v6  ;;  %v14106_v21 = vcombine.high %v679_v9, %v683_v10  ;;  %v732_v4 = vld [vmem:[%s22810_s3 + $0x638] sm:$0xff]  ;;  %v14147_v28 = vcombine.low %v720_v58, %v724_v59 }
 0x187   :  { %2379 = vmatprep.subr.bf16.mxu1 %v14052_v22  ;;  %v14108_v22 = vcombine.high %v680_v16, %v684_v17  ;;  %v14155_v17 = vcombine.low %v728_v2, %v732_v4 }
 0x189   :  { %2298 = vmatpush1.bf16.msra.mxu0 %v14049_v30  ;;  %v14114_v30 = vcombine.high %v687_v23, %v691_v24  ;;  %v744_v23 = vld [vmem:[%s22810_s3 + $0x698] sm:$0xff] }
 0x18a   :  { %2380 = vmatpush1.bf16.msra.mxu1 %v14051_v31  ;;  %2299 = vmatprep.subr.bf16.mxu0 %v14058_v32  ;;  %v695_v32 = vld [vmem:[%s22810_s3 + $0x510] sm:$0xff]  ;;  %v748_v24 = vld [vmem:[%s22810_s3 + $0x6b8] sm:$0xff] }
 0x18b   :  { %2381 = vmatprep.subr.bf16.mxu1 %v14060_v33  ;;  %v699_v33 = vld [vmem:[%s22810_s3 + $0x530] sm:$0xff] }
 0x18c   :  { %v14121_v14 = vcombine.low %v695_v32, %v699_v33 }
 0x18d   :  { %2300 = vmatpush1.bf16.msra.mxu0 %v14057_v38  ;;  %v14122_v38 = vcombine.high %v695_v32, %v699_v33  ;;  %v752_v32 = vld [vmem:[%s22810_s3 + $0x6d8] sm:$0xff] }
 0x18e   :  { %2382 = vmatpush1.bf16.msra.mxu1 %v14059_v39  ;;  %2301 = vmatprep.subr.bf16.mxu0 %v14066_v40  ;;  %v14124_v39 = vcombine.high %v696_v34, %v700_v35  ;;  %v703_v40 = vld [vmem:[%s22810_s3 + $0x550] sm:$0xff]  ;;  %v756_v33 = vld [vmem:[%s22810_s3 + $0x6f8] sm:$0xff]  ;;  %v14171_v35 = vcombine.low %v744_v23, %v748_v24 }
 0x18f   :  { %2383 = vmatprep.subr.bf16.mxu1 %v14068_v41  ;;  %v707_v41 = vld [vmem:[%s22810_s3 + $0x570] sm:$0xff] }
 0x190   :  { %v14129_v51 = vcombine.low %v703_v40, %v707_v41 }
 0x191   :  { %2302 = vmatpush1.bf16.msra.mxu0 %v14065_v45  ;;  %v14130_v45 = vcombine.high %v703_v40, %v707_v41  ;;  %v760_v40 = vld [vmem:[%s22810_s3 + $0x718] sm:$0xff] }
 0x192   :  { %2384 = vmatpush1.bf16.msra.mxu1 %v14067_v46  ;;  %2303 = vmatprep.subr.bf16.mxu0 %v14074_v47  ;;  %v14132_v46 = vcombine.high %v704_v42, %v708_v43  ;;  %v711_v47 = vld [vmem:[%s22810_s3 + $0x590] sm:$0xff]  ;;  %v764_v41 = vld [vmem:[%s22810_s3 + $0x738] sm:$0xff]  ;;  %v14179_v43 = vcombine.low %v752_v32, %v756_v33 }
 0x193   :  { %2385 = vmatprep.subr.bf16.mxu1 %v14076_v48  ;;  %v715_v48 = vld [vmem:[%s22810_s3 + $0x5b0] sm:$0xff] }
 0x194   :  { %v14137_v60 = vcombine.low %v711_v47, %v715_v48 }
 0x195   :  { %2304 = vmatpush1.bf16.msra.mxu0 %v14073_v53  ;;  %v14138_v53 = vcombine.high %v711_v47, %v715_v48  ;;  %v768_v47 = vld [vmem:[%s22810_s3 + $0x758] sm:$0xff] }
 0x196   :  { %2386 = vmatpush1.bf16.msra.mxu1 %v14075_v55  ;;  %2305 = vmatprep.subr.bf16.mxu0 %v14082_v56  ;;  %v14140_v55 = vcombine.high %v712_v49, %v716_v50  ;;  %v719_v56 = vld [vmem:[%s22810_s3 + $0x5d0] sm:$0xff]  ;;  %v772_v48 = vld [vmem:[%s22810_s3 + $0x778] sm:$0xff]  ;;  %v14187_v50 = vcombine.low %v760_v40, %v764_v41 }
 0x197   :  { %2387 = vmatprep.subr.bf16.mxu1 %v14084_v57  ;;  %v723_v57 = vld [vmem:[%s22810_s3 + $0x5f0] sm:$0xff] }
 0x199   :  { %2306 = vmatpush1.bf16.msra.mxu0 %v14081_v62  ;;  %v14146_v62 = vcombine.high %v719_v56, %v723_v57 }
 0x19a   :  { %2388 = vmatpush1.bf16.msra.mxu1 %v14083_v63  ;;  %2316 = vmatprep.subr.bf16.mxu0 %v14090_v0  ;;  %v14148_v63 = vcombine.high %v720_v58, %v724_v59  ;;  %v727_v0 = vld [vmem:[%s22810_s3 + $0x610] sm:$0xff]  ;;  %v14195_v59 = vcombine.low %v768_v47, %v772_v48 }
 0x19b   :  { %2398 = vmatprep.subr.bf16.mxu1 %v14092_v1  ;;  %v731_v1 = vld [vmem:[%s22810_s3 + $0x630] sm:$0xff] }
 0x19c   :  { %2308 = vmatmul.mubr.bf16.vlgmr.msra.gmra.mrb[8].mxu0 %v17378_v29  ;;  %v14154_v6 = vcombine.high %v727_v0, %v731_v1  ;;  %v14153_v16 = vcombine.low %v727_v0, %v731_v1  ;;  %v784_v0 = vld [vmem:[%s22810_s3 + $0x7d8] sm:$0xff] }
 0x19d   :  { %2390 = vmatmul.mubr.bf16.vlgmr.msra.gmra.mrb[8].mxu1 %v17378_v29  ;;  %2317 = vmatpush1.bf16.msra.mxu0 %v14089_v5  ;;  %v688_v29 = vld [vmem:[%s22810_s3 + $0x4d8] sm:$0xff]  ;;  %v14145_v5 = vcombine.low %v719_v56, %v723_v57 }
 0x19e   :  { %2348 = vmatprep.mubr.bf16.mxu0 %v17454_v20  ;;  %2399 = vmatpush1.bf16.msra.mxu1 %v14091_v7  ;;  %v14116_v31 = vcombine.high %v688_v29, %v692_v25  ;;  %v14115_v37 = vcombine.low %v688_v29, %v692_v25  ;;  %v14156_v7 = vcombine.high %v728_v2, %v732_v4  ;;  %v776_v56 = vld [vmem:[%s22810_s3 + $0x798] sm:$0xff] }
 0x19f   :  { %2430 = vmatprep.mubr.bf16.mxu1 %v17454_v20  ;;  %2318 = vmatprep.subr.bf16.mxu0 %v14098_v8  ;;  %v14105_v20 = vcombine.low %v679_v9, %v683_v10  ;;  %v735_v8 = vld [vmem:[%s22810_s3 + $0x650] sm:$0xff]  ;;  %v736_v10 = vld [vmem:[%s22810_s3 + $0x658] sm:$0xff] }
 0x1a0   :  { %2400 = vmatprep.subr.bf16.mxu1 %v14100_v11  ;;  %v739_v9 = vld [vmem:[%s22810_s3 + $0x670] sm:$0xff]  ;;  %v740_v11 = vld [vmem:[%s22810_s3 + $0x678] sm:$0xff] }
 0x1a1   :  { %2319 = vmatpush1.bf16.msra.mxu0 %v14097_v18  ;;  %v14162_v18 = vcombine.high %v735_v8, %v739_v9  ;;  %v14161_v29 = vcombine.low %v735_v8, %v739_v9  ;;  %v14163_v25 = vcombine.low %v736_v10, %v740_v11  ;;  %v780_v57 = vld [vmem:[%s22810_s3 + $0x7b8] sm:$0xff]  ;;  %v2448_v8 = vld [vmem:[%s22812_s5 + $0x8] sm:$0xff] }
 0x1a2   :  { %2401 = vmatpush1.bf16.msra.mxu1 %v14099_v19  ;;  %2320 = vmatprep.subr.bf16.mxu0 %v14106_v21  ;;  %v14164_v19 = vcombine.high %v736_v10, %v740_v11  ;;  %v743_v21 = vld [vmem:[%s22810_s3 + $0x690] sm:$0xff]  ;;  %v788_v1 = vld [vmem:[%s22810_s3 + $0x7f8] sm:$0xff]  ;;  %v14203_v4 = vcombine.low %v776_v56, %v780_v57  ;;  %v2456_v9 = vld [vmem:[%s22812_s5 + $0x48] sm:$0xff] }
 0x1a3   :  { %2402 = vmatprep.subr.bf16.mxu1 %v14108_v22  ;;  %v747_v22 = vld [vmem:[%s22810_s3 + $0x6b0] sm:$0xff]  ;;  %v14211_v11 = vcombine.low %v784_v0, %v788_v1 }
 0x1a4   :  { %v14169_v34 = vcombine.low %v743_v21, %v747_v22 }
 0x1a5   :  { %2321 = vmatpush1.bf16.msra.mxu0 %v14105_v20  ;;  %v14170_v20 = vcombine.high %v743_v21, %v747_v22  ;;  %v2464_v21 = vld [vmem:[%s22812_s5 + $0x88] sm:$0xff] }
 0x1a6   :  { %2403 = vmatpush1.bf16.msra.mxu1 %v14107_v26  ;;  %2322 = vmatprep.subr.bf16.mxu0 %v14114_v30  ;;  %v14172_v26 = vcombine.high %v744_v23, %v748_v24  ;;  %v751_v30 = vld [vmem:[%s22810_s3 + $0x6d0] sm:$0xff]  ;;  %v2472_v22 = vld [vmem:[%s22812_s5 + $0xc8] sm:$0xff]  ;;  %v14215_v24 = vcombine.low %v2448_v8, %v2456_v9 }
 0x1a7   :  { %2404 = vmatprep.subr.bf16.mxu1 %v14116_v31  ;;  %v755_v31 = vld [vmem:[%s22810_s3 + $0x6f0] sm:$0xff] }
 0x1a8   :  { %v14177_v42 = vcombine.low %v751_v30, %v755_v31 }
 0x1a9   :  { %2323 = vmatpush1.bf16.msra.mxu0 %v14113_v36  ;;  %v14178_v36 = vcombine.high %v751_v30, %v755_v31  ;;  %v2480_v30 = vld [vmem:[%s22812_s5 + $0x108] sm:$0xff] }
 0x1aa   :  { %2405 = vmatpush1.bf16.msra.mxu1 %v14115_v37  ;;  %2324 = vmatprep.subr.bf16.mxu0 %v14122_v38  ;;  %v14180_v37 = vcombine.high %v752_v32, %v756_v33  ;;  %v759_v38 = vld [vmem:[%s22810_s3 + $0x710] sm:$0xff]  ;;  %v2488_v31 = vld [vmem:[%s22812_s5 + $0x148] sm:$0xff]  ;;  %v14231_v33 = vcombine.low %v2464_v21, %v2472_v22 }
 0x1ab   :  { %2406 = vmatprep.subr.bf16.mxu1 %v14124_v39  ;;  %v763_v39 = vld [vmem:[%s22810_s3 + $0x730] sm:$0xff] }
 0x1ac   :  { %v14185_v49 = vcombine.low %v759_v38, %v763_v39 }
 0x1ad   :  { %2325 = vmatpush1.bf16.msra.mxu0 %v14121_v14  ;;  %v14186_v14 = vcombine.high %v759_v38, %v763_v39  ;;  %v2504_v38 = vld [vmem:[%s22812_s5 + $0x1c8] sm:$0xff] }
 0x1ae   :  { %2407 = vmatpush1.bf16.msra.mxu1 %v14123_v44  ;;  %2326 = vmatprep.subr.bf16.mxu0 %v14130_v45  ;;  %v14188_v44 = vcombine.high %v760_v40, %v764_v41  ;;  %v767_v45 = vld [vmem:[%s22810_s3 + $0x750] sm:$0xff]  ;;  %v14247_v40 = vcombine.low %v2480_v30, %v2488_v31 }
 0x1af   :  { %2408 = vmatprep.subr.bf16.mxu1 %v14132_v46  ;;  %v771_v46 = vld [vmem:[%s22810_s3 + $0x770] sm:$0xff] }
 0x1b0   :  { %v14193_v58 = vcombine.low %v767_v45, %v771_v46 }
 0x1b1   :  { %2327 = vmatpush1.bf16.msra.mxu0 %v14129_v51  ;;  %v14194_v51 = vcombine.high %v767_v45, %v771_v46  ;;  %v2520_v45 = vld [vmem:[%s22812_s5 + $0x248] sm:$0xff] }
 0x1b2   :  { %2409 = vmatpush1.bf16.msra.mxu1 %v14131_v3  ;;  %2328 = vmatprep.subr.bf16.mxu0 %v14138_v53  ;;  %v14196_v3 = vcombine.high %v768_v47, %v772_v48  ;;  %v775_v53 = vld [vmem:[%s22810_s3 + $0x790] sm:$0xff] }
 0x1b3   :  { %2410 = vmatprep.subr.bf16.mxu1 %v14140_v55  ;;  %v779_v55 = vld [vmem:[%s22810_s3 + $0x7b0] sm:$0xff] }
 0x1b4   :  { %v14201_v2 = vcombine.low %v775_v53, %v779_v55 }
 0x1b5   :  { %2329 = vmatpush1.bf16.msra.mxu0 %v14137_v60  ;;  %v14202_v60 = vcombine.high %v775_v53, %v779_v55  ;;  %v2536_v53 = vld [vmem:[%s22812_s5 + $0x2c8] sm:$0xff] }
 0x1b6   :  { %2411 = vmatpush1.bf16.msra.mxu1 %v14139_v61  ;;  %2330 = vmatprep.subr.bf16.mxu0 %v14146_v62  ;;  %v14204_v61 = vcombine.high %v776_v56, %v780_v57  ;;  %v783_v62 = vld [vmem:[%s22810_s3 + $0x7d0] sm:$0xff] }
 0x1b7   :  { %2412 = vmatprep.subr.bf16.mxu1 %v14148_v63  ;;  %v787_v63 = vld [vmem:[%s22810_s3 + $0x7f0] sm:$0xff] }
 0x1b8   :  { %v14209_v10 = vcombine.low %v783_v62, %v787_v63 }
 0x1b9   :  { %2331 = vmatpush1.bf16.msra.mxu0 %v14145_v5  ;;  %v14210_v5 = vcombine.high %v783_v62, %v787_v63  ;;  %v2552_v62 = vld [vmem:[%s22812_s5 + $0x348] sm:$0xff] }
 0x1ba   :  { %2413 = vmatpush1.bf16.msra.mxu1 %v14147_v28  ;;  %2332 = vmatprep.subr.bf16.mxu0 %v14154_v6  ;;  %v14212_v28 = vcombine.high %v784_v0, %v788_v1  ;;  %v2447_v6 = vld [vmem:[%s22812_s5] sm:$0xff] }
 0x1bb   :  { %2414 = vmatprep.subr.bf16.mxu1 %v14156_v7  ;;  %v2455_v7 = vld [vmem:[%s22812_s5 + $0x40] sm:$0xff] }
 0x1bc   :  { %v14213_v23 = vcombine.low %v2447_v6, %v2455_v7 }
 0x1bd   :  { %2333 = vmatpush1.bf16.msra.mxu0 %v14153_v16  ;;  %v14214_v16 = vcombine.high %v2447_v6, %v2455_v7  ;;  %v2568_v6 = vld [vmem:[%s22812_s5 + $0x3c8] sm:$0xff] }
 0x1be   :  { %2415 = vmatpush1.bf16.msra.mxu1 %v14155_v17  ;;  %2334 = vmatprep.subr.bf16.mxu0 %v14162_v18  ;;  %v14216_v17 = vcombine.high %v2448_v8, %v2456_v9  ;;  %v2463_v18 = vld [vmem:[%s22812_s5 + $0x80] sm:$0xff] }
 0x1bf   :  { %2416 = vmatprep.subr.bf16.mxu1 %v14164_v19  ;;  %v2471_v19 = vld [vmem:[%s22812_s5 + $0xc0] sm:$0xff] }
 0x1c0   :  { %v14229_v32 = vcombine.low %v2463_v18, %v2471_v19 }
 0x1c1   :  { %2335 = vmatpush1.bf16.msra.mxu0 %v14161_v29  ;;  %v14230_v29 = vcombine.high %v2463_v18, %v2471_v19  ;;  %v2584_v18 = vld [vmem:[%s22812_s5 + $0x448] sm:$0xff] }
 0x1c2   :  { %2417 = vmatpush1.bf16.msra.mxu1 %v14163_v25  ;;  %2336 = vmatprep.subr.bf16.mxu0 %v14170_v20  ;;  %v14232_v25 = vcombine.high %v2464_v21, %v2472_v22  ;;  %v2479_v20 = vld [vmem:[%s22812_s5 + $0x100] sm:$0xff] }
 0x1c3   :  { %2418 = vmatprep.subr.bf16.mxu1 %v14172_v26  ;;  %v2487_v26 = vld [vmem:[%s22812_s5 + $0x140] sm:$0xff] }
 0x1c4   :  { %v14245_v39 = vcombine.low %v2479_v20, %v2487_v26 }
 0x1c5   :  { %2337 = vmatpush1.bf16.msra.mxu0 %v14169_v34  ;;  %v14246_v34 = vcombine.high %v2479_v20, %v2487_v26  ;;  %v2600_v20 = vld [vmem:[%s22812_s5 + $0x4c8] sm:$0xff] }
 0x1c6   :  { %2419 = vmatpush1.bf16.msra.mxu1 %v14171_v35  ;;  %2338 = vmatprep.subr.bf16.mxu0 %v14178_v36  ;;  %v14248_v35 = vcombine.high %v2480_v30, %v2488_v31  ;;  %v2495_v36 = vld [vmem:[%s22812_s5 + $0x180] sm:$0xff] }
 0x1c7   :  { %2420 = vmatprep.subr.bf16.mxu1 %v14180_v37  ;;  %v2503_v37 = vld [vmem:[%s22812_s5 + $0x1c0] sm:$0xff] }
 0x1c8   :  { %v14262_v41 = vcombine.high %v2495_v36, %v2503_v37  ;;  %v14261_v46 = vcombine.low %v2495_v36, %v2503_v37  ;;  %v2616_v36 = vld [vmem:[%s22812_s5 + $0x548] sm:$0xff] }
 0x1c9   :  { %2339 = vmatpush1.bf16.msra.mxu0 %v14177_v42 }
 0x1ca   :  { %2421 = vmatpush1.bf16.msra.mxu1 %v14179_v43  ;;  %2340 = vmatprep.subr.bf16.mxu0 %v14186_v14  ;;  %v2511_v43 = vld [vmem:[%s22812_s5 + $0x200] sm:$0xff] }
 0x1cb   :  { %2422 = vmatprep.subr.bf16.mxu1 %v14188_v44  ;;  %v2519_v14 = vld [vmem:[%s22812_s5 + $0x240] sm:$0xff]  ;;  %v2512_v44 = vld [vmem:[%s22812_s5 + $0x208] sm:$0xff] }
 0x1cc   :  { %v14278_v48 = vcombine.high %v2511_v43, %v2519_v14  ;;  %v14277_v55 = vcombine.low %v2511_v43, %v2519_v14  ;;  %v14279_v56 = vcombine.low %v2512_v44, %v2520_v45  ;;  %v2632_v43 = vld [vmem:[%s22812_s5 + $0x5c8] sm:$0xff] }
 0x1cd   :  { %2341 = vmatpush1.bf16.msra.mxu0 %v14185_v49  ;;  %v14280_v49 = vcombine.high %v2512_v44, %v2520_v45 }
 0x1ce   :  { %2423 = vmatpush1.bf16.msra.mxu1 %v14187_v50  ;;  %2342 = vmatprep.subr.bf16.mxu0 %v14194_v51  ;;  %v2527_v50 = vld [vmem:[%s22812_s5 + $0x280] sm:$0xff] }
 0x1cf   :  { %2424 = vmatprep.subr.bf16.mxu1 %v14196_v3  ;;  %v2535_v51 = vld [vmem:[%s22812_s5 + $0x2c0] sm:$0xff]  ;;  %v2528_v3 = vld [vmem:[%s22812_s5 + $0x288] sm:$0xff] }
 0x1d0   :  { %v14294_v57 = vcombine.high %v2527_v50, %v2535_v51  ;;  %v14293_v63 = vcombine.low %v2527_v50, %v2535_v51  ;;  %v14295_v0 = vcombine.low %v2528_v3, %v2536_v53  ;;  %v2648_v50 = vld [vmem:[%s22812_s5 + $0x648] sm:$0xff] }
 0x1d1   :  { %2343 = vmatpush1.bf16.msra.mxu0 %v14193_v58  ;;  %v14296_v58 = vcombine.high %v2528_v3, %v2536_v53 }
 0x1d2   :  { %2425 = vmatpush1.bf16.msra.mxu1 %v14195_v59  ;;  %2344 = vmatprep.subr.bf16.mxu0 %v14202_v60  ;;  %v2543_v59 = vld [vmem:[%s22812_s5 + $0x300] sm:$0xff] }
 0x1d3   :  { %2426 = vmatprep.subr.bf16.mxu1 %v14204_v61  ;;  %v2551_v60 = vld [vmem:[%s22812_s5 + $0x340] sm:$0xff]  ;;  %v2544_v61 = vld [vmem:[%s22812_s5 + $0x308] sm:$0xff] }
 0x1d4   :  { %v14310_v1 = vcombine.high %v2543_v59, %v2551_v60  ;;  %v14309_v7 = vcombine.low %v2543_v59, %v2551_v60  ;;  %v14311_v8 = vcombine.low %v2544_v61, %v2552_v62  ;;  %v2664_v59 = vld [vmem:[%s22812_s5 + $0x6c8] sm:$0xff] }
 0x1d5   :  { %2345 = vmatpush1.bf16.msra.mxu0 %v14201_v2  ;;  %v14312_v2 = vcombine.high %v2544_v61, %v2552_v62 }
 0x1d6   :  { %2427 = vmatpush1.bf16.msra.mxu1 %v14203_v4  ;;  %2346 = vmatprep.subr.bf16.mxu0 %v14210_v5  ;;  %v2559_v4 = vld [vmem:[%s22812_s5 + $0x380] sm:$0xff] }
 0x1d7   :  { %2428 = vmatprep.subr.bf16.mxu1 %v14212_v28  ;;  %v2567_v5 = vld [vmem:[%s22812_s5 + $0x3c0] sm:$0xff]  ;;  %v2560_v28 = vld [vmem:[%s22812_s5 + $0x388] sm:$0xff] }
 0x1d8   :  { %v14326_v9 = vcombine.high %v2559_v4, %v2567_v5  ;;  %v14325_v19 = vcombine.low %v2559_v4, %v2567_v5  ;;  %v14327_v21 = vcombine.low %v2560_v28, %v2568_v6  ;;  %v2680_v4 = vld [vmem:[%s22812_s5 + $0x748] sm:$0xff] }
 0x1d9   :  { %2347 = vmatpush1.bf16.msra.mxu0 %v14209_v10  ;;  %v14328_v10 = vcombine.high %v2560_v28, %v2568_v6 }
 0x1da   :  { %2429 = vmatpush1.bf16.msra.mxu1 %v14211_v11  ;;  %8675 = vmatprep.subr.bf16.mxu0 %v14214_v16  ;;  %v2575_v11 = vld [vmem:[%s22812_s5 + $0x400] sm:$0xff] }
 0x1db   :  { %8839 = vmatprep.subr.bf16.mxu1 %v14216_v17  ;;  %v2583_v16 = vld [vmem:[%s22812_s5 + $0x440] sm:$0xff]  ;;  %v2576_v17 = vld [vmem:[%s22812_s5 + $0x408] sm:$0xff] }
 0x1dc   :  { %2349 = vmatmul.mubr.bf16.vlgmr.msra.gmra.mrb[8].mxu0 %v17593_v54  ;;  %v14342_v22 = vcombine.high %v2575_v11, %v2583_v16  ;;  %v14341_v26 = vcombine.low %v2575_v11, %v2583_v16  ;;  %v14343_v30 = vcombine.low %v2576_v17, %v2584_v18  ;;  %v2696_v11 = vld [vmem:[%s22812_s5 + $0x7c8] sm:$0xff] }
 0x1dd   :  { %2431 = vmatmul.mubr.bf16.vlgmr.msra.gmra.mrb[8].mxu1 %v17593_v54  ;;  %8676 = vmatpush1.bf16.msra.mxu0 %v14213_v23  ;;  %v2496_v54 = vld [vmem:[%s22812_s5 + $0x188] sm:$0xff]  ;;  %v14344_v23 = vcombine.high %v2576_v17, %v2584_v18 }
 0x1de   :  { %8840 = vmatpush1.bf16.msra.mxu1 %v14215_v24  ;;  %8677 = vmatprep.subr.bf16.mxu0 %v14230_v29  ;;  %v14264_v42 = vcombine.high %v2496_v54, %v2504_v38  ;;  %v14263_v47 = vcombine.low %v2496_v54, %v2504_v38  ;;  %v2591_v24 = vld [vmem:[%s22812_s5 + $0x480] sm:$0xff] }
 0x1df   :  { %8841 = vmatprep.subr.bf16.mxu1 %v14232_v25  ;;  %v2599_v29 = vld [vmem:[%s22812_s5 + $0x4c0] sm:$0xff]  ;;  %v2592_v25 = vld [vmem:[%s22812_s5 + $0x488] sm:$0xff] }
 0x1e0   :  { %v14358_v31 = vcombine.high %v2591_v24, %v2599_v29  ;;  %v14357_v37 = vcombine.low %v2591_v24, %v2599_v29  ;;  %v14359_v54 = vcombine.low %v2592_v25, %v2600_v20  ;;  %v2712_v24 = vld [vmem:[%s22812_s5 + $0x848] sm:$0xff] }
 0x1e1   :  { %8678 = vmatpush1.bf16.msra.mxu0 %v14229_v32  ;;  %v14360_v32 = vcombine.high %v2592_v25, %v2600_v20 }
 0x1e2   :  { %8842 = vmatpush1.bf16.msra.mxu1 %v14231_v33  ;;  %8679 = vmatprep.subr.bf16.mxu0 %v14246_v34  ;;  %v2607_v33 = vld [vmem:[%s22812_s5 + $0x500] sm:$0xff] }
 0x1e3   :  { %8843 = vmatprep.subr.bf16.mxu1 %v14248_v35  ;;  %v2615_v34 = vld [vmem:[%s22812_s5 + $0x540] sm:$0xff]  ;;  %v2608_v35 = vld [vmem:[%s22812_s5 + $0x508] sm:$0xff] }
 0x1e4   :  { %v14374_v38 = vcombine.high %v2607_v33, %v2615_v34  ;;  %v14373_v14 = vcombine.low %v2607_v33, %v2615_v34  ;;  %v14375_v44 = vcombine.low %v2608_v35, %v2616_v36 }
 0x1e5   :  { %8680 = vmatpush1.bf16.msra.mxu0 %v14245_v39  ;;  %v14376_v39 = vcombine.high %v2608_v35, %v2616_v36 }
 0x1e6   :  { %8844 = vmatpush1.bf16.msra.mxu1 %v14247_v40  ;;  %8681 = vmatprep.subr.bf16.mxu0 %v14262_v41  ;;  %v2623_v40 = vld [vmem:[%s22812_s5 + $0x580] sm:$0xff] }
 0x1e7   :  { %8845 = vmatprep.subr.bf16.mxu1 %v14264_v42  ;;  %v2631_v41 = vld [vmem:[%s22812_s5 + $0x5c0] sm:$0xff]  ;;  %v2624_v42 = vld [vmem:[%s22812_s5 + $0x588] sm:$0xff] }
 0x1e8   :  { %v14390_v45 = vcombine.high %v2623_v40, %v2631_v41  ;;  %v14389_v51 = vcombine.low %v2623_v40, %v2631_v41  ;;  %v14391_v3 = vcombine.low %v2624_v42, %v2632_v43  ;;  %v2719_v41 = vld [vmem:[%s22812_s5 + $0x880] sm:$0xff] }
 0x1e9   :  { %8682 = vmatpush1.bf16.msra.mxu0 %v14261_v46  ;;  %v14392_v46 = vcombine.high %v2624_v42, %v2632_v43 }
 0x1ea   :  { %8846 = vmatpush1.bf16.msra.mxu1 %v14263_v47  ;;  %8683 = vmatprep.subr.bf16.mxu0 %v14278_v48  ;;  %v2639_v47 = vld [vmem:[%s22812_s5 + $0x600] sm:$0xff] }
 0x1eb   :  { %8847 = vmatprep.subr.bf16.mxu1 %v14280_v49  ;;  %v2647_v48 = vld [vmem:[%s22812_s5 + $0x640] sm:$0xff]  ;;  %v2640_v49 = vld [vmem:[%s22812_s5 + $0x608] sm:$0xff] }
 0x1ec   :  { %v14406_v53 = vcombine.high %v2639_v47, %v2647_v48  ;;  %v14405_v60 = vcombine.low %v2639_v47, %v2647_v48  ;;  %v14407_v61 = vcombine.low %v2640_v49, %v2648_v50 }
 0x1ed   :  { %8684 = vmatpush1.bf16.msra.mxu0 %v14277_v55  ;;  %v14408_v55 = vcombine.high %v2640_v49, %v2648_v50 }
 0x1ee   :  { %8848 = vmatpush1.bf16.msra.mxu1 %v14279_v56  ;;  %8685 = vmatprep.subr.bf16.mxu0 %v14294_v57  ;;  %v2655_v56 = vld [vmem:[%s22812_s5 + $0x680] sm:$0xff] }
 0x1ef   :  { %8849 = vmatprep.subr.bf16.mxu1 %v14296_v58  ;;  %v2663_v57 = vld [vmem:[%s22812_s5 + $0x6c0] sm:$0xff]  ;;  %v2656_v58 = vld [vmem:[%s22812_s5 + $0x688] sm:$0xff] }
 0x1f0   :  { %v14422_v62 = vcombine.high %v2655_v56, %v2663_v57  ;;  %v14421_v5 = vcombine.low %v2655_v56, %v2663_v57  ;;  %v14423_v28 = vcombine.low %v2656_v58, %v2664_v59  ;;  %v2736_v56 = vld [vmem:[%s22812_s5 + $0x908] sm:$0xff] }
 0x1f1   :  { %8686 = vmatpush1.bf16.msra.mxu0 %v14293_v63  ;;  %v14424_v63 = vcombine.high %v2656_v58, %v2664_v59  ;;  %v2744_v57 = vld [vmem:[%s22812_s5 + $0x948] sm:$0xff] }
 0x1f2   :  { %8850 = vmatpush1.bf16.msra.mxu1 %v14295_v0  ;;  %8687 = vmatprep.subr.bf16.mxu0 %v14310_v1  ;;  %v2671_v0 = vld [vmem:[%s22812_s5 + $0x700] sm:$0xff] }
 0x1f3   :  { %8851 = vmatprep.subr.bf16.mxu1 %v14312_v2  ;;  %v2679_v1 = vld [vmem:[%s22812_s5 + $0x740] sm:$0xff]  ;;  %v2672_v2 = vld [vmem:[%s22812_s5 + $0x708] sm:$0xff] }
 0x1f4   :  { %v14438_v6 = vcombine.high %v2671_v0, %v2679_v1  ;;  %v14437_v16 = vcombine.low %v2671_v0, %v2679_v1  ;;  %v14439_v17 = vcombine.low %v2672_v2, %v2680_v4  ;;  %v2759_v0 = vld [vmem:[%s22812_s5 + $0x9c0] sm:$0xff]  ;;  %v2752_v1 = vld [vmem:[%s22812_s5 + $0x988] sm:$0xff] }
 0x1f5   :  { %8688 = vmatpush1.bf16.msra.mxu0 %v14309_v7  ;;  %v14440_v7 = vcombine.high %v2672_v2, %v2680_v4  ;;  %v2760_v2 = vld [vmem:[%s22812_s5 + $0x9c8] sm:$0xff] }
 0x1f6   :  { %8852 = vmatpush1.bf16.msra.mxu1 %v14311_v8  ;;  %8689 = vmatprep.subr.bf16.mxu0 %v14326_v9  ;;  %v2687_v8 = vld [vmem:[%s22812_s5 + $0x780] sm:$0xff] }
 0x1f7   :  { %8853 = vmatprep.subr.bf16.mxu1 %v14328_v10  ;;  %v2695_v9 = vld [vmem:[%s22812_s5 + $0x7c0] sm:$0xff]  ;;  %v2688_v10 = vld [vmem:[%s22812_s5 + $0x788] sm:$0xff] }
 0x1f8   :  { %v14454_v18 = vcombine.high %v2687_v8, %v2695_v9  ;;  %v14453_v29 = vcombine.low %v2687_v8, %v2695_v9  ;;  %v14455_v25 = vcombine.low %v2688_v10, %v2696_v11  ;;  %v2775_v8 = vld [vmem:[%s22812_s5 + $0xa40] sm:$0xff]  ;;  %v2768_v9 = vld [vmem:[%s22812_s5 + $0xa08] sm:$0xff] }
 0x1f9   :  { %8690 = vmatpush1.bf16.msra.mxu0 %v14325_v19  ;;  %v14456_v19 = vcombine.high %v2688_v10, %v2696_v11  ;;  %v2776_v10 = vld [vmem:[%s22812_s5 + $0xa48] sm:$0xff] }
 0x1fa   :  { %8854 = vmatpush1.bf16.msra.mxu1 %v14327_v21  ;;  %8691 = vmatprep.subr.bf16.mxu0 %v14342_v22  ;;  %v2703_v21 = vld [vmem:[%s22812_s5 + $0x800] sm:$0xff] }
 0x1fb   :  { %8855 = vmatprep.subr.bf16.mxu1 %v14344_v23  ;;  %v2711_v22 = vld [vmem:[%s22812_s5 + $0x840] sm:$0xff]  ;;  %v2704_v23 = vld [vmem:[%s22812_s5 + $0x808] sm:$0xff] }
 0x1fc   :  { %v14470_v20 = vcombine.high %v2703_v21, %v2711_v22  ;;  %v14469_v48 = vcombine.low %v2703_v21, %v2711_v22  ;;  %v14471_v49 = vcombine.low %v2704_v23, %v2712_v24  ;;  %v2791_v21 = vld [vmem:[%s22812_s5 + $0xac0] sm:$0xff]  ;;  %v2784_v22 = vld [vmem:[%s22812_s5 + $0xa88] sm:$0xff] }
 0x1fd   :  { %8692 = vmatpush1.bf16.msra.mxu0 %v14341_v26  ;;  %v14472_v26 = vcombine.high %v2704_v23, %v2712_v24  ;;  %v2792_v23 = vld [vmem:[%s22812_s5 + $0xac8] sm:$0xff] }
 0x1fe   :  { %8856 = vmatpush1.bf16.msra.mxu1 %v14343_v30  ;;  %8693 = vmatprep.subr.bf16.mxu0 %v14358_v31  ;;  %v18172_v30 = vld [vmem:[%s22811_s4] sm:$0xff] }
 0x1ff   :  { %8857 = vmatprep.subr.bf16.mxu1 %v14360_v32  ;;  %v794_v31 = vrot.slane %v18172_v30, %v17350_v13  ;;  %v798_v32 = vrot.slane %v18172_v30, %v17358_v15  ;;  %v806_v33 = vrot.slane %v18172_v30, %v17421_v52 }
 0x201   :  { %8694 = vmatpush1.bf16.msra.mxu0 %v14357_v37 }
 0x202   :  { %8858 = vmatpush1.bf16.msra.mxu1 %v14359_v54  ;;  %8695 = vmatprep.subr.bf16.mxu0 %v14374_v38 }
 0x203   :  { %8859 = vmatprep.subr.bf16.mxu1 %v14376_v39 }
 0x205   :  { %8696 = vmatpush1.bf16.msra.mxu0 %v14373_v14 }
 0x206   :  { %8860 = vmatpush1.bf16.msra.mxu1 %v14375_v44  ;;  %8697 = vmatprep.subr.bf16.mxu0 %v14390_v45  ;;  %v2727_v44 = vld [vmem:[%s22812_s5 + $0x8c0] sm:$0xff]  ;;  %v2720_v45 = vld [vmem:[%s22812_s5 + $0x888] sm:$0xff] }
 0x207   :  { %8861 = vmatprep.subr.bf16.mxu1 %v14392_v46  ;;  %v2728_v46 = vld [vmem:[%s22812_s5 + $0x8c8] sm:$0xff]  ;;  %v14485_v59 = vcombine.low %v2719_v41, %v2727_v44 }
 0x209   :  { %8698 = vmatpush1.bf16.msra.mxu0 %v14389_v51  ;;  %v2735_v51 = vld [vmem:[%s22812_s5 + $0x900] sm:$0xff] }
 0x20a   :  { %8862 = vmatpush1.bf16.msra.mxu1 %v14391_v3  ;;  %8699 = vmatprep.subr.bf16.mxu0 %v14406_v53  ;;  %v14486_v3 = vcombine.high %v2719_v41, %v2727_v44  ;;  %v14488_v53 = vcombine.high %v2720_v45, %v2728_v46  ;;  %v2824_v41 = vld [vmem:[%s22812_s5 + $0xbc8] sm:$0xff] }
 0x20b   :  { %8863 = vmatprep.subr.bf16.mxu1 %v14408_v55  ;;  %v2743_v55 = vld [vmem:[%s22812_s5 + $0x940] sm:$0xff] }
 0x20c   :  { %v14501_v4 = vcombine.low %v2735_v51, %v2743_v55 }
 0x20d   :  { %8700 = vmatpush1.bf16.msra.mxu0 %v14405_v60  ;;  %v14487_v60 = vcombine.low %v2720_v45, %v2728_v46  ;;  %v2831_v45 = vld [vmem:[%s22812_s5 + $0xc00] sm:$0xff] }
 0x20e   :  { %8864 = vmatpush1.bf16.msra.mxu1 %v14407_v61  ;;  %8701 = vmatprep.subr.bf16.mxu0 %v14422_v62  ;;  %v14502_v61 = vcombine.high %v2735_v51, %v2743_v55  ;;  %v14504_v62 = vcombine.high %v2736_v56, %v2744_v57  ;;  %v2839_v46 = vld [vmem:[%s22812_s5 + $0xc40] sm:$0xff] }
 0x20f   :  { %8865 = vmatprep.subr.bf16.mxu1 %v14424_v63  ;;  %v2751_v63 = vld [vmem:[%s22812_s5 + $0x980] sm:$0xff] }
 0x210   :  { %v14517_v11 = vcombine.low %v2751_v63, %v2759_v0 }
 0x211   :  { %8702 = vmatpush1.bf16.msra.mxu0 %v14421_v5  ;;  %v14503_v5 = vcombine.low %v2736_v56, %v2744_v57  ;;  %v2847_v56 = vld [vmem:[%s22812_s5 + $0xc80] sm:$0xff] }
 0x212   :  { %8866 = vmatpush1.bf16.msra.mxu1 %v14423_v28  ;;  %8703 = vmatprep.subr.bf16.mxu0 %v14438_v6  ;;  %v14518_v28 = vcombine.high %v2751_v63, %v2759_v0  ;;  %v14520_v6 = vcombine.high %v2752_v1, %v2760_v2  ;;  %v2855_v57 = vld [vmem:[%s22812_s5 + $0xcc0] sm:$0xff] }
 0x213   :  { %8867 = vmatprep.subr.bf16.mxu1 %v14440_v7  ;;  %v2767_v7 = vld [vmem:[%s22812_s5 + $0xa00] sm:$0xff]  ;;  %v14614_v63 = vcombine.high %v2847_v56, %v2855_v57 }
 0x214   :  { %v14533_v24 = vcombine.low %v2767_v7, %v2775_v8 }
 0x215   :  { %8704 = vmatpush1.bf16.msra.mxu0 %v14437_v16  ;;  %v14519_v16 = vcombine.low %v2752_v1, %v2760_v2  ;;  %v2863_v1 = vld [vmem:[%s22812_s5 + $0xd00] sm:$0xff] }
 0x216   :  { %8868 = vmatpush1.bf16.msra.mxu1 %v14439_v17  ;;  %8705 = vmatprep.subr.bf16.mxu0 %v14454_v18  ;;  %v14534_v17 = vcombine.high %v2767_v7, %v2775_v8  ;;  %v14536_v18 = vcombine.high %v2768_v9, %v2776_v10  ;;  %v2871_v2 = vld [vmem:[%s22812_s5 + $0xd40] sm:$0xff] }
 0x217   :  { %8869 = vmatprep.subr.bf16.mxu1 %v14456_v19  ;;  %v2783_v19 = vld [vmem:[%s22812_s5 + $0xa80] sm:$0xff]  ;;  %v14630_v7 = vcombine.high %v2863_v1, %v2871_v2 }
 0x219   :  { %8706 = vmatpush1.bf16.msra.mxu0 %v14453_v29  ;;  %v14535_v29 = vcombine.low %v2768_v9, %v2776_v10  ;;  %v2879_v9 = vld [vmem:[%s22812_s5 + $0xd80] sm:$0xff] }
 0x21a   :  { %8870 = vmatpush1.bf16.msra.mxu1 %v14455_v25  ;;  %8716 = vmatprep.subr.bf16.mxu0 %v14470_v20  ;;  %v14550_v25 = vcombine.high %v2783_v19, %v2791_v21  ;;  %v14552_v20 = vcombine.high %v2784_v22, %v2792_v23  ;;  %v2887_v10 = vld [vmem:[%s22812_s5 + $0xdc0] sm:$0xff] }
 0x21b   :  { %8880 = vmatprep.subr.bf16.mxu1 %v14472_v26  ;;  %v2799_v26 = vld [vmem:[%s22812_s5 + $0xb00] sm:$0xff] }
 0x22f   :  { %v2186_v34 = vpop.f32.mrb[4].mxu0  ;;  %v18180_v35 = vpop.f32.mrb[4].mxu1 }
 0x230   :  { %v15797_v36 = vadd.f32 %v2186_v34, %v794_v31  ;;  %v2188_v37 = vpop.f32.mrb[5].mxu0  ;;  %v2270_v54 = vpop.f32.mrb[5].mxu1  ;;  %v2807_v31 = vld [vmem:[%s22812_s5 + $0xb40] sm:$0xff]  ;;  %v14549_v34 = vcombine.low %v2783_v19, %v2791_v21  ;;  %v14646_v19 = vcombine.high %v2879_v9, %v2887_v10 }
 0x231   :  { %v15798_v38 = vadd.f32 %v2188_v37, %v798_v32  ;;  %v2190_v39 = vpop.f32.mrb[6].mxu0  ;;  %v2272_v40 = vpop.f32.mrb[6].mxu1  ;;  %v15800_v42 = vadd.f32 %v2270_v54, %v806_v33  ;;  %v2800_v32 = vld [vmem:[%s22812_s5 + $0xb08] sm:$0xff]  ;;  %v14566_v37 = vcombine.high %v2799_v26, %v2807_v31 }
 0x232   :  { %v2191_v43 = vpop.f32.mrb[7].mxu0  ;;  %v2273_v14 = vpop.f32.mrb[7].mxu1  ;;  %v18196_v50 = vpack.c.bf16 %v15797_v36, %v15797_v36  ;;  %v2808_v33 = vld [vmem:[%s22812_s5 + $0xb48] sm:$0xff]  ;;  %v14551_v36 = vcombine.low %v2784_v22, %v2792_v23  ;;  %v2823_v39 = vld [vmem:[%s22812_s5 + $0xbc0] sm:$0xff] }
 0x233   :  { %v18194_v47 = vpack.c.bf16 %v15798_v38, %v15798_v38  ;;  %v18212_v58 = vpack.c.bf16 %v15800_v42, %v15800_v42  ;;  %v14568_v54 = vcombine.high %v2800_v32, %v2808_v33  ;;  %v2815_v38 = vld [vmem:[%s22812_s5 + $0xb80] sm:$0xff]  ;;  %v2816_v40 = vld [vmem:[%s22812_s5 + $0xb88] sm:$0xff]  ;;  %v14565_v42 = vcombine.low %v2799_v26, %v2807_v31 }
 0x234   :  { %v14567_v43 = vcombine.low %v2800_v32, %v2808_v33  ;;  %v14582_v14 = vcombine.high %v2815_v38, %v2823_v39  ;;  %v14584_v44 = vcombine.high %v2816_v40, %v2824_v41  ;;  %v14581_v51 = vcombine.low %v2815_v38, %v2823_v39  ;;  %v2895_v22 = vld [vmem:[%s22812_s5 + $0xe00] sm:$0xff] }
 0x235   :  { %8707 = vmatprep.mubr.bf16.mxu0 %v18194_v47  ;;  %8871 = vmatprep.mubr.bf16.mxu1 %v18194_v47  ;;  %v2903_v23 = vld [vmem:[%s22812_s5 + $0xe40] sm:$0xff] }
 0x236   :  { %8708 = vmatmul.mubr.bf16.vlgmr.msra.gmra.mrb[12].mxu0 %v18196_v50  ;;  %8872 = vmatmul.mubr.bf16.vlgmr.msra.gmra.mrb[12].mxu1 %v18196_v50  ;;  %v14662_v26 = vcombine.high %v2895_v22, %v2903_v23  ;;  %v2911_v32 = vld [vmem:[%s22812_s5 + $0xe80] sm:$0xff] }
 0x237   :  { %8717 = vmatpush1.bf16.msra.mxu0 %v14469_v48  ;;  %8881 = vmatpush1.bf16.msra.mxu1 %v14471_v49  ;;  %v2832_v48 = vld [vmem:[%s22812_s5 + $0xc08] sm:$0xff]  ;;  %v2919_v33 = vld [vmem:[%s22812_s5 + $0xec0] sm:$0xff] }
 0x238   :  { %8748 = vmatprep.mubr.bf16.mxu0 %v18212_v58  ;;  %8912 = vmatprep.mubr.bf16.mxu1 %v18212_v58  ;;  %v2840_v49 = vld [vmem:[%s22812_s5 + $0xc48] sm:$0xff]  ;;  %v14678_v38 = vcombine.high %v2911_v32, %v2919_v33 }
 0x239   :  { %8718 = vmatprep.subr.bf16.mxu0 %v14486_v3  ;;  %8882 = vmatprep.subr.bf16.mxu1 %v14488_v53  ;;  %v14583_v3 = vcombine.low %v2816_v40, %v2824_v41  ;;  %v14598_v53 = vcombine.high %v2831_v45, %v2839_v46  ;;  %v14600_v55 = vcombine.high %v2832_v48, %v2840_v49  ;;  %v2927_v40 = vld [vmem:[%s22812_s5 + $0xf00] sm:$0xff] }
 0x23a   :  { %v2935_v41 = vld [vmem:[%s22812_s5 + $0xf40] sm:$0xff] }
 0x23b   :  { %8719 = vmatpush1.bf16.msra.mxu0 %v14485_v59  ;;  %8883 = vmatpush1.bf16.msra.mxu1 %v14487_v60  ;;  %v2848_v59 = vld [vmem:[%s22812_s5 + $0xc88] sm:$0xff] }
 0x23c   :  { %8720 = vmatprep.subr.bf16.mxu0 %v14502_v61  ;;  %8884 = vmatprep.subr.bf16.mxu1 %v14504_v62  ;;  %v2856_v60 = vld [vmem:[%s22812_s5 + $0xcc8] sm:$0xff]  ;;  %v14597_v61 = vcombine.low %v2831_v45, %v2839_v46  ;;  %v14599_v62 = vcombine.low %v2832_v48, %v2840_v49  ;;  %v14694_v45 = vcombine.high %v2927_v40, %v2935_v41  ;;  %v2943_v48 = vld [vmem:[%s22812_s5 + $0xf80] sm:$0xff] }
 0x23d   :  { %v14616_v0 = vcombine.high %v2848_v59, %v2856_v60  ;;  %v2951_v49 = vld [vmem:[%s22812_s5 + $0xfc0] sm:$0xff] }
 0x23f   :  { %8721 = vmatpush1.bf16.msra.mxu0 %v14501_v4  ;;  %8885 = vmatpush1.bf16.msra.mxu1 %v14503_v5  ;;  %v2864_v4 = vld [vmem:[%s22812_s5 + $0xd08] sm:$0xff] }
 0x240   :  { %8722 = vmatprep.subr.bf16.mxu0 %v14518_v28  ;;  %8886 = vmatprep.subr.bf16.mxu1 %v14520_v6  ;;  %v2872_v5 = vld [vmem:[%s22812_s5 + $0xd48] sm:$0xff]  ;;  %v14613_v28 = vcombine.low %v2847_v56, %v2855_v57  ;;  %v14615_v6 = vcombine.low %v2848_v59, %v2856_v60  ;;  %v802_v56 = vrot.slane %v18172_v30, %v17552_v27  ;;  %v2959_v60 = vld [vmem:[%s22812_s5 + $0x1000] sm:$0xff] }
 0x241   :  { %v14632_v8 = vcombine.high %v2864_v4, %v2872_v5  ;;  %v14710_v57 = vcombine.high %v2943_v48, %v2951_v49 }
 0x243   :  { %8723 = vmatpush1.bf16.msra.mxu0 %v14517_v11  ;;  %8887 = vmatpush1.bf16.msra.mxu1 %v14519_v16  ;;  %v2880_v11 = vld [vmem:[%s22812_s5 + $0xd88] sm:$0xff] }
 0x244   :  { %8724 = vmatprep.subr.bf16.mxu0 %v14534_v17  ;;  %8888 = vmatprep.subr.bf16.mxu1 %v14536_v18  ;;  %v2888_v16 = vld [vmem:[%s22812_s5 + $0xdc8] sm:$0xff]  ;;  %v14629_v17 = vcombine.low %v2863_v1, %v2871_v2  ;;  %v14631_v18 = vcombine.low %v2864_v4, %v2872_v5  ;;  %v15799_v2 = vadd.f32 %v18180_v35, %v802_v56 }
 0x245   :  { %v14648_v21 = vcombine.high %v2880_v11, %v2888_v16  ;;  %v2984_v35 = vld [vmem:[%s22812_s5 + $0x10c8] sm:$0xff] }
 0x246   :  { %v3056_v56 = vld [vmem:[%s22812_s5 + $0x1308] sm:$0xff] }
 0x247   :  { %8725 = vmatpush1.bf16.msra.mxu0 %v14533_v24  ;;  %8889 = vmatpush1.bf16.msra.mxu1 %v14535_v29  ;;  %v2896_v24 = vld [vmem:[%s22812_s5 + $0xe08] sm:$0xff] }
 0x248   :  { %8726 = vmatprep.subr.bf16.mxu0 %v14550_v25  ;;  %8890 = vmatprep.subr.bf16.mxu1 %v14552_v20  ;;  %v2904_v29 = vld [vmem:[%s22812_s5 + $0xe48] sm:$0xff]  ;;  %v14645_v25 = vcombine.low %v2879_v9, %v2887_v10  ;;  %v14647_v20 = vcombine.low %v2880_v11, %v2888_v16  ;;  %v18401_v10 = vpack.c.bf16 %v15799_v2, %v15799_v2 }
 0x249   :  { %v14664_v31 = vcombine.high %v2896_v24, %v2904_v29  ;;  %v3080_v2 = vld [vmem:[%s22812_s5 + $0x13c8] sm:$0xff] }
 0x24b   :  { %8727 = vmatpush1.bf16.msra.mxu0 %v14549_v34  ;;  %8891 = vmatpush1.bf16.msra.mxu1 %v14551_v36  ;;  %v2912_v34 = vld [vmem:[%s22812_s5 + $0xe88] sm:$0xff] }
 0x24c   :  { %8728 = vmatprep.subr.bf16.mxu0 %v14566_v37  ;;  %8892 = vmatprep.subr.bf16.mxu1 %v14568_v54  ;;  %v2920_v36 = vld [vmem:[%s22812_s5 + $0xec8] sm:$0xff]  ;;  %v14661_v37 = vcombine.low %v2895_v22, %v2903_v23  ;;  %v14663_v54 = vcombine.low %v2896_v24, %v2904_v29 }
 0x24d   :  { %v14680_v39 = vcombine.high %v2912_v34, %v2920_v36 }
 0x24f   :  { %8729 = vmatpush1.bf16.msra.mxu0 %v14565_v42  ;;  %8893 = vmatpush1.bf16.msra.mxu1 %v14567_v43  ;;  %v2928_v42 = vld [vmem:[%s22812_s5 + $0xf08] sm:$0xff] }
 0x250   :  { %8730 = vmatprep.subr.bf16.mxu0 %v14582_v14  ;;  %8894 = vmatprep.subr.bf16.mxu1 %v14584_v44  ;;  %v2936_v43 = vld [vmem:[%s22812_s5 + $0xf48] sm:$0xff]  ;;  %v14677_v14 = vcombine.low %v2911_v32, %v2919_v33  ;;  %v14679_v44 = vcombine.low %v2912_v34, %v2920_v36 }
 0x251   :  { %v14696_v46 = vcombine.high %v2928_v42, %v2936_v43 }
 0x253   :  { %8731 = vmatpush1.bf16.msra.mxu0 %v14581_v51  ;;  %8895 = vmatpush1.bf16.msra.mxu1 %v14583_v3  ;;  %v2944_v51 = vld [vmem:[%s22812_s5 + $0xf88] sm:$0xff] }
 0x254   :  { %8732 = vmatprep.subr.bf16.mxu0 %v14598_v53  ;;  %8896 = vmatprep.subr.bf16.mxu1 %v14600_v55  ;;  %v2952_v3 = vld [vmem:[%s22812_s5 + $0xfc8] sm:$0xff]  ;;  %v14693_v53 = vcombine.low %v2927_v40, %v2935_v41  ;;  %v14695_v55 = vcombine.low %v2928_v42, %v2936_v43 }
 0x255   :  { %v14712_v59 = vcombine.high %v2944_v51, %v2952_v3  ;;  %v14711_v1 = vcombine.low %v2944_v51, %v2952_v3 }
 0x257   :  { %8733 = vmatpush1.bf16.msra.mxu0 %v14597_v61  ;;  %8897 = vmatpush1.bf16.msra.mxu1 %v14599_v62  ;;  %v2967_v61 = vld [vmem:[%s22812_s5 + $0x1040] sm:$0xff]  ;;  %v2960_v62 = vld [vmem:[%s22812_s5 + $0x1008] sm:$0xff] }
 0x258   :  { %8734 = vmatprep.subr.bf16.mxu0 %v14614_v63  ;;  %8898 = vmatprep.subr.bf16.mxu1 %v14616_v0  ;;  %v2968_v63 = vld [vmem:[%s22812_s5 + $0x1048] sm:$0xff]  ;;  %v14709_v0 = vcombine.low %v2943_v48, %v2951_v49  ;;  %v14726_v4 = vcombine.high %v2959_v60, %v2967_v61 }
 0x259   :  { %v14728_v5 = vcombine.high %v2960_v62, %v2968_v63  ;;  %v14727_v9 = vcombine.low %v2960_v62, %v2968_v63  ;;  %v3071_v63 = vld [vmem:[%s22812_s5 + $0x1380] sm:$0xff] }
 0x25b   :  { %8735 = vmatpush1.bf16.msra.mxu0 %v14613_v28  ;;  %8899 = vmatpush1.bf16.msra.mxu1 %v14615_v6  ;;  %v2975_v28 = vld [vmem:[%s22812_s5 + $0x1080] sm:$0xff] }
 0x25c   :  { %8736 = vmatprep.subr.bf16.mxu0 %v14630_v7  ;;  %8900 = vmatprep.subr.bf16.mxu1 %v14632_v8  ;;  %v2983_v6 = vld [vmem:[%s22812_s5 + $0x10c0] sm:$0xff]  ;;  %v2976_v7 = vld [vmem:[%s22812_s5 + $0x1088] sm:$0xff]  ;;  %v14725_v8 = vcombine.low %v2959_v60, %v2967_v61 }
 0x25d   :  { %v14742_v11 = vcombine.high %v2975_v28, %v2983_v6  ;;  %v14744_v16 = vcombine.high %v2976_v7, %v2984_v35  ;;  %v14741_v22 = vcombine.low %v2975_v28, %v2983_v6  ;;  %v14743_v23 = vcombine.low %v2976_v7, %v2984_v35  ;;  %v3087_v7 = vld [vmem:[%s22812_s5 + $0x1400] sm:$0xff] }
 0x25e   :  { %v3095_v35 = vld [vmem:[%s22812_s5 + $0x1440] sm:$0xff] }
 0x25f   :  { %8737 = vmatpush1.bf16.msra.mxu0 %v14629_v17  ;;  %8901 = vmatpush1.bf16.msra.mxu1 %v14631_v18  ;;  %v2991_v17 = vld [vmem:[%s22812_s5 + $0x1100] sm:$0xff] }
 0x260   :  { %8738 = vmatprep.subr.bf16.mxu0 %v14646_v19  ;;  %8902 = vmatprep.subr.bf16.mxu1 %v14648_v21  ;;  %v2999_v18 = vld [vmem:[%s22812_s5 + $0x1140] sm:$0xff]  ;;  %v2992_v19 = vld [vmem:[%s22812_s5 + $0x1108] sm:$0xff] }
 0x261   :  { %v3000_v21 = vld [vmem:[%s22812_s5 + $0x1148] sm:$0xff]  ;;  %v14758_v24 = vcombine.high %v2991_v17, %v2999_v18  ;;  %v14757_v32 = vcombine.low %v2991_v17, %v2999_v18  ;;  %v14854_v17 = vcombine.high %v3087_v7, %v3095_v35 }
 0x262   :  { %v14760_v29 = vcombine.high %v2992_v19, %v3000_v21  ;;  %v14759_v33 = vcombine.low %v2992_v19, %v3000_v21  ;;  %v3103_v19 = vld [vmem:[%s22812_s5 + $0x1480] sm:$0xff] }
 0x263   :  { %8739 = vmatpush1.bf16.msra.mxu0 %v14645_v25  ;;  %8903 = vmatpush1.bf16.msra.mxu1 %v14647_v20  ;;  %v3007_v25 = vld [vmem:[%s22812_s5 + $0x1180] sm:$0xff] }
 0x264   :  { %8740 = vmatprep.subr.bf16.mxu0 %v14662_v26  ;;  %8904 = vmatprep.subr.bf16.mxu1 %v14664_v31  ;;  %v3015_v20 = vld [vmem:[%s22812_s5 + $0x11c0] sm:$0xff]  ;;  %v3008_v26 = vld [vmem:[%s22812_s5 + $0x1188] sm:$0xff] }
 0x265   :  { %v3016_v31 = vld [vmem:[%s22812_s5 + $0x11c8] sm:$0xff]  ;;  %v14774_v34 = vcombine.high %v3007_v25, %v3015_v20  ;;  %v14773_v40 = vcombine.low %v3007_v25, %v3015_v20  ;;  %v3111_v21 = vld [vmem:[%s22812_s5 + $0x14c0] sm:$0xff] }
 0x266   :  { %v14776_v36 = vcombine.high %v3008_v26, %v3016_v31  ;;  %v14775_v41 = vcombine.low %v3008_v26, %v3016_v31  ;;  %v14870_v25 = vcombine.high %v3103_v19, %v3111_v21  ;;  %v3119_v26 = vld [vmem:[%s22812_s5 + $0x1500] sm:$0xff] }
 0x267   :  { %8741 = vmatpush1.bf16.msra.mxu0 %v14661_v37  ;;  %8905 = vmatpush1.bf16.msra.mxu1 %v14663_v54  ;;  %v3023_v37 = vld [vmem:[%s22812_s5 + $0x1200] sm:$0xff] }
 0x268   :  { %8742 = vmatprep.subr.bf16.mxu0 %v14678_v38  ;;  %8906 = vmatprep.subr.bf16.mxu1 %v14680_v39  ;;  %v3031_v54 = vld [vmem:[%s22812_s5 + $0x1240] sm:$0xff]  ;;  %v3024_v38 = vld [vmem:[%s22812_s5 + $0x1208] sm:$0xff] }
 0x269   :  { %v3032_v39 = vld [vmem:[%s22812_s5 + $0x1248] sm:$0xff]  ;;  %v14790_v42 = vcombine.high %v3023_v37, %v3031_v54  ;;  %v14789_v48 = vcombine.low %v3023_v37, %v3031_v54  ;;  %v3127_v31 = vld [vmem:[%s22812_s5 + $0x1540] sm:$0xff] }
 0x26a   :  { %v14792_v43 = vcombine.high %v3024_v38, %v3032_v39  ;;  %v14791_v49 = vcombine.low %v3024_v38, %v3032_v39  ;;  %v14886_v37 = vcombine.high %v3119_v26, %v3127_v31  ;;  %v3135_v38 = vld [vmem:[%s22812_s5 + $0x1580] sm:$0xff] }
 0x26b   :  { %8743 = vmatpush1.bf16.msra.mxu0 %v14677_v14  ;;  %8907 = vmatpush1.bf16.msra.mxu1 %v14679_v44  ;;  %v3039_v14 = vld [vmem:[%s22812_s5 + $0x1280] sm:$0xff] }
 0x26c   :  { %8744 = vmatprep.subr.bf16.mxu0 %v14694_v45  ;;  %8908 = vmatprep.subr.bf16.mxu1 %v14696_v46  ;;  %v3047_v44 = vld [vmem:[%s22812_s5 + $0x12c0] sm:$0xff]  ;;  %v3040_v45 = vld [vmem:[%s22812_s5 + $0x1288] sm:$0xff] }
 0x26d   :  { %v3048_v46 = vld [vmem:[%s22812_s5 + $0x12c8] sm:$0xff]  ;;  %v14806_v51 = vcombine.high %v3039_v14, %v3047_v44  ;;  %v3143_v39 = vld [vmem:[%s22812_s5 + $0x15c0] sm:$0xff] }
 0x26e   :  { %v14808_v3 = vcombine.high %v3040_v45, %v3048_v46  ;;  %v14807_v60 = vcombine.low %v3040_v45, %v3048_v46  ;;  %v3151_v45 = vld [vmem:[%s22812_s5 + $0x1600] sm:$0xff] }
 0x26f   :  { %8745 = vmatpush1.bf16.msra.mxu0 %v14693_v53  ;;  %8909 = vmatpush1.bf16.msra.mxu1 %v14695_v55  ;;  %v3055_v53 = vld [vmem:[%s22812_s5 + $0x1300] sm:$0xff] }
 0x270   :  { %8746 = vmatprep.subr.bf16.mxu0 %v14710_v57  ;;  %8910 = vmatprep.subr.bf16.mxu1 %v14712_v59  ;;  %v3063_v55 = vld [vmem:[%s22812_s5 + $0x1340] sm:$0xff]  ;;  %v3064_v57 = vld [vmem:[%s22812_s5 + $0x1348] sm:$0xff]  ;;  %v14805_v59 = vcombine.low %v3039_v14, %v3047_v44  ;;  %v14902_v14 = vcombine.high %v3135_v38, %v3143_v39 }
 0x271   :  { %v14822_v61 = vcombine.high %v3055_v53, %v3063_v55  ;;  %v14824_v62 = vcombine.high %v3056_v56, %v3064_v57  ;;  %v3159_v46 = vld [vmem:[%s22812_s5 + $0x1640] sm:$0xff] }
 0x273   :  { %8747 = vmatpush1.bf16.msra.mxu0 %v14709_v0  ;;  %8911 = vmatpush1.bf16.msra.mxu1 %v14711_v1  ;;  %v3079_v0 = vld [vmem:[%s22812_s5 + $0x13c0] sm:$0xff]  ;;  %v3072_v1 = vld [vmem:[%s22812_s5 + $0x1388] sm:$0xff] }
 0x274   :  { %8757 = vmatprep.subr.bf16.mxu0 %v14726_v4  ;;  %8921 = vmatprep.subr.bf16.mxu1 %v14728_v5  ;;  %v14821_v4 = vcombine.low %v3055_v53, %v3063_v55  ;;  %v14823_v5 = vcombine.low %v3056_v56, %v3064_v57  ;;  %v14838_v28 = vcombine.high %v3071_v63, %v3079_v0  ;;  %v3167_v56 = vld [vmem:[%s22812_s5 + $0x1680] sm:$0xff] }
 0x275   :  { %v14840_v6 = vcombine.high %v3072_v1, %v3080_v2  ;;  %v14918_v53 = vcombine.high %v3151_v45, %v3159_v46  ;;  %v3175_v57 = vld [vmem:[%s22812_s5 + $0x16c0] sm:$0xff] }
 0x276   :  { %8749 = vmatmul.mubr.bf16.vlgmr.msra.gmra.mrb[12].mxu0 %v18401_v10  ;;  %8913 = vmatmul.mubr.bf16.vlgmr.msra.gmra.mrb[12].mxu1 %v18401_v10 }
 0x277   :  { %8758 = vmatpush1.bf16.msra.mxu0 %v14725_v8  ;;  %8922 = vmatpush1.bf16.msra.mxu1 %v14727_v9  ;;  %v3088_v8 = vld [vmem:[%s22812_s5 + $0x1408] sm:$0xff] }
 0x278   :  { %8759 = vmatprep.subr.bf16.mxu0 %v14742_v11  ;;  %8923 = vmatprep.subr.bf16.mxu1 %v14744_v16  ;;  %v3096_v9 = vld [vmem:[%s22812_s5 + $0x1448] sm:$0xff]  ;;  %v14837_v11 = vcombine.low %v3071_v63, %v3079_v0  ;;  %v14839_v16 = vcombine.low %v3072_v1, %v3080_v2  ;;  %v14934_v63 = vcombine.high %v3167_v56, %v3175_v57  ;;  %v3183_v1 = vld [vmem:[%s22812_s5 + $0x1700] sm:$0xff] }
 0x279   :  { %v14856_v18 = vcombine.high %v3088_v8, %v3096_v9  ;;  %v3191_v2 = vld [vmem:[%s22812_s5 + $0x1740] sm:$0xff] }
 0x27b   :  { %8760 = vmatpush1.bf16.msra.mxu0 %v14741_v22  ;;  %8924 = vmatpush1.bf16.msra.mxu1 %v14743_v23  ;;  %v3104_v22 = vld [vmem:[%s22812_s5 + $0x1488] sm:$0xff] }
 0x27c   :  { %8761 = vmatprep.subr.bf16.mxu0 %v14758_v24  ;;  %8925 = vmatprep.subr.bf16.mxu1 %v14760_v29  ;;  %v3112_v23 = vld [vmem:[%s22812_s5 + $0x14c8] sm:$0xff]  ;;  %v14853_v24 = vcombine.low %v3087_v7, %v3095_v35  ;;  %v14855_v29 = vcombine.low %v3088_v8, %v3096_v9  ;;  %v14950_v7 = vcombine.high %v3183_v1, %v3191_v2  ;;  %v18562_v8 = vsub.s32 4, %v17347_v12  ;;  %v3199_v9 = vld [vmem:[%s22812_s5 + $0x1780] sm:$0xff] }
 0x27d   :  { %v14872_v20 = vcombine.high %v3104_v22, %v3112_v23 }
 0x27f   :  { %8762 = vmatpush1.bf16.msra.mxu0 %v14757_v32  ;;  %8926 = vmatpush1.bf16.msra.mxu1 %v14759_v33  ;;  %v3120_v32 = vld [vmem:[%s22812_s5 + $0x1508] sm:$0xff] }
 0x280   :  { %8763 = vmatprep.subr.bf16.mxu0 %v14774_v34  ;;  %8927 = vmatprep.subr.bf16.mxu1 %v14776_v36  ;;  %v3128_v33 = vld [vmem:[%s22812_s5 + $0x1548] sm:$0xff]  ;;  %v14869_v34 = vcombine.low %v3103_v19, %v3111_v21  ;;  %v14871_v36 = vcombine.low %v3104_v22, %v3112_v23  ;;  %v18580_v19 = vsub.s32 7, %v17347_v12  ;;  %v14949_v21 = vcombine.low %v3183_v1, %v3191_v2 }
 0x281   :  { %v14888_v54 = vcombine.high %v3120_v32, %v3128_v33  ;;  %v810_v23 = vrot.slane %v18172_v30, %v18562_v8 }
 0x283   :  { %8764 = vmatpush1.bf16.msra.mxu0 %v14773_v40  ;;  %8928 = vmatpush1.bf16.msra.mxu1 %v14775_v41  ;;  %v3136_v40 = vld [vmem:[%s22812_s5 + $0x1588] sm:$0xff] }
 0x284   :  { %8765 = vmatprep.subr.bf16.mxu0 %v14790_v42  ;;  %8929 = vmatprep.subr.bf16.mxu1 %v14792_v43  ;;  %v3144_v41 = vld [vmem:[%s22812_s5 + $0x15c8] sm:$0xff]  ;;  %v14885_v42 = vcombine.low %v3119_v26, %v3127_v31  ;;  %v14887_v43 = vcombine.low %v3120_v32, %v3128_v33  ;;  %v3223_v26 = vld [vmem:[%s22812_s5 + $0x1840] sm:$0xff]  ;;  %v822_v33 = vrot.slane %v18172_v30, %v18580_v19 }
 0x285   :  { %v14904_v44 = vcombine.high %v3136_v40, %v3144_v41  ;;  %v3216_v31 = vld [vmem:[%s22812_s5 + $0x1808] sm:$0xff] }
 0x286   :  { %v3224_v32 = vld [vmem:[%s22812_s5 + $0x1848] sm:$0xff] }
 0x287   :  { %8766 = vmatpush1.bf16.msra.mxu0 %v14789_v48  ;;  %8930 = vmatpush1.bf16.msra.mxu1 %v14791_v49  ;;  %v3152_v48 = vld [vmem:[%s22812_s5 + $0x1608] sm:$0xff] }
 0x288   :  { %8767 = vmatprep.subr.bf16.mxu0 %v14806_v51  ;;  %8931 = vmatprep.subr.bf16.mxu1 %v14808_v3  ;;  %v3160_v49 = vld [vmem:[%s22812_s5 + $0x1648] sm:$0xff]  ;;  %v14901_v51 = vcombine.low %v3135_v38, %v3143_v39  ;;  %v14903_v3 = vcombine.low %v3136_v40, %v3144_v41  ;;  %v14984_v41 = vcombine.high %v3216_v31, %v3224_v32 }
 0x289   :  { %v14920_v55 = vcombine.high %v3152_v48, %v3160_v49 }
 0x28b   :  { %8768 = vmatpush1.bf16.msra.mxu0 %v14805_v59  ;;  %8932 = vmatpush1.bf16.msra.mxu1 %v14807_v60  ;;  %v3168_v59 = vld [vmem:[%s22812_s5 + $0x1688] sm:$0xff] }
 0x28c   :  { %8769 = vmatprep.subr.bf16.mxu0 %v14822_v61  ;;  %8933 = vmatprep.subr.bf16.mxu1 %v14824_v62  ;;  %v3176_v60 = vld [vmem:[%s22812_s5 + $0x16c8] sm:$0xff]  ;;  %v14917_v61 = vcombine.low %v3151_v45, %v3159_v46  ;;  %v14919_v62 = vcombine.low %v3152_v48, %v3160_v49  ;;  %v3239_v48 = vld [vmem:[%s22812_s5 + $0x18c0] sm:$0xff] }
 0x28d   :  { %v14936_v0 = vcombine.high %v3168_v59, %v3176_v60  ;;  %v3232_v49 = vld [vmem:[%s22812_s5 + $0x1888] sm:$0xff] }
 0x28f   :  { %8770 = vmatpush1.bf16.msra.mxu0 %v14821_v4  ;;  %8934 = vmatpush1.bf16.msra.mxu1 %v14823_v5  ;;  %v3184_v4 = vld [vmem:[%s22812_s5 + $0x1708] sm:$0xff] }
 0x290   :  { %8771 = vmatprep.subr.bf16.mxu0 %v14838_v28  ;;  %8935 = vmatprep.subr.bf16.mxu1 %v14840_v6  ;;  %v3192_v5 = vld [vmem:[%s22812_s5 + $0x1748] sm:$0xff]  ;;  %v14933_v28 = vcombine.low %v3167_v56, %v3175_v57  ;;  %v14935_v6 = vcombine.low %v3168_v59, %v3176_v60  ;;  %v14983_v56 = vcombine.low %v3216_v31, %v3224_v32  ;;  %v3247_v59 = vld [vmem:[%s22812_s5 + $0x1900] sm:$0xff] }
 0x291   :  { %v14952_v35 = vcombine.high %v3184_v4, %v3192_v5  ;;  %v14951_v22 = vcombine.low %v3184_v4, %v3192_v5  ;;  %v3295_v32 = vld [vmem:[%s22812_s5 + $0x1a80] sm:$0xff] }
 0x293   :  { %8772 = vmatpush1.bf16.msra.mxu0 %v14837_v11  ;;  %8936 = vmatpush1.bf16.msra.mxu1 %v14839_v16  ;;  %v18568_v11 = vsub.s32 5, %v17347_v12  ;;  %v3207_v16 = vld [vmem:[%s22812_s5 + $0x17c0] sm:$0xff] }
 0x294   :  { %8773 = vmatprep.subr.bf16.mxu0 %v14854_v17  ;;  %8937 = vmatprep.subr.bf16.mxu1 %v14856_v18  ;;  %v3200_v17 = vld [vmem:[%s22812_s5 + $0x1788] sm:$0xff] }
 0x295   :  { %v3208_v18 = vld [vmem:[%s22812_s5 + $0x17c8] sm:$0xff] }
 0x297   :  { %8774 = vmatpush1.bf16.msra.mxu0 %v14853_v24  ;;  %8938 = vmatpush1.bf16.msra.mxu1 %v14855_v29  ;;  %v14966_v24 = vcombine.high %v3199_v9, %v3207_v16  ;;  %v14968_v29 = vcombine.high %v3200_v17, %v3208_v18 }
 0x298   :  { %8775 = vmatprep.subr.bf16.mxu0 %v14870_v25  ;;  %8939 = vmatprep.subr.bf16.mxu1 %v14872_v20  ;;  %v3215_v25 = vld [vmem:[%s22812_s5 + $0x1800] sm:$0xff]  ;;  %v814_v20 = vrot.slane %v18172_v30, %v18568_v11 }
 0x299   :  { %v14982_v40 = vcombine.high %v3215_v25, %v3223_v26  ;;  %v3231_v30 = vld [vmem:[%s22812_s5 + $0x1880] sm:$0xff] }
 0x29a   :  { %v14998_v60 = vcombine.high %v3231_v30, %v3239_v48  ;;  %v14997_v2 = vcombine.low %v3231_v30, %v3239_v48  ;;  %v3327_v48 = vld [vmem:[%s22812_s5 + $0x1b80] sm:$0xff] }
 0x29b   :  { %8776 = vmatpush1.bf16.msra.mxu0 %v14869_v34  ;;  %8940 = vmatpush1.bf16.msra.mxu1 %v14871_v36  ;;  %v14965_v36 = vcombine.low %v3199_v9, %v3207_v16  ;;  %v3272_v9 = vld [vmem:[%s22812_s5 + $0x19c8] sm:$0xff] }
 0x29c   :  { %8777 = vmatprep.subr.bf16.mxu0 %v14886_v37  ;;  %8941 = vmatprep.subr.bf16.mxu1 %v14888_v54  ;;  %v14967_v37 = vcombine.low %v3200_v17, %v3208_v18 }
 0x29f   :  { %8778 = vmatpush1.bf16.msra.mxu0 %v14885_v42  ;;  %8942 = vmatpush1.bf16.msra.mxu1 %v14887_v43 }
 0x2a0   :  { %8779 = vmatprep.subr.bf16.mxu0 %v14902_v14  ;;  %8943 = vmatprep.subr.bf16.mxu1 %v14904_v44 }
 0x2a3   :  { %8780 = vmatpush1.bf16.msra.mxu0 %v14901_v51  ;;  %8944 = vmatpush1.bf16.msra.mxu1 %v14903_v3  ;;  %v3240_v51 = vld [vmem:[%s22812_s5 + $0x18c8] sm:$0xff] }
 0x2a4   :  { %8781 = vmatprep.subr.bf16.mxu0 %v14918_v53  ;;  %8945 = vmatprep.subr.bf16.mxu1 %v14920_v55  ;;  %v14981_v55 = vcombine.low %v3215_v25, %v3223_v26  ;;  %v14999_v4 = vcombine.low %v3232_v49, %v3240_v51 }
 0x2a7   :  { %8782 = vmatpush1.bf16.msra.mxu0 %v14917_v61  ;;  %8946 = vmatpush1.bf16.msra.mxu1 %v14919_v62  ;;  %v15000_v61 = vcombine.high %v3232_v49, %v3240_v51  ;;  %v3255_v62 = vld [vmem:[%s22812_s5 + $0x1940] sm:$0xff]  ;;  %v3328_v51 = vld [vmem:[%s22812_s5 + $0x1b88] sm:$0xff] }
 0x2a8   :  { %8783 = vmatprep.subr.bf16.mxu0 %v14934_v63  ;;  %8947 = vmatprep.subr.bf16.mxu1 %v14936_v0  ;;  %v3248_v63 = vld [vmem:[%s22812_s5 + $0x1908] sm:$0xff]  ;;  %v15014_v5 = vcombine.high %v3247_v59, %v3255_v62  ;;  %v15013_v16 = vcombine.low %v3247_v59, %v3255_v62  ;;  %v3335_v49 = vld [vmem:[%s22812_s5 + $0x1bc0] sm:$0xff] }
 0x2a9   :  { %v3256_v0 = vld [vmem:[%s22812_s5 + $0x1948] sm:$0xff]  ;;  %v15094_v59 = vcombine.high %v3327_v48, %v3335_v49  ;;  %v3351_v62 = vld [vmem:[%s22812_s5 + $0x1c40] sm:$0xff] }
 0x2aa   :  { %v15015_v17 = vcombine.low %v3248_v63, %v3256_v0 }
 0x2ab   :  { %8784 = vmatpush1.bf16.msra.mxu0 %v14933_v28  ;;  %8948 = vmatpush1.bf16.msra.mxu1 %v14935_v6  ;;  %v15016_v28 = vcombine.high %v3248_v63, %v3256_v0  ;;  %v3263_v6 = vld [vmem:[%s22812_s5 + $0x1980] sm:$0xff]  ;;  %v3344_v63 = vld [vmem:[%s22812_s5 + $0x1c08] sm:$0xff] }
 0x2ac   :  { %8785 = vmatprep.subr.bf16.mxu0 %v14950_v7  ;;  %8949 = vmatprep.subr.bf16.mxu1 %v14952_v35  ;;  %v3271_v7 = vld [vmem:[%s22812_s5 + $0x19c0] sm:$0xff]  ;;  %v3264_v35 = vld [vmem:[%s22812_s5 + $0x1988] sm:$0xff] }
 0x2ad   :  { %v15030_v18 = vcombine.high %v3263_v6, %v3271_v7  ;;  %v15029_v25 = vcombine.low %v3263_v6, %v3271_v7  ;;  %v3352_v0 = vld [vmem:[%s22812_s5 + $0x1c48] sm:$0xff]  ;;  %v3359_v6 = vld [vmem:[%s22812_s5 + $0x1c80] sm:$0xff] }
 0x2ae   :  { %v3367_v7 = vld [vmem:[%s22812_s5 + $0x1cc0] sm:$0xff] }
 0x2af   :  { %8786 = vmatpush1.bf16.msra.mxu0 %v14949_v21  ;;  %8950 = vmatpush1.bf16.msra.mxu1 %v14951_v22  ;;  %v2350_v34 = vpop.f32.mrb[8].mxu0  ;;  %v15032_v21 = vcombine.high %v3264_v35, %v3272_v9  ;;  %v3279_v22 = vld [vmem:[%s22812_s5 + $0x1a00] sm:$0xff] }
 0x2b0   :  { %v15801_v54 = vadd.f32 %v2350_v34, %v810_v23  ;;  %v18600_v38 = vpop.f32.mrb[8].mxu1  ;;  %v2352_v39 = vpop.f32.mrb[9].mxu0  ;;  %8787 = vmatprep.subr.bf16.mxu0 %v14966_v24  ;;  %8951 = vmatprep.subr.bf16.mxu1 %v14968_v29  ;;  %v3287_v23 = vld [vmem:[%s22812_s5 + $0x1a40] sm:$0xff]  ;;  %v3280_v24 = vld [vmem:[%s22812_s5 + $0x1a08] sm:$0xff] }
 0x2b1   :  { %v15802_v42 = vadd.f32 %v2352_v39, %v814_v20  ;;  %v2434_v43 = vpop.f32.mrb[9].mxu1  ;;  %v2354_v14 = vpop.f32.mrb[10].mxu0  ;;  %v3288_v29 = vld [vmem:[%s22812_s5 + $0x1a48] sm:$0xff]  ;;  %v15031_v20 = vcombine.low %v3264_v35, %v3272_v9  ;;  %v15046_v26 = vcombine.high %v3279_v22, %v3287_v23 }
 0x2b2   :  { %v15804_v44 = vadd.f32 %v2434_v43, %v822_v33  ;;  %v2436_v45 = vpop.f32.mrb[10].mxu1  ;;  %v2355_v46 = vpop.f32.mrb[11].mxu0  ;;  %v18616_v57 = vpack.c.bf16 %v15801_v54, %v15801_v54  ;;  %v15048_v31 = vcombine.high %v3280_v24, %v3288_v29  ;;  %v3303_v33 = vld [vmem:[%s22812_s5 + $0x1ac0] sm:$0xff]  ;;  %v3296_v34 = vld [vmem:[%s22812_s5 + $0x1a88] sm:$0xff]  ;;  %v15047_v54 = vcombine.low %v3280_v24, %v3288_v29 }
 0x2b3   :  { %v18614_v3 = vpack.c.bf16 %v15802_v42, %v15802_v42  ;;  %v2437_v53 = vpop.f32.mrb[11].mxu1  ;;  %8788 = vmatpush1.bf16.msra.mxu0 %v14965_v36  ;;  %8952 = vmatpush1.bf16.msra.mxu1 %v14967_v37  ;;  %v3304_v36 = vld [vmem:[%s22812_s5 + $0x1ac8] sm:$0xff]  ;;  %v15045_v37 = vcombine.low %v3279_v22, %v3287_v23  ;;  %v15062_v39 = vcombine.high %v3295_v32, %v3303_v33  ;;  %v3319_v42 = vld [vmem:[%s22812_s5 + $0x1b40] sm:$0xff] }
 0x2b4   :  { %8798 = vmatprep.subr.bf16.mxu0 %v14982_v40  ;;  %8962 = vmatprep.subr.bf16.mxu1 %v14984_v41  ;;  %v18632_v1 = vpack.c.bf16 %v15804_v44, %v15804_v44  ;;  %v15064_v40 = vcombine.high %v3296_v34, %v3304_v36  ;;  %v3311_v41 = vld [vmem:[%s22812_s5 + $0x1b00] sm:$0xff]  ;;  %v3312_v43 = vld [vmem:[%s22812_s5 + $0x1b08] sm:$0xff]  ;;  %v15061_v30 = vcombine.low %v3295_v32, %v3303_v33 }
 0x2b5   :  { %8789 = vmatprep.mubr.bf16.mxu0 %v18614_v3  ;;  %8953 = vmatprep.mubr.bf16.mxu1 %v18614_v3  ;;  %v3320_v14 = vld [vmem:[%s22812_s5 + $0x1b48] sm:$0xff]  ;;  %v15063_v44 = vcombine.low %v3296_v34, %v3304_v36  ;;  %v15078_v45 = vcombine.high %v3311_v41, %v3319_v42  ;;  %v3375_v22 = vld [vmem:[%s22812_s5 + $0x1d00] sm:$0xff] }
 0x2b6   :  { %8790 = vmatmul.mubr.bf16.vlgmr.msra.gmra.mrb[12].mxu0 %v18616_v57  ;;  %8954 = vmatmul.mubr.bf16.vlgmr.msra.gmra.mrb[12].mxu1 %v18616_v57  ;;  %v15080_v46 = vcombine.high %v3312_v43, %v3320_v14  ;;  %v3336_v53 = vld [vmem:[%s22812_s5 + $0x1bc8] sm:$0xff]  ;;  %v3383_v23 = vld [vmem:[%s22812_s5 + $0x1d40] sm:$0xff] }
 0x2b7   :  { %8799 = vmatpush1.bf16.msra.mxu0 %v14981_v55  ;;  %8963 = vmatpush1.bf16.msra.mxu1 %v14983_v56  ;;  %v15077_v55 = vcombine.low %v3311_v41, %v3319_v42  ;;  %v15079_v56 = vcombine.low %v3312_v43, %v3320_v14  ;;  %v3360_v35 = vld [vmem:[%s22812_s5 + $0x1c88] sm:$0xff]  ;;  %v3391_v32 = vld [vmem:[%s22812_s5 + $0x1d80] sm:$0xff] }
 0x2b8   :  { %8830 = vmatprep.mubr.bf16.mxu0 %v18632_v1  ;;  %8994 = vmatprep.mubr.bf16.mxu1 %v18632_v1  ;;  %v3368_v9 = vld [vmem:[%s22812_s5 + $0x1cc8] sm:$0xff]  ;;  %v3399_v33 = vld [vmem:[%s22812_s5 + $0x1dc0] sm:$0xff] }
 0x2b9   :  { %8800 = vmatprep.subr.bf16.mxu0 %v14998_v60  ;;  %8964 = vmatprep.subr.bf16.mxu1 %v15000_v61  ;;  %v15096_v60 = vcombine.high %v3328_v51, %v3336_v53  ;;  %v3343_v61 = vld [vmem:[%s22812_s5 + $0x1c00] sm:$0xff]  ;;  %v3376_v24 = vld [vmem:[%s22812_s5 + $0x1d08] sm:$0xff] }
 0x2ba   :  { %v3384_v29 = vld [vmem:[%s22812_s5 + $0x1d48] sm:$0xff]  ;;  %v3407_v41 = vld [vmem:[%s22812_s5 + $0x1e00] sm:$0xff] }
 0x2bb   :  { %8801 = vmatpush1.bf16.msra.mxu0 %v14997_v2  ;;  %8965 = vmatpush1.bf16.msra.mxu1 %v14999_v4  ;;  %v15093_v2 = vcombine.low %v3327_v48, %v3335_v49  ;;  %v15095_v4 = vcombine.low %v3328_v51, %v3336_v53  ;;  %v3392_v34 = vld [vmem:[%s22812_s5 + $0x1d88] sm:$0xff]  ;;  %v3415_v42 = vld [vmem:[%s22812_s5 + $0x1e40] sm:$0xff] }
 0x2bc   :  { %8802 = vmatprep.subr.bf16.mxu0 %v15014_v5  ;;  %8966 = vmatprep.subr.bf16.mxu1 %v15016_v28  ;;  %v15110_v5 = vcombine.high %v3343_v61, %v3351_v62  ;;  %v15112_v28 = vcombine.high %v3344_v63, %v3352_v0  ;;  %v3400_v36 = vld [vmem:[%s22812_s5 + $0x1dc8] sm:$0xff]  ;;  %v3423_v48 = vld [vmem:[%s22812_s5 + $0x1e80] sm:$0xff] }
 0x2bd   :  { %v3408_v43 = vld [vmem:[%s22812_s5 + $0x1e08] sm:$0xff]  ;;  %v3431_v49 = vld [vmem:[%s22812_s5 + $0x1ec0] sm:$0xff] }
 0x2be   :  { %v3416_v14 = vld [vmem:[%s22812_s5 + $0x1e48] sm:$0xff] }
 0x2bf   :  { %8803 = vmatpush1.bf16.msra.mxu0 %v15013_v16  ;;  %8967 = vmatpush1.bf16.msra.mxu1 %v15015_v17  ;;  %v15109_v16 = vcombine.low %v3343_v61, %v3351_v62  ;;  %v15111_v17 = vcombine.low %v3344_v63, %v3352_v0  ;;  %v3424_v51 = vld [vmem:[%s22812_s5 + $0x1e88] sm:$0xff]  ;;  %v3439_v61 = vld [vmem:[%s22812_s5 + $0x1f00] sm:$0xff] }
 0x2c0   :  { %8804 = vmatprep.subr.bf16.mxu0 %v15030_v18  ;;  %8968 = vmatprep.subr.bf16.mxu1 %v15032_v21  ;;  %v15126_v18 = vcombine.high %v3359_v6, %v3367_v7  ;;  %v15128_v21 = vcombine.high %v3360_v35, %v3368_v9  ;;  %v3432_v53 = vld [vmem:[%s22812_s5 + $0x1ec8] sm:$0xff]  ;;  %v3447_v62 = vld [vmem:[%s22812_s5 + $0x1f40] sm:$0xff] }
 0x2c1   :  { %v3440_v63 = vld [vmem:[%s22812_s5 + $0x1f08] sm:$0xff] }
 0x2c2   :  { %v3448_v0 = vld [vmem:[%s22812_s5 + $0x1f48] sm:$0xff] }
 0x2c3   :  { %8805 = vmatpush1.bf16.msra.mxu0 %v15029_v25  ;;  %8969 = vmatpush1.bf16.msra.mxu1 %v15031_v20  ;;  %v15125_v25 = vcombine.low %v3359_v6, %v3367_v7  ;;  %v15127_v20 = vcombine.low %v3360_v35, %v3368_v9  ;;  %v15208_v6 = vcombine.high %v3440_v63, %v3448_v0  ;;  %v3455_v7 = vld [vmem:[%s22812_s5 + $0x1f80] sm:$0xff]  ;;  %v3456_v9 = vld [vmem:[%s22812_s5 + $0x1f88] sm:$0xff] }
 0x2c4   :  { %8806 = vmatprep.subr.bf16.mxu0 %v15046_v26  ;;  %8970 = vmatprep.subr.bf16.mxu1 %v15048_v31  ;;  %v15142_v26 = vcombine.high %v3375_v22, %v3383_v23  ;;  %v15144_v31 = vcombine.high %v3376_v24, %v3384_v29  ;;  %v3463_v35 = vld [vmem:[%s22812_s5 + $0x1fc0] sm:$0xff] }
 0x2c7   :  { %8807 = vmatpush1.bf16.msra.mxu0 %v15045_v37  ;;  %8971 = vmatpush1.bf16.msra.mxu1 %v15047_v54  ;;  %v15141_v37 = vcombine.low %v3375_v22, %v3383_v23  ;;  %v15143_v54 = vcombine.low %v3376_v24, %v3384_v29  ;;  %v15222_v22 = vcombine.high %v3455_v7, %v3463_v35  ;;  %v2449_v24 = vld [vmem:[%s22812_s5 + $0x10] sm:$0xff] }
 0x2c8   :  { %8808 = vmatprep.subr.bf16.mxu0 %v15062_v39  ;;  %8972 = vmatprep.subr.bf16.mxu1 %v15064_v40  ;;  %v15158_v39 = vcombine.high %v3391_v32, %v3399_v33  ;;  %v15160_v40 = vcombine.high %v3392_v34, %v3400_v36  ;;  %v2457_v29 = vld [vmem:[%s22812_s5 + $0x50] sm:$0xff] }
 0x2cb   :  { %8809 = vmatpush1.bf16.msra.mxu0 %v15061_v30  ;;  %8973 = vmatpush1.bf16.msra.mxu1 %v15063_v44  ;;  %v15157_v30 = vcombine.low %v3391_v32, %v3399_v33  ;;  %v15159_v44 = vcombine.low %v3392_v34, %v3400_v36  ;;  %v14218_v33 = vcombine.high %v2449_v24, %v2457_v29  ;;  %v2465_v36 = vld [vmem:[%s22812_s5 + $0x90] sm:$0xff] }
 0x2cc   :  { %8810 = vmatprep.subr.bf16.mxu0 %v15078_v45  ;;  %8974 = vmatprep.subr.bf16.mxu1 %v15080_v46  ;;  %v15174_v45 = vcombine.high %v3407_v41, %v3415_v42  ;;  %v15176_v46 = vcombine.high %v3408_v43, %v3416_v14 }
 0x2cf   :  { %8811 = vmatpush1.bf16.msra.mxu0 %v15077_v55  ;;  %8975 = vmatpush1.bf16.msra.mxu1 %v15079_v56  ;;  %v15173_v55 = vcombine.low %v3407_v41, %v3415_v42  ;;  %v15175_v56 = vcombine.low %v3408_v43, %v3416_v14  ;;  %v2481_v14 = vld [vmem:[%s22812_s5 + $0x110] sm:$0xff] }
 0x2d0   :  { %8812 = vmatprep.subr.bf16.mxu0 %v15094_v59  ;;  %8976 = vmatprep.subr.bf16.mxu1 %v15096_v60  ;;  %v15190_v59 = vcombine.high %v3423_v48, %v3431_v49  ;;  %v15192_v60 = vcombine.high %v3424_v51, %v3432_v53 }
 0x2d3   :  { %8813 = vmatpush1.bf16.msra.mxu0 %v15093_v2  ;;  %8977 = vmatpush1.bf16.msra.mxu1 %v15095_v4  ;;  %v15189_v2 = vcombine.low %v3423_v48, %v3431_v49  ;;  %v15191_v4 = vcombine.low %v3424_v51, %v3432_v53  ;;  %v2497_v53 = vld [vmem:[%s22812_s5 + $0x190] sm:$0xff] }
 0x2d4   :  { %8814 = vmatprep.subr.bf16.mxu0 %v15110_v5  ;;  %8978 = vmatprep.subr.bf16.mxu1 %v15112_v28  ;;  %v18783_v5 = vsub.s32 6, %v17347_v12  ;;  %v15206_v28 = vcombine.high %v3439_v61, %v3447_v62  ;;  %v3464_v12 = vld [vmem:[%s22812_s5 + $0x1fc8] sm:$0xff] }
 0x2d5   :  { %v15224_v23 = vcombine.high %v3456_v9, %v3464_v12 }
 0x2d7   :  { %8815 = vmatpush1.bf16.msra.mxu0 %v15109_v16  ;;  %8979 = vmatpush1.bf16.msra.mxu1 %v15111_v17  ;;  %v15205_v16 = vcombine.low %v3439_v61, %v3447_v62  ;;  %v15207_v17 = vcombine.low %v3440_v63, %v3448_v0  ;;  %v2513_v0 = vld [vmem:[%s22812_s5 + $0x210] sm:$0xff] }
 0x2d8   :  { %8816 = vmatprep.subr.bf16.mxu0 %v15126_v18  ;;  %8980 = vmatprep.subr.bf16.mxu1 %v15128_v21  ;;  %v16860_v18 = vld [vmem:[%s22811_s4] sm:$0xff] }
 0x2d9   :  { %v818_v21 = vrot.slane %v16860_v18, %v18783_v5  ;;  %v2538_v18 = vld [vmem:[%s22812_s5 + $0x2d8] sm:$0xff] }
 0x2db   :  { %8817 = vmatpush1.bf16.msra.mxu0 %v15125_v25  ;;  %8981 = vmatpush1.bf16.msra.mxu1 %v15127_v20  ;;  %v2450_v25 = vld [vmem:[%s22812_s5 + $0x18] sm:$0xff]  ;;  %v15803_v32 = vadd.f32 %v18600_v38, %v818_v21 }
 0x2dc   :  { %8818 = vmatprep.subr.bf16.mxu0 %v15142_v26  ;;  %8982 = vmatprep.subr.bf16.mxu1 %v15144_v31  ;;  %v2458_v20 = vld [vmem:[%s22812_s5 + $0x58] sm:$0xff]  ;;  %v15221_v26 = vcombine.low %v3455_v7, %v3463_v35  ;;  %v15223_v31 = vcombine.low %v3456_v9, %v3464_v12  ;;  %v2529_v12 = vld [vmem:[%s22812_s5 + $0x290] sm:$0xff] }
 0x2dd   :  { %v14220_v34 = vcombine.high %v2450_v25, %v2458_v20  ;;  %v2474_v38 = vld [vmem:[%s22812_s5 + $0xd8] sm:$0xff]  ;;  %v14219_v41 = vcombine.low %v2450_v25, %v2458_v20  ;;  %v2553_v25 = vld [vmem:[%s22812_s5 + $0x350] sm:$0xff] }
 0x2de   :  { %v2546_v20 = vld [vmem:[%s22812_s5 + $0x318] sm:$0xff] }
 0x2df   :  { %8819 = vmatpush1.bf16.msra.mxu0 %v15141_v37  ;;  %8983 = vmatpush1.bf16.msra.mxu1 %v15143_v54  ;;  %v2473_v37 = vld [vmem:[%s22812_s5 + $0xd0] sm:$0xff]  ;;  %v2466_v54 = vld [vmem:[%s22812_s5 + $0x98] sm:$0xff] }
 0x2e0   :  { %8820 = vmatprep.subr.bf16.mxu0 %v15158_v39  ;;  %8984 = vmatprep.subr.bf16.mxu1 %v15160_v40  ;;  %v14217_v39 = vcombine.low %v2449_v24, %v2457_v29  ;;  %v18826_v40 = vpack.c.bf16 %v15803_v32, %v15803_v32  ;;  %v14234_v42 = vcombine.high %v2465_v36, %v2473_v37  ;;  %v2545_v29 = vld [vmem:[%s22812_s5 + $0x310] sm:$0xff] }
 0x2e1   :  { %v14236_v43 = vcombine.high %v2466_v54, %v2474_v38  ;;  %v14235_v48 = vcombine.low %v2466_v54, %v2474_v38  ;;  %v2562_v54 = vld [vmem:[%s22812_s5 + $0x398] sm:$0xff] }
 0x2e2   :  { %v2570_v38 = vld [vmem:[%s22812_s5 + $0x3d8] sm:$0xff] }
 0x2e3   :  { %8821 = vmatpush1.bf16.msra.mxu0 %v15157_v30  ;;  %8985 = vmatpush1.bf16.msra.mxu1 %v15159_v44  ;;  %v2489_v30 = vld [vmem:[%s22812_s5 + $0x150] sm:$0xff]  ;;  %v2482_v44 = vld [vmem:[%s22812_s5 + $0x118] sm:$0xff] }
 0x2e4   :  { %8822 = vmatprep.subr.bf16.mxu0 %v15174_v45  ;;  %8986 = vmatprep.subr.bf16.mxu1 %v15176_v46  ;;  %v2490_v45 = vld [vmem:[%s22812_s5 + $0x158] sm:$0xff]  ;;  %v14233_v46 = vcombine.low %v2465_v36, %v2473_v37  ;;  %v14250_v49 = vcombine.high %v2481_v14, %v2489_v30  ;;  %v2561_v36 = vld [vmem:[%s22812_s5 + $0x390] sm:$0xff] }
 0x2e5   :  { %v14252_v51 = vcombine.high %v2482_v44, %v2490_v45  ;;  %v14251_v61 = vcombine.low %v2482_v44, %v2490_v45  ;;  %v2569_v37 = vld [vmem:[%s22812_s5 + $0x3d0] sm:$0xff]  ;;  %v2578_v44 = vld [vmem:[%s22812_s5 + $0x418] sm:$0xff] }
 0x2e6   :  { %v2586_v45 = vld [vmem:[%s22812_s5 + $0x458] sm:$0xff] }
 0x2e7   :  { %8823 = vmatpush1.bf16.msra.mxu0 %v15173_v55  ;;  %8987 = vmatpush1.bf16.msra.mxu1 %v15175_v56  ;;  %v2505_v55 = vld [vmem:[%s22812_s5 + $0x1d0] sm:$0xff]  ;;  %v2498_v56 = vld [vmem:[%s22812_s5 + $0x198] sm:$0xff] }
 0x2e8   :  { %8824 = vmatprep.subr.bf16.mxu0 %v15190_v59  ;;  %8988 = vmatprep.subr.bf16.mxu1 %v15192_v60  ;;  %v2506_v59 = vld [vmem:[%s22812_s5 + $0x1d8] sm:$0xff]  ;;  %v14249_v60 = vcombine.low %v2481_v14, %v2489_v30  ;;  %v14266_v62 = vcombine.high %v2497_v53, %v2505_v55  ;;  %v2577_v14 = vld [vmem:[%s22812_s5 + $0x410] sm:$0xff] }
 0x2e9   :  { %v14268_v63 = vcombine.high %v2498_v56, %v2506_v59  ;;  %v14267_v7 = vcombine.low %v2498_v56, %v2506_v59  ;;  %v2585_v30 = vld [vmem:[%s22812_s5 + $0x450] sm:$0xff]  ;;  %v2594_v56 = vld [vmem:[%s22812_s5 + $0x498] sm:$0xff] }
 0x2ea   :  { %v2602_v59 = vld [vmem:[%s22812_s5 + $0x4d8] sm:$0xff] }
 0x2eb   :  { %8825 = vmatpush1.bf16.msra.mxu0 %v15189_v2  ;;  %8989 = vmatpush1.bf16.msra.mxu1 %v15191_v4  ;;  %v2521_v2 = vld [vmem:[%s22812_s5 + $0x250] sm:$0xff]  ;;  %v2514_v4 = vld [vmem:[%s22812_s5 + $0x218] sm:$0xff] }
 0x2ec   :  { %8826 = vmatprep.subr.bf16.mxu0 %v15206_v28  ;;  %8990 = vmatprep.subr.bf16.mxu1 %v15208_v6  ;;  %v2522_v28 = vld [vmem:[%s22812_s5 + $0x258] sm:$0xff]  ;;  %v14265_v6 = vcombine.low %v2497_v53, %v2505_v55  ;;  %v14282_v35 = vcombine.high %v2513_v0, %v2521_v2  ;;  %v14281_v21 = vcombine.low %v2513_v0, %v2521_v2  ;;  %v2593_v53 = vld [vmem:[%s22812_s5 + $0x490] sm:$0xff] }
 0x2ed   :  { %v14284_v9 = vcombine.high %v2514_v4, %v2522_v28  ;;  %v2601_v55 = vld [vmem:[%s22812_s5 + $0x4d0] sm:$0xff] }
 0x2ee   :  { %v2609_v0 = vld [vmem:[%s22812_s5 + $0x510] sm:$0xff] }
 0x2ef   :  { %8827 = vmatpush1.bf16.msra.mxu0 %v15205_v16  ;;  %8991 = vmatpush1.bf16.msra.mxu1 %v15207_v17  ;;  %v2537_v16 = vld [vmem:[%s22812_s5 + $0x2d0] sm:$0xff]  ;;  %v2530_v17 = vld [vmem:[%s22812_s5 + $0x298] sm:$0xff] }
 0x2f0   :  { %8828 = vmatprep.subr.bf16.mxu0 %v15222_v22  ;;  %8992 = vmatprep.subr.bf16.mxu1 %v15224_v23  ;;  %v14283_v22 = vcombine.low %v2514_v4, %v2522_v28  ;;  %v14298_v23 = vcombine.high %v2529_v12, %v2537_v16  ;;  %v14300_v24 = vcombine.high %v2530_v17, %v2538_v18  ;;  %v2617_v2 = vld [vmem:[%s22812_s5 + $0x550] sm:$0xff]  ;;  %v2610_v4 = vld [vmem:[%s22812_s5 + $0x518] sm:$0xff] }
 0x2f1   :  { %v14299_v32 = vcombine.low %v2530_v17, %v2538_v18  ;;  %v2618_v28 = vld [vmem:[%s22812_s5 + $0x558] sm:$0xff] }
 0x2f2   :  { %v2626_v17 = vld [vmem:[%s22812_s5 + $0x598] sm:$0xff] }
 0x2f3   :  { %8829 = vmatpush1.bf16.msra.mxu0 %v15221_v26  ;;  %8993 = vmatpush1.bf16.msra.mxu1 %v15223_v31  ;;  %v2554_v26 = vld [vmem:[%s22812_s5 + $0x358] sm:$0xff]  ;;  %v14297_v31 = vcombine.low %v2529_v12, %v2537_v16  ;;  %v2625_v12 = vld [vmem:[%s22812_s5 + $0x590] sm:$0xff] }
 0x2f4   :  { %9003 = vmatprep.subr.bf16.mxu0 %v14218_v33  ;;  %9167 = vmatprep.subr.bf16.mxu1 %v14220_v34  ;;  %v14314_v33 = vcombine.high %v2545_v29, %v2553_v25  ;;  %v14316_v34 = vcombine.high %v2546_v20, %v2554_v26  ;;  %v2633_v16 = vld [vmem:[%s22812_s5 + $0x5d0] sm:$0xff]  ;;  %v2634_v18 = vld [vmem:[%s22812_s5 + $0x5d8] sm:$0xff] }
 0x2f6   :  { %8831 = vmatmul.mubr.bf16.vlgmr.msra.gmra.mrb[12].mxu0 %v18826_v40  ;;  %8995 = vmatmul.mubr.bf16.vlgmr.msra.gmra.mrb[12].mxu1 %v18826_v40 }
 0x2f7   :  { %9004 = vmatpush1.bf16.msra.mxu0 %v14217_v39  ;;  %9035 = vmatprep.mubr.bf16.mxu0 %v18194_v47  ;;  %v14313_v39 = vcombine.low %v2545_v29, %v2553_v25  ;;  %v2641_v29 = vld [vmem:[%s22812_s5 + $0x610] sm:$0xff] }
 0x2f8   :  { %9168 = vmatpush1.bf16.msra.mxu1 %v14219_v41  ;;  %9199 = vmatprep.mubr.bf16.mxu1 %v18194_v47  ;;  %v14315_v41 = vcombine.low %v2546_v20, %v2554_v26  ;;  %v2649_v25 = vld [vmem:[%s22812_s5 + $0x650] sm:$0xff]  ;;  %v2642_v20 = vld [vmem:[%s22812_s5 + $0x618] sm:$0xff] }
 0x2f9   :  { %9005 = vmatprep.subr.bf16.mxu0 %v14234_v42  ;;  %9169 = vmatprep.subr.bf16.mxu1 %v14236_v43  ;;  %v14330_v42 = vcombine.high %v2561_v36, %v2569_v37  ;;  %v14332_v43 = vcombine.high %v2562_v54, %v2570_v38  ;;  %v2650_v26 = vld [vmem:[%s22812_s5 + $0x658] sm:$0xff] }
 0x2fb   :  { %9006 = vmatpush1.bf16.msra.mxu0 %v14233_v46  ;;  %v14329_v46 = vcombine.low %v2561_v36, %v2569_v37  ;;  %v2657_v36 = vld [vmem:[%s22812_s5 + $0x690] sm:$0xff] }
 0x2fc   :  { %9170 = vmatpush1.bf16.msra.mxu1 %v14235_v48  ;;  %9007 = vmatprep.subr.bf16.mxu0 %v14250_v49  ;;  %v14331_v48 = vcombine.low %v2562_v54, %v2570_v38  ;;  %v14346_v49 = vcombine.high %v2577_v14, %v2585_v30  ;;  %v2665_v37 = vld [vmem:[%s22812_s5 + $0x6d0] sm:$0xff]  ;;  %v2658_v54 = vld [vmem:[%s22812_s5 + $0x698] sm:$0xff] }
 0x2fd   :  { %9171 = vmatprep.subr.bf16.mxu1 %v14252_v51  ;;  %v14348_v51 = vcombine.high %v2578_v44, %v2586_v45  ;;  %v2666_v38 = vld [vmem:[%s22812_s5 + $0x6d8] sm:$0xff] }
 0x2ff   :  { %9008 = vmatpush1.bf16.msra.mxu0 %v14249_v60  ;;  %v14345_v60 = vcombine.low %v2577_v14, %v2585_v30  ;;  %v2673_v14 = vld [vmem:[%s22812_s5 + $0x710] sm:$0xff] }
 0x300   :  { %9172 = vmatpush1.bf16.msra.mxu1 %v14251_v61  ;;  %9009 = vmatprep.subr.bf16.mxu0 %v14266_v62  ;;  %v14347_v61 = vcombine.low %v2578_v44, %v2586_v45  ;;  %v14362_v62 = vcombine.high %v2593_v53, %v2601_v55  ;;  %v2681_v30 = vld [vmem:[%s22812_s5 + $0x750] sm:$0xff]  ;;  %v2674_v44 = vld [vmem:[%s22812_s5 + $0x718] sm:$0xff] }
 0x301   :  { %9173 = vmatprep.subr.bf16.mxu1 %v14268_v63  ;;  %v14364_v63 = vcombine.high %v2594_v56, %v2602_v59  ;;  %v2682_v45 = vld [vmem:[%s22812_s5 + $0x758] sm:$0xff] }
 0x303   :  { %9010 = vmatpush1.bf16.msra.mxu0 %v14265_v6  ;;  %v14361_v6 = vcombine.low %v2593_v53, %v2601_v55  ;;  %v2689_v53 = vld [vmem:[%s22812_s5 + $0x790] sm:$0xff] }
 0x304   :  { %9174 = vmatpush1.bf16.msra.mxu1 %v14267_v7  ;;  %9011 = vmatprep.subr.bf16.mxu0 %v14282_v35  ;;  %v14363_v7 = vcombine.low %v2594_v56, %v2602_v59  ;;  %v14378_v35 = vcombine.high %v2609_v0, %v2617_v2  ;;  %v2697_v55 = vld [vmem:[%s22812_s5 + $0x7d0] sm:$0xff]  ;;  %v2690_v56 = vld [vmem:[%s22812_s5 + $0x798] sm:$0xff] }
 0x305   :  { %9175 = vmatprep.subr.bf16.mxu1 %v14284_v9  ;;  %v14380_v9 = vcombine.high %v2610_v4, %v2618_v28  ;;  %v2698_v59 = vld [vmem:[%s22812_s5 + $0x7d8] sm:$0xff] }
 0x307   :  { %9012 = vmatpush1.bf16.msra.mxu0 %v14281_v21  ;;  %v14377_v21 = vcombine.low %v2609_v0, %v2617_v2  ;;  %v2705_v0 = vld [vmem:[%s22812_s5 + $0x810] sm:$0xff] }
 0x308   :  { %9176 = vmatpush1.bf16.msra.mxu1 %v14283_v22  ;;  %9013 = vmatprep.subr.bf16.mxu0 %v14298_v23  ;;  %v14379_v22 = vcombine.low %v2610_v4, %v2618_v28  ;;  %v14394_v23 = vcombine.high %v2625_v12, %v2633_v16  ;;  %v2713_v2 = vld [vmem:[%s22812_s5 + $0x850] sm:$0xff]  ;;  %v2706_v4 = vld [vmem:[%s22812_s5 + $0x818] sm:$0xff] }
 0x309   :  { %9177 = vmatprep.subr.bf16.mxu1 %v14300_v24  ;;  %v14396_v24 = vcombine.high %v2626_v17, %v2634_v18  ;;  %v2714_v28 = vld [vmem:[%s22812_s5 + $0x858] sm:$0xff] }
 0x30b   :  { %9014 = vmatpush1.bf16.msra.mxu0 %v14297_v31  ;;  %v14393_v31 = vcombine.low %v2625_v12, %v2633_v16  ;;  %v2721_v12 = vld [vmem:[%s22812_s5 + $0x890] sm:$0xff] }
 0x30c   :  { %9178 = vmatpush1.bf16.msra.mxu1 %v14299_v32  ;;  %9015 = vmatprep.subr.bf16.mxu0 %v14314_v33  ;;  %v14395_v32 = vcombine.low %v2626_v17, %v2634_v18  ;;  %v14410_v33 = vcombine.high %v2641_v29, %v2649_v25  ;;  %v2729_v16 = vld [vmem:[%s22812_s5 + $0x8d0] sm:$0xff]  ;;  %v14473_v17 = vcombine.low %v2705_v0, %v2713_v2  ;;  %v2722_v18 = vld [vmem:[%s22812_s5 + $0x898] sm:$0xff] }
 0x30d   :  { %9179 = vmatprep.subr.bf16.mxu1 %v14316_v34  ;;  %v14412_v34 = vcombine.high %v2642_v20, %v2650_v26 }
 0x30f   :  { %9016 = vmatpush1.bf16.msra.mxu0 %v14313_v39  ;;  %v14409_v39 = vcombine.low %v2641_v29, %v2649_v25  ;;  %v2745_v29 = vld [vmem:[%s22812_s5 + $0x950] sm:$0xff] }
 0x310   :  { %9180 = vmatpush1.bf16.msra.mxu1 %v14315_v41  ;;  %9017 = vmatprep.subr.bf16.mxu0 %v14330_v42  ;;  %v14411_v41 = vcombine.low %v2642_v20, %v2650_v26  ;;  %v14426_v42 = vcombine.high %v2657_v36, %v2665_v37  ;;  %v2738_v20 = vld [vmem:[%s22812_s5 + $0x918] sm:$0xff] }
 0x311   :  { %9181 = vmatprep.subr.bf16.mxu1 %v14332_v43  ;;  %v14428_v43 = vcombine.high %v2658_v54, %v2666_v38  ;;  %v2746_v26 = vld [vmem:[%s22812_s5 + $0x958] sm:$0xff] }
 0x313   :  { %9018 = vmatpush1.bf16.msra.mxu0 %v14329_v46  ;;  %v14425_v46 = vcombine.low %v2657_v36, %v2665_v37  ;;  %v2753_v36 = vld [vmem:[%s22812_s5 + $0x990] sm:$0xff] }
 0x314   :  { %9182 = vmatpush1.bf16.msra.mxu1 %v14331_v48  ;;  %9019 = vmatprep.subr.bf16.mxu0 %v14346_v49  ;;  %v14427_v48 = vcombine.low %v2658_v54, %v2666_v38  ;;  %v14442_v49 = vcombine.high %v2673_v14, %v2681_v30  ;;  %v2761_v37 = vld [vmem:[%s22812_s5 + $0x9d0] sm:$0xff]  ;;  %v2754_v54 = vld [vmem:[%s22812_s5 + $0x998] sm:$0xff] }
 0x315   :  { %9183 = vmatprep.subr.bf16.mxu1 %v14348_v51  ;;  %v14444_v51 = vcombine.high %v2674_v44, %v2682_v45  ;;  %v2762_v38 = vld [vmem:[%s22812_s5 + $0x9d8] sm:$0xff] }
 0x317   :  { %9020 = vmatpush1.bf16.msra.mxu0 %v14345_v60  ;;  %v14441_v60 = vcombine.low %v2673_v14, %v2681_v30  ;;  %v2769_v14 = vld [vmem:[%s22812_s5 + $0xa10] sm:$0xff] }
 0x318   :  { %9184 = vmatpush1.bf16.msra.mxu1 %v14347_v61  ;;  %9021 = vmatprep.subr.bf16.mxu0 %v14362_v62  ;;  %v14443_v61 = vcombine.low %v2674_v44, %v2682_v45  ;;  %v14458_v62 = vcombine.high %v2689_v53, %v2697_v55  ;;  %v2777_v30 = vld [vmem:[%s22812_s5 + $0xa50] sm:$0xff]  ;;  %v2770_v44 = vld [vmem:[%s22812_s5 + $0xa18] sm:$0xff] }
 0x319   :  { %9185 = vmatprep.subr.bf16.mxu1 %v14364_v63  ;;  %v14460_v63 = vcombine.high %v2690_v56, %v2698_v59  ;;  %v2778_v45 = vld [vmem:[%s22812_s5 + $0xa58] sm:$0xff] }
 0x31b   :  { %9022 = vmatpush1.bf16.msra.mxu0 %v14361_v6  ;;  %v14457_v6 = vcombine.low %v2689_v53, %v2697_v55  ;;  %v2785_v53 = vld [vmem:[%s22812_s5 + $0xa90] sm:$0xff] }
 0x31c   :  { %9186 = vmatpush1.bf16.msra.mxu1 %v14363_v7  ;;  %9023 = vmatprep.subr.bf16.mxu0 %v14378_v35  ;;  %v14459_v7 = vcombine.low %v2690_v56, %v2698_v59  ;;  %v14474_v35 = vcombine.high %v2705_v0, %v2713_v2  ;;  %v2793_v55 = vld [vmem:[%s22812_s5 + $0xad0] sm:$0xff]  ;;  %v2786_v56 = vld [vmem:[%s22812_s5 + $0xa98] sm:$0xff] }
 0x31d   :  { %9187 = vmatprep.subr.bf16.mxu1 %v14380_v9  ;;  %v14476_v9 = vcombine.high %v2706_v4, %v2714_v28  ;;  %v2794_v59 = vld [vmem:[%s22812_s5 + $0xad8] sm:$0xff]  ;;  %v2801_v0 = vld [vmem:[%s22812_s5 + $0xb10] sm:$0xff] }
 0x31e   :  { %v2809_v2 = vld [vmem:[%s22812_s5 + $0xb50] sm:$0xff] }
 0x31f   :  { %9024 = vmatpush1.bf16.msra.mxu0 %v14377_v21  ;;  %v2730_v21 = vld [vmem:[%s22812_s5 + $0x8d8] sm:$0xff] }
 0x320   :  { %9188 = vmatpush1.bf16.msra.mxu1 %v14379_v22  ;;  %9025 = vmatprep.subr.bf16.mxu0 %v14394_v23  ;;  %v14475_v22 = vcombine.low %v2706_v4, %v2714_v28  ;;  %v14490_v23 = vcombine.high %v2721_v12, %v2729_v16  ;;  %v14492_v25 = vcombine.high %v2722_v18, %v2730_v21  ;;  %v2802_v4 = vld [vmem:[%s22812_s5 + $0xb18] sm:$0xff] }
 0x321   :  { %9189 = vmatprep.subr.bf16.mxu1 %v14396_v24  ;;  %v2737_v24 = vld [vmem:[%s22812_s5 + $0x910] sm:$0xff]  ;;  %v2810_v28 = vld [vmem:[%s22812_s5 + $0xb58] sm:$0xff] }
 0x323   :  { %9026 = vmatpush1.bf16.msra.mxu0 %v14393_v31  ;;  %v14489_v31 = vcombine.low %v2721_v12, %v2729_v16  ;;  %v2817_v12 = vld [vmem:[%s22812_s5 + $0xb90] sm:$0xff] }
 0x324   :  { %9190 = vmatpush1.bf16.msra.mxu1 %v14395_v32  ;;  %9027 = vmatprep.subr.bf16.mxu0 %v14410_v33  ;;  %v14491_v32 = vcombine.low %v2722_v18, %v2730_v21  ;;  %v14506_v33 = vcombine.high %v2737_v24, %v2745_v29  ;;  %v2825_v16 = vld [vmem:[%s22812_s5 + $0xbd0] sm:$0xff]  ;;  %v2826_v18 = vld [vmem:[%s22812_s5 + $0xbd8] sm:$0xff]  ;;  %v14569_v21 = vcombine.low %v2801_v0, %v2809_v2 }
 0x325   :  { %9191 = vmatprep.subr.bf16.mxu1 %v14412_v34  ;;  %v14508_v34 = vcombine.high %v2738_v20, %v2746_v26 }
 0x327   :  { %9028 = vmatpush1.bf16.msra.mxu0 %v14409_v39  ;;  %v14505_v39 = vcombine.low %v2737_v24, %v2745_v29  ;;  %v2833_v29 = vld [vmem:[%s22812_s5 + $0xc10] sm:$0xff] }
 0x328   :  { %9192 = vmatpush1.bf16.msra.mxu1 %v14411_v41  ;;  %9029 = vmatprep.subr.bf16.mxu0 %v14426_v42  ;;  %v14507_v41 = vcombine.low %v2738_v20, %v2746_v26  ;;  %v14522_v42 = vcombine.high %v2753_v36, %v2761_v37  ;;  %v2834_v20 = vld [vmem:[%s22812_s5 + $0xc18] sm:$0xff] }
 0x329   :  { %9193 = vmatprep.subr.bf16.mxu1 %v14428_v43  ;;  %v14524_v43 = vcombine.high %v2754_v54, %v2762_v38  ;;  %v2842_v26 = vld [vmem:[%s22812_s5 + $0xc58] sm:$0xff] }
 0x32b   :  { %9030 = vmatpush1.bf16.msra.mxu0 %v14425_v46  ;;  %v14521_v46 = vcombine.low %v2753_v36, %v2761_v37  ;;  %v2849_v36 = vld [vmem:[%s22812_s5 + $0xc90] sm:$0xff] }
 0x32c   :  { %9194 = vmatpush1.bf16.msra.mxu1 %v14427_v48  ;;  %9031 = vmatprep.subr.bf16.mxu0 %v14442_v49  ;;  %v14523_v48 = vcombine.low %v2754_v54, %v2762_v38  ;;  %v14538_v49 = vcombine.high %v2769_v14, %v2777_v30  ;;  %v2857_v37 = vld [vmem:[%s22812_s5 + $0xcd0] sm:$0xff]  ;;  %v2850_v54 = vld [vmem:[%s22812_s5 + $0xc98] sm:$0xff] }
 0x32d   :  { %9195 = vmatprep.subr.bf16.mxu1 %v14444_v51  ;;  %v14540_v51 = vcombine.high %v2770_v44, %v2778_v45  ;;  %v2858_v38 = vld [vmem:[%s22812_s5 + $0xcd8] sm:$0xff] }
 0x32f   :  { %9032 = vmatpush1.bf16.msra.mxu0 %v14441_v60  ;;  %v14537_v60 = vcombine.low %v2769_v14, %v2777_v30  ;;  %v2865_v14 = vld [vmem:[%s22812_s5 + $0xd10] sm:$0xff] }
 0x330   :  { %9196 = vmatpush1.bf16.msra.mxu1 %v14443_v61  ;;  %9033 = vmatprep.subr.bf16.mxu0 %v14458_v62  ;;  %v14539_v61 = vcombine.low %v2770_v44, %v2778_v45  ;;  %v14554_v62 = vcombine.high %v2785_v53, %v2793_v55  ;;  %v2873_v30 = vld [vmem:[%s22812_s5 + $0xd50] sm:$0xff]  ;;  %v2866_v44 = vld [vmem:[%s22812_s5 + $0xd18] sm:$0xff] }
 0x331   :  { %9197 = vmatprep.subr.bf16.mxu1 %v14460_v63  ;;  %v14556_v63 = vcombine.high %v2786_v56, %v2794_v59  ;;  %v2874_v45 = vld [vmem:[%s22812_s5 + $0xd58] sm:$0xff] }
 0x333   :  { %9034 = vmatpush1.bf16.msra.mxu0 %v14457_v6  ;;  %v14553_v6 = vcombine.low %v2785_v53, %v2793_v55  ;;  %v2881_v53 = vld [vmem:[%s22812_s5 + $0xd90] sm:$0xff] }
 0x334   :  { %9198 = vmatpush1.bf16.msra.mxu1 %v14459_v7  ;;  %9044 = vmatprep.subr.bf16.mxu0 %v14474_v35  ;;  %v14555_v7 = vcombine.low %v2786_v56, %v2794_v59  ;;  %v14570_v35 = vcombine.high %v2801_v0, %v2809_v2  ;;  %v2889_v55 = vld [vmem:[%s22812_s5 + $0xdd0] sm:$0xff]  ;;  %v2882_v56 = vld [vmem:[%s22812_s5 + $0xd98] sm:$0xff] }
 0x335   :  { %9208 = vmatprep.subr.bf16.mxu1 %v14476_v9  ;;  %v14572_v9 = vcombine.high %v2802_v4, %v2810_v28  ;;  %v2890_v59 = vld [vmem:[%s22812_s5 + $0xdd8] sm:$0xff]  ;;  %v2897_v0 = vld [vmem:[%s22812_s5 + $0xe10] sm:$0xff] }
 0x336   :  { %9036 = vmatmul.mubr.bf16.vlgmr.msra.gmra.mrb[16].mxu0 %v18196_v50  ;;  %v2905_v2 = vld [vmem:[%s22812_s5 + $0xe50] sm:$0xff] }
 0x337   :  { %9200 = vmatmul.mubr.bf16.vlgmr.msra.gmra.mrb[16].mxu1 %v18196_v50  ;;  %9045 = vmatpush1.bf16.msra.mxu0 %v14473_v17  ;;  %v2818_v17 = vld [vmem:[%s22812_s5 + $0xb98] sm:$0xff] }
 0x338   :  { %9076 = vmatprep.mubr.bf16.mxu0 %v18212_v58  ;;  %9209 = vmatpush1.bf16.msra.mxu1 %v14475_v22  ;;  %v14571_v22 = vcombine.low %v2802_v4, %v2810_v28  ;;  %v14588_v24 = vcombine.high %v2818_v17, %v2826_v18  ;;  %v2898_v4 = vld [vmem:[%s22812_s5 + $0xe18] sm:$0xff] }
 0x339   :  { %9240 = vmatprep.mubr.bf16.mxu1 %v18212_v58  ;;  %9046 = vmatprep.subr.bf16.mxu0 %v14490_v23  ;;  %v14586_v23 = vcombine.high %v2817_v12, %v2825_v16  ;;  %v2906_v28 = vld [vmem:[%s22812_s5 + $0xe58] sm:$0xff] }
 0x33a   :  { %9210 = vmatprep.subr.bf16.mxu1 %v14492_v25  ;;  %v2841_v25 = vld [vmem:[%s22812_s5 + $0xc50] sm:$0xff] }
 0x33b   :  { %9047 = vmatpush1.bf16.msra.mxu0 %v14489_v31  ;;  %v14585_v31 = vcombine.low %v2817_v12, %v2825_v16  ;;  %v2913_v12 = vld [vmem:[%s22812_s5 + $0xe90] sm:$0xff] }
 0x33c   :  { %9211 = vmatpush1.bf16.msra.mxu1 %v14491_v32  ;;  %9048 = vmatprep.subr.bf16.mxu0 %v14506_v33  ;;  %v14587_v32 = vcombine.low %v2818_v17, %v2826_v18  ;;  %v14602_v33 = vcombine.high %v2833_v29, %v2841_v25  ;;  %v2921_v16 = vld [vmem:[%s22812_s5 + $0xed0] sm:$0xff]  ;;  %v2914_v17 = vld [vmem:[%s22812_s5 + $0xe98] sm:$0xff] }
 0x33d   :  { %9212 = vmatprep.subr.bf16.mxu1 %v14508_v34  ;;  %v14604_v34 = vcombine.high %v2834_v20, %v2842_v26  ;;  %v2922_v18 = vld [vmem:[%s22812_s5 + $0xed8] sm:$0xff] }
 0x33f   :  { %9049 = vmatpush1.bf16.msra.mxu0 %v14505_v39  ;;  %v14601_v39 = vcombine.low %v2833_v29, %v2841_v25  ;;  %v2929_v29 = vld [vmem:[%s22812_s5 + $0xf10] sm:$0xff] }
 0x340   :  { %9213 = vmatpush1.bf16.msra.mxu1 %v14507_v41  ;;  %9050 = vmatprep.subr.bf16.mxu0 %v14522_v42  ;;  %v14603_v41 = vcombine.low %v2834_v20, %v2842_v26  ;;  %v14618_v42 = vcombine.high %v2849_v36, %v2857_v37  ;;  %v2937_v25 = vld [vmem:[%s22812_s5 + $0xf50] sm:$0xff]  ;;  %v2930_v20 = vld [vmem:[%s22812_s5 + $0xf18] sm:$0xff] }
 0x341   :  { %9214 = vmatprep.subr.bf16.mxu1 %v14524_v43  ;;  %v14620_v43 = vcombine.high %v2850_v54, %v2858_v38  ;;  %v2938_v26 = vld [vmem:[%s22812_s5 + $0xf58] sm:$0xff] }
 0x343   :  { %9051 = vmatpush1.bf16.msra.mxu0 %v14521_v46  ;;  %v14617_v46 = vcombine.low %v2849_v36, %v2857_v37  ;;  %v2945_v36 = vld [vmem:[%s22812_s5 + $0xf90] sm:$0xff] }
 0x344   :  { %9215 = vmatpush1.bf16.msra.mxu1 %v14523_v48  ;;  %9052 = vmatprep.subr.bf16.mxu0 %v14538_v49  ;;  %v14619_v48 = vcombine.low %v2850_v54, %v2858_v38  ;;  %v14634_v49 = vcombine.high %v2865_v14, %v2873_v30  ;;  %v2953_v37 = vld [vmem:[%s22812_s5 + $0xfd0] sm:$0xff]  ;;  %v2946_v54 = vld [vmem:[%s22812_s5 + $0xf98] sm:$0xff] }
 0x345   :  { %9216 = vmatprep.subr.bf16.mxu1 %v14540_v51  ;;  %v14636_v51 = vcombine.high %v2866_v44, %v2874_v45  ;;  %v2954_v38 = vld [vmem:[%s22812_s5 + $0xfd8] sm:$0xff] }
 0x347   :  { %9053 = vmatpush1.bf16.msra.mxu0 %v14537_v60  ;;  %v14633_v60 = vcombine.low %v2865_v14, %v2873_v30  ;;  %v2961_v14 = vld [vmem:[%s22812_s5 + $0x1010] sm:$0xff] }
 0x348   :  { %9217 = vmatpush1.bf16.msra.mxu1 %v14539_v61  ;;  %9054 = vmatprep.subr.bf16.mxu0 %v14554_v62  ;;  %v14635_v61 = vcombine.low %v2866_v44, %v2874_v45  ;;  %v14650_v62 = vcombine.high %v2881_v53, %v2889_v55  ;;  %v2969_v30 = vld [vmem:[%s22812_s5 + $0x1050] sm:$0xff]  ;;  %v2962_v44 = vld [vmem:[%s22812_s5 + $0x1018] sm:$0xff] }
 0x349   :  { %9218 = vmatprep.subr.bf16.mxu1 %v14556_v63  ;;  %v14652_v63 = vcombine.high %v2882_v56, %v2890_v59  ;;  %v2970_v45 = vld [vmem:[%s22812_s5 + $0x1058] sm:$0xff] }
 0x34b   :  { %9055 = vmatpush1.bf16.msra.mxu0 %v14553_v6  ;;  %v14649_v6 = vcombine.low %v2881_v53, %v2889_v55  ;;  %v2977_v53 = vld [vmem:[%s22812_s5 + $0x1090] sm:$0xff] }
 0x34c   :  { %9219 = vmatpush1.bf16.msra.mxu1 %v14555_v7  ;;  %9056 = vmatprep.subr.bf16.mxu0 %v14570_v35  ;;  %v14651_v7 = vcombine.low %v2882_v56, %v2890_v59  ;;  %v14666_v35 = vcombine.high %v2897_v0, %v2905_v2  ;;  %v2985_v55 = vld [vmem:[%s22812_s5 + $0x10d0] sm:$0xff]  ;;  %v14729_v56 = vcombine.low %v2961_v14, %v2969_v30  ;;  %v2978_v59 = vld [vmem:[%s22812_s5 + $0x1098] sm:$0xff] }
 0x34d   :  { %9220 = vmatprep.subr.bf16.mxu1 %v14572_v9  ;;  %v14668_v9 = vcombine.high %v2898_v4, %v2906_v28 }
 0x34f   :  { %9057 = vmatpush1.bf16.msra.mxu0 %v14569_v21  ;;  %v14665_v21 = vcombine.low %v2897_v0, %v2905_v2  ;;  %v3001_v0 = vld [vmem:[%s22812_s5 + $0x1150] sm:$0xff] }
 0x350   :  { %9221 = vmatpush1.bf16.msra.mxu1 %v14571_v22  ;;  %9058 = vmatprep.subr.bf16.mxu0 %v14586_v23  ;;  %v14667_v22 = vcombine.low %v2898_v4, %v2906_v28  ;;  %v14682_v23 = vcombine.high %v2913_v12, %v2921_v16  ;;  %v2994_v4 = vld [vmem:[%s22812_s5 + $0x1118] sm:$0xff] }
 0x351   :  { %9222 = vmatprep.subr.bf16.mxu1 %v14588_v24  ;;  %v14684_v24 = vcombine.high %v2914_v17, %v2922_v18  ;;  %v3002_v28 = vld [vmem:[%s22812_s5 + $0x1158] sm:$0xff] }
 0x353   :  { %9059 = vmatpush1.bf16.msra.mxu0 %v14585_v31  ;;  %v14681_v31 = vcombine.low %v2913_v12, %v2921_v16  ;;  %v3009_v12 = vld [vmem:[%s22812_s5 + $0x1190] sm:$0xff] }
 0x354   :  { %9223 = vmatpush1.bf16.msra.mxu1 %v14587_v32  ;;  %9060 = vmatprep.subr.bf16.mxu0 %v14602_v33  ;;  %v14683_v32 = vcombine.low %v2914_v17, %v2922_v18  ;;  %v14698_v33 = vcombine.high %v2929_v29, %v2937_v25  ;;  %v3017_v16 = vld [vmem:[%s22812_s5 + $0x11d0] sm:$0xff]  ;;  %v3010_v17 = vld [vmem:[%s22812_s5 + $0x1198] sm:$0xff] }
 0x355   :  { %9224 = vmatprep.subr.bf16.mxu1 %v14604_v34  ;;  %v14700_v34 = vcombine.high %v2930_v20, %v2938_v26  ;;  %v3018_v18 = vld [vmem:[%s22812_s5 + $0x11d8] sm:$0xff] }
 0x357   :  { %9061 = vmatpush1.bf16.msra.mxu0 %v14601_v39  ;;  %v14697_v39 = vcombine.low %v2929_v29, %v2937_v25  ;;  %v3025_v29 = vld [vmem:[%s22812_s5 + $0x1210] sm:$0xff] }
 0x358   :  { %9225 = vmatpush1.bf16.msra.mxu1 %v14603_v41  ;;  %9062 = vmatprep.subr.bf16.mxu0 %v14618_v42  ;;  %v14699_v41 = vcombine.low %v2930_v20, %v2938_v26  ;;  %v14714_v42 = vcombine.high %v2945_v36, %v2953_v37  ;;  %v3033_v25 = vld [vmem:[%s22812_s5 + $0x1250] sm:$0xff]  ;;  %v3026_v20 = vld [vmem:[%s22812_s5 + $0x1218] sm:$0xff] }
 0x359   :  { %9226 = vmatprep.subr.bf16.mxu1 %v14620_v43  ;;  %v14716_v43 = vcombine.high %v2946_v54, %v2954_v38  ;;  %v3034_v26 = vld [vmem:[%s22812_s5 + $0x1258] sm:$0xff] }
 0x35b   :  { %9063 = vmatpush1.bf16.msra.mxu0 %v14617_v46  ;;  %v14713_v46 = vcombine.low %v2945_v36, %v2953_v37  ;;  %v3041_v36 = vld [vmem:[%s22812_s5 + $0x1290] sm:$0xff] }
 0x35c   :  { %9227 = vmatpush1.bf16.msra.mxu1 %v14619_v48  ;;  %9064 = vmatprep.subr.bf16.mxu0 %v14634_v49  ;;  %v14715_v48 = vcombine.low %v2946_v54, %v2954_v38  ;;  %v14730_v49 = vcombine.high %v2961_v14, %v2969_v30  ;;  %v3049_v37 = vld [vmem:[%s22812_s5 + $0x12d0] sm:$0xff]  ;;  %v3042_v54 = vld [vmem:[%s22812_s5 + $0x1298] sm:$0xff] }
 0x35d   :  { %9228 = vmatprep.subr.bf16.mxu1 %v14636_v51  ;;  %v14732_v51 = vcombine.high %v2962_v44, %v2970_v45  ;;  %v3050_v38 = vld [vmem:[%s22812_s5 + $0x12d8] sm:$0xff]  ;;  %v3057_v14 = vld [vmem:[%s22812_s5 + $0x1310] sm:$0xff] }
 0x35e   :  { %v3065_v30 = vld [vmem:[%s22812_s5 + $0x1350] sm:$0xff] }
 0x35f   :  { %9065 = vmatpush1.bf16.msra.mxu0 %v14633_v60  ;;  %v2986_v60 = vld [vmem:[%s22812_s5 + $0x10d8] sm:$0xff] }
 0x360   :  { %9229 = vmatpush1.bf16.msra.mxu1 %v14635_v61  ;;  %9066 = vmatprep.subr.bf16.mxu0 %v14650_v62  ;;  %v14731_v61 = vcombine.low %v2962_v44, %v2970_v45  ;;  %v14746_v62 = vcombine.high %v2977_v53, %v2985_v55  ;;  %v14748_v2 = vcombine.high %v2978_v59, %v2986_v60  ;;  %v3058_v44 = vld [vmem:[%s22812_s5 + $0x1318] sm:$0xff] }
 0x361   :  { %9230 = vmatprep.subr.bf16.mxu1 %v14652_v63  ;;  %v2993_v63 = vld [vmem:[%s22812_s5 + $0x1110] sm:$0xff]  ;;  %v3066_v45 = vld [vmem:[%s22812_s5 + $0x1358] sm:$0xff] }
 0x363   :  { %9067 = vmatpush1.bf16.msra.mxu0 %v14649_v6  ;;  %v14745_v6 = vcombine.low %v2977_v53, %v2985_v55  ;;  %v3073_v53 = vld [vmem:[%s22812_s5 + $0x1390] sm:$0xff] }
 0x364   :  { %9231 = vmatpush1.bf16.msra.mxu1 %v14651_v7  ;;  %9068 = vmatprep.subr.bf16.mxu0 %v14666_v35  ;;  %v14747_v7 = vcombine.low %v2978_v59, %v2986_v60  ;;  %v14762_v35 = vcombine.high %v2993_v63, %v3001_v0  ;;  %v3081_v55 = vld [vmem:[%s22812_s5 + $0x13d0] sm:$0xff]  ;;  %v3082_v59 = vld [vmem:[%s22812_s5 + $0x13d8] sm:$0xff]  ;;  %v14825_v60 = vcombine.low %v3057_v14, %v3065_v30 }
 0x365   :  { %9232 = vmatprep.subr.bf16.mxu1 %v14668_v9  ;;  %v14764_v9 = vcombine.high %v2994_v4, %v3002_v28 }
 0x367   :  { %9069 = vmatpush1.bf16.msra.mxu0 %v14665_v21  ;;  %v14761_v21 = vcombine.low %v2993_v63, %v3001_v0  ;;  %v3089_v0 = vld [vmem:[%s22812_s5 + $0x1410] sm:$0xff] }
 0x368   :  { %9233 = vmatpush1.bf16.msra.mxu1 %v14667_v22  ;;  %9070 = vmatprep.subr.bf16.mxu0 %v14682_v23  ;;  %v14763_v22 = vcombine.low %v2994_v4, %v3002_v28  ;;  %v14778_v23 = vcombine.high %v3009_v12, %v3017_v16  ;;  %v3090_v4 = vld [vmem:[%s22812_s5 + $0x1418] sm:$0xff] }
 0x369   :  { %9234 = vmatprep.subr.bf16.mxu1 %v14684_v24  ;;  %v14780_v24 = vcombine.high %v3010_v17, %v3018_v18  ;;  %v3098_v28 = vld [vmem:[%s22812_s5 + $0x1458] sm:$0xff] }
 0x36b   :  { %9071 = vmatpush1.bf16.msra.mxu0 %v14681_v31  ;;  %v14777_v31 = vcombine.low %v3009_v12, %v3017_v16  ;;  %v3105_v12 = vld [vmem:[%s22812_s5 + $0x1490] sm:$0xff] }
 0x36c   :  { %9235 = vmatpush1.bf16.msra.mxu1 %v14683_v32  ;;  %9072 = vmatprep.subr.bf16.mxu0 %v14698_v33  ;;  %v14779_v32 = vcombine.low %v3010_v17, %v3018_v18  ;;  %v14794_v33 = vcombine.high %v3025_v29, %v3033_v25  ;;  %v3113_v16 = vld [vmem:[%s22812_s5 + $0x14d0] sm:$0xff]  ;;  %v3106_v17 = vld [vmem:[%s22812_s5 + $0x1498] sm:$0xff] }
 0x36d   :  { %9236 = vmatprep.subr.bf16.mxu1 %v14700_v34  ;;  %v14796_v34 = vcombine.high %v3026_v20, %v3034_v26  ;;  %v3114_v18 = vld [vmem:[%s22812_s5 + $0x14d8] sm:$0xff] }
 0x36f   :  { %9073 = vmatpush1.bf16.msra.mxu0 %v14697_v39  ;;  %v14793_v39 = vcombine.low %v3025_v29, %v3033_v25  ;;  %v3121_v29 = vld [vmem:[%s22812_s5 + $0x1510] sm:$0xff] }
 0x370   :  { %9237 = vmatpush1.bf16.msra.mxu1 %v14699_v41  ;;  %9074 = vmatprep.subr.bf16.mxu0 %v14714_v42  ;;  %v14795_v41 = vcombine.low %v3026_v20, %v3034_v26  ;;  %v14810_v42 = vcombine.high %v3041_v36, %v3049_v37  ;;  %v3129_v25 = vld [vmem:[%s22812_s5 + $0x1550] sm:$0xff]  ;;  %v3122_v20 = vld [vmem:[%s22812_s5 + $0x1518] sm:$0xff] }
 0x371   :  { %9238 = vmatprep.subr.bf16.mxu1 %v14716_v43  ;;  %v14812_v43 = vcombine.high %v3042_v54, %v3050_v38  ;;  %v3130_v26 = vld [vmem:[%s22812_s5 + $0x1558] sm:$0xff] }
 0x373   :  { %9075 = vmatpush1.bf16.msra.mxu0 %v14713_v46  ;;  %v14809_v46 = vcombine.low %v3041_v36, %v3049_v37  ;;  %v3137_v36 = vld [vmem:[%s22812_s5 + $0x1590] sm:$0xff] }
 0x374   :  { %9239 = vmatpush1.bf16.msra.mxu1 %v14715_v48  ;;  %9085 = vmatprep.subr.bf16.mxu0 %v14730_v49  ;;  %v14811_v48 = vcombine.low %v3042_v54, %v3050_v38  ;;  %v14826_v49 = vcombine.high %v3057_v14, %v3065_v30  ;;  %v3145_v37 = vld [vmem:[%s22812_s5 + $0x15d0] sm:$0xff]  ;;  %v3138_v54 = vld [vmem:[%s22812_s5 + $0x1598] sm:$0xff] }
 0x375   :  { %9249 = vmatprep.subr.bf16.mxu1 %v14732_v51  ;;  %v14828_v51 = vcombine.high %v3058_v44, %v3066_v45  ;;  %v3146_v38 = vld [vmem:[%s22812_s5 + $0x15d8] sm:$0xff]  ;;  %v3153_v14 = vld [vmem:[%s22812_s5 + $0x1610] sm:$0xff] }
 0x376   :  { %9077 = vmatmul.mubr.bf16.vlgmr.msra.gmra.mrb[16].mxu0 %v18401_v10  ;;  %v3161_v30 = vld [vmem:[%s22812_s5 + $0x1650] sm:$0xff] }
 0x377   :  { %9241 = vmatmul.mubr.bf16.vlgmr.msra.gmra.mrb[16].mxu1 %v18401_v10  ;;  %9086 = vmatpush1.bf16.msra.mxu0 %v14729_v56  ;;  %v3074_v56 = vld [vmem:[%s22812_s5 + $0x1398] sm:$0xff] }
 0x378   :  { %9117 = vmatprep.mubr.bf16.mxu0 %v18614_v3  ;;  %9250 = vmatpush1.bf16.msra.mxu1 %v14731_v61  ;;  %v14827_v61 = vcombine.low %v3058_v44, %v3066_v45  ;;  %v14844_v63 = vcombine.high %v3074_v56, %v3082_v59  ;;  %v3154_v44 = vld [vmem:[%s22812_s5 + $0x1618] sm:$0xff] }
 0x379   :  { %9281 = vmatprep.mubr.bf16.mxu1 %v18614_v3  ;;  %9087 = vmatprep.subr.bf16.mxu0 %v14746_v62  ;;  %v14842_v62 = vcombine.high %v3073_v53, %v3081_v55  ;;  %v3162_v45 = vld [vmem:[%s22812_s5 + $0x1658] sm:$0xff] }
 0x37a   :  { %9251 = vmatprep.subr.bf16.mxu1 %v14748_v2  ;;  %v3097_v2 = vld [vmem:[%s22812_s5 + $0x1450] sm:$0xff] }
 0x37b   :  { %9088 = vmatpush1.bf16.msra.mxu0 %v14745_v6  ;;  %v14841_v6 = vcombine.low %v3073_v53, %v3081_v55  ;;  %v3169_v53 = vld [vmem:[%s22812_s5 + $0x1690] sm:$0xff] }
 0x37c   :  { %9252 = vmatpush1.bf16.msra.mxu1 %v14747_v7  ;;  %9089 = vmatprep.subr.bf16.mxu0 %v14762_v35  ;;  %v14843_v7 = vcombine.low %v3074_v56, %v3082_v59  ;;  %v14858_v35 = vcombine.high %v3089_v0, %v3097_v2  ;;  %v3177_v55 = vld [vmem:[%s22812_s5 + $0x16d0] sm:$0xff]  ;;  %v3170_v56 = vld [vmem:[%s22812_s5 + $0x1698] sm:$0xff] }
 0x37d   :  { %9253 = vmatprep.subr.bf16.mxu1 %v14764_v9  ;;  %v14860_v9 = vcombine.high %v3090_v4, %v3098_v28  ;;  %v3178_v59 = vld [vmem:[%s22812_s5 + $0x16d8] sm:$0xff] }
 0x37f   :  { %9090 = vmatpush1.bf16.msra.mxu0 %v14761_v21  ;;  %v14857_v21 = vcombine.low %v3089_v0, %v3097_v2  ;;  %v3185_v0 = vld [vmem:[%s22812_s5 + $0x1710] sm:$0xff] }
 0x380   :  { %9254 = vmatpush1.bf16.msra.mxu1 %v14763_v22  ;;  %9091 = vmatprep.subr.bf16.mxu0 %v14778_v23  ;;  %v14859_v22 = vcombine.low %v3090_v4, %v3098_v28  ;;  %v14874_v23 = vcombine.high %v3105_v12, %v3113_v16  ;;  %v3193_v2 = vld [vmem:[%s22812_s5 + $0x1750] sm:$0xff]  ;;  %v3186_v4 = vld [vmem:[%s22812_s5 + $0x1718] sm:$0xff] }
 0x381   :  { %9255 = vmatprep.subr.bf16.mxu1 %v14780_v24  ;;  %v14876_v24 = vcombine.high %v3106_v17, %v3114_v18  ;;  %v3194_v28 = vld [vmem:[%s22812_s5 + $0x1758] sm:$0xff] }
 0x383   :  { %9092 = vmatpush1.bf16.msra.mxu0 %v14777_v31  ;;  %v14873_v31 = vcombine.low %v3105_v12, %v3113_v16  ;;  %v3201_v12 = vld [vmem:[%s22812_s5 + $0x1790] sm:$0xff] }
 0x384   :  { %9256 = vmatpush1.bf16.msra.mxu1 %v14779_v32  ;;  %9093 = vmatprep.subr.bf16.mxu0 %v14794_v33  ;;  %v14875_v32 = vcombine.low %v3106_v17, %v3114_v18  ;;  %v14890_v33 = vcombine.high %v3121_v29, %v3129_v25  ;;  %v3209_v16 = vld [vmem:[%s22812_s5 + $0x17d0] sm:$0xff]  ;;  %v3202_v17 = vld [vmem:[%s22812_s5 + $0x1798] sm:$0xff] }
 0x385   :  { %9257 = vmatprep.subr.bf16.mxu1 %v14796_v34  ;;  %v14892_v34 = vcombine.high %v3122_v20, %v3130_v26  ;;  %v3210_v18 = vld [vmem:[%s22812_s5 + $0x17d8] sm:$0xff] }
 0x387   :  { %9094 = vmatpush1.bf16.msra.mxu0 %v14793_v39  ;;  %v14889_v39 = vcombine.low %v3121_v29, %v3129_v25  ;;  %v3217_v29 = vld [vmem:[%s22812_s5 + $0x1810] sm:$0xff] }
 0x388   :  { %9258 = vmatpush1.bf16.msra.mxu1 %v14795_v41  ;;  %9095 = vmatprep.subr.bf16.mxu0 %v14810_v42  ;;  %v14891_v41 = vcombine.low %v3122_v20, %v3130_v26  ;;  %v14906_v42 = vcombine.high %v3137_v36, %v3145_v37  ;;  %v3225_v25 = vld [vmem:[%s22812_s5 + $0x1850] sm:$0xff]  ;;  %v3218_v20 = vld [vmem:[%s22812_s5 + $0x1818] sm:$0xff] }
 0x389   :  { %9259 = vmatprep.subr.bf16.mxu1 %v14812_v43  ;;  %v14908_v43 = vcombine.high %v3138_v54, %v3146_v38  ;;  %v3226_v26 = vld [vmem:[%s22812_s5 + $0x1858] sm:$0xff] }
 0x38b   :  { %9096 = vmatpush1.bf16.msra.mxu0 %v14809_v46  ;;  %v14905_v46 = vcombine.low %v3137_v36, %v3145_v37  ;;  %v3233_v36 = vld [vmem:[%s22812_s5 + $0x1890] sm:$0xff] }
 0x38c   :  { %9260 = vmatpush1.bf16.msra.mxu1 %v14811_v48  ;;  %9097 = vmatprep.subr.bf16.mxu0 %v14826_v49  ;;  %v14907_v48 = vcombine.low %v3138_v54, %v3146_v38  ;;  %v14922_v49 = vcombine.high %v3153_v14, %v3161_v30  ;;  %v3241_v37 = vld [vmem:[%s22812_s5 + $0x18d0] sm:$0xff]  ;;  %v14985_v54 = vcombine.low %v3217_v29, %v3225_v25  ;;  %v3234_v38 = vld [vmem:[%s22812_s5 + $0x1898] sm:$0xff] }
 0x38d   :  { %9261 = vmatprep.subr.bf16.mxu1 %v14828_v51  ;;  %v14924_v51 = vcombine.high %v3154_v44, %v3162_v45 }
 0x38f   :  { %9098 = vmatpush1.bf16.msra.mxu0 %v14825_v60  ;;  %v14921_v60 = vcombine.low %v3153_v14, %v3161_v30  ;;  %v3257_v14 = vld [vmem:[%s22812_s5 + $0x1950] sm:$0xff] }
 0x390   :  { %9262 = vmatpush1.bf16.msra.mxu1 %v14827_v61  ;;  %9099 = vmatprep.subr.bf16.mxu0 %v14842_v62  ;;  %v14923_v61 = vcombine.low %v3154_v44, %v3162_v45  ;;  %v14938_v62 = vcombine.high %v3169_v53, %v3177_v55  ;;  %v3250_v44 = vld [vmem:[%s22812_s5 + $0x1918] sm:$0xff] }
 0x391   :  { %9263 = vmatprep.subr.bf16.mxu1 %v14844_v63  ;;  %v14940_v63 = vcombine.high %v3170_v56, %v3178_v59  ;;  %v3258_v45 = vld [vmem:[%s22812_s5 + $0x1958] sm:$0xff] }
 0x393   :  { %9100 = vmatpush1.bf16.msra.mxu0 %v14841_v6  ;;  %v14937_v6 = vcombine.low %v3169_v53, %v3177_v55  ;;  %v3265_v53 = vld [vmem:[%s22812_s5 + $0x1990] sm:$0xff] }
 0x394   :  { %9264 = vmatpush1.bf16.msra.mxu1 %v14843_v7  ;;  %9101 = vmatprep.subr.bf16.mxu0 %v14858_v35  ;;  %v14939_v7 = vcombine.low %v3170_v56, %v3178_v59  ;;  %v14954_v35 = vcombine.high %v3185_v0, %v3193_v2  ;;  %v3273_v55 = vld [vmem:[%s22812_s5 + $0x19d0] sm:$0xff]  ;;  %v3266_v56 = vld [vmem:[%s22812_s5 + $0x1998] sm:$0xff] }
 0x395   :  { %9265 = vmatprep.subr.bf16.mxu1 %v14860_v9  ;;  %v14956_v9 = vcombine.high %v3186_v4, %v3194_v28  ;;  %v3274_v59 = vld [vmem:[%s22812_s5 + $0x19d8] sm:$0xff] }
 0x397   :  { %9102 = vmatpush1.bf16.msra.mxu0 %v14857_v21  ;;  %v14953_v21 = vcombine.low %v3185_v0, %v3193_v2  ;;  %v3281_v0 = vld [vmem:[%s22812_s5 + $0x1a10] sm:$0xff] }
 0x398   :  { %9266 = vmatpush1.bf16.msra.mxu1 %v14859_v22  ;;  %9103 = vmatprep.subr.bf16.mxu0 %v14874_v23  ;;  %v14955_v22 = vcombine.low %v3186_v4, %v3194_v28  ;;  %v14970_v23 = vcombine.high %v3201_v12, %v3209_v16  ;;  %v3289_v2 = vld [vmem:[%s22812_s5 + $0x1a50] sm:$0xff]  ;;  %v3282_v4 = vld [vmem:[%s22812_s5 + $0x1a18] sm:$0xff] }
 0x399   :  { %9267 = vmatprep.subr.bf16.mxu1 %v14876_v24  ;;  %v14972_v24 = vcombine.high %v3202_v17, %v3210_v18  ;;  %v3290_v28 = vld [vmem:[%s22812_s5 + $0x1a58] sm:$0xff] }
 0x39b   :  { %9104 = vmatpush1.bf16.msra.mxu0 %v14873_v31  ;;  %v14969_v31 = vcombine.low %v3201_v12, %v3209_v16  ;;  %v3297_v12 = vld [vmem:[%s22812_s5 + $0x1a90] sm:$0xff] }
 0x39c   :  { %9268 = vmatpush1.bf16.msra.mxu1 %v14875_v32  ;;  %9105 = vmatprep.subr.bf16.mxu0 %v14890_v33  ;;  %v14971_v32 = vcombine.low %v3202_v17, %v3210_v18  ;;  %v14986_v33 = vcombine.high %v3217_v29, %v3225_v25  ;;  %v3305_v16 = vld [vmem:[%s22812_s5 + $0x1ad0] sm:$0xff]  ;;  %v3298_v17 = vld [vmem:[%s22812_s5 + $0x1a98] sm:$0xff] }
 0x39d   :  { %9269 = vmatprep.subr.bf16.mxu1 %v14892_v34  ;;  %v14988_v34 = vcombine.high %v3218_v20, %v3226_v26  ;;  %v3306_v18 = vld [vmem:[%s22812_s5 + $0x1ad8] sm:$0xff]  ;;  %v3313_v29 = vld [vmem:[%s22812_s5 + $0x1b10] sm:$0xff] }
 0x39e   :  { %v3321_v25 = vld [vmem:[%s22812_s5 + $0x1b50] sm:$0xff] }
 0x39f   :  { %9106 = vmatpush1.bf16.msra.mxu0 %v14889_v39  ;;  %v3242_v39 = vld [vmem:[%s22812_s5 + $0x18d8] sm:$0xff] }
 0x3a0   :  { %9270 = vmatpush1.bf16.msra.mxu1 %v14891_v41  ;;  %9107 = vmatprep.subr.bf16.mxu0 %v14906_v42  ;;  %v14987_v41 = vcombine.low %v3218_v20, %v3226_v26  ;;  %v15002_v42 = vcombine.high %v3233_v36, %v3241_v37  ;;  %v15004_v30 = vcombine.high %v3234_v38, %v3242_v39  ;;  %v3314_v20 = vld [vmem:[%s22812_s5 + $0x1b18] sm:$0xff] }
 0x3a1   :  { %9271 = vmatprep.subr.bf16.mxu1 %v14908_v43  ;;  %v3249_v43 = vld [vmem:[%s22812_s5 + $0x1910] sm:$0xff]  ;;  %v3322_v26 = vld [vmem:[%s22812_s5 + $0x1b58] sm:$0xff] }
 0x3a3   :  { %9108 = vmatpush1.bf16.msra.mxu0 %v14905_v46  ;;  %v15001_v46 = vcombine.low %v3233_v36, %v3241_v37  ;;  %v15084_v37 = vcombine.high %v3314_v20, %v3322_v26 }
 0x3a4   :  { %9272 = vmatpush1.bf16.msra.mxu1 %v14907_v48  ;;  %9109 = vmatprep.subr.bf16.mxu0 %v14922_v49  ;;  %v15003_v48 = vcombine.low %v3234_v38, %v3242_v39  ;;  %v15018_v49 = vcombine.high %v3249_v43, %v3257_v14  ;;  %v3337_v38 = vld [vmem:[%s22812_s5 + $0x1bd0] sm:$0xff] }
 0x3a5   :  { %9273 = vmatprep.subr.bf16.mxu1 %v14924_v51  ;;  %v15020_v51 = vcombine.high %v3250_v44, %v3258_v45 }
 0x3a7   :  { %9110 = vmatpush1.bf16.msra.mxu0 %v14921_v60  ;;  %v15017_v60 = vcombine.low %v3249_v43, %v3257_v14  ;;  %v3338_v43 = vld [vmem:[%s22812_s5 + $0x1bd8] sm:$0xff] }
 0x3a8   :  { %9274 = vmatpush1.bf16.msra.mxu1 %v14923_v61  ;;  %9111 = vmatprep.subr.bf16.mxu0 %v14938_v62  ;;  %v15019_v61 = vcombine.low %v3250_v44, %v3258_v45  ;;  %v15034_v62 = vcombine.high %v3265_v53, %v3273_v55  ;;  %v15081_v44 = vcombine.low %v3313_v29, %v3321_v25 }
 0x3a9   :  { %9275 = vmatprep.subr.bf16.mxu1 %v14940_v63  ;;  %v15036_v63 = vcombine.high %v3266_v56, %v3274_v59 }
 0x3ab   :  { %9112 = vmatpush1.bf16.msra.mxu0 %v14937_v6  ;;  %v15033_v6 = vcombine.low %v3265_v53, %v3273_v55  ;;  %v3345_v53 = vld [vmem:[%s22812_s5 + $0x1c10] sm:$0xff] }
 0x3ac   :  { %9276 = vmatpush1.bf16.msra.mxu1 %v14939_v7  ;;  %9113 = vmatprep.subr.bf16.mxu0 %v14954_v35  ;;  %v15035_v7 = vcombine.low %v3266_v56, %v3274_v59  ;;  %v15050_v35 = vcombine.high %v3281_v0, %v3289_v2  ;;  %v3353_v55 = vld [vmem:[%s22812_s5 + $0x1c50] sm:$0xff]  ;;  %v3346_v56 = vld [vmem:[%s22812_s5 + $0x1c18] sm:$0xff] }
 0x3ad   :  { %9277 = vmatprep.subr.bf16.mxu1 %v14956_v9  ;;  %v15052_v9 = vcombine.high %v3282_v4, %v3290_v28  ;;  %v3354_v59 = vld [vmem:[%s22812_s5 + $0x1c58] sm:$0xff] }
 0x3af   :  { %9114 = vmatpush1.bf16.msra.mxu0 %v14953_v21  ;;  %v15049_v21 = vcombine.low %v3281_v0, %v3289_v2  ;;  %v3361_v0 = vld [vmem:[%s22812_s5 + $0x1c90] sm:$0xff] }
 0x3b0   :  { %9278 = vmatpush1.bf16.msra.mxu1 %v14955_v22  ;;  %9115 = vmatprep.subr.bf16.mxu0 %v14970_v23  ;;  %v15051_v22 = vcombine.low %v3282_v4, %v3290_v28  ;;  %v15066_v23 = vcombine.high %v3297_v12, %v3305_v16  ;;  %v3369_v2 = vld [vmem:[%s22812_s5 + $0x1cd0] sm:$0xff]  ;;  %v3362_v4 = vld [vmem:[%s22812_s5 + $0x1c98] sm:$0xff] }
 0x3b1   :  { %9279 = vmatprep.subr.bf16.mxu1 %v14972_v24  ;;  %v15068_v24 = vcombine.high %v3298_v17, %v3306_v18  ;;  %v3370_v28 = vld [vmem:[%s22812_s5 + $0x1cd8] sm:$0xff] }
 0x3b3   :  { %9116 = vmatpush1.bf16.msra.mxu0 %v14969_v31  ;;  %v15065_v31 = vcombine.low %v3297_v12, %v3305_v16  ;;  %v3377_v12 = vld [vmem:[%s22812_s5 + $0x1d10] sm:$0xff] }
 0x3b4   :  { %9280 = vmatpush1.bf16.msra.mxu1 %v14971_v32  ;;  %9126 = vmatprep.subr.bf16.mxu0 %v14986_v33  ;;  %v15067_v32 = vcombine.low %v3298_v17, %v3306_v18  ;;  %v15082_v33 = vcombine.high %v3313_v29, %v3321_v25  ;;  %v3385_v16 = vld [vmem:[%s22812_s5 + $0x1d50] sm:$0xff]  ;;  %v3378_v17 = vld [vmem:[%s22812_s5 + $0x1d18] sm:$0xff] }
 0x3b5   :  { %9290 = vmatprep.subr.bf16.mxu1 %v14988_v34  ;;  %v3386_v18 = vld [vmem:[%s22812_s5 + $0x1d58] sm:$0xff]  ;;  %v3393_v29 = vld [vmem:[%s22812_s5 + $0x1d90] sm:$0xff] }
 0x3b6   :  { %9118 = vmatmul.mubr.bf16.vlgmr.msra.gmra.mrb[16].mxu0 %v18616_v57  ;;  %v3401_v25 = vld [vmem:[%s22812_s5 + $0x1dd0] sm:$0xff] }
 0x3b7   :  { %9282 = vmatmul.mubr.bf16.vlgmr.msra.gmra.mrb[16].mxu1 %v18616_v57  ;;  %9127 = vmatpush1.bf16.msra.mxu0 %v14985_v54  ;;  %v3329_v54 = vld [vmem:[%s22812_s5 + $0x1b90] sm:$0xff] }
 0x3b8   :  { %9158 = vmatprep.mubr.bf16.mxu0 %v18632_v1  ;;  %9291 = vmatpush1.bf16.msra.mxu1 %v14987_v41 }
 0x3b9   :  { %9322 = vmatprep.mubr.bf16.mxu1 %v18632_v1  ;;  %9128 = vmatprep.subr.bf16.mxu0 %v15002_v42  ;;  %v3330_v42 = vld [vmem:[%s22812_s5 + $0x1b98] sm:$0xff] }
 0x3ba   :  { %9292 = vmatprep.subr.bf16.mxu1 %v15004_v30 }
 0x3bb   :  { %9129 = vmatpush1.bf16.msra.mxu0 %v15001_v46 }
 0x3bc   :  { %9293 = vmatpush1.bf16.msra.mxu1 %v15003_v48  ;;  %9130 = vmatprep.subr.bf16.mxu0 %v15018_v49  ;;  %v15083_v48 = vcombine.low %v3314_v20, %v3322_v26  ;;  %v15098_v49 = vcombine.high %v3329_v54, %v3337_v38  ;;  %v3394_v20 = vld [vmem:[%s22812_s5 + $0x1d98] sm:$0xff] }
 0x3bd   :  { %9294 = vmatprep.subr.bf16.mxu1 %v15020_v51  ;;  %v15100_v51 = vcombine.high %v3330_v42, %v3338_v43  ;;  %v3402_v26 = vld [vmem:[%s22812_s5 + $0x1dd8] sm:$0xff] }
 0x3bf   :  { %9131 = vmatpush1.bf16.msra.mxu0 %v15017_v60  ;;  %v15097_v60 = vcombine.low %v3329_v54, %v3337_v38  ;;  %v3409_v54 = vld [vmem:[%s22812_s5 + $0x1e10] sm:$0xff] }
 0x3c0   :  { %9295 = vmatpush1.bf16.msra.mxu1 %v15019_v61  ;;  %9132 = vmatprep.subr.bf16.mxu0 %v15034_v62  ;;  %v15099_v61 = vcombine.low %v3330_v42, %v3338_v43  ;;  %v15114_v62 = vcombine.high %v3345_v53, %v3353_v55  ;;  %v3417_v38 = vld [vmem:[%s22812_s5 + $0x1e50] sm:$0xff]  ;;  %v3410_v42 = vld [vmem:[%s22812_s5 + $0x1e18] sm:$0xff] }
 0x3c1   :  { %9296 = vmatprep.subr.bf16.mxu1 %v15036_v63  ;;  %v15116_v63 = vcombine.high %v3346_v56, %v3354_v59  ;;  %v3418_v43 = vld [vmem:[%s22812_s5 + $0x1e58] sm:$0xff] }
 0x3c3   :  { %9133 = vmatpush1.bf16.msra.mxu0 %v15033_v6  ;;  %v15113_v6 = vcombine.low %v3345_v53, %v3353_v55  ;;  %v15177_v53 = vcombine.low %v3409_v54, %v3417_v38  ;;  %v15179_v55 = vcombine.low %v3410_v42, %v3418_v43 }
 0x3c4   :  { %9297 = vmatpush1.bf16.msra.mxu1 %v15035_v7  ;;  %9134 = vmatprep.subr.bf16.mxu0 %v15050_v35  ;;  %v15115_v7 = vcombine.low %v3346_v56, %v3354_v59  ;;  %v15130_v35 = vcombine.high %v3361_v0, %v3369_v2 }
 0x3c5   :  { %9298 = vmatprep.subr.bf16.mxu1 %v15052_v9  ;;  %v15132_v9 = vcombine.high %v3362_v4, %v3370_v28 }
 0x3c7   :  { %9135 = vmatpush1.bf16.msra.mxu0 %v15049_v21  ;;  %v15129_v21 = vcombine.low %v3361_v0, %v3369_v2 }
 0x3c8   :  { %9299 = vmatpush1.bf16.msra.mxu1 %v15051_v22  ;;  %9136 = vmatprep.subr.bf16.mxu0 %v15066_v23  ;;  %v15131_v22 = vcombine.low %v3362_v4, %v3370_v28  ;;  %v15146_v23 = vcombine.high %v3377_v12, %v3385_v16 }
 0x3c9   :  { %v19480_v34 = vpop.f32.mrb[12].mxu0  ;;  %v19482_v36 = vpop.f32.mrb[12].mxu1  ;;  %9300 = vmatprep.subr.bf16.mxu1 %v15068_v24  ;;  %v15148_v24 = vcombine.high %v3378_v17, %v3386_v18 }
 0x3ca   :  { %v19490_v39 = vpop.f32.mrb[13].mxu0  ;;  %v19492_v41 = vpop.f32.mrb[13].mxu1 }
 0x3cb   :  { %v8836_v14 = vpop.f32.mrb[14].mxu0  ;;  %v9000_v30 = vpop.f32.mrb[14].mxu1  ;;  %9137 = vmatpush1.bf16.msra.mxu0 %v15065_v31  ;;  %v15145_v31 = vcombine.low %v3377_v12, %v3385_v16 }
 0x3cc   :  { %9301 = vmatpush1.bf16.msra.mxu1 %v15067_v32  ;;  %v8837_v45 = vpop.f32.mrb[15].mxu0  ;;  %v9001_v46 = vpop.f32.mrb[15].mxu1  ;;  %9138 = vmatprep.subr.bf16.mxu0 %v15082_v33  ;;  %v15147_v32 = vcombine.low %v3378_v17, %v3386_v18  ;;  %v15162_v33 = vcombine.high %v3393_v29, %v3401_v25  ;;  %v15161_v14 = vcombine.low %v3393_v29, %v3401_v25 }
 0x3cd   :  { %9302 = vmatprep.subr.bf16.mxu1 %v15084_v37  ;;  %v15164_v37 = vcombine.high %v3394_v20, %v3402_v26  ;;  %v15163_v30 = vcombine.low %v3394_v20, %v3402_v26  ;;  %v15180_v45 = vcombine.high %v3410_v42, %v3418_v43  ;;  %v3425_v46 = vld [vmem:[%s22812_s5 + $0x1e90] sm:$0xff]  ;;  %v2483_v43 = vld [vmem:[%s22812_s5 + $0x120] sm:$0xff] }
 0x3cf   :  { %9139 = vmatpush1.bf16.msra.mxu0 %v15081_v44  ;;  %v15178_v44 = vcombine.high %v3409_v54, %v3417_v38  ;;  %v2476_v54 = vld [vmem:[%s22812_s5 + $0xe8] sm:$0xff] }
 0x3d0   :  { %9303 = vmatpush1.bf16.msra.mxu1 %v15083_v48  ;;  %9140 = vmatprep.subr.bf16.mxu0 %v15098_v49  ;;  %v3433_v48 = vld [vmem:[%s22812_s5 + $0x1ed0] sm:$0xff]  ;;  %v3426_v49 = vld [vmem:[%s22812_s5 + $0x1e98] sm:$0xff] }
 0x3d1   :  { %9304 = vmatprep.subr.bf16.mxu1 %v15100_v51  ;;  %v3434_v51 = vld [vmem:[%s22812_s5 + $0x1ed8] sm:$0xff]  ;;  %v15194_v56 = vcombine.high %v3425_v46, %v3433_v48  ;;  %v15193_v0 = vcombine.low %v3425_v46, %v3433_v48 }
 0x3d2   :  { %v15196_v59 = vcombine.high %v3426_v49, %v3434_v51  ;;  %v15195_v2 = vcombine.low %v3426_v49, %v3434_v51 }
 0x3d3   :  { %9141 = vmatpush1.bf16.msra.mxu0 %v15097_v60  ;;  %v3441_v60 = vld [vmem:[%s22812_s5 + $0x1f10] sm:$0xff] }
 0x3d4   :  { %9305 = vmatpush1.bf16.msra.mxu1 %v15099_v61  ;;  %9142 = vmatprep.subr.bf16.mxu0 %v15114_v62  ;;  %v3449_v61 = vld [vmem:[%s22812_s5 + $0x1f50] sm:$0xff]  ;;  %v3442_v62 = vld [vmem:[%s22812_s5 + $0x1f18] sm:$0xff] }
 0x3d5   :  { %9306 = vmatprep.subr.bf16.mxu1 %v15116_v63  ;;  %v3450_v63 = vld [vmem:[%s22812_s5 + $0x1f58] sm:$0xff]  ;;  %v15210_v4 = vcombine.high %v3441_v60, %v3449_v61  ;;  %v15209_v12 = vcombine.low %v3441_v60, %v3449_v61 }
 0x3d6   :  { %v15212_v28 = vcombine.high %v3442_v62, %v3450_v63  ;;  %v15211_v16 = vcombine.low %v3442_v62, %v3450_v63 }
 0x3d7   :  { %9143 = vmatpush1.bf16.msra.mxu0 %v15113_v6  ;;  %v3457_v6 = vld [vmem:[%s22812_s5 + $0x1f90] sm:$0xff] }
 0x3d8   :  { %9307 = vmatpush1.bf16.msra.mxu1 %v15115_v7  ;;  %9144 = vmatprep.subr.bf16.mxu0 %v15130_v35  ;;  %v3465_v7 = vld [vmem:[%s22812_s5 + $0x1fd0] sm:$0xff]  ;;  %v3458_v35 = vld [vmem:[%s22812_s5 + $0x1f98] sm:$0xff] }
 0x3d9   :  { %9308 = vmatprep.subr.bf16.mxu1 %v15132_v9  ;;  %v3466_v9 = vld [vmem:[%s22812_s5 + $0x1fd8] sm:$0xff]  ;;  %v15226_v17 = vcombine.high %v3457_v6, %v3465_v7  ;;  %v15225_v29 = vcombine.low %v3457_v6, %v3465_v7 }
 0x3da   :  { %v15228_v18 = vcombine.high %v3458_v35, %v3466_v9  ;;  %v15227_v25 = vcombine.low %v3458_v35, %v3466_v9 }
 0x3db   :  { %9145 = vmatpush1.bf16.msra.mxu0 %v15129_v21  ;;  %v2451_v21 = vld [vmem:[%s22812_s5 + $0x20] sm:$0xff] }
 0x3dc   :  { %9309 = vmatpush1.bf16.msra.mxu1 %v15131_v22  ;;  %9146 = vmatprep.subr.bf16.mxu0 %v15146_v23  ;;  %v2459_v22 = vld [vmem:[%s22812_s5 + $0x60] sm:$0xff]  ;;  %v2452_v23 = vld [vmem:[%s22812_s5 + $0x28] sm:$0xff] }
 0x3dd   :  { %9310 = vmatprep.subr.bf16.mxu1 %v15148_v24  ;;  %v2460_v24 = vld [vmem:[%s22812_s5 + $0x68] sm:$0xff]  ;;  %v14222_v20 = vcombine.high %v2451_v21, %v2459_v22 }
 0x3de   :  { %v14224_v26 = vcombine.high %v2452_v23, %v2460_v24  ;;  %v14223_v38 = vcombine.low %v2452_v23, %v2460_v24 }
 0x3df   :  { %9147 = vmatpush1.bf16.msra.mxu0 %v15145_v31  ;;  %v2467_v31 = vld [vmem:[%s22812_s5 + $0xa0] sm:$0xff] }
 0x3e0   :  { %9311 = vmatpush1.bf16.msra.mxu1 %v15147_v32  ;;  %9148 = vmatprep.subr.bf16.mxu0 %v15162_v33  ;;  %v2475_v32 = vld [vmem:[%s22812_s5 + $0xe0] sm:$0xff]  ;;  %v14221_v33 = vcombine.low %v2451_v21, %v2459_v22 }
 0x3e1   :  { %9312 = vmatprep.subr.bf16.mxu1 %v15164_v37  ;;  %v2468_v37 = vld [vmem:[%s22812_s5 + $0xa8] sm:$0xff]  ;;  %v14238_v42 = vcombine.high %v2467_v31, %v2475_v32  ;;  %v14237_v46 = vcombine.low %v2467_v31, %v2475_v32 }
 0x3e2   :  { %v14239_v48 = vcombine.low %v2468_v37, %v2476_v54 }
 0x3e3   :  { %9149 = vmatpush1.bf16.msra.mxu0 %v15161_v14  ;;  %v2491_v14 = vld [vmem:[%s22812_s5 + $0x160] sm:$0xff] }
 0x3e4   :  { %9313 = vmatpush1.bf16.msra.mxu1 %v15163_v30  ;;  %9150 = vmatprep.subr.bf16.mxu0 %v15178_v44  ;;  %v14240_v30 = vcombine.high %v2468_v37, %v2476_v54  ;;  %v2484_v44 = vld [vmem:[%s22812_s5 + $0x128] sm:$0xff]  ;;  %v14254_v49 = vcombine.high %v2483_v43, %v2491_v14  ;;  %v14253_v60 = vcombine.low %v2483_v43, %v2491_v14  ;;  %v2563_v54 = vld [vmem:[%s22812_s5 + $0x3a0] sm:$0xff] }
 0x3e5   :  { %9314 = vmatprep.subr.bf16.mxu1 %v15180_v45  ;;  %v2492_v45 = vld [vmem:[%s22812_s5 + $0x168] sm:$0xff] }
 0x3e6   :  { %v14256_v51 = vcombine.high %v2484_v44, %v2492_v45  ;;  %v14255_v61 = vcombine.low %v2484_v44, %v2492_v45  ;;  %v2572_v43 = vld [vmem:[%s22812_s5 + $0x3e8] sm:$0xff] }
 0x3e7   :  { %9151 = vmatpush1.bf16.msra.mxu0 %v15177_v53  ;;  %v2499_v53 = vld [vmem:[%s22812_s5 + $0x1a0] sm:$0xff] }
 0x3e8   :  { %9315 = vmatpush1.bf16.msra.mxu1 %v15179_v55  ;;  %9152 = vmatprep.subr.bf16.mxu0 %v15194_v56  ;;  %v2507_v55 = vld [vmem:[%s22812_s5 + $0x1e0] sm:$0xff]  ;;  %v2500_v56 = vld [vmem:[%s22812_s5 + $0x1a8] sm:$0xff] }
 0x3e9   :  { %9316 = vmatprep.subr.bf16.mxu1 %v15196_v59  ;;  %v2508_v59 = vld [vmem:[%s22812_s5 + $0x1e8] sm:$0xff]  ;;  %v14270_v62 = vcombine.high %v2499_v53, %v2507_v55  ;;  %v14269_v6 = vcombine.low %v2499_v53, %v2507_v55 }
 0x3ea   :  { %v14272_v63 = vcombine.high %v2500_v56, %v2508_v59  ;;  %v14271_v7 = vcombine.low %v2500_v56, %v2508_v59 }
 0x3eb   :  { %9153 = vmatpush1.bf16.msra.mxu0 %v15193_v0  ;;  %v2515_v0 = vld [vmem:[%s22812_s5 + $0x220] sm:$0xff] }
 0x3ec   :  { %9317 = vmatpush1.bf16.msra.mxu1 %v15195_v2  ;;  %9154 = vmatprep.subr.bf16.mxu0 %v15210_v4  ;;  %v2523_v2 = vld [vmem:[%s22812_s5 + $0x260] sm:$0xff]  ;;  %v2516_v4 = vld [vmem:[%s22812_s5 + $0x228] sm:$0xff] }
 0x3ed   :  { %9318 = vmatprep.subr.bf16.mxu1 %v15212_v28  ;;  %v2524_v28 = vld [vmem:[%s22812_s5 + $0x268] sm:$0xff]  ;;  %v14286_v35 = vcombine.high %v2515_v0, %v2523_v2  ;;  %v14285_v21 = vcombine.low %v2515_v0, %v2523_v2 }
 0x3ee   :  { %v14288_v9 = vcombine.high %v2516_v4, %v2524_v28  ;;  %v14287_v22 = vcombine.low %v2516_v4, %v2524_v28 }
 0x3ef   :  { %9155 = vmatpush1.bf16.msra.mxu0 %v15209_v12  ;;  %v2531_v12 = vld [vmem:[%s22812_s5 + $0x2a0] sm:$0xff] }
 0x3f0   :  { %9319 = vmatpush1.bf16.msra.mxu1 %v15211_v16  ;;  %9156 = vmatprep.subr.bf16.mxu0 %v15226_v17  ;;  %v2539_v16 = vld [vmem:[%s22812_s5 + $0x2e0] sm:$0xff]  ;;  %v2532_v17 = vld [vmem:[%s22812_s5 + $0x2a8] sm:$0xff] }
 0x3f1   :  { %9320 = vmatprep.subr.bf16.mxu1 %v15228_v18  ;;  %v2540_v18 = vld [vmem:[%s22812_s5 + $0x2e8] sm:$0xff]  ;;  %v14302_v23 = vcombine.high %v2531_v12, %v2539_v16  ;;  %v14301_v31 = vcombine.low %v2531_v12, %v2539_v16 }
 0x3f2   :  { %v14304_v24 = vcombine.high %v2532_v17, %v2540_v18  ;;  %v14303_v32 = vcombine.low %v2532_v17, %v2540_v18 }
 0x3f3   :  { %9157 = vmatpush1.bf16.msra.mxu0 %v15225_v29  ;;  %v2547_v29 = vld [vmem:[%s22812_s5 + $0x320] sm:$0xff] }
 0x3f4   :  { %9321 = vmatpush1.bf16.msra.mxu1 %v15227_v25  ;;  %9331 = vmatprep.subr.bf16.mxu0 %v14222_v20  ;;  %v2555_v25 = vld [vmem:[%s22812_s5 + $0x360] sm:$0xff]  ;;  %v2548_v20 = vld [vmem:[%s22812_s5 + $0x328] sm:$0xff] }
 0x3f5   :  { %9495 = vmatprep.subr.bf16.mxu1 %v14224_v26  ;;  %v2556_v26 = vld [vmem:[%s22812_s5 + $0x368] sm:$0xff]  ;;  %v14317_v14 = vcombine.low %v2547_v29, %v2555_v25 }
 0x3f6   :  { %9159 = vmatmul.mubr.bf16.vlgmr.msra.gmra.mrb[16].mxu0 %v18826_v40  ;;  %v14320_v37 = vcombine.high %v2548_v20, %v2556_v26 }
 0x3f7   :  { %9323 = vmatmul.mubr.bf16.vlgmr.msra.gmra.mrb[16].mxu1 %v18826_v40  ;;  %9332 = vmatpush1.bf16.msra.mxu0 %v14221_v33  ;;  %v14318_v33 = vcombine.high %v2547_v29, %v2555_v25 }
 0x3f8   :  { %9363 = vmatprep.mubr.bf16.mxu0 %v18194_v47  ;;  %9496 = vmatpush1.bf16.msra.mxu1 %v14223_v38  ;;  %v2571_v38 = vld [vmem:[%s22812_s5 + $0x3e0] sm:$0xff] }
 0x3f9   :  { %9527 = vmatprep.mubr.bf16.mxu1 %v18194_v47  ;;  %9333 = vmatprep.subr.bf16.mxu0 %v14238_v42  ;;  %v2564_v42 = vld [vmem:[%s22812_s5 + $0x3a8] sm:$0xff]  ;;  %v14334_v44 = vcombine.high %v2563_v54, %v2571_v38  ;;  %v14333_v53 = vcombine.low %v2563_v54, %v2571_v38 }
 0x3fa   :  { %9497 = vmatprep.subr.bf16.mxu1 %v14240_v30  ;;  %v14319_v30 = vcombine.low %v2548_v20, %v2556_v26  ;;  %v14336_v45 = vcombine.high %v2564_v42, %v2572_v43  ;;  %v14335_v55 = vcombine.low %v2564_v42, %v2572_v43 }
 0x3fb   :  { %9334 = vmatpush1.bf16.msra.mxu0 %v14237_v46  ;;  %v2579_v46 = vld [vmem:[%s22812_s5 + $0x420] sm:$0xff] }
 0x3fc   :  { %9498 = vmatpush1.bf16.msra.mxu1 %v14239_v48  ;;  %9335 = vmatprep.subr.bf16.mxu0 %v14254_v49  ;;  %v2587_v48 = vld [vmem:[%s22812_s5 + $0x460] sm:$0xff]  ;;  %v2580_v49 = vld [vmem:[%s22812_s5 + $0x428] sm:$0xff] }
 0x3fd   :  { %9499 = vmatprep.subr.bf16.mxu1 %v14256_v51  ;;  %v2588_v51 = vld [vmem:[%s22812_s5 + $0x468] sm:$0xff]  ;;  %v14350_v56 = vcombine.high %v2579_v46, %v2587_v48  ;;  %v14349_v0 = vcombine.low %v2579_v46, %v2587_v48 }
 0x3fe   :  { %v14352_v59 = vcombine.high %v2580_v49, %v2588_v51  ;;  %v14351_v2 = vcombine.low %v2580_v49, %v2588_v51 }
 0x3ff   :  { %9336 = vmatpush1.bf16.msra.mxu0 %v14253_v60  ;;  %v2595_v60 = vld [vmem:[%s22812_s5 + $0x4a0] sm:$0xff] }
 0x400   :  { %9500 = vmatpush1.bf16.msra.mxu1 %v14255_v61  ;;  %9337 = vmatprep.subr.bf16.mxu0 %v14270_v62  ;;  %v2603_v61 = vld [vmem:[%s22812_s5 + $0x4e0] sm:$0xff]  ;;  %v2596_v62 = vld [vmem:[%s22812_s5 + $0x4a8] sm:$0xff] }
 0x401   :  { %9501 = vmatprep.subr.bf16.mxu1 %v14272_v63  ;;  %v2604_v63 = vld [vmem:[%s22812_s5 + $0x4e8] sm:$0xff]  ;;  %v14366_v4 = vcombine.high %v2595_v60, %v2603_v61  ;;  %v14365_v12 = vcombine.low %v2595_v60, %v2603_v61 }
 0x402   :  { %v14368_v28 = vcombine.high %v2596_v62, %v2604_v63  ;;  %v14367_v16 = vcombine.low %v2596_v62, %v2604_v63 }
 0x403   :  { %9338 = vmatpush1.bf16.msra.mxu0 %v14269_v6  ;;  %v2611_v6 = vld [vmem:[%s22812_s5 + $0x520] sm:$0xff] }
 0x404   :  { %9502 = vmatpush1.bf16.msra.mxu1 %v14271_v7  ;;  %9339 = vmatprep.subr.bf16.mxu0 %v14286_v35  ;;  %v2619_v7 = vld [vmem:[%s22812_s5 + $0x560] sm:$0xff]  ;;  %v2612_v35 = vld [vmem:[%s22812_s5 + $0x528] sm:$0xff] }
 0x405   :  { %9503 = vmatprep.subr.bf16.mxu1 %v14288_v9  ;;  %v2620_v9 = vld [vmem:[%s22812_s5 + $0x568] sm:$0xff]  ;;  %v14382_v17 = vcombine.high %v2611_v6, %v2619_v7  ;;  %v14381_v29 = vcombine.low %v2611_v6, %v2619_v7 }
 0x406   :  { %v14384_v18 = vcombine.high %v2612_v35, %v2620_v9  ;;  %v14383_v25 = vcombine.low %v2612_v35, %v2620_v9 }
 0x407   :  { %9340 = vmatpush1.bf16.msra.mxu0 %v14285_v21  ;;  %v2627_v21 = vld [vmem:[%s22812_s5 + $0x5a0] sm:$0xff] }
 0x408   :  { %9504 = vmatpush1.bf16.msra.mxu1 %v14287_v22  ;;  %9341 = vmatprep.subr.bf16.mxu0 %v14302_v23  ;;  %v2635_v22 = vld [vmem:[%s22812_s5 + $0x5e0] sm:$0xff]  ;;  %v2628_v23 = vld [vmem:[%s22812_s5 + $0x5a8] sm:$0xff] }
 0x409   :  { %9505 = vmatprep.subr.bf16.mxu1 %v14304_v24  ;;  %v2636_v24 = vld [vmem:[%s22812_s5 + $0x5e8] sm:$0xff]  ;;  %v14398_v20 = vcombine.high %v2627_v21, %v2635_v22  ;;  %v14397_v54 = vcombine.low %v2627_v21, %v2635_v22 }
 0x40a   :  { %v14400_v26 = vcombine.high %v2628_v23, %v2636_v24  ;;  %v14399_v38 = vcombine.low %v2628_v23, %v2636_v24 }
 0x40b   :  { %9342 = vmatpush1.bf16.msra.mxu0 %v14301_v31  ;;  %v2643_v31 = vld [vmem:[%s22812_s5 + $0x620] sm:$0xff] }
 0x40c   :  { %9506 = vmatpush1.bf16.msra.mxu1 %v14303_v32  ;;  %9343 = vmatprep.subr.bf16.mxu0 %v14318_v33  ;;  %v2651_v32 = vld [vmem:[%s22812_s5 + $0x660] sm:$0xff]  ;;  %v2644_v33 = vld [vmem:[%s22812_s5 + $0x628] sm:$0xff] }
 0x40d   :  { %9507 = vmatprep.subr.bf16.mxu1 %v14320_v37  ;;  %v2652_v37 = vld [vmem:[%s22812_s5 + $0x668] sm:$0xff]  ;;  %v14414_v42 = vcombine.high %v2643_v31, %v2651_v32  ;;  %v14413_v46 = vcombine.low %v2643_v31, %v2651_v32 }
 0x40e   :  { %v14416_v43 = vcombine.high %v2644_v33, %v2652_v37  ;;  %v14415_v48 = vcombine.low %v2644_v33, %v2652_v37  ;;  %v2732_v31 = vld [vmem:[%s22812_s5 + $0x8e8] sm:$0xff]  ;;  %v2739_v37 = vld [vmem:[%s22812_s5 + $0x920] sm:$0xff] }
 0x40f   :  { %9344 = vmatpush1.bf16.msra.mxu0 %v14317_v14  ;;  %v2659_v14 = vld [vmem:[%s22812_s5 + $0x6a0] sm:$0xff] }
 0x410   :  { %9508 = vmatpush1.bf16.msra.mxu1 %v14319_v30  ;;  %9345 = vmatprep.subr.bf16.mxu0 %v14334_v44  ;;  %v2667_v30 = vld [vmem:[%s22812_s5 + $0x6e0] sm:$0xff]  ;;  %v2660_v44 = vld [vmem:[%s22812_s5 + $0x6a8] sm:$0xff] }
 0x411   :  { %9509 = vmatprep.subr.bf16.mxu1 %v14336_v45  ;;  %v2668_v45 = vld [vmem:[%s22812_s5 + $0x6e8] sm:$0xff]  ;;  %v14430_v49 = vcombine.high %v2659_v14, %v2667_v30  ;;  %v14429_v60 = vcombine.low %v2659_v14, %v2667_v30 }
 0x412   :  { %v14432_v51 = vcombine.high %v2660_v44, %v2668_v45  ;;  %v14431_v61 = vcombine.low %v2660_v44, %v2668_v45 }
 0x413   :  { %9346 = vmatpush1.bf16.msra.mxu0 %v14333_v53  ;;  %v2675_v53 = vld [vmem:[%s22812_s5 + $0x720] sm:$0xff] }
 0x414   :  { %9510 = vmatpush1.bf16.msra.mxu1 %v14335_v55  ;;  %9347 = vmatprep.subr.bf16.mxu0 %v14350_v56  ;;  %v2683_v55 = vld [vmem:[%s22812_s5 + $0x760] sm:$0xff]  ;;  %v2676_v56 = vld [vmem:[%s22812_s5 + $0x728] sm:$0xff] }
 0x415   :  { %9511 = vmatprep.subr.bf16.mxu1 %v14352_v59  ;;  %v2684_v59 = vld [vmem:[%s22812_s5 + $0x768] sm:$0xff]  ;;  %v14446_v62 = vcombine.high %v2675_v53, %v2683_v55  ;;  %v14445_v6 = vcombine.low %v2675_v53, %v2683_v55 }
 0x416   :  { %v14448_v63 = vcombine.high %v2676_v56, %v2684_v59  ;;  %v14447_v7 = vcombine.low %v2676_v56, %v2684_v59 }
 0x417   :  { %9348 = vmatpush1.bf16.msra.mxu0 %v14349_v0  ;;  %v2691_v0 = vld [vmem:[%s22812_s5 + $0x7a0] sm:$0xff] }
 0x418   :  { %9512 = vmatpush1.bf16.msra.mxu1 %v14351_v2  ;;  %9349 = vmatprep.subr.bf16.mxu0 %v14366_v4  ;;  %v2699_v2 = vld [vmem:[%s22812_s5 + $0x7e0] sm:$0xff]  ;;  %v2692_v4 = vld [vmem:[%s22812_s5 + $0x7a8] sm:$0xff] }
 0x419   :  { %9513 = vmatprep.subr.bf16.mxu1 %v14368_v28  ;;  %v2700_v28 = vld [vmem:[%s22812_s5 + $0x7e8] sm:$0xff]  ;;  %v14462_v35 = vcombine.high %v2691_v0, %v2699_v2  ;;  %v14461_v21 = vcombine.low %v2691_v0, %v2699_v2 }
 0x41a   :  { %v14464_v9 = vcombine.high %v2692_v4, %v2700_v28  ;;  %v14463_v22 = vcombine.low %v2692_v4, %v2700_v28 }
 0x41b   :  { %9350 = vmatpush1.bf16.msra.mxu0 %v14365_v12  ;;  %v2707_v12 = vld [vmem:[%s22812_s5 + $0x820] sm:$0xff] }
 0x41c   :  { %9514 = vmatpush1.bf16.msra.mxu1 %v14367_v16  ;;  %9351 = vmatprep.subr.bf16.mxu0 %v14382_v17  ;;  %v2715_v16 = vld [vmem:[%s22812_s5 + $0x860] sm:$0xff]  ;;  %v2708_v17 = vld [vmem:[%s22812_s5 + $0x828] sm:$0xff] }
 0x41d   :  { %9515 = vmatprep.subr.bf16.mxu1 %v14384_v18  ;;  %v2716_v18 = vld [vmem:[%s22812_s5 + $0x868] sm:$0xff]  ;;  %v14478_v23 = vcombine.high %v2707_v12, %v2715_v16 }
 0x41e   :  { %v14480_v24 = vcombine.high %v2708_v17, %v2716_v18  ;;  %v14479_v32 = vcombine.low %v2708_v17, %v2716_v18 }
 0x41f   :  { %9352 = vmatpush1.bf16.msra.mxu0 %v14381_v29  ;;  %v2723_v29 = vld [vmem:[%s22812_s5 + $0x8a0] sm:$0xff] }
 0x420   :  { %9516 = vmatpush1.bf16.msra.mxu1 %v14383_v25  ;;  %9353 = vmatprep.subr.bf16.mxu0 %v14398_v20  ;;  %v2731_v25 = vld [vmem:[%s22812_s5 + $0x8e0] sm:$0xff]  ;;  %v14477_v20 = vcombine.low %v2707_v12, %v2715_v16 }
 0x421   :  { %9517 = vmatprep.subr.bf16.mxu1 %v14400_v26  ;;  %v2724_v26 = vld [vmem:[%s22812_s5 + $0x8a8] sm:$0xff]  ;;  %v14494_v33 = vcombine.high %v2723_v29, %v2731_v25  ;;  %v14493_v14 = vcombine.low %v2723_v29, %v2731_v25 }
 0x422   :  { %v14495_v30 = vcombine.low %v2724_v26, %v2732_v31 }
 0x423   :  { %9354 = vmatpush1.bf16.msra.mxu0 %v14397_v54  ;;  %v2747_v54 = vld [vmem:[%s22812_s5 + $0x960] sm:$0xff] }
 0x424   :  { %9518 = vmatpush1.bf16.msra.mxu1 %v14399_v38  ;;  %9355 = vmatprep.subr.bf16.mxu0 %v14414_v42  ;;  %v14496_v38 = vcombine.high %v2724_v26, %v2732_v31  ;;  %v2740_v42 = vld [vmem:[%s22812_s5 + $0x928] sm:$0xff]  ;;  %v14510_v44 = vcombine.high %v2739_v37, %v2747_v54  ;;  %v14509_v53 = vcombine.low %v2739_v37, %v2747_v54  ;;  %v2819_v31 = vld [vmem:[%s22812_s5 + $0xba0] sm:$0xff] }
 0x425   :  { %9519 = vmatprep.subr.bf16.mxu1 %v14416_v43  ;;  %v2748_v43 = vld [vmem:[%s22812_s5 + $0x968] sm:$0xff] }
 0x426   :  { %v14512_v45 = vcombine.high %v2740_v42, %v2748_v43  ;;  %v14511_v55 = vcombine.low %v2740_v42, %v2748_v43  ;;  %v2828_v37 = vld [vmem:[%s22812_s5 + $0xbe8] sm:$0xff] }
 0x427   :  { %9356 = vmatpush1.bf16.msra.mxu0 %v14413_v46  ;;  %v2755_v46 = vld [vmem:[%s22812_s5 + $0x9a0] sm:$0xff] }
 0x428   :  { %9520 = vmatpush1.bf16.msra.mxu1 %v14415_v48  ;;  %9357 = vmatprep.subr.bf16.mxu0 %v14430_v49  ;;  %v2763_v48 = vld [vmem:[%s22812_s5 + $0x9e0] sm:$0xff]  ;;  %v2756_v49 = vld [vmem:[%s22812_s5 + $0x9a8] sm:$0xff] }
 0x429   :  { %9521 = vmatprep.subr.bf16.mxu1 %v14432_v51  ;;  %v2764_v51 = vld [vmem:[%s22812_s5 + $0x9e8] sm:$0xff]  ;;  %v14526_v56 = vcombine.high %v2755_v46, %v2763_v48  ;;  %v14525_v0 = vcombine.low %v2755_v46, %v2763_v48 }
 0x42a   :  { %v14528_v59 = vcombine.high %v2756_v49, %v2764_v51  ;;  %v14527_v2 = vcombine.low %v2756_v49, %v2764_v51 }
 0x42b   :  { %9358 = vmatpush1.bf16.msra.mxu0 %v14429_v60  ;;  %v2771_v60 = vld [vmem:[%s22812_s5 + $0xa20] sm:$0xff] }
 0x42c   :  { %9522 = vmatpush1.bf16.msra.mxu1 %v14431_v61  ;;  %9359 = vmatprep.subr.bf16.mxu0 %v14446_v62  ;;  %v2779_v61 = vld [vmem:[%s22812_s5 + $0xa60] sm:$0xff]  ;;  %v2772_v62 = vld [vmem:[%s22812_s5 + $0xa28] sm:$0xff] }
 0x42d   :  { %9523 = vmatprep.subr.bf16.mxu1 %v14448_v63  ;;  %v2780_v63 = vld [vmem:[%s22812_s5 + $0xa68] sm:$0xff]  ;;  %v14542_v4 = vcombine.high %v2771_v60, %v2779_v61  ;;  %v14541_v12 = vcombine.low %v2771_v60, %v2779_v61 }
 0x42e   :  { %v14544_v28 = vcombine.high %v2772_v62, %v2780_v63  ;;  %v14543_v16 = vcombine.low %v2772_v62, %v2780_v63 }
 0x42f   :  { %9360 = vmatpush1.bf16.msra.mxu0 %v14445_v6  ;;  %v2787_v6 = vld [vmem:[%s22812_s5 + $0xaa0] sm:$0xff] }
 0x430   :  { %9524 = vmatpush1.bf16.msra.mxu1 %v14447_v7  ;;  %9361 = vmatprep.subr.bf16.mxu0 %v14462_v35  ;;  %v2795_v7 = vld [vmem:[%s22812_s5 + $0xae0] sm:$0xff]  ;;  %v2788_v35 = vld [vmem:[%s22812_s5 + $0xaa8] sm:$0xff] }
 0x431   :  { %9525 = vmatprep.subr.bf16.mxu1 %v14464_v9  ;;  %v2796_v9 = vld [vmem:[%s22812_s5 + $0xae8] sm:$0xff]  ;;  %v14558_v17 = vcombine.high %v2787_v6, %v2795_v7  ;;  %v14557_v29 = vcombine.low %v2787_v6, %v2795_v7 }
 0x432   :  { %v14560_v18 = vcombine.high %v2788_v35, %v2796_v9  ;;  %v14559_v25 = vcombine.low %v2788_v35, %v2796_v9 }
 0x433   :  { %9362 = vmatpush1.bf16.msra.mxu0 %v14461_v21  ;;  %v2803_v21 = vld [vmem:[%s22812_s5 + $0xb20] sm:$0xff] }
 0x434   :  { %9526 = vmatpush1.bf16.msra.mxu1 %v14463_v22  ;;  %9372 = vmatprep.subr.bf16.mxu0 %v14478_v23  ;;  %v2811_v22 = vld [vmem:[%s22812_s5 + $0xb60] sm:$0xff]  ;;  %v2804_v23 = vld [vmem:[%s22812_s5 + $0xb28] sm:$0xff] }
 0x435   :  { %9536 = vmatprep.subr.bf16.mxu1 %v14480_v24  ;;  %v2812_v24 = vld [vmem:[%s22812_s5 + $0xb68] sm:$0xff]  ;;  %v14573_v54 = vcombine.low %v2803_v21, %v2811_v22 }
 0x436   :  { %9364 = vmatmul.mubr.bf16.vlgmr.msra.gmra.mrb[20].mxu0 %v18196_v50  ;;  %v14576_v26 = vcombine.high %v2804_v23, %v2812_v24 }
 0x437   :  { %9528 = vmatmul.mubr.bf16.vlgmr.msra.gmra.mrb[20].mxu1 %v18196_v50  ;;  %9373 = vmatpush1.bf16.msra.mxu0 %v14477_v20  ;;  %v14574_v20 = vcombine.high %v2803_v21, %v2811_v22 }
 0x438   :  { %9404 = vmatprep.mubr.bf16.mxu0 %v18212_v58  ;;  %9537 = vmatpush1.bf16.msra.mxu1 %v14479_v32  ;;  %v2827_v32 = vld [vmem:[%s22812_s5 + $0xbe0] sm:$0xff] }
 0x439   :  { %9568 = vmatprep.mubr.bf16.mxu1 %v18212_v58  ;;  %9374 = vmatprep.subr.bf16.mxu0 %v14494_v33  ;;  %v2820_v33 = vld [vmem:[%s22812_s5 + $0xba8] sm:$0xff]  ;;  %v14590_v42 = vcombine.high %v2819_v31, %v2827_v32  ;;  %v14589_v46 = vcombine.low %v2819_v31, %v2827_v32 }
 0x43a   :  { %9538 = vmatprep.subr.bf16.mxu1 %v14496_v38  ;;  %v14575_v38 = vcombine.low %v2804_v23, %v2812_v24  ;;  %v14592_v43 = vcombine.high %v2820_v33, %v2828_v37  ;;  %v14591_v48 = vcombine.low %v2820_v33, %v2828_v37 }
 0x43b   :  { %9375 = vmatpush1.bf16.msra.mxu0 %v14493_v14  ;;  %v2835_v14 = vld [vmem:[%s22812_s5 + $0xc20] sm:$0xff] }
 0x43c   :  { %9539 = vmatpush1.bf16.msra.mxu1 %v14495_v30  ;;  %9376 = vmatprep.subr.bf16.mxu0 %v14510_v44  ;;  %v2843_v30 = vld [vmem:[%s22812_s5 + $0xc60] sm:$0xff]  ;;  %v2836_v44 = vld [vmem:[%s22812_s5 + $0xc28] sm:$0xff] }
 0x43d   :  { %9540 = vmatprep.subr.bf16.mxu1 %v14512_v45  ;;  %v2844_v45 = vld [vmem:[%s22812_s5 + $0xc68] sm:$0xff]  ;;  %v14606_v49 = vcombine.high %v2835_v14, %v2843_v30  ;;  %v14605_v60 = vcombine.low %v2835_v14, %v2843_v30 }
 0x43e   :  { %v14608_v51 = vcombine.high %v2836_v44, %v2844_v45  ;;  %v14607_v61 = vcombine.low %v2836_v44, %v2844_v45 }
 0x43f   :  { %9377 = vmatpush1.bf16.msra.mxu0 %v14509_v53  ;;  %v2851_v53 = vld [vmem:[%s22812_s5 + $0xca0] sm:$0xff] }
 0x440   :  { %9541 = vmatpush1.bf16.msra.mxu1 %v14511_v55  ;;  %9378 = vmatprep.subr.bf16.mxu0 %v14526_v56  ;;  %v2859_v55 = vld [vmem:[%s22812_s5 + $0xce0] sm:$0xff]  ;;  %v2852_v56 = vld [vmem:[%s22812_s5 + $0xca8] sm:$0xff] }
 0x441   :  { %9542 = vmatprep.subr.bf16.mxu1 %v14528_v59  ;;  %v2860_v59 = vld [vmem:[%s22812_s5 + $0xce8] sm:$0xff]  ;;  %v14622_v62 = vcombine.high %v2851_v53, %v2859_v55  ;;  %v14621_v6 = vcombine.low %v2851_v53, %v2859_v55 }
 0x442   :  { %v14624_v63 = vcombine.high %v2852_v56, %v2860_v59  ;;  %v14623_v7 = vcombine.low %v2852_v56, %v2860_v59 }
 0x443   :  { %9379 = vmatpush1.bf16.msra.mxu0 %v14525_v0  ;;  %v2867_v0 = vld [vmem:[%s22812_s5 + $0xd20] sm:$0xff] }
 0x444   :  { %9543 = vmatpush1.bf16.msra.mxu1 %v14527_v2  ;;  %9380 = vmatprep.subr.bf16.mxu0 %v14542_v4  ;;  %v2875_v2 = vld [vmem:[%s22812_s5 + $0xd60] sm:$0xff]  ;;  %v2868_v4 = vld [vmem:[%s22812_s5 + $0xd28] sm:$0xff] }
 0x445   :  { %9544 = vmatprep.subr.bf16.mxu1 %v14544_v28  ;;  %v2876_v28 = vld [vmem:[%s22812_s5 + $0xd68] sm:$0xff]  ;;  %v14638_v35 = vcombine.high %v2867_v0, %v2875_v2  ;;  %v14637_v21 = vcombine.low %v2867_v0, %v2875_v2 }
 0x446   :  { %v14640_v9 = vcombine.high %v2868_v4, %v2876_v28  ;;  %v14639_v22 = vcombine.low %v2868_v4, %v2876_v28 }
 0x447   :  { %9381 = vmatpush1.bf16.msra.mxu0 %v14541_v12  ;;  %v2883_v12 = vld [vmem:[%s22812_s5 + $0xda0] sm:$0xff] }
 0x448   :  { %9545 = vmatpush1.bf16.msra.mxu1 %v14543_v16  ;;  %9382 = vmatprep.subr.bf16.mxu0 %v14558_v17  ;;  %v2891_v16 = vld [vmem:[%s22812_s5 + $0xde0] sm:$0xff]  ;;  %v2884_v17 = vld [vmem:[%s22812_s5 + $0xda8] sm:$0xff] }
 0x449   :  { %9546 = vmatprep.subr.bf16.mxu1 %v14560_v18  ;;  %v2892_v18 = vld [vmem:[%s22812_s5 + $0xde8] sm:$0xff]  ;;  %v14654_v23 = vcombine.high %v2883_v12, %v2891_v16  ;;  %v14653_v31 = vcombine.low %v2883_v12, %v2891_v16 }
 0x44a   :  { %v14656_v24 = vcombine.high %v2884_v17, %v2892_v18  ;;  %v14655_v32 = vcombine.low %v2884_v17, %v2892_v18 }
 0x44b   :  { %9383 = vmatpush1.bf16.msra.mxu0 %v14557_v29  ;;  %v2899_v29 = vld [vmem:[%s22812_s5 + $0xe20] sm:$0xff] }
 0x44c   :  { %9547 = vmatpush1.bf16.msra.mxu1 %v14559_v25  ;;  %9384 = vmatprep.subr.bf16.mxu0 %v14574_v20  ;;  %v2907_v25 = vld [vmem:[%s22812_s5 + $0xe60] sm:$0xff]  ;;  %v2900_v20 = vld [vmem:[%s22812_s5 + $0xe28] sm:$0xff] }
 0x44d   :  { %9548 = vmatprep.subr.bf16.mxu1 %v14576_v26  ;;  %v2908_v26 = vld [vmem:[%s22812_s5 + $0xe68] sm:$0xff]  ;;  %v14670_v33 = vcombine.high %v2899_v29, %v2907_v25  ;;  %v14669_v14 = vcombine.low %v2899_v29, %v2907_v25 }
 0x44e   :  { %v14672_v37 = vcombine.high %v2900_v20, %v2908_v26  ;;  %v14671_v30 = vcombine.low %v2900_v20, %v2908_v26  ;;  %v2988_v29 = vld [vmem:[%s22812_s5 + $0x10e8] sm:$0xff]  ;;  %v2995_v26 = vld [vmem:[%s22812_s5 + $0x1120] sm:$0xff] }
 0x44f   :  { %9385 = vmatpush1.bf16.msra.mxu0 %v14573_v54  ;;  %v2915_v54 = vld [vmem:[%s22812_s5 + $0xea0] sm:$0xff] }
 0x450   :  { %9549 = vmatpush1.bf16.msra.mxu1 %v14575_v38  ;;  %9386 = vmatprep.subr.bf16.mxu0 %v14590_v42  ;;  %v2923_v38 = vld [vmem:[%s22812_s5 + $0xee0] sm:$0xff]  ;;  %v2916_v42 = vld [vmem:[%s22812_s5 + $0xea8] sm:$0xff] }
 0x451   :  { %9550 = vmatprep.subr.bf16.mxu1 %v14592_v43  ;;  %v2924_v43 = vld [vmem:[%s22812_s5 + $0xee8] sm:$0xff]  ;;  %v14686_v44 = vcombine.high %v2915_v54, %v2923_v38  ;;  %v14685_v53 = vcombine.low %v2915_v54, %v2923_v38 }
 0x452   :  { %v14688_v45 = vcombine.high %v2916_v42, %v2924_v43  ;;  %v14687_v55 = vcombine.low %v2916_v42, %v2924_v43 }
 0x453   :  { %9387 = vmatpush1.bf16.msra.mxu0 %v14589_v46  ;;  %v2931_v46 = vld [vmem:[%s22812_s5 + $0xf20] sm:$0xff] }
 0x454   :  { %9551 = vmatpush1.bf16.msra.mxu1 %v14591_v48  ;;  %9388 = vmatprep.subr.bf16.mxu0 %v14606_v49  ;;  %v2939_v48 = vld [vmem:[%s22812_s5 + $0xf60] sm:$0xff]  ;;  %v2932_v49 = vld [vmem:[%s22812_s5 + $0xf28] sm:$0xff] }
 0x455   :  { %9552 = vmatprep.subr.bf16.mxu1 %v14608_v51  ;;  %v2940_v51 = vld [vmem:[%s22812_s5 + $0xf68] sm:$0xff]  ;;  %v14702_v56 = vcombine.high %v2931_v46, %v2939_v48  ;;  %v14701_v0 = vcombine.low %v2931_v46, %v2939_v48 }
 0x456   :  { %v14704_v59 = vcombine.high %v2932_v49, %v2940_v51  ;;  %v14703_v2 = vcombine.low %v2932_v49, %v2940_v51 }
 0x457   :  { %9389 = vmatpush1.bf16.msra.mxu0 %v14605_v60  ;;  %v2947_v60 = vld [vmem:[%s22812_s5 + $0xfa0] sm:$0xff] }
 0x458   :  { %9553 = vmatpush1.bf16.msra.mxu1 %v14607_v61  ;;  %9390 = vmatprep.subr.bf16.mxu0 %v14622_v62  ;;  %v2955_v61 = vld [vmem:[%s22812_s5 + $0xfe0] sm:$0xff]  ;;  %v2948_v62 = vld [vmem:[%s22812_s5 + $0xfa8] sm:$0xff] }
 0x459   :  { %9554 = vmatprep.subr.bf16.mxu1 %v14624_v63  ;;  %v2956_v63 = vld [vmem:[%s22812_s5 + $0xfe8] sm:$0xff]  ;;  %v14718_v4 = vcombine.high %v2947_v60, %v2955_v61  ;;  %v14717_v12 = vcombine.low %v2947_v60, %v2955_v61 }
 0x45a   :  { %v14720_v28 = vcombine.high %v2948_v62, %v2956_v63  ;;  %v14719_v16 = vcombine.low %v2948_v62, %v2956_v63 }
 0x45b   :  { %9391 = vmatpush1.bf16.msra.mxu0 %v14621_v6  ;;  %v2963_v6 = vld [vmem:[%s22812_s5 + $0x1020] sm:$0xff] }
 0x45c   :  { %9555 = vmatpush1.bf16.msra.mxu1 %v14623_v7  ;;  %9392 = vmatprep.subr.bf16.mxu0 %v14638_v35  ;;  %v2971_v7 = vld [vmem:[%s22812_s5 + $0x1060] sm:$0xff]  ;;  %v2964_v35 = vld [vmem:[%s22812_s5 + $0x1028] sm:$0xff] }
 0x45d   :  { %9556 = vmatprep.subr.bf16.mxu1 %v14640_v9  ;;  %v2972_v9 = vld [vmem:[%s22812_s5 + $0x1068] sm:$0xff]  ;;  %v14734_v17 = vcombine.high %v2963_v6, %v2971_v7 }
 0x45e   :  { %v14736_v18 = vcombine.high %v2964_v35, %v2972_v9  ;;  %v14735_v25 = vcombine.low %v2964_v35, %v2972_v9 }
 0x45f   :  { %9393 = vmatpush1.bf16.msra.mxu0 %v14637_v21  ;;  %v2979_v21 = vld [vmem:[%s22812_s5 + $0x10a0] sm:$0xff] }
 0x460   :  { %9557 = vmatpush1.bf16.msra.mxu1 %v14639_v22  ;;  %9394 = vmatprep.subr.bf16.mxu0 %v14654_v23  ;;  %v2987_v22 = vld [vmem:[%s22812_s5 + $0x10e0] sm:$0xff]  ;;  %v14733_v23 = vcombine.low %v2963_v6, %v2971_v7 }
 0x461   :  { %9558 = vmatprep.subr.bf16.mxu1 %v14656_v24  ;;  %v2980_v24 = vld [vmem:[%s22812_s5 + $0x10a8] sm:$0xff]  ;;  %v14750_v20 = vcombine.high %v2979_v21, %v2987_v22  ;;  %v14749_v54 = vcombine.low %v2979_v21, %v2987_v22 }
 0x462   :  { %v14751_v38 = vcombine.low %v2980_v24, %v2988_v29 }
 0x463   :  { %9395 = vmatpush1.bf16.msra.mxu0 %v14653_v31  ;;  %v3003_v31 = vld [vmem:[%s22812_s5 + $0x1160] sm:$0xff] }
 0x464   :  { %9559 = vmatpush1.bf16.msra.mxu1 %v14655_v32  ;;  %9396 = vmatprep.subr.bf16.mxu0 %v14670_v33  ;;  %v14752_v32 = vcombine.high %v2980_v24, %v2988_v29  ;;  %v2996_v33 = vld [vmem:[%s22812_s5 + $0x1128] sm:$0xff]  ;;  %v14766_v42 = vcombine.high %v2995_v26, %v3003_v31  ;;  %v14765_v46 = vcombine.low %v2995_v26, %v3003_v31  ;;  %v3075_v29 = vld [vmem:[%s22812_s5 + $0x13a0] sm:$0xff] }
 0x465   :  { %9560 = vmatprep.subr.bf16.mxu1 %v14672_v37  ;;  %v3004_v37 = vld [vmem:[%s22812_s5 + $0x1168] sm:$0xff] }
 0x466   :  { %v14768_v43 = vcombine.high %v2996_v33, %v3004_v37  ;;  %v14767_v48 = vcombine.low %v2996_v33, %v3004_v37  ;;  %v3084_v26 = vld [vmem:[%s22812_s5 + $0x13e8] sm:$0xff] }
 0x467   :  { %9397 = vmatpush1.bf16.msra.mxu0 %v14669_v14  ;;  %v3011_v14 = vld [vmem:[%s22812_s5 + $0x11a0] sm:$0xff] }
 0x468   :  { %9561 = vmatpush1.bf16.msra.mxu1 %v14671_v30  ;;  %9398 = vmatprep.subr.bf16.mxu0 %v14686_v44  ;;  %v3019_v30 = vld [vmem:[%s22812_s5 + $0x11e0] sm:$0xff]  ;;  %v3012_v44 = vld [vmem:[%s22812_s5 + $0x11a8] sm:$0xff] }
 0x469   :  { %9562 = vmatprep.subr.bf16.mxu1 %v14688_v45  ;;  %v3020_v45 = vld [vmem:[%s22812_s5 + $0x11e8] sm:$0xff]  ;;  %v14782_v49 = vcombine.high %v3011_v14, %v3019_v30  ;;  %v14781_v60 = vcombine.low %v3011_v14, %v3019_v30 }
 0x46a   :  { %v14784_v51 = vcombine.high %v3012_v44, %v3020_v45  ;;  %v14783_v61 = vcombine.low %v3012_v44, %v3020_v45 }
 0x46b   :  { %9399 = vmatpush1.bf16.msra.mxu0 %v14685_v53  ;;  %v3027_v53 = vld [vmem:[%s22812_s5 + $0x1220] sm:$0xff] }
 0x46c   :  { %9563 = vmatpush1.bf16.msra.mxu1 %v14687_v55  ;;  %9400 = vmatprep.subr.bf16.mxu0 %v14702_v56  ;;  %v3035_v55 = vld [vmem:[%s22812_s5 + $0x1260] sm:$0xff]  ;;  %v3028_v56 = vld [vmem:[%s22812_s5 + $0x1228] sm:$0xff] }
 0x46d   :  { %9564 = vmatprep.subr.bf16.mxu1 %v14704_v59  ;;  %v3036_v59 = vld [vmem:[%s22812_s5 + $0x1268] sm:$0xff]  ;;  %v14798_v62 = vcombine.high %v3027_v53, %v3035_v55  ;;  %v14797_v6 = vcombine.low %v3027_v53, %v3035_v55 }
 0x46e   :  { %v14800_v63 = vcombine.high %v3028_v56, %v3036_v59  ;;  %v14799_v7 = vcombine.low %v3028_v56, %v3036_v59 }
 0x46f   :  { %9401 = vmatpush1.bf16.msra.mxu0 %v14701_v0  ;;  %v3043_v0 = vld [vmem:[%s22812_s5 + $0x12a0] sm:$0xff] }
 0x470   :  { %9565 = vmatpush1.bf16.msra.mxu1 %v14703_v2  ;;  %9402 = vmatprep.subr.bf16.mxu0 %v14718_v4  ;;  %v3051_v2 = vld [vmem:[%s22812_s5 + $0x12e0] sm:$0xff]  ;;  %v3044_v4 = vld [vmem:[%s22812_s5 + $0x12a8] sm:$0xff] }
 0x471   :  { %9566 = vmatprep.subr.bf16.mxu1 %v14720_v28  ;;  %v3052_v28 = vld [vmem:[%s22812_s5 + $0x12e8] sm:$0xff]  ;;  %v14814_v35 = vcombine.high %v3043_v0, %v3051_v2  ;;  %v14813_v21 = vcombine.low %v3043_v0, %v3051_v2 }
 0x472   :  { %v14816_v9 = vcombine.high %v3044_v4, %v3052_v28  ;;  %v14815_v22 = vcombine.low %v3044_v4, %v3052_v28 }
 0x473   :  { %9403 = vmatpush1.bf16.msra.mxu0 %v14717_v12  ;;  %v3059_v12 = vld [vmem:[%s22812_s5 + $0x1320] sm:$0xff] }
 0x474   :  { %9567 = vmatpush1.bf16.msra.mxu1 %v14719_v16  ;;  %9413 = vmatprep.subr.bf16.mxu0 %v14734_v17  ;;  %v3067_v16 = vld [vmem:[%s22812_s5 + $0x1360] sm:$0xff]  ;;  %v3060_v17 = vld [vmem:[%s22812_s5 + $0x1328] sm:$0xff] }
 0x475   :  { %9577 = vmatprep.subr.bf16.mxu1 %v14736_v18  ;;  %v3068_v18 = vld [vmem:[%s22812_s5 + $0x1368] sm:$0xff]  ;;  %v14829_v31 = vcombine.low %v3059_v12, %v3067_v16 }
 0x476   :  { %9405 = vmatmul.mubr.bf16.vlgmr.msra.gmra.mrb[20].mxu0 %v18401_v10  ;;  %v14832_v24 = vcombine.high %v3060_v17, %v3068_v18 }
 0x477   :  { %9569 = vmatmul.mubr.bf16.vlgmr.msra.gmra.mrb[20].mxu1 %v18401_v10  ;;  %9414 = vmatpush1.bf16.msra.mxu0 %v14733_v23  ;;  %v14830_v23 = vcombine.high %v3059_v12, %v3067_v16 }
 0x478   :  { %9445 = vmatprep.mubr.bf16.mxu0 %v18614_v3  ;;  %9578 = vmatpush1.bf16.msra.mxu1 %v14735_v25  ;;  %v3083_v25 = vld [vmem:[%s22812_s5 + $0x13e0] sm:$0xff] }
 0x479   :  { %9609 = vmatprep.mubr.bf16.mxu1 %v18614_v3  ;;  %9415 = vmatprep.subr.bf16.mxu0 %v14750_v20  ;;  %v3076_v20 = vld [vmem:[%s22812_s5 + $0x13a8] sm:$0xff]  ;;  %v14846_v33 = vcombine.high %v3075_v29, %v3083_v25  ;;  %v14845_v14 = vcombine.low %v3075_v29, %v3083_v25 }
 0x47a   :  { %9579 = vmatprep.subr.bf16.mxu1 %v14752_v32  ;;  %v14831_v32 = vcombine.low %v3060_v17, %v3068_v18  ;;  %v14848_v37 = vcombine.high %v3076_v20, %v3084_v26  ;;  %v14847_v30 = vcombine.low %v3076_v20, %v3084_v26 }
 0x47b   :  { %9416 = vmatpush1.bf16.msra.mxu0 %v14749_v54  ;;  %v3091_v54 = vld [vmem:[%s22812_s5 + $0x1420] sm:$0xff] }
 0x47c   :  { %9580 = vmatpush1.bf16.msra.mxu1 %v14751_v38  ;;  %9417 = vmatprep.subr.bf16.mxu0 %v14766_v42  ;;  %v3099_v38 = vld [vmem:[%s22812_s5 + $0x1460] sm:$0xff]  ;;  %v3092_v42 = vld [vmem:[%s22812_s5 + $0x1428] sm:$0xff] }
 0x47d   :  { %9581 = vmatprep.subr.bf16.mxu1 %v14768_v43  ;;  %v3100_v43 = vld [vmem:[%s22812_s5 + $0x1468] sm:$0xff]  ;;  %v14862_v44 = vcombine.high %v3091_v54, %v3099_v38  ;;  %v14861_v53 = vcombine.low %v3091_v54, %v3099_v38 }
 0x47e   :  { %v14864_v45 = vcombine.high %v3092_v42, %v3100_v43  ;;  %v14863_v55 = vcombine.low %v3092_v42, %v3100_v43 }
 0x47f   :  { %9418 = vmatpush1.bf16.msra.mxu0 %v14765_v46  ;;  %v3107_v46 = vld [vmem:[%s22812_s5 + $0x14a0] sm:$0xff] }
 0x480   :  { %9582 = vmatpush1.bf16.msra.mxu1 %v14767_v48  ;;  %9419 = vmatprep.subr.bf16.mxu0 %v14782_v49  ;;  %v3115_v48 = vld [vmem:[%s22812_s5 + $0x14e0] sm:$0xff]  ;;  %v3108_v49 = vld [vmem:[%s22812_s5 + $0x14a8] sm:$0xff] }
 0x481   :  { %9583 = vmatprep.subr.bf16.mxu1 %v14784_v51  ;;  %v3116_v51 = vld [vmem:[%s22812_s5 + $0x14e8] sm:$0xff]  ;;  %v14878_v56 = vcombine.high %v3107_v46, %v3115_v48  ;;  %v14877_v0 = vcombine.low %v3107_v46, %v3115_v48 }
 0x482   :  { %v14880_v59 = vcombine.high %v3108_v49, %v3116_v51  ;;  %v14879_v2 = vcombine.low %v3108_v49, %v3116_v51 }
 0x483   :  { %9420 = vmatpush1.bf16.msra.mxu0 %v14781_v60  ;;  %v3123_v60 = vld [vmem:[%s22812_s5 + $0x1520] sm:$0xff] }
 0x484   :  { %9584 = vmatpush1.bf16.msra.mxu1 %v14783_v61  ;;  %9421 = vmatprep.subr.bf16.mxu0 %v14798_v62  ;;  %v3131_v61 = vld [vmem:[%s22812_s5 + $0x1560] sm:$0xff]  ;;  %v3124_v62 = vld [vmem:[%s22812_s5 + $0x1528] sm:$0xff] }
 0x485   :  { %9585 = vmatprep.subr.bf16.mxu1 %v14800_v63  ;;  %v3132_v63 = vld [vmem:[%s22812_s5 + $0x1568] sm:$0xff]  ;;  %v14894_v4 = vcombine.high %v3123_v60, %v3131_v61  ;;  %v14893_v12 = vcombine.low %v3123_v60, %v3131_v61 }
 0x486   :  { %v14896_v28 = vcombine.high %v3124_v62, %v3132_v63  ;;  %v14895_v16 = vcombine.low %v3124_v62, %v3132_v63 }
 0x487   :  { %9422 = vmatpush1.bf16.msra.mxu0 %v14797_v6  ;;  %v3139_v6 = vld [vmem:[%s22812_s5 + $0x15a0] sm:$0xff] }
 0x488   :  { %9586 = vmatpush1.bf16.msra.mxu1 %v14799_v7  ;;  %9423 = vmatprep.subr.bf16.mxu0 %v14814_v35  ;;  %v3147_v7 = vld [vmem:[%s22812_s5 + $0x15e0] sm:$0xff]  ;;  %v3140_v35 = vld [vmem:[%s22812_s5 + $0x15a8] sm:$0xff] }
 0x489   :  { %9587 = vmatprep.subr.bf16.mxu1 %v14816_v9  ;;  %v3148_v9 = vld [vmem:[%s22812_s5 + $0x15e8] sm:$0xff]  ;;  %v14910_v17 = vcombine.high %v3139_v6, %v3147_v7  ;;  %v14909_v29 = vcombine.low %v3139_v6, %v3147_v7 }
 0x48a   :  { %v14912_v18 = vcombine.high %v3140_v35, %v3148_v9  ;;  %v14911_v25 = vcombine.low %v3140_v35, %v3148_v9 }
 0x48b   :  { %9424 = vmatpush1.bf16.msra.mxu0 %v14813_v21  ;;  %v3155_v21 = vld [vmem:[%s22812_s5 + $0x1620] sm:$0xff] }
 0x48c   :  { %9588 = vmatpush1.bf16.msra.mxu1 %v14815_v22  ;;  %9425 = vmatprep.subr.bf16.mxu0 %v14830_v23  ;;  %v3163_v22 = vld [vmem:[%s22812_s5 + $0x1660] sm:$0xff]  ;;  %v3156_v23 = vld [vmem:[%s22812_s5 + $0x1628] sm:$0xff] }
 0x48d   :  { %9589 = vmatprep.subr.bf16.mxu1 %v14832_v24  ;;  %v3164_v24 = vld [vmem:[%s22812_s5 + $0x1668] sm:$0xff]  ;;  %v14926_v20 = vcombine.high %v3155_v21, %v3163_v22  ;;  %v14925_v54 = vcombine.low %v3155_v21, %v3163_v22 }
 0x48e   :  { %v14928_v26 = vcombine.high %v3156_v23, %v3164_v24  ;;  %v14927_v38 = vcombine.low %v3156_v23, %v3164_v24  ;;  %v3244_v21 = vld [vmem:[%s22812_s5 + $0x18e8] sm:$0xff]  ;;  %v3251_v24 = vld [vmem:[%s22812_s5 + $0x1920] sm:$0xff] }
 0x48f   :  { %9426 = vmatpush1.bf16.msra.mxu0 %v14829_v31  ;;  %v3171_v31 = vld [vmem:[%s22812_s5 + $0x16a0] sm:$0xff] }
 0x490   :  { %9590 = vmatpush1.bf16.msra.mxu1 %v14831_v32  ;;  %9427 = vmatprep.subr.bf16.mxu0 %v14846_v33  ;;  %v3179_v32 = vld [vmem:[%s22812_s5 + $0x16e0] sm:$0xff]  ;;  %v3172_v33 = vld [vmem:[%s22812_s5 + $0x16a8] sm:$0xff] }
 0x491   :  { %9591 = vmatprep.subr.bf16.mxu1 %v14848_v37  ;;  %v3180_v37 = vld [vmem:[%s22812_s5 + $0x16e8] sm:$0xff]  ;;  %v14942_v42 = vcombine.high %v3171_v31, %v3179_v32  ;;  %v14941_v46 = vcombine.low %v3171_v31, %v3179_v32 }
 0x492   :  { %v14944_v43 = vcombine.high %v3172_v33, %v3180_v37  ;;  %v14943_v48 = vcombine.low %v3172_v33, %v3180_v37 }
 0x493   :  { %9428 = vmatpush1.bf16.msra.mxu0 %v14845_v14  ;;  %v3187_v14 = vld [vmem:[%s22812_s5 + $0x1720] sm:$0xff] }
 0x494   :  { %9592 = vmatpush1.bf16.msra.mxu1 %v14847_v30  ;;  %9429 = vmatprep.subr.bf16.mxu0 %v14862_v44  ;;  %v3195_v30 = vld [vmem:[%s22812_s5 + $0x1760] sm:$0xff]  ;;  %v3188_v44 = vld [vmem:[%s22812_s5 + $0x1728] sm:$0xff] }
 0x495   :  { %9593 = vmatprep.subr.bf16.mxu1 %v14864_v45  ;;  %v3196_v45 = vld [vmem:[%s22812_s5 + $0x1768] sm:$0xff]  ;;  %v14958_v49 = vcombine.high %v3187_v14, %v3195_v30  ;;  %v14957_v60 = vcombine.low %v3187_v14, %v3195_v30 }
 0x496   :  { %v14960_v51 = vcombine.high %v3188_v44, %v3196_v45  ;;  %v14959_v61 = vcombine.low %v3188_v44, %v3196_v45 }
 0x497   :  { %9430 = vmatpush1.bf16.msra.mxu0 %v14861_v53  ;;  %v3203_v53 = vld [vmem:[%s22812_s5 + $0x17a0] sm:$0xff] }
 0x498   :  { %9594 = vmatpush1.bf16.msra.mxu1 %v14863_v55  ;;  %9431 = vmatprep.subr.bf16.mxu0 %v14878_v56  ;;  %v3211_v55 = vld [vmem:[%s22812_s5 + $0x17e0] sm:$0xff]  ;;  %v3204_v56 = vld [vmem:[%s22812_s5 + $0x17a8] sm:$0xff] }
 0x499   :  { %9595 = vmatprep.subr.bf16.mxu1 %v14880_v59  ;;  %v3212_v59 = vld [vmem:[%s22812_s5 + $0x17e8] sm:$0xff]  ;;  %v14974_v62 = vcombine.high %v3203_v53, %v3211_v55  ;;  %v14973_v6 = vcombine.low %v3203_v53, %v3211_v55 }
 0x49a   :  { %v14976_v63 = vcombine.high %v3204_v56, %v3212_v59  ;;  %v14975_v7 = vcombine.low %v3204_v56, %v3212_v59 }
 0x49b   :  { %9432 = vmatpush1.bf16.msra.mxu0 %v14877_v0  ;;  %v3219_v0 = vld [vmem:[%s22812_s5 + $0x1820] sm:$0xff] }
 0x49c   :  { %9596 = vmatpush1.bf16.msra.mxu1 %v14879_v2  ;;  %9433 = vmatprep.subr.bf16.mxu0 %v14894_v4  ;;  %v3227_v2 = vld [vmem:[%s22812_s5 + $0x1860] sm:$0xff]  ;;  %v3220_v4 = vld [vmem:[%s22812_s5 + $0x1828] sm:$0xff] }
 0x49d   :  { %9597 = vmatprep.subr.bf16.mxu1 %v14896_v28  ;;  %v3228_v28 = vld [vmem:[%s22812_s5 + $0x1868] sm:$0xff]  ;;  %v14990_v35 = vcombine.high %v3219_v0, %v3227_v2 }
 0x49e   :  { %v14992_v9 = vcombine.high %v3220_v4, %v3228_v28  ;;  %v14991_v22 = vcombine.low %v3220_v4, %v3228_v28 }
 0x49f   :  { %9434 = vmatpush1.bf16.msra.mxu0 %v14893_v12  ;;  %v3235_v12 = vld [vmem:[%s22812_s5 + $0x18a0] sm:$0xff] }
 0x4a0   :  { %9598 = vmatpush1.bf16.msra.mxu1 %v14895_v16  ;;  %9435 = vmatprep.subr.bf16.mxu0 %v14910_v17  ;;  %v3243_v16 = vld [vmem:[%s22812_s5 + $0x18e0] sm:$0xff]  ;;  %v14989_v17 = vcombine.low %v3219_v0, %v3227_v2 }
 0x4a1   :  { %9599 = vmatprep.subr.bf16.mxu1 %v14912_v18  ;;  %v3236_v18 = vld [vmem:[%s22812_s5 + $0x18a8] sm:$0xff]  ;;  %v15006_v23 = vcombine.high %v3235_v12, %v3243_v16  ;;  %v15005_v31 = vcombine.low %v3235_v12, %v3243_v16 }
 0x4a2   :  { %v15007_v32 = vcombine.low %v3236_v18, %v3244_v21 }
 0x4a3   :  { %9436 = vmatpush1.bf16.msra.mxu0 %v14909_v29  ;;  %v3259_v29 = vld [vmem:[%s22812_s5 + $0x1960] sm:$0xff] }
 0x4a4   :  { %9600 = vmatpush1.bf16.msra.mxu1 %v14911_v25  ;;  %9437 = vmatprep.subr.bf16.mxu0 %v14926_v20  ;;  %v15008_v25 = vcombine.high %v3236_v18, %v3244_v21  ;;  %v3252_v20 = vld [vmem:[%s22812_s5 + $0x1928] sm:$0xff]  ;;  %v15022_v33 = vcombine.high %v3251_v24, %v3259_v29  ;;  %v15021_v14 = vcombine.low %v3251_v24, %v3259_v29 }
 0x4a5   :  { %9601 = vmatprep.subr.bf16.mxu1 %v14928_v26  ;;  %v3260_v26 = vld [vmem:[%s22812_s5 + $0x1968] sm:$0xff] }
 0x4a6   :  { %v15024_v37 = vcombine.high %v3252_v20, %v3260_v26  ;;  %v15023_v30 = vcombine.low %v3252_v20, %v3260_v26  ;;  %v3340_v20 = vld [vmem:[%s22812_s5 + $0x1be8] sm:$0xff] }
 0x4a7   :  { %9438 = vmatpush1.bf16.msra.mxu0 %v14925_v54  ;;  %v3267_v54 = vld [vmem:[%s22812_s5 + $0x19a0] sm:$0xff] }
 0x4a8   :  { %9602 = vmatpush1.bf16.msra.mxu1 %v14927_v38  ;;  %9439 = vmatprep.subr.bf16.mxu0 %v14942_v42  ;;  %v3275_v38 = vld [vmem:[%s22812_s5 + $0x19e0] sm:$0xff]  ;;  %v3268_v42 = vld [vmem:[%s22812_s5 + $0x19a8] sm:$0xff] }
 0x4a9   :  { %9603 = vmatprep.subr.bf16.mxu1 %v14944_v43  ;;  %v3276_v43 = vld [vmem:[%s22812_s5 + $0x19e8] sm:$0xff]  ;;  %v15038_v44 = vcombine.high %v3267_v54, %v3275_v38  ;;  %v15037_v53 = vcombine.low %v3267_v54, %v3275_v38 }
 0x4aa   :  { %v15040_v45 = vcombine.high %v3268_v42, %v3276_v43  ;;  %v15039_v55 = vcombine.low %v3268_v42, %v3276_v43 }
 0x4ab   :  { %9440 = vmatpush1.bf16.msra.mxu0 %v14941_v46  ;;  %v3283_v46 = vld [vmem:[%s22812_s5 + $0x1a20] sm:$0xff] }
 0x4ac   :  { %9604 = vmatpush1.bf16.msra.mxu1 %v14943_v48  ;;  %9441 = vmatprep.subr.bf16.mxu0 %v14958_v49  ;;  %v3291_v48 = vld [vmem:[%s22812_s5 + $0x1a60] sm:$0xff]  ;;  %v3284_v49 = vld [vmem:[%s22812_s5 + $0x1a28] sm:$0xff] }
 0x4ad   :  { %9605 = vmatprep.subr.bf16.mxu1 %v14960_v51  ;;  %v3292_v51 = vld [vmem:[%s22812_s5 + $0x1a68] sm:$0xff]  ;;  %v15054_v56 = vcombine.high %v3283_v46, %v3291_v48  ;;  %v15053_v0 = vcombine.low %v3283_v46, %v3291_v48 }
 0x4ae   :  { %v15056_v59 = vcombine.high %v3284_v49, %v3292_v51  ;;  %v15055_v2 = vcombine.low %v3284_v49, %v3292_v51 }
 0x4af   :  { %9442 = vmatpush1.bf16.msra.mxu0 %v14957_v60  ;;  %v3299_v60 = vld [vmem:[%s22812_s5 + $0x1aa0] sm:$0xff] }
 0x4b0   :  { %9606 = vmatpush1.bf16.msra.mxu1 %v14959_v61  ;;  %9443 = vmatprep.subr.bf16.mxu0 %v14974_v62  ;;  %v3307_v61 = vld [vmem:[%s22812_s5 + $0x1ae0] sm:$0xff]  ;;  %v3300_v62 = vld [vmem:[%s22812_s5 + $0x1aa8] sm:$0xff] }
 0x4b1   :  { %9607 = vmatprep.subr.bf16.mxu1 %v14976_v63  ;;  %v3308_v63 = vld [vmem:[%s22812_s5 + $0x1ae8] sm:$0xff]  ;;  %v15070_v4 = vcombine.high %v3299_v60, %v3307_v61  ;;  %v15069_v12 = vcombine.low %v3299_v60, %v3307_v61 }
 0x4b2   :  { %v15072_v28 = vcombine.high %v3300_v62, %v3308_v63  ;;  %v15071_v16 = vcombine.low %v3300_v62, %v3308_v63 }
 0x4b3   :  { %9444 = vmatpush1.bf16.msra.mxu0 %v14973_v6  ;;  %v3315_v6 = vld [vmem:[%s22812_s5 + $0x1b20] sm:$0xff] }
 0x4b4   :  { %9608 = vmatpush1.bf16.msra.mxu1 %v14975_v7  ;;  %9454 = vmatprep.subr.bf16.mxu0 %v14990_v35  ;;  %v3323_v7 = vld [vmem:[%s22812_s5 + $0x1b60] sm:$0xff]  ;;  %v3316_v35 = vld [vmem:[%s22812_s5 + $0x1b28] sm:$0xff] }
 0x4b5   :  { %9618 = vmatprep.subr.bf16.mxu1 %v14992_v9  ;;  %v3324_v9 = vld [vmem:[%s22812_s5 + $0x1b68] sm:$0xff] }
 0x4b6   :  { %9446 = vmatmul.mubr.bf16.vlgmr.msra.gmra.mrb[20].mxu0 %v18616_v57  ;;  %v15088_v21 = vcombine.high %v3316_v35, %v3324_v9  ;;  %v15087_v54 = vcombine.low %v3316_v35, %v3324_v9 }
 0x4b7   :  { %9610 = vmatmul.mubr.bf16.vlgmr.msra.gmra.mrb[20].mxu1 %v18616_v57  ;;  %9455 = vmatpush1.bf16.msra.mxu0 %v14989_v17  ;;  %v15086_v17 = vcombine.high %v3315_v6, %v3323_v7 }
 0x4b8   :  { %9486 = vmatprep.mubr.bf16.mxu0 %v18632_v1  ;;  %9619 = vmatpush1.bf16.msra.mxu1 %v14991_v22  ;;  %v3331_v22 = vld [vmem:[%s22812_s5 + $0x1ba0] sm:$0xff] }
 0x4b9   :  { %9650 = vmatprep.mubr.bf16.mxu1 %v18632_v1  ;;  %9456 = vmatprep.subr.bf16.mxu0 %v15006_v23  ;;  %v3339_v23 = vld [vmem:[%s22812_s5 + $0x1be0] sm:$0xff] }
 0x4ba   :  { %9620 = vmatprep.subr.bf16.mxu1 %v15008_v25  ;;  %v3332_v25 = vld [vmem:[%s22812_s5 + $0x1ba8] sm:$0xff]  ;;  %v15102_v38 = vcombine.high %v3331_v22, %v3339_v23  ;;  %v15101_v46 = vcombine.low %v3331_v22, %v3339_v23 }
 0x4bb   :  { %9457 = vmatpush1.bf16.msra.mxu0 %v15005_v31  ;;  %v15104_v43 = vcombine.high %v3332_v25, %v3340_v20  ;;  %v15103_v48 = vcombine.low %v3332_v25, %v3340_v20 }
 0x4bc   :  { %9621 = vmatpush1.bf16.msra.mxu1 %v15007_v32  ;;  %9458 = vmatprep.subr.bf16.mxu0 %v15022_v33  ;;  %v15085_v32 = vcombine.low %v3315_v6, %v3323_v7 }
 0x4bd   :  { %9622 = vmatprep.subr.bf16.mxu1 %v15024_v37 }
 0x4bf   :  { %9459 = vmatpush1.bf16.msra.mxu0 %v15021_v14  ;;  %v3347_v14 = vld [vmem:[%s22812_s5 + $0x1c20] sm:$0xff] }
 0x4c0   :  { %9623 = vmatpush1.bf16.msra.mxu1 %v15023_v30  ;;  %9460 = vmatprep.subr.bf16.mxu0 %v15038_v44  ;;  %v3355_v30 = vld [vmem:[%s22812_s5 + $0x1c60] sm:$0xff]  ;;  %v3348_v44 = vld [vmem:[%s22812_s5 + $0x1c28] sm:$0xff] }
 0x4c1   :  { %9624 = vmatprep.subr.bf16.mxu1 %v15040_v45  ;;  %v3356_v45 = vld [vmem:[%s22812_s5 + $0x1c68] sm:$0xff]  ;;  %v15118_v49 = vcombine.high %v3347_v14, %v3355_v30  ;;  %v15117_v60 = vcombine.low %v3347_v14, %v3355_v30  ;;  %v3427_v14 = vld [vmem:[%s22812_s5 + $0x1ea0] sm:$0xff] }
 0x4c2   :  { %v15120_v51 = vcombine.high %v3348_v44, %v3356_v45  ;;  %v15119_v61 = vcombine.low %v3348_v44, %v3356_v45  ;;  %v3435_v30 = vld [vmem:[%s22812_s5 + $0x1ee0] sm:$0xff]  ;;  %v3428_v44 = vld [vmem:[%s22812_s5 + $0x1ea8] sm:$0xff] }
 0x4c3   :  { %9461 = vmatpush1.bf16.msra.mxu0 %v15037_v53  ;;  %v3363_v53 = vld [vmem:[%s22812_s5 + $0x1ca0] sm:$0xff]  ;;  %v3436_v45 = vld [vmem:[%s22812_s5 + $0x1ee8] sm:$0xff] }
 0x4c4   :  { %9625 = vmatpush1.bf16.msra.mxu1 %v15039_v55  ;;  %9462 = vmatprep.subr.bf16.mxu0 %v15054_v56  ;;  %v3371_v55 = vld [vmem:[%s22812_s5 + $0x1ce0] sm:$0xff]  ;;  %v3364_v56 = vld [vmem:[%s22812_s5 + $0x1ca8] sm:$0xff] }
 0x4c5   :  { %9626 = vmatprep.subr.bf16.mxu1 %v15056_v59  ;;  %v3372_v59 = vld [vmem:[%s22812_s5 + $0x1ce8] sm:$0xff]  ;;  %v15134_v62 = vcombine.high %v3363_v53, %v3371_v55  ;;  %v15133_v6 = vcombine.low %v3363_v53, %v3371_v55  ;;  %v3443_v53 = vld [vmem:[%s22812_s5 + $0x1f20] sm:$0xff] }
 0x4c6   :  { %v15136_v63 = vcombine.high %v3364_v56, %v3372_v59  ;;  %v15135_v7 = vcombine.low %v3364_v56, %v3372_v59  ;;  %v3451_v55 = vld [vmem:[%s22812_s5 + $0x1f60] sm:$0xff]  ;;  %v3444_v56 = vld [vmem:[%s22812_s5 + $0x1f28] sm:$0xff] }
 0x4c7   :  { %9463 = vmatpush1.bf16.msra.mxu0 %v15053_v0  ;;  %v3379_v0 = vld [vmem:[%s22812_s5 + $0x1d20] sm:$0xff]  ;;  %v3452_v59 = vld [vmem:[%s22812_s5 + $0x1f68] sm:$0xff] }
 0x4c8   :  { %9627 = vmatpush1.bf16.msra.mxu1 %v15055_v2  ;;  %9464 = vmatprep.subr.bf16.mxu0 %v15070_v4  ;;  %v3387_v2 = vld [vmem:[%s22812_s5 + $0x1d60] sm:$0xff]  ;;  %v3380_v4 = vld [vmem:[%s22812_s5 + $0x1d28] sm:$0xff] }
 0x4c9   :  { %v20272_v18 = vpop.f32.mrb[16].mxu0  ;;  %9628 = vmatprep.subr.bf16.mxu1 %v15072_v28  ;;  %v3388_v28 = vld [vmem:[%s22812_s5 + $0x1d68] sm:$0xff]  ;;  %v15150_v35 = vcombine.high %v3379_v0, %v3387_v2  ;;  %v15149_v22 = vcombine.low %v3379_v0, %v3387_v2  ;;  %v3459_v0 = vld [vmem:[%s22812_s5 + $0x1fa0] sm:$0xff] }
 0x4ca   :  { %v20280_v24 = vpop.f32.mrb[16].mxu1  ;;  %v20282_v29 = vpop.f32.mrb[17].mxu0  ;;  %v15152_v9 = vcombine.high %v3380_v4, %v3388_v28  ;;  %v15151_v23 = vcombine.low %v3380_v4, %v3388_v28  ;;  %v3467_v2 = vld [vmem:[%s22812_s5 + $0x1fe0] sm:$0xff]  ;;  %v3460_v4 = vld [vmem:[%s22812_s5 + $0x1fa8] sm:$0xff] }
 0x4cb   :  { %v20290_v26 = vpop.f32.mrb[17].mxu1  ;;  %v9164_v31 = vpop.f32.mrb[18].mxu0  ;;  %9465 = vmatpush1.bf16.msra.mxu0 %v15069_v12  ;;  %v3395_v12 = vld [vmem:[%s22812_s5 + $0x1da0] sm:$0xff]  ;;  %v3468_v28 = vld [vmem:[%s22812_s5 + $0x1fe8] sm:$0xff] }
 0x4cc   :  { %v9328_v33 = vpop.f32.mrb[18].mxu1  ;;  %9629 = vmatpush1.bf16.msra.mxu1 %v15071_v16  ;;  %v9165_v37 = vpop.f32.mrb[19].mxu0  ;;  %9466 = vmatprep.subr.bf16.mxu0 %v15086_v17  ;;  %v3403_v16 = vld [vmem:[%s22812_s5 + $0x1de0] sm:$0xff]  ;;  %v3396_v17 = vld [vmem:[%s22812_s5 + $0x1da8] sm:$0xff] }
 0x4cd   :  { %v9329_v42 = vpop.f32.mrb[19].mxu1  ;;  %9630 = vmatprep.subr.bf16.mxu1 %v15088_v21  ;;  %v3404_v21 = vld [vmem:[%s22812_s5 + $0x1de8] sm:$0xff]  ;;  %v15166_v25 = vcombine.high %v3395_v12, %v3403_v16  ;;  %v3411_v31 = vld [vmem:[%s22812_s5 + $0x1e20] sm:$0xff] }
 0x4ce   :  { %v15168_v20 = vcombine.high %v3396_v17, %v3404_v21  ;;  %v3412_v33 = vld [vmem:[%s22812_s5 + $0x1e28] sm:$0xff] }
 0x4cf   :  { %9467 = vmatpush1.bf16.msra.mxu0 %v15085_v32  ;;  %v3419_v32 = vld [vmem:[%s22812_s5 + $0x1e60] sm:$0xff]  ;;  %v3420_v37 = vld [vmem:[%s22812_s5 + $0x1e68] sm:$0xff] }
 0x4d0   :  { %9631 = vmatpush1.bf16.msra.mxu1 %v15087_v54  ;;  %9468 = vmatprep.subr.bf16.mxu0 %v15102_v38  ;;  %v15165_v54 = vcombine.low %v3395_v12, %v3403_v16  ;;  %v15167_v38 = vcombine.low %v3396_v17, %v3404_v21  ;;  %v15182_v42 = vcombine.high %v3411_v31, %v3419_v32  ;;  %v2453_v12 = vld [vmem:[%s22812_s5 + $0x30] sm:$0xff]  ;;  %v2454_v17 = vld [vmem:[%s22812_s5 + $0x38] sm:$0xff] }
 0x4d1   :  { %9632 = vmatprep.subr.bf16.mxu1 %v15104_v43  ;;  %v15184_v43 = vcombine.high %v3412_v33, %v3420_v37  ;;  %v2461_v16 = vld [vmem:[%s22812_s5 + $0x70] sm:$0xff]  ;;  %v2462_v21 = vld [vmem:[%s22812_s5 + $0x78] sm:$0xff] }
 0x4d3   :  { %9469 = vmatpush1.bf16.msra.mxu0 %v15101_v46  ;;  %v15181_v46 = vcombine.low %v3411_v31, %v3419_v32  ;;  %v2469_v31 = vld [vmem:[%s22812_s5 + $0xb0] sm:$0xff] }
 0x4d4   :  { %9633 = vmatpush1.bf16.msra.mxu1 %v15103_v48  ;;  %9470 = vmatprep.subr.bf16.mxu0 %v15118_v49  ;;  %v15183_v48 = vcombine.low %v3412_v33, %v3420_v37  ;;  %v15198_v49 = vcombine.high %v3427_v14, %v3435_v30  ;;  %v2477_v32 = vld [vmem:[%s22812_s5 + $0xf0] sm:$0xff]  ;;  %v14225_v33 = vcombine.low %v2453_v12, %v2461_v16  ;;  %v2470_v37 = vld [vmem:[%s22812_s5 + $0xb8] sm:$0xff] }
 0x4d5   :  { %9634 = vmatprep.subr.bf16.mxu1 %v15120_v51  ;;  %v15200_v51 = vcombine.high %v3428_v44, %v3436_v45 }
 0x4d7   :  { %9471 = vmatpush1.bf16.msra.mxu0 %v15117_v60  ;;  %v15197_v60 = vcombine.low %v3427_v14, %v3435_v30  ;;  %v2493_v14 = vld [vmem:[%s22812_s5 + $0x170] sm:$0xff] }
 0x4d8   :  { %9635 = vmatpush1.bf16.msra.mxu1 %v15119_v61  ;;  %9472 = vmatprep.subr.bf16.mxu0 %v15134_v62  ;;  %v15199_v61 = vcombine.low %v3428_v44, %v3436_v45  ;;  %v15214_v62 = vcombine.high %v3443_v53, %v3451_v55  ;;  %v2486_v44 = vld [vmem:[%s22812_s5 + $0x138] sm:$0xff] }
 0x4d9   :  { %9636 = vmatprep.subr.bf16.mxu1 %v15136_v63  ;;  %v15216_v63 = vcombine.high %v3444_v56, %v3452_v59  ;;  %v2494_v45 = vld [vmem:[%s22812_s5 + $0x178] sm:$0xff] }
 0x4db   :  { %9473 = vmatpush1.bf16.msra.mxu0 %v15133_v6  ;;  %v15213_v6 = vcombine.low %v3443_v53, %v3451_v55  ;;  %v2501_v53 = vld [vmem:[%s22812_s5 + $0x1b0] sm:$0xff] }
 0x4dc   :  { %9637 = vmatpush1.bf16.msra.mxu1 %v15135_v7  ;;  %9474 = vmatprep.subr.bf16.mxu0 %v15150_v35  ;;  %v15215_v7 = vcombine.low %v3444_v56, %v3452_v59  ;;  %v15230_v35 = vcombine.high %v3459_v0, %v3467_v2  ;;  %v2509_v55 = vld [vmem:[%s22812_s5 + $0x1f0] sm:$0xff]  ;;  %v2502_v56 = vld [vmem:[%s22812_s5 + $0x1b8] sm:$0xff] }
 0x4dd   :  { %9638 = vmatprep.subr.bf16.mxu1 %v15152_v9  ;;  %v15232_v9 = vcombine.high %v3460_v4, %v3468_v28  ;;  %v2510_v59 = vld [vmem:[%s22812_s5 + $0x1f8] sm:$0xff] }
 0x4df   :  { %9475 = vmatpush1.bf16.msra.mxu0 %v15149_v22  ;;  %v15229_v22 = vcombine.low %v3459_v0, %v3467_v2  ;;  %v2525_v0 = vld [vmem:[%s22812_s5 + $0x270] sm:$0xff]  ;;  %v2518_v2 = vld [vmem:[%s22812_s5 + $0x238] sm:$0xff] }
 0x4e0   :  { %9639 = vmatpush1.bf16.msra.mxu1 %v15151_v23  ;;  %9476 = vmatprep.subr.bf16.mxu0 %v15166_v25  ;;  %v15231_v23 = vcombine.low %v3460_v4, %v3468_v28  ;;  %v14226_v25 = vcombine.high %v2453_v12, %v2461_v16  ;;  %v2526_v4 = vld [vmem:[%s22812_s5 + $0x278] sm:$0xff]  ;;  %v14273_v28 = vcombine.low %v2501_v53, %v2509_v55  ;;  %v2541_v12 = vld [vmem:[%s22812_s5 + $0x2f0] sm:$0xff] }
 0x4e1   :  { %9640 = vmatprep.subr.bf16.mxu1 %v15168_v20  ;;  %v14228_v20 = vcombine.high %v2454_v17, %v2462_v21  ;;  %v2534_v16 = vld [vmem:[%s22812_s5 + $0x2b8] sm:$0xff] }
 0x4e3   :  { %9477 = vmatpush1.bf16.msra.mxu0 %v15165_v54  ;;  %v2478_v54 = vld [vmem:[%s22812_s5 + $0xf8] sm:$0xff] }
 0x4e4   :  { %9641 = vmatpush1.bf16.msra.mxu1 %v15167_v38  ;;  %9478 = vmatprep.subr.bf16.mxu0 %v15182_v42  ;;  %v14227_v38 = vcombine.low %v2454_v17, %v2462_v21  ;;  %v14242_v42 = vcombine.high %v2469_v31, %v2477_v32  ;;  %v14244_v30 = vcombine.high %v2470_v37, %v2478_v54  ;;  %v2542_v17 = vld [vmem:[%s22812_s5 + $0x2f8] sm:$0xff] }
 0x4e5   :  { %9642 = vmatprep.subr.bf16.mxu1 %v15184_v43  ;;  %v2485_v43 = vld [vmem:[%s22812_s5 + $0x130] sm:$0xff] }
 0x4e7   :  { %9479 = vmatpush1.bf16.msra.mxu0 %v15181_v46  ;;  %v14241_v46 = vcombine.low %v2469_v31, %v2477_v32  ;;  %v2557_v31 = vld [vmem:[%s22812_s5 + $0x370] sm:$0xff]  ;;  %v2550_v32 = vld [vmem:[%s22812_s5 + $0x338] sm:$0xff] }
 0x4e8   :  { %9643 = vmatpush1.bf16.msra.mxu1 %v15183_v48  ;;  %9480 = vmatprep.subr.bf16.mxu0 %v15198_v49  ;;  %v14243_v48 = vcombine.low %v2470_v37, %v2478_v54  ;;  %v14258_v49 = vcombine.high %v2485_v43, %v2493_v14  ;;  %v14307_v54 = vcombine.low %v2534_v16, %v2542_v17 }
 0x4e9   :  { %9644 = vmatprep.subr.bf16.mxu1 %v15200_v51  ;;  %v14260_v51 = vcombine.high %v2486_v44, %v2494_v45 }
 0x4eb   :  { %9481 = vmatpush1.bf16.msra.mxu0 %v15197_v60  ;;  %v14259_v60 = vcombine.low %v2486_v44, %v2494_v45  ;;  %v2574_v44 = vld [vmem:[%s22812_s5 + $0x3f8] sm:$0xff] }
 0x4ec   :  { %9645 = vmatpush1.bf16.msra.mxu1 %v15199_v61  ;;  %9482 = vmatprep.subr.bf16.mxu0 %v15214_v62  ;;  %v14274_v61 = vcombine.high %v2501_v53, %v2509_v55  ;;  %v14276_v62 = vcombine.high %v2502_v56, %v2510_v59  ;;  %v2589_v53 = vld [vmem:[%s22812_s5 + $0x470] sm:$0xff]  ;;  %v2582_v55 = vld [vmem:[%s22812_s5 + $0x438] sm:$0xff] }
 0x4ed   :  { %9646 = vmatprep.subr.bf16.mxu1 %v15216_v63  ;;  %v2517_v63 = vld [vmem:[%s22812_s5 + $0x230] sm:$0xff] }
 0x4ee   :  { %v14289_v21 = vcombine.low %v2517_v63, %v2525_v0 }
 0x4ef   :  { %9483 = vmatpush1.bf16.msra.mxu0 %v15213_v6  ;;  %v14275_v6 = vcombine.low %v2502_v56, %v2510_v59  ;;  %v2590_v56 = vld [vmem:[%s22812_s5 + $0x478] sm:$0xff] }
 0x4f0   :  { %9647 = vmatpush1.bf16.msra.mxu1 %v15215_v7  ;;  %9484 = vmatprep.subr.bf16.mxu0 %v15230_v35  ;;  %v14290_v7 = vcombine.high %v2517_v63, %v2525_v0  ;;  %v14292_v35 = vcombine.high %v2518_v2, %v2526_v4  ;;  %v2605_v63 = vld [vmem:[%s22812_s5 + $0x4f0] sm:$0xff]  ;;  %v2598_v0 = vld [vmem:[%s22812_s5 + $0x4b8] sm:$0xff] }
 0x4f1   :  { %9648 = vmatprep.subr.bf16.mxu1 %v15232_v9  ;;  %v2533_v9 = vld [vmem:[%s22812_s5 + $0x2b0] sm:$0xff] }
 0x4f2   :  { %v14305_v37 = vcombine.low %v2533_v9, %v2541_v12 }
 0x4f3   :  { %9485 = vmatpush1.bf16.msra.mxu0 %v15229_v22  ;;  %v14291_v22 = vcombine.low %v2518_v2, %v2526_v4  ;;  %v2606_v2 = vld [vmem:[%s22812_s5 + $0x4f8] sm:$0xff] }
 0x4f4   :  { %9649 = vmatpush1.bf16.msra.mxu1 %v15231_v23  ;;  %9659 = vmatprep.subr.bf16.mxu0 %v14226_v25  ;;  %v14306_v23 = vcombine.high %v2533_v9, %v2541_v12  ;;  %v14308_v25 = vcombine.high %v2534_v16, %v2542_v17  ;;  %v2621_v9 = vld [vmem:[%s22812_s5 + $0x570] sm:$0xff]  ;;  %v2614_v12 = vld [vmem:[%s22812_s5 + $0x538] sm:$0xff] }
 0x4f5   :  { %9823 = vmatprep.subr.bf16.mxu1 %v14228_v20  ;;  %v2549_v20 = vld [vmem:[%s22812_s5 + $0x330] sm:$0xff]  ;;  %v2622_v16 = vld [vmem:[%s22812_s5 + $0x578] sm:$0xff] }
 0x4f6   :  { %9487 = vmatmul.mubr.bf16.vlgmr.msra.gmra.mrb[20].mxu0 %v18826_v40  ;;  %v14321_v45 = vcombine.low %v2549_v20, %v2557_v31 }
 0x4f7   :  { %9651 = vmatmul.mubr.bf16.vlgmr.msra.gmra.mrb[20].mxu1 %v18826_v40  ;;  %9660 = vmatpush1.bf16.msra.mxu0 %v14225_v33  ;;  %v2558_v33 = vld [vmem:[%s22812_s5 + $0x378] sm:$0xff] }
 0x4f8   :  { %9691 = vmatprep.mubr.bf16.mxu0 %v18194_v47  ;;  %9824 = vmatpush1.bf16.msra.mxu1 %v14227_v38  ;;  %v14322_v38 = vcombine.high %v2549_v20, %v2557_v31  ;;  %v2637_v20 = vld [vmem:[%s22812_s5 + $0x5f0] sm:$0xff]  ;;  %v2630_v31 = vld [vmem:[%s22812_s5 + $0x5b8] sm:$0xff] }
 0x4f9   :  { %9855 = vmatprep.mubr.bf16.mxu1 %v18194_v47  ;;  %9661 = vmatprep.subr.bf16.mxu0 %v14242_v42  ;;  %v14257_v47 = vcombine.low %v2485_v43, %v2493_v14  ;;  %v14324_v42 = vcombine.high %v2550_v32, %v2558_v33  ;;  %v2565_v43 = vld [vmem:[%s22812_s5 + $0x3b0] sm:$0xff] }
 0x4fa   :  { %9825 = vmatprep.subr.bf16.mxu1 %v14244_v30  ;;  %v2573_v14 = vld [vmem:[%s22812_s5 + $0x3f0] sm:$0xff]  ;;  %v2566_v30 = vld [vmem:[%s22812_s5 + $0x3b8] sm:$0xff] }
 0x4fb   :  { %9662 = vmatpush1.bf16.msra.mxu0 %v14241_v46  ;;  %v14323_v46 = vcombine.low %v2550_v32, %v2558_v33  ;;  %v14337_v59 = vcombine.low %v2565_v43, %v2573_v14  ;;  %v2638_v32 = vld [vmem:[%s22812_s5 + $0x5f8] sm:$0xff] }
 0x4fc   :  { %9826 = vmatpush1.bf16.msra.mxu1 %v14243_v48  ;;  %9663 = vmatprep.subr.bf16.mxu0 %v14258_v49  ;;  %v14338_v48 = vcombine.high %v2565_v43, %v2573_v14  ;;  %v14340_v49 = vcombine.high %v2566_v30, %v2574_v44  ;;  %v2653_v43 = vld [vmem:[%s22812_s5 + $0x670] sm:$0xff]  ;;  %v2646_v14 = vld [vmem:[%s22812_s5 + $0x638] sm:$0xff] }
 0x4fd   :  { %9827 = vmatprep.subr.bf16.mxu1 %v14260_v51  ;;  %v2581_v51 = vld [vmem:[%s22812_s5 + $0x430] sm:$0xff] }
 0x4fe   :  { %v14353_v4 = vcombine.low %v2581_v51, %v2589_v53 }
 0x4ff   :  { %9664 = vmatpush1.bf16.msra.mxu0 %v14257_v47  ;;  %v14339_v47 = vcombine.low %v2566_v30, %v2574_v44  ;;  %v2654_v30 = vld [vmem:[%s22812_s5 + $0x678] sm:$0xff] }
 0x500   :  { %9828 = vmatpush1.bf16.msra.mxu1 %v14259_v60  ;;  %9665 = vmatprep.subr.bf16.mxu0 %v14274_v61  ;;  %v14354_v60 = vcombine.high %v2581_v51, %v2589_v53  ;;  %v14356_v61 = vcombine.high %v2582_v55, %v2590_v56  ;;  %v2669_v51 = vld [vmem:[%s22812_s5 + $0x6f0] sm:$0xff]  ;;  %v2662_v53 = vld [vmem:[%s22812_s5 + $0x6b8] sm:$0xff] }
 0x501   :  { %9829 = vmatprep.subr.bf16.mxu1 %v14276_v62  ;;  %v2597_v62 = vld [vmem:[%s22812_s5 + $0x4b0] sm:$0xff] }
 0x502   :  { %v14369_v17 = vcombine.low %v2597_v62, %v2605_v63 }
 0x503   :  { %9666 = vmatpush1.bf16.msra.mxu0 %v14273_v28  ;;  %v14355_v28 = vcombine.low %v2582_v55, %v2590_v56  ;;  %v2670_v55 = vld [vmem:[%s22812_s5 + $0x6f8] sm:$0xff] }
 0x504   :  { %9830 = vmatpush1.bf16.msra.mxu1 %v14275_v6  ;;  %9667 = vmatprep.subr.bf16.mxu0 %v14290_v7  ;;  %v14370_v6 = vcombine.high %v2597_v62, %v2605_v63  ;;  %v14372_v7 = vcombine.high %v2598_v0, %v2606_v2  ;;  %v2685_v62 = vld [vmem:[%s22812_s5 + $0x770] sm:$0xff]  ;;  %v2678_v63 = vld [vmem:[%s22812_s5 + $0x738] sm:$0xff] }
 0x505   :  { %9831 = vmatprep.subr.bf16.mxu1 %v14292_v35  ;;  %v2613_v35 = vld [vmem:[%s22812_s5 + $0x530] sm:$0xff] }
 0x506   :  { %v14385_v33 = vcombine.low %v2613_v35, %v2621_v9 }
 0x507   :  { %9668 = vmatpush1.bf16.msra.mxu0 %v14289_v21  ;;  %v14371_v21 = vcombine.low %v2598_v0, %v2606_v2  ;;  %v2686_v0 = vld [vmem:[%s22812_s5 + $0x778] sm:$0xff] }
 0x508   :  { %9832 = vmatpush1.bf16.msra.mxu1 %v14291_v22  ;;  %9669 = vmatprep.subr.bf16.mxu0 %v14306_v23  ;;  %v14386_v22 = vcombine.high %v2613_v35, %v2621_v9  ;;  %v14388_v23 = vcombine.high %v2614_v12, %v2622_v16  ;;  %v2701_v35 = vld [vmem:[%s22812_s5 + $0x7f0] sm:$0xff]  ;;  %v2694_v9 = vld [vmem:[%s22812_s5 + $0x7b8] sm:$0xff] }
 0x509   :  { %9833 = vmatprep.subr.bf16.mxu1 %v14308_v25  ;;  %v2629_v25 = vld [vmem:[%s22812_s5 + $0x5b0] sm:$0xff] }
 0x50a   :  { %v14401_v44 = vcombine.low %v2629_v25, %v2637_v20 }
 0x50b   :  { %9670 = vmatpush1.bf16.msra.mxu0 %v14305_v37  ;;  %v14387_v37 = vcombine.low %v2614_v12, %v2622_v16  ;;  %v2702_v12 = vld [vmem:[%s22812_s5 + $0x7f8] sm:$0xff] }
 0x50c   :  { %9834 = vmatpush1.bf16.msra.mxu1 %v14307_v54  ;;  %9671 = vmatprep.subr.bf16.mxu0 %v14322_v38  ;;  %v14402_v54 = vcombine.high %v2629_v25, %v2637_v20  ;;  %v14404_v38 = vcombine.high %v2630_v31, %v2638_v32  ;;  %v2717_v25 = vld [vmem:[%s22812_s5 + $0x870] sm:$0xff]  ;;  %v2710_v20 = vld [vmem:[%s22812_s5 + $0x838] sm:$0xff] }
 0x50d   :  { %9835 = vmatprep.subr.bf16.mxu1 %v14324_v42  ;;  %v2645_v42 = vld [vmem:[%s22812_s5 + $0x630] sm:$0xff] }
 0x50e   :  { %v14417_v56 = vcombine.low %v2645_v42, %v2653_v43 }
 0x50f   :  { %9672 = vmatpush1.bf16.msra.mxu0 %v14321_v45  ;;  %v14403_v45 = vcombine.low %v2630_v31, %v2638_v32  ;;  %v2718_v31 = vld [vmem:[%s22812_s5 + $0x878] sm:$0xff] }
 0x510   :  { %9836 = vmatpush1.bf16.msra.mxu1 %v14323_v46  ;;  %9673 = vmatprep.subr.bf16.mxu0 %v14338_v48  ;;  %v14418_v46 = vcombine.high %v2645_v42, %v2653_v43  ;;  %v14420_v48 = vcombine.high %v2646_v14, %v2654_v30  ;;  %v2733_v42 = vld [vmem:[%s22812_s5 + $0x8f0] sm:$0xff] }
 0x511   :  { %9837 = vmatprep.subr.bf16.mxu1 %v14340_v49  ;;  %v2661_v49 = vld [vmem:[%s22812_s5 + $0x6b0] sm:$0xff] }
 0x512   :  { %v14433_v2 = vcombine.low %v2661_v49, %v2669_v51 }
 0x513   :  { %9674 = vmatpush1.bf16.msra.mxu0 %v14337_v59  ;;  %v14419_v59 = vcombine.low %v2646_v14, %v2654_v30  ;;  %v2726_v14 = vld [vmem:[%s22812_s5 + $0x8b8] sm:$0xff] }
 0x514   :  { %9838 = vmatpush1.bf16.msra.mxu1 %v14339_v47  ;;  %9675 = vmatprep.subr.bf16.mxu0 %v14354_v60  ;;  %v14434_v47 = vcombine.high %v2661_v49, %v2669_v51  ;;  %v14436_v60 = vcombine.high %v2662_v53, %v2670_v55  ;;  %v2734_v30 = vld [vmem:[%s22812_s5 + $0x8f8] sm:$0xff] }
 0x515   :  { %9839 = vmatprep.subr.bf16.mxu1 %v14356_v61  ;;  %v2677_v61 = vld [vmem:[%s22812_s5 + $0x730] sm:$0xff]  ;;  %v14500_v49 = vcombine.high %v2726_v14, %v2734_v30  ;;  %v2742_v51 = vld [vmem:[%s22812_s5 + $0x938] sm:$0xff] }
 0x516   :  { %v14449_v16 = vcombine.low %v2677_v61, %v2685_v62 }
 0x517   :  { %9676 = vmatpush1.bf16.msra.mxu0 %v14353_v4  ;;  %v14435_v4 = vcombine.low %v2662_v53, %v2670_v55  ;;  %v2750_v53 = vld [vmem:[%s22812_s5 + $0x978] sm:$0xff] }
 0x518   :  { %9840 = vmatpush1.bf16.msra.mxu1 %v14355_v28  ;;  %9677 = vmatprep.subr.bf16.mxu0 %v14370_v6  ;;  %v14450_v28 = vcombine.high %v2677_v61, %v2685_v62  ;;  %v14452_v6 = vcombine.high %v2678_v63, %v2686_v0  ;;  %v2765_v61 = vld [vmem:[%s22812_s5 + $0x9f0] sm:$0xff]  ;;  %v2766_v62 = vld [vmem:[%s22812_s5 + $0x9f8] sm:$0xff] }
 0x519   :  { %9841 = vmatprep.subr.bf16.mxu1 %v14372_v7  ;;  %v2693_v7 = vld [vmem:[%s22812_s5 + $0x7b0] sm:$0xff] }
 0x51a   :  { %v14465_v32 = vcombine.low %v2693_v7, %v2701_v35 }
 0x51b   :  { %9678 = vmatpush1.bf16.msra.mxu0 %v14369_v17  ;;  %v14451_v17 = vcombine.low %v2678_v63, %v2686_v0  ;;  %v14515_v63 = vcombine.low %v2742_v51, %v2750_v53 }
 0x51c   :  { %9842 = vmatpush1.bf16.msra.mxu1 %v14371_v21  ;;  %9679 = vmatprep.subr.bf16.mxu0 %v14386_v22  ;;  %v14466_v21 = vcombine.high %v2693_v7, %v2701_v35  ;;  %v14468_v22 = vcombine.high %v2694_v9, %v2702_v12  ;;  %v2782_v7 = vld [vmem:[%s22812_s5 + $0xa78] sm:$0xff] }
 0x51d   :  { %9843 = vmatprep.subr.bf16.mxu1 %v14388_v23  ;;  %v2709_v23 = vld [vmem:[%s22812_s5 + $0x830] sm:$0xff] }
 0x51e   :  { %v14481_v43 = vcombine.low %v2709_v23, %v2717_v25 }
 0x51f   :  { %9680 = vmatpush1.bf16.msra.mxu0 %v14385_v33  ;;  %v14467_v33 = vcombine.low %v2694_v9, %v2702_v12 }
 0x520   :  { %9844 = vmatpush1.bf16.msra.mxu1 %v14387_v37  ;;  %9681 = vmatprep.subr.bf16.mxu0 %v14402_v54  ;;  %v14482_v37 = vcombine.high %v2709_v23, %v2717_v25  ;;  %v14484_v54 = vcombine.high %v2710_v20, %v2718_v31  ;;  %v2798_v23 = vld [vmem:[%s22812_s5 + $0xaf8] sm:$0xff] }
 0x521   :  { %9845 = vmatprep.subr.bf16.mxu1 %v14404_v38  ;;  %v2725_v38 = vld [vmem:[%s22812_s5 + $0x8b0] sm:$0xff] }
 0x522   :  { %v14497_v55 = vcombine.low %v2725_v38, %v2733_v42 }
 0x523   :  { %9682 = vmatpush1.bf16.msra.mxu0 %v14401_v44  ;;  %v14483_v44 = vcombine.low %v2710_v20, %v2718_v31 }
 0x524   :  { %9846 = vmatpush1.bf16.msra.mxu1 %v14403_v45  ;;  %9683 = vmatprep.subr.bf16.mxu0 %v14418_v46  ;;  %v14498_v45 = vcombine.high %v2725_v38, %v2733_v42  ;;  %v2741_v46 = vld [vmem:[%s22812_s5 + $0x930] sm:$0xff]  ;;  %v2814_v38 = vld [vmem:[%s22812_s5 + $0xb78] sm:$0xff] }
 0x525   :  { %9847 = vmatprep.subr.bf16.mxu1 %v14420_v48  ;;  %v2749_v48 = vld [vmem:[%s22812_s5 + $0x970] sm:$0xff] }
 0x527   :  { %9684 = vmatpush1.bf16.msra.mxu0 %v14417_v56  ;;  %v14499_v56 = vcombine.low %v2726_v14, %v2734_v30 }
 0x528   :  { %9848 = vmatpush1.bf16.msra.mxu1 %v14419_v59  ;;  %9685 = vmatprep.subr.bf16.mxu0 %v14434_v47  ;;  %v14514_v59 = vcombine.high %v2741_v46, %v2749_v48  ;;  %v14516_v47 = vcombine.high %v2742_v51, %v2750_v53 }
 0x529   :  { %9849 = vmatprep.subr.bf16.mxu1 %v14436_v60  ;;  %v2757_v60 = vld [vmem:[%s22812_s5 + $0x9b0] sm:$0xff] }
 0x52a   :  { %v14530_v0 = vcombine.high %v2757_v60, %v2765_v61  ;;  %v14529_v35 = vcombine.low %v2757_v60, %v2765_v61  ;;  %v2846_v60 = vld [vmem:[%s22812_s5 + $0xc78] sm:$0xff] }
 0x52b   :  { %9686 = vmatpush1.bf16.msra.mxu0 %v14433_v2 }
 0x52c   :  { %9850 = vmatpush1.bf16.msra.mxu1 %v14435_v4  ;;  %9687 = vmatprep.subr.bf16.mxu0 %v14450_v28  ;;  %v2773_v4 = vld [vmem:[%s22812_s5 + $0xa30] sm:$0xff] }
 0x52d   :  { %9851 = vmatprep.subr.bf16.mxu1 %v14452_v6  ;;  %v2781_v28 = vld [vmem:[%s22812_s5 + $0xa70] sm:$0xff]  ;;  %v2774_v6 = vld [vmem:[%s22812_s5 + $0xa38] sm:$0xff] }
 0x52e   :  { %v14546_v12 = vcombine.high %v2773_v4, %v2781_v28  ;;  %v14545_v25 = vcombine.low %v2773_v4, %v2781_v28  ;;  %v14547_v20 = vcombine.low %v2774_v6, %v2782_v7  ;;  %v2862_v4 = vld [vmem:[%s22812_s5 + $0xcf8] sm:$0xff] }
 0x52f   :  { %9688 = vmatpush1.bf16.msra.mxu0 %v14449_v16  ;;  %v14548_v16 = vcombine.high %v2774_v6, %v2782_v7 }
 0x530   :  { %9852 = vmatpush1.bf16.msra.mxu1 %v14451_v17  ;;  %9689 = vmatprep.subr.bf16.mxu0 %v14466_v21  ;;  %v2789_v17 = vld [vmem:[%s22812_s5 + $0xab0] sm:$0xff] }
 0x531   :  { %9853 = vmatprep.subr.bf16.mxu1 %v14468_v22  ;;  %v2797_v21 = vld [vmem:[%s22812_s5 + $0xaf0] sm:$0xff]  ;;  %v2790_v22 = vld [vmem:[%s22812_s5 + $0xab8] sm:$0xff] }
 0x532   :  { %v14562_v31 = vcombine.high %v2789_v17, %v2797_v21  ;;  %v14561_v42 = vcombine.low %v2789_v17, %v2797_v21  ;;  %v2878_v17 = vld [vmem:[%s22812_s5 + $0xd78] sm:$0xff] }
 0x533   :  { %9690 = vmatpush1.bf16.msra.mxu0 %v14465_v32  ;;  %v14564_v32 = vcombine.high %v2790_v22, %v2798_v23 }
 0x534   :  { %9854 = vmatpush1.bf16.msra.mxu1 %v14467_v33  ;;  %9700 = vmatprep.subr.bf16.mxu0 %v14482_v37  ;;  %v2805_v33 = vld [vmem:[%s22812_s5 + $0xb30] sm:$0xff] }
 0x535   :  { %9864 = vmatprep.subr.bf16.mxu1 %v14484_v54  ;;  %v2813_v37 = vld [vmem:[%s22812_s5 + $0xb70] sm:$0xff]  ;;  %v2806_v54 = vld [vmem:[%s22812_s5 + $0xb38] sm:$0xff] }
 0x536   :  { %9692 = vmatmul.mubr.bf16.vlgmr.msra.gmra.mrb[24].mxu0 %v18196_v50  ;;  %v14578_v14 = vcombine.high %v2805_v33, %v2813_v37  ;;  %v14580_v30 = vcombine.high %v2806_v54, %v2814_v38  ;;  %v14579_v51 = vcombine.low %v2806_v54, %v2814_v38 }
 0x537   :  { %9856 = vmatmul.mubr.bf16.vlgmr.msra.gmra.mrb[24].mxu1 %v18196_v50  ;;  %9701 = vmatpush1.bf16.msra.mxu0 %v14481_v43  ;;  %v2758_v50 = vld [vmem:[%s22812_s5 + $0x9b8] sm:$0xff]  ;;  %v14563_v43 = vcombine.low %v2790_v22, %v2798_v23 }
 0x538   :  { %9732 = vmatprep.mubr.bf16.mxu0 %v18212_v58  ;;  %9865 = vmatpush1.bf16.msra.mxu1 %v14483_v44  ;;  %v14532_v2 = vcombine.high %v2758_v50, %v2766_v62  ;;  %v14531_v9 = vcombine.low %v2758_v50, %v2766_v62  ;;  %v2821_v44 = vld [vmem:[%s22812_s5 + $0xbb0] sm:$0xff] }
 0x539   :  { %9896 = vmatprep.mubr.bf16.mxu1 %v18212_v58  ;;  %9702 = vmatprep.subr.bf16.mxu0 %v14498_v45  ;;  %v14513_v58 = vcombine.low %v2741_v46, %v2749_v48  ;;  %v2829_v45 = vld [vmem:[%s22812_s5 + $0xbf0] sm:$0xff]  ;;  %v2822_v46 = vld [vmem:[%s22812_s5 + $0xbb8] sm:$0xff] }
 0x53a   :  { %9866 = vmatprep.subr.bf16.mxu1 %v14500_v49  ;;  %v2830_v48 = vld [vmem:[%s22812_s5 + $0xbf8] sm:$0xff]  ;;  %v14577_v49 = vcombine.low %v2805_v33, %v2813_v37  ;;  %v14594_v53 = vcombine.high %v2821_v44, %v2829_v45  ;;  %v14593_v61 = vcombine.low %v2821_v44, %v2829_v45 }
 0x53b   :  { %9703 = vmatpush1.bf16.msra.mxu0 %v14497_v55  ;;  %v14596_v55 = vcombine.high %v2822_v46, %v2830_v48  ;;  %v14595_v50 = vcombine.low %v2822_v46, %v2830_v48  ;;  %v2894_v33 = vld [vmem:[%s22812_s5 + $0xdf8] sm:$0xff] }
 0x53c   :  { %9867 = vmatpush1.bf16.msra.mxu1 %v14499_v56  ;;  %9704 = vmatprep.subr.bf16.mxu0 %v14514_v59  ;;  %v2837_v56 = vld [vmem:[%s22812_s5 + $0xc30] sm:$0xff]  ;;  %v2910_v44 = vld [vmem:[%s22812_s5 + $0xe78] sm:$0xff] }
 0x53d   :  { %9868 = vmatprep.subr.bf16.mxu1 %v14516_v47  ;;  %v2845_v59 = vld [vmem:[%s22812_s5 + $0xc70] sm:$0xff]  ;;  %v2838_v47 = vld [vmem:[%s22812_s5 + $0xc38] sm:$0xff] }
 0x53e   :  { %v14610_v62 = vcombine.high %v2837_v56, %v2845_v59  ;;  %v14609_v28 = vcombine.low %v2837_v56, %v2845_v59  ;;  %v14611_v6 = vcombine.low %v2838_v47, %v2846_v60  ;;  %v2926_v56 = vld [vmem:[%s22812_s5 + $0xef8] sm:$0xff] }
 0x53f   :  { %9705 = vmatpush1.bf16.msra.mxu0 %v14513_v58  ;;  %v14612_v58 = vcombine.high %v2838_v47, %v2846_v60 }
 0x540   :  { %9869 = vmatpush1.bf16.msra.mxu1 %v14515_v63  ;;  %9706 = vmatprep.subr.bf16.mxu0 %v14530_v0  ;;  %v2853_v63 = vld [vmem:[%s22812_s5 + $0xcb0] sm:$0xff] }
 0x541   :  { %9870 = vmatprep.subr.bf16.mxu1 %v14532_v2  ;;  %v2861_v0 = vld [vmem:[%s22812_s5 + $0xcf0] sm:$0xff]  ;;  %v2854_v2 = vld [vmem:[%s22812_s5 + $0xcb8] sm:$0xff] }
 0x542   :  { %v14626_v7 = vcombine.high %v2853_v63, %v2861_v0  ;;  %v14625_v21 = vcombine.low %v2853_v63, %v2861_v0  ;;  %v14627_v22 = vcombine.low %v2854_v2, %v2862_v4  ;;  %v2942_v63 = vld [vmem:[%s22812_s5 + $0xf78] sm:$0xff] }
 0x543   :  { %9707 = vmatpush1.bf16.msra.mxu0 %v14529_v35  ;;  %v14628_v35 = vcombine.high %v2854_v2, %v2862_v4 }
 0x544   :  { %9871 = vmatpush1.bf16.msra.mxu1 %v14531_v9  ;;  %9708 = vmatprep.subr.bf16.mxu0 %v14546_v12  ;;  %v2869_v9 = vld [vmem:[%s22812_s5 + $0xd30] sm:$0xff] }
 0x545   :  { %9872 = vmatprep.subr.bf16.mxu1 %v14548_v16  ;;  %v2877_v12 = vld [vmem:[%s22812_s5 + $0xd70] sm:$0xff]  ;;  %v2870_v16 = vld [vmem:[%s22812_s5 + $0xd38] sm:$0xff] }
 0x546   :  { %v14642_v23 = vcombine.high %v2869_v9, %v2877_v12  ;;  %v14641_v37 = vcombine.low %v2869_v9, %v2877_v12  ;;  %v14643_v54 = vcombine.low %v2870_v16, %v2878_v17  ;;  %v2958_v9 = vld [vmem:[%s22812_s5 + $0xff8] sm:$0xff] }
 0x547   :  { %9709 = vmatpush1.bf16.msra.mxu0 %v14545_v25  ;;  %v14644_v25 = vcombine.high %v2870_v16, %v2878_v17 }
 0x548   :  { %9873 = vmatpush1.bf16.msra.mxu1 %v14547_v20  ;;  %9710 = vmatprep.subr.bf16.mxu0 %v14562_v31  ;;  %v2885_v20 = vld [vmem:[%s22812_s5 + $0xdb0] sm:$0xff] }
 0x549   :  { %9874 = vmatprep.subr.bf16.mxu1 %v14564_v32  ;;  %v2893_v31 = vld [vmem:[%s22812_s5 + $0xdf0] sm:$0xff]  ;;  %v2886_v32 = vld [vmem:[%s22812_s5 + $0xdb8] sm:$0xff] }
 0x54a   :  { %v14658_v38 = vcombine.high %v2885_v20, %v2893_v31  ;;  %v14657_v45 = vcombine.low %v2885_v20, %v2893_v31  ;;  %v14659_v46 = vcombine.low %v2886_v32, %v2894_v33  ;;  %v2974_v20 = vld [vmem:[%s22812_s5 + $0x1078] sm:$0xff] }
 0x54b   :  { %9711 = vmatpush1.bf16.msra.mxu0 %v14561_v42  ;;  %v14660_v42 = vcombine.high %v2886_v32, %v2894_v33 }
 0x54c   :  { %9875 = vmatpush1.bf16.msra.mxu1 %v14563_v43  ;;  %9712 = vmatprep.subr.bf16.mxu0 %v14578_v14  ;;  %v2901_v43 = vld [vmem:[%s22812_s5 + $0xe30] sm:$0xff] }
 0x54d   :  { %9876 = vmatprep.subr.bf16.mxu1 %v14580_v30  ;;  %v2909_v14 = vld [vmem:[%s22812_s5 + $0xe70] sm:$0xff]  ;;  %v2902_v30 = vld [vmem:[%s22812_s5 + $0xe38] sm:$0xff] }
 0x54e   :  { %v14674_v48 = vcombine.high %v2901_v43, %v2909_v14  ;;  %v14673_v59 = vcombine.low %v2901_v43, %v2909_v14  ;;  %v14675_v47 = vcombine.low %v2902_v30, %v2910_v44  ;;  %v2982_v43 = vld [vmem:[%s22812_s5 + $0x10b8] sm:$0xff] }
 0x54f   :  { %9713 = vmatpush1.bf16.msra.mxu0 %v14577_v49  ;;  %v14676_v49 = vcombine.high %v2902_v30, %v2910_v44  ;;  %v2990_v14 = vld [vmem:[%s22812_s5 + $0x10f8] sm:$0xff] }
 0x550   :  { %9877 = vmatpush1.bf16.msra.mxu1 %v14579_v51  ;;  %9714 = vmatprep.subr.bf16.mxu0 %v14594_v53  ;;  %v2917_v51 = vld [vmem:[%s22812_s5 + $0xeb0] sm:$0xff] }
 0x551   :  { %9878 = vmatprep.subr.bf16.mxu1 %v14596_v55  ;;  %v2925_v53 = vld [vmem:[%s22812_s5 + $0xef0] sm:$0xff]  ;;  %v2918_v55 = vld [vmem:[%s22812_s5 + $0xeb8] sm:$0xff] }
 0x552   :  { %v14690_v60 = vcombine.high %v2917_v51, %v2925_v53  ;;  %v14689_v0 = vcombine.low %v2917_v51, %v2925_v53  ;;  %v14691_v2 = vcombine.low %v2918_v55, %v2926_v56  ;;  %v3006_v51 = vld [vmem:[%s22812_s5 + $0x1178] sm:$0xff] }
 0x553   :  { %9715 = vmatpush1.bf16.msra.mxu0 %v14593_v61  ;;  %v14692_v61 = vcombine.high %v2918_v55, %v2926_v56  ;;  %v14755_v55 = vcombine.low %v2982_v43, %v2990_v14 }
 0x554   :  { %9879 = vmatpush1.bf16.msra.mxu1 %v14595_v50  ;;  %9716 = vmatprep.subr.bf16.mxu0 %v14610_v62  ;;  %v2933_v50 = vld [vmem:[%s22812_s5 + $0xf30] sm:$0xff] }
 0x555   :  { %9880 = vmatprep.subr.bf16.mxu1 %v14612_v58  ;;  %v2941_v62 = vld [vmem:[%s22812_s5 + $0xf70] sm:$0xff]  ;;  %v2934_v58 = vld [vmem:[%s22812_s5 + $0xf38] sm:$0xff] }
 0x556   :  { %v14706_v4 = vcombine.high %v2933_v50, %v2941_v62  ;;  %v14705_v12 = vcombine.low %v2933_v50, %v2941_v62  ;;  %v14707_v16 = vcombine.low %v2934_v58, %v2942_v63 }
 0x557   :  { %9717 = vmatpush1.bf16.msra.mxu0 %v14609_v28  ;;  %v14708_v28 = vcombine.high %v2934_v58, %v2942_v63  ;;  %v3029_v63 = vld [vmem:[%s22812_s5 + $0x1230] sm:$0xff] }
 0x558   :  { %9881 = vmatpush1.bf16.msra.mxu1 %v14611_v6  ;;  %9718 = vmatprep.subr.bf16.mxu0 %v14626_v7  ;;  %v2949_v6 = vld [vmem:[%s22812_s5 + $0xfb0] sm:$0xff] }
 0x559   :  { %9882 = vmatprep.subr.bf16.mxu1 %v14628_v35  ;;  %v2957_v7 = vld [vmem:[%s22812_s5 + $0xff0] sm:$0xff]  ;;  %v2950_v35 = vld [vmem:[%s22812_s5 + $0xfb8] sm:$0xff] }
 0x55a   :  { %v14722_v17 = vcombine.high %v2949_v6, %v2957_v7  ;;  %v14721_v31 = vcombine.low %v2949_v6, %v2957_v7  ;;  %v14723_v32 = vcombine.low %v2950_v35, %v2958_v9 }
 0x55b   :  { %9719 = vmatpush1.bf16.msra.mxu0 %v14625_v21  ;;  %v14724_v21 = vcombine.high %v2950_v35, %v2958_v9  ;;  %v3045_v9 = vld [vmem:[%s22812_s5 + $0x12b0] sm:$0xff] }
 0x55c   :  { %9883 = vmatpush1.bf16.msra.mxu1 %v14627_v22  ;;  %9720 = vmatprep.subr.bf16.mxu0 %v14642_v23  ;;  %v2965_v22 = vld [vmem:[%s22812_s5 + $0x1030] sm:$0xff] }
 0x55d   :  { %9884 = vmatprep.subr.bf16.mxu1 %v14644_v25  ;;  %v2973_v23 = vld [vmem:[%s22812_s5 + $0x1070] sm:$0xff]  ;;  %v2966_v25 = vld [vmem:[%s22812_s5 + $0x1038] sm:$0xff] }
 0x55e   :  { %v14738_v33 = vcombine.high %v2965_v22, %v2973_v23  ;;  %v14739_v30 = vcombine.low %v2966_v25, %v2974_v20 }
 0x55f   :  { %9721 = vmatpush1.bf16.msra.mxu0 %v14641_v37  ;;  %v14740_v37 = vcombine.high %v2966_v25, %v2974_v20  ;;  %v3061_v20 = vld [vmem:[%s22812_s5 + $0x1330] sm:$0xff] }
 0x560   :  { %9885 = vmatpush1.bf16.msra.mxu1 %v14643_v54  ;;  %9722 = vmatprep.subr.bf16.mxu0 %v14658_v38  ;;  %v2981_v54 = vld [vmem:[%s22812_s5 + $0x10b0] sm:$0xff] }
 0x561   :  { %9886 = vmatprep.subr.bf16.mxu1 %v14660_v42  ;;  %v2989_v38 = vld [vmem:[%s22812_s5 + $0x10f0] sm:$0xff]  ;;  %v14737_v42 = vcombine.low %v2965_v22, %v2973_v23 }
 0x562   :  { %v14754_v44 = vcombine.high %v2981_v54, %v2989_v38  ;;  %v14753_v53 = vcombine.low %v2981_v54, %v2989_v38 }
 0x563   :  { %9723 = vmatpush1.bf16.msra.mxu0 %v14657_v45  ;;  %v2997_v45 = vld [vmem:[%s22812_s5 + $0x1130] sm:$0xff] }
 0x564   :  { %9887 = vmatpush1.bf16.msra.mxu1 %v14659_v46  ;;  %9724 = vmatprep.subr.bf16.mxu0 %v14674_v48  ;;  %v3005_v46 = vld [vmem:[%s22812_s5 + $0x1170] sm:$0xff]  ;;  %v14756_v48 = vcombine.high %v2982_v43, %v2990_v14 }
 0x565   :  { %9888 = vmatprep.subr.bf16.mxu1 %v14676_v49  ;;  %v2998_v49 = vld [vmem:[%s22812_s5 + $0x1138] sm:$0xff]  ;;  %v14770_v56 = vcombine.high %v2997_v45, %v3005_v46  ;;  %v3077_v43 = vld [vmem:[%s22812_s5 + $0x13b0] sm:$0xff] }
 0x566   :  { %v14771_v50 = vcombine.low %v2998_v49, %v3006_v51  ;;  %v3085_v14 = vld [vmem:[%s22812_s5 + $0x13f0] sm:$0xff] }
 0x567   :  { %9725 = vmatpush1.bf16.msra.mxu0 %v14673_v59  ;;  %v14772_v59 = vcombine.high %v2998_v49, %v3006_v51  ;;  %v3093_v51 = vld [vmem:[%s22812_s5 + $0x1430] sm:$0xff] }
 0x568   :  { %9889 = vmatpush1.bf16.msra.mxu1 %v14675_v47  ;;  %9726 = vmatprep.subr.bf16.mxu0 %v14690_v60  ;;  %v3013_v47 = vld [vmem:[%s22812_s5 + $0x11b0] sm:$0xff] }
 0x569   :  { %9890 = vmatprep.subr.bf16.mxu1 %v14692_v61  ;;  %v3021_v60 = vld [vmem:[%s22812_s5 + $0x11f0] sm:$0xff]  ;;  %v3022_v61 = vld [vmem:[%s22812_s5 + $0x11f8] sm:$0xff] }
 0x56a   :  { %v14786_v62 = vcombine.high %v3013_v47, %v3021_v60 }
 0x56b   :  { %9727 = vmatpush1.bf16.msra.mxu0 %v14689_v0  ;;  %v3037_v0 = vld [vmem:[%s22812_s5 + $0x1270] sm:$0xff] }
 0x56c   :  { %9891 = vmatpush1.bf16.msra.mxu1 %v14691_v2  ;;  %9728 = vmatprep.subr.bf16.mxu0 %v14706_v4  ;;  %v3030_v2 = vld [vmem:[%s22812_s5 + $0x1238] sm:$0xff]  ;;  %v14802_v7 = vcombine.high %v3029_v63, %v3037_v0 }
 0x56d   :  { %9892 = vmatprep.subr.bf16.mxu1 %v14708_v28  ;;  %v3038_v4 = vld [vmem:[%s22812_s5 + $0x1278] sm:$0xff]  ;;  %v14785_v28 = vcombine.low %v3013_v47, %v3021_v60 }
 0x56e   :  { %v14804_v35 = vcombine.high %v3030_v2, %v3038_v4  ;;  %v14803_v22 = vcombine.low %v3030_v2, %v3038_v4  ;;  %v3125_v4 = vld [vmem:[%s22812_s5 + $0x1530] sm:$0xff] }
 0x56f   :  { %9729 = vmatpush1.bf16.msra.mxu0 %v14705_v12  ;;  %v3053_v12 = vld [vmem:[%s22812_s5 + $0x12f0] sm:$0xff] }
 0x570   :  { %9893 = vmatpush1.bf16.msra.mxu1 %v14707_v16  ;;  %9730 = vmatprep.subr.bf16.mxu0 %v14722_v17  ;;  %v3046_v16 = vld [vmem:[%s22812_s5 + $0x12b8] sm:$0xff]  ;;  %v14818_v23 = vcombine.high %v3045_v9, %v3053_v12 }
 0x571   :  { %9894 = vmatprep.subr.bf16.mxu1 %v14724_v21  ;;  %v3054_v17 = vld [vmem:[%s22812_s5 + $0x12f8] sm:$0xff]  ;;  %v14801_v21 = vcombine.low %v3029_v63, %v3037_v0 }
 0x572   :  { %v14820_v25 = vcombine.high %v3046_v16, %v3054_v17  ;;  %v14819_v54 = vcombine.low %v3046_v16, %v3054_v17  ;;  %v3141_v17 = vld [vmem:[%s22812_s5 + $0x15b0] sm:$0xff] }
 0x573   :  { %9731 = vmatpush1.bf16.msra.mxu0 %v14721_v31  ;;  %v3069_v31 = vld [vmem:[%s22812_s5 + $0x1370] sm:$0xff] }
 0x574   :  { %9895 = vmatpush1.bf16.msra.mxu1 %v14723_v32  ;;  %9741 = vmatprep.subr.bf16.mxu0 %v14738_v33  ;;  %v3062_v32 = vld [vmem:[%s22812_s5 + $0x1338] sm:$0xff]  ;;  %v14834_v38 = vcombine.high %v3061_v20, %v3069_v31 }
 0x575   :  { %9905 = vmatprep.subr.bf16.mxu1 %v14740_v37  ;;  %v3070_v33 = vld [vmem:[%s22812_s5 + $0x1378] sm:$0xff]  ;;  %v14817_v37 = vcombine.low %v3045_v9, %v3053_v12 }
 0x576   :  { %9733 = vmatmul.mubr.bf16.vlgmr.msra.gmra.mrb[24].mxu0 %v18401_v10 }
 0x577   :  { %9897 = vmatmul.mubr.bf16.vlgmr.msra.gmra.mrb[24].mxu1 %v18401_v10  ;;  %9742 = vmatpush1.bf16.msra.mxu0 %v14737_v42  ;;  %v3014_v10 = vld [vmem:[%s22812_s5 + $0x11b8] sm:$0xff]  ;;  %v14836_v42 = vcombine.high %v3062_v32, %v3070_v33 }
 0x578   :  { %9773 = vmatprep.mubr.bf16.mxu0 %v18614_v3  ;;  %9906 = vmatpush1.bf16.msra.mxu1 %v14739_v30  ;;  %v14788_v58 = vcombine.high %v3014_v10, %v3022_v61  ;;  %v14787_v6 = vcombine.low %v3014_v10, %v3022_v61  ;;  %v3078_v30 = vld [vmem:[%s22812_s5 + $0x13b8] sm:$0xff]  ;;  %v3109_v61 = vld [vmem:[%s22812_s5 + $0x14b0] sm:$0xff] }
 0x579   :  { %9937 = vmatprep.mubr.bf16.mxu1 %v18614_v3  ;;  %9743 = vmatprep.subr.bf16.mxu0 %v14754_v44  ;;  %v14769_v3 = vcombine.low %v2997_v45, %v3005_v46  ;;  %v3086_v44 = vld [vmem:[%s22812_s5 + $0x13f8] sm:$0xff]  ;;  %v14833_v45 = vcombine.low %v3061_v20, %v3069_v31  ;;  %v14835_v46 = vcombine.low %v3062_v32, %v3070_v33  ;;  %v3157_v33 = vld [vmem:[%s22812_s5 + $0x1630] sm:$0xff] }
 0x57a   :  { %9907 = vmatprep.subr.bf16.mxu1 %v14756_v48  ;;  %v14850_v48 = vcombine.high %v3077_v43, %v3085_v14  ;;  %v14852_v49 = vcombine.high %v3078_v30, %v3086_v44  ;;  %v14851_v47 = vcombine.low %v3078_v30, %v3086_v44  ;;  %v3173_v44 = vld [vmem:[%s22812_s5 + $0x16b0] sm:$0xff] }
 0x57b   :  { %9744 = vmatpush1.bf16.msra.mxu0 %v14753_v53  ;;  %v3101_v53 = vld [vmem:[%s22812_s5 + $0x1470] sm:$0xff] }
 0x57c   :  { %9908 = vmatpush1.bf16.msra.mxu1 %v14755_v55  ;;  %9745 = vmatprep.subr.bf16.mxu0 %v14770_v56  ;;  %v3094_v55 = vld [vmem:[%s22812_s5 + $0x1438] sm:$0xff]  ;;  %v14866_v60 = vcombine.high %v3093_v51, %v3101_v53 }
 0x57d   :  { %9909 = vmatprep.subr.bf16.mxu1 %v14772_v59  ;;  %v3102_v56 = vld [vmem:[%s22812_s5 + $0x1478] sm:$0xff]  ;;  %v14849_v59 = vcombine.low %v3077_v43, %v3085_v14 }
 0x57e   :  { %v14868_v10 = vcombine.high %v3094_v55, %v3102_v56  ;;  %v14867_v63 = vcombine.low %v3094_v55, %v3102_v56  ;;  %v3189_v56 = vld [vmem:[%s22812_s5 + $0x1730] sm:$0xff] }
 0x57f   :  { %9746 = vmatpush1.bf16.msra.mxu0 %v14769_v3  ;;  %v3117_v3 = vld [vmem:[%s22812_s5 + $0x14f0] sm:$0xff] }
 0x580   :  { %9910 = vmatpush1.bf16.msra.mxu1 %v14771_v50  ;;  %9747 = vmatprep.subr.bf16.mxu0 %v14786_v62  ;;  %v3110_v50 = vld [vmem:[%s22812_s5 + $0x14b8] sm:$0xff]  ;;  %v14882_v0 = vcombine.high %v3109_v61, %v3117_v3 }
 0x581   :  { %9911 = vmatprep.subr.bf16.mxu1 %v14788_v58  ;;  %v3118_v62 = vld [vmem:[%s22812_s5 + $0x14f8] sm:$0xff]  ;;  %v14865_v58 = vcombine.low %v3093_v51, %v3101_v53 }
 0x582   :  { %v14884_v2 = vcombine.high %v3110_v50, %v3118_v62  ;;  %v14883_v9 = vcombine.low %v3110_v50, %v3118_v62  ;;  %v3205_v62 = vld [vmem:[%s22812_s5 + $0x17b0] sm:$0xff] }
 0x583   :  { %9748 = vmatpush1.bf16.msra.mxu0 %v14785_v28  ;;  %v3133_v28 = vld [vmem:[%s22812_s5 + $0x1570] sm:$0xff] }
 0x584   :  { %9912 = vmatpush1.bf16.msra.mxu1 %v14787_v6  ;;  %9749 = vmatprep.subr.bf16.mxu0 %v14802_v7  ;;  %v3126_v6 = vld [vmem:[%s22812_s5 + $0x1538] sm:$0xff]  ;;  %v14898_v12 = vcombine.high %v3125_v4, %v3133_v28 }
 0x585   :  { %9913 = vmatprep.subr.bf16.mxu1 %v14804_v35  ;;  %v3134_v7 = vld [vmem:[%s22812_s5 + $0x1578] sm:$0xff]  ;;  %v14881_v35 = vcombine.low %v3109_v61, %v3117_v3 }
 0x586   :  { %v14900_v16 = vcombine.high %v3126_v6, %v3134_v7  ;;  %v14899_v20 = vcombine.low %v3126_v6, %v3134_v7  ;;  %v3221_v7 = vld [vmem:[%s22812_s5 + $0x1830] sm:$0xff] }
 0x587   :  { %9750 = vmatpush1.bf16.msra.mxu0 %v14801_v21  ;;  %v3149_v21 = vld [vmem:[%s22812_s5 + $0x15f0] sm:$0xff] }
 0x588   :  { %9914 = vmatpush1.bf16.msra.mxu1 %v14803_v22  ;;  %9751 = vmatprep.subr.bf16.mxu0 %v14818_v23  ;;  %v3142_v22 = vld [vmem:[%s22812_s5 + $0x15b8] sm:$0xff]  ;;  %v14914_v31 = vcombine.high %v3141_v17, %v3149_v21 }
 0x589   :  { %9915 = vmatprep.subr.bf16.mxu1 %v14820_v25  ;;  %v3150_v23 = vld [vmem:[%s22812_s5 + $0x15f8] sm:$0xff]  ;;  %v14897_v25 = vcombine.low %v3125_v4, %v3133_v28 }
 0x58a   :  { %v14916_v32 = vcombine.high %v3142_v22, %v3150_v23  ;;  %v14915_v43 = vcombine.low %v3142_v22, %v3150_v23  ;;  %v3237_v23 = vld [vmem:[%s22812_s5 + $0x18b0] sm:$0xff] }
 0x58b   :  { %9752 = vmatpush1.bf16.msra.mxu0 %v14817_v37  ;;  %v3165_v37 = vld [vmem:[%s22812_s5 + $0x1670] sm:$0xff] }
 0x58c   :  { %9916 = vmatpush1.bf16.msra.mxu1 %v14819_v54  ;;  %9753 = vmatprep.subr.bf16.mxu0 %v14834_v38  ;;  %v3158_v54 = vld [vmem:[%s22812_s5 + $0x1638] sm:$0xff]  ;;  %v14930_v14 = vcombine.high %v3157_v33, %v3165_v37 }
 0x58d   :  { %9917 = vmatprep.subr.bf16.mxu1 %v14836_v42  ;;  %v3166_v38 = vld [vmem:[%s22812_s5 + $0x1678] sm:$0xff]  ;;  %v14913_v42 = vcombine.low %v3141_v17, %v3149_v21 }
 0x58e   :  { %v14932_v30 = vcombine.high %v3158_v54, %v3166_v38  ;;  %v14931_v51 = vcombine.low %v3158_v54, %v3166_v38  ;;  %v3253_v54 = vld [vmem:[%s22812_s5 + $0x1930] sm:$0xff] }
 0x58f   :  { %9754 = vmatpush1.bf16.msra.mxu0 %v14833_v45  ;;  %v3181_v45 = vld [vmem:[%s22812_s5 + $0x16f0] sm:$0xff] }
 0x590   :  { %9918 = vmatpush1.bf16.msra.mxu1 %v14835_v46  ;;  %9755 = vmatprep.subr.bf16.mxu0 %v14850_v48  ;;  %v3174_v46 = vld [vmem:[%s22812_s5 + $0x16b8] sm:$0xff]  ;;  %v14946_v53 = vcombine.high %v3173_v44, %v3181_v45  ;;  %v3261_v38 = vld [vmem:[%s22812_s5 + $0x1970] sm:$0xff] }
 0x591   :  { %9919 = vmatprep.subr.bf16.mxu1 %v14852_v49  ;;  %v3182_v48 = vld [vmem:[%s22812_s5 + $0x16f8] sm:$0xff]  ;;  %v14929_v49 = vcombine.low %v3157_v33, %v3165_v37 }
 0x592   :  { %v14948_v55 = vcombine.high %v3174_v46, %v3182_v48  ;;  %v14947_v61 = vcombine.low %v3174_v46, %v3182_v48  ;;  %v3269_v48 = vld [vmem:[%s22812_s5 + $0x19b0] sm:$0xff] }
 0x593   :  { %9756 = vmatpush1.bf16.msra.mxu0 %v14849_v59  ;;  %v3197_v59 = vld [vmem:[%s22812_s5 + $0x1770] sm:$0xff] }
 0x594   :  { %9920 = vmatpush1.bf16.msra.mxu1 %v14851_v47  ;;  %9757 = vmatprep.subr.bf16.mxu0 %v14866_v60  ;;  %v3190_v47 = vld [vmem:[%s22812_s5 + $0x1738] sm:$0xff]  ;;  %v14962_v3 = vcombine.high %v3189_v56, %v3197_v59 }
 0x595   :  { %9921 = vmatprep.subr.bf16.mxu1 %v14868_v10  ;;  %v3198_v60 = vld [vmem:[%s22812_s5 + $0x1778] sm:$0xff]  ;;  %v14945_v10 = vcombine.low %v3173_v44, %v3181_v45  ;;  %v15026_v45 = vcombine.high %v3253_v54, %v3261_v38 }
 0x596   :  { %v14964_v50 = vcombine.high %v3190_v47, %v3198_v60  ;;  %v14963_v4 = vcombine.low %v3190_v47, %v3198_v60  ;;  %v3293_v47 = vld [vmem:[%s22812_s5 + $0x1a70] sm:$0xff]  ;;  %v3286_v60 = vld [vmem:[%s22812_s5 + $0x1a38] sm:$0xff] }
 0x597   :  { %9758 = vmatpush1.bf16.msra.mxu0 %v14865_v58  ;;  %v3213_v58 = vld [vmem:[%s22812_s5 + $0x17f0] sm:$0xff] }
 0x598   :  { %9922 = vmatpush1.bf16.msra.mxu1 %v14867_v63  ;;  %9759 = vmatprep.subr.bf16.mxu0 %v14882_v0  ;;  %v3206_v63 = vld [vmem:[%s22812_s5 + $0x17b8] sm:$0xff]  ;;  %v14978_v28 = vcombine.high %v3205_v62, %v3213_v58 }
 0x599   :  { %9923 = vmatprep.subr.bf16.mxu1 %v14884_v2  ;;  %v3214_v0 = vld [vmem:[%s22812_s5 + $0x17f8] sm:$0xff]  ;;  %v14961_v2 = vcombine.low %v3189_v56, %v3197_v59  ;;  %v3285_v59 = vld [vmem:[%s22812_s5 + $0x1a30] sm:$0xff] }
 0x59a   :  { %v14980_v6 = vcombine.high %v3206_v63, %v3214_v0  ;;  %v14979_v17 = vcombine.low %v3206_v63, %v3214_v0  ;;  %v3309_v63 = vld [vmem:[%s22812_s5 + $0x1af0] sm:$0xff]  ;;  %v3302_v0 = vld [vmem:[%s22812_s5 + $0x1ab8] sm:$0xff] }
 0x59b   :  { %9760 = vmatpush1.bf16.msra.mxu0 %v14881_v35  ;;  %v3229_v35 = vld [vmem:[%s22812_s5 + $0x1870] sm:$0xff] }
 0x59c   :  { %9924 = vmatpush1.bf16.msra.mxu1 %v14883_v9  ;;  %9761 = vmatprep.subr.bf16.mxu0 %v14898_v12  ;;  %v3222_v9 = vld [vmem:[%s22812_s5 + $0x1838] sm:$0xff]  ;;  %v14994_v21 = vcombine.high %v3221_v7, %v3229_v35 }
 0x59d   :  { %9925 = vmatprep.subr.bf16.mxu1 %v14900_v16  ;;  %v3230_v12 = vld [vmem:[%s22812_s5 + $0x1878] sm:$0xff]  ;;  %v14977_v16 = vcombine.low %v3205_v62, %v3213_v58  ;;  %v3301_v58 = vld [vmem:[%s22812_s5 + $0x1ab0] sm:$0xff] }
 0x59e   :  { %v14996_v22 = vcombine.high %v3222_v9, %v3230_v12  ;;  %v14995_v33 = vcombine.low %v3222_v9, %v3230_v12  ;;  %v3325_v9 = vld [vmem:[%s22812_s5 + $0x1b70] sm:$0xff]  ;;  %v3318_v12 = vld [vmem:[%s22812_s5 + $0x1b38] sm:$0xff] }
 0x59f   :  { %9762 = vmatpush1.bf16.msra.mxu0 %v14897_v25  ;;  %v3245_v25 = vld [vmem:[%s22812_s5 + $0x18f0] sm:$0xff] }
 0x5a0   :  { %9926 = vmatpush1.bf16.msra.mxu1 %v14899_v20  ;;  %9763 = vmatprep.subr.bf16.mxu0 %v14914_v31  ;;  %v14993_v20 = vcombine.low %v3221_v7, %v3229_v35  ;;  %v3238_v31 = vld [vmem:[%s22812_s5 + $0x18b8] sm:$0xff]  ;;  %v15010_v37 = vcombine.high %v3237_v23, %v3245_v25  ;;  %v3317_v35 = vld [vmem:[%s22812_s5 + $0x1b30] sm:$0xff] }
 0x5a1   :  { %9927 = vmatprep.subr.bf16.mxu1 %v14916_v32  ;;  %v3246_v32 = vld [vmem:[%s22812_s5 + $0x18f8] sm:$0xff] }
 0x5a2   :  { %v15011_v44 = vcombine.low %v3238_v31, %v3246_v32 }
 0x5a3   :  { %9764 = vmatpush1.bf16.msra.mxu0 %v14913_v42  ;;  %v15012_v42 = vcombine.high %v3238_v31, %v3246_v32  ;;  %v3341_v31 = vld [vmem:[%s22812_s5 + $0x1bf0] sm:$0xff] }
 0x5a4   :  { %9928 = vmatpush1.bf16.msra.mxu1 %v14915_v43  ;;  %9765 = vmatprep.subr.bf16.mxu0 %v14930_v14  ;;  %v3254_v43 = vld [vmem:[%s22812_s5 + $0x1938] sm:$0xff] }
 0x5a5   :  { %9929 = vmatprep.subr.bf16.mxu1 %v14932_v30  ;;  %v3262_v14 = vld [vmem:[%s22812_s5 + $0x1978] sm:$0xff]  ;;  %v15009_v30 = vcombine.low %v3237_v23, %v3245_v25 }
 0x5a6   :  { %v15028_v46 = vcombine.high %v3254_v43, %v3262_v14 }
 0x5a7   :  { %9766 = vmatpush1.bf16.msra.mxu0 %v14929_v49  ;;  %v3277_v49 = vld [vmem:[%s22812_s5 + $0x19f0] sm:$0xff] }
 0x5a8   :  { %9930 = vmatpush1.bf16.msra.mxu1 %v14931_v51  ;;  %9767 = vmatprep.subr.bf16.mxu0 %v14946_v53  ;;  %v3278_v51 = vld [vmem:[%s22812_s5 + $0x19f8] sm:$0xff]  ;;  %v15027_v53 = vcombine.low %v3254_v43, %v3262_v14  ;;  %v15089_v43 = vcombine.low %v3317_v35, %v3325_v9 }
 0x5a9   :  { %9931 = vmatprep.subr.bf16.mxu1 %v14948_v55  ;;  %v15042_v55 = vcombine.high %v3269_v48, %v3277_v49 }
 0x5ab   :  { %9768 = vmatpush1.bf16.msra.mxu0 %v14945_v10  ;;  %v3294_v10 = vld [vmem:[%s22812_s5 + $0x1a78] sm:$0xff] }
 0x5ac   :  { %9932 = vmatpush1.bf16.msra.mxu1 %v14947_v61  ;;  %9769 = vmatprep.subr.bf16.mxu0 %v14962_v3  ;;  %v15041_v61 = vcombine.low %v3269_v48, %v3277_v49  ;;  %v15060_v62 = vcombine.high %v3286_v60, %v3294_v10  ;;  %v3349_v49 = vld [vmem:[%s22812_s5 + $0x1c30] sm:$0xff] }
 0x5ad   :  { %9933 = vmatprep.subr.bf16.mxu1 %v14964_v50  ;;  %v15058_v50 = vcombine.high %v3285_v59, %v3293_v47 }
 0x5af   :  { %9770 = vmatpush1.bf16.msra.mxu0 %v14961_v2  ;;  %v3310_v2 = vld [vmem:[%s22812_s5 + $0x1af8] sm:$0xff] }
 0x5b0   :  { %9934 = vmatpush1.bf16.msra.mxu1 %v14963_v4  ;;  %9771 = vmatprep.subr.bf16.mxu0 %v14978_v28  ;;  %v15057_v4 = vcombine.low %v3285_v59, %v3293_v47  ;;  %v15059_v28 = vcombine.low %v3286_v60, %v3294_v10  ;;  %v15076_v7 = vcombine.high %v3302_v0, %v3310_v2  ;;  %v3365_v47 = vld [vmem:[%s22812_s5 + $0x1cb0] sm:$0xff]  ;;  %v3366_v10 = vld [vmem:[%s22812_s5 + $0x1cb8] sm:$0xff] }
 0x5b1   :  { %9935 = vmatprep.subr.bf16.mxu1 %v14980_v6  ;;  %v15074_v6 = vcombine.high %v3301_v58, %v3309_v63  ;;  %v3373_v60 = vld [vmem:[%s22812_s5 + $0x1cf0] sm:$0xff] }
 0x5b3   :  { %9772 = vmatpush1.bf16.msra.mxu0 %v14977_v16  ;;  %v3326_v16 = vld [vmem:[%s22812_s5 + $0x1b78] sm:$0xff] }
 0x5b4   :  { %9936 = vmatpush1.bf16.msra.mxu1 %v14979_v17  ;;  %9782 = vmatprep.subr.bf16.mxu0 %v14994_v21  ;;  %v15073_v17 = vcombine.low %v3301_v58, %v3309_v63  ;;  %v15075_v21 = vcombine.low %v3302_v0, %v3310_v2  ;;  %v15092_v25 = vcombine.high %v3318_v12, %v3326_v16  ;;  %v3381_v63 = vld [vmem:[%s22812_s5 + $0x1d30] sm:$0xff]  ;;  %v3382_v2 = vld [vmem:[%s22812_s5 + $0x1d38] sm:$0xff] }
 0x5b5   :  { %9946 = vmatprep.subr.bf16.mxu1 %v14996_v22  ;;  %v15090_v22 = vcombine.high %v3317_v35, %v3325_v9  ;;  %v3389_v0 = vld [vmem:[%s22812_s5 + $0x1d70] sm:$0xff] }
 0x5b6   :  { %9774 = vmatmul.mubr.bf16.vlgmr.msra.gmra.mrb[24].mxu0 %v18616_v57  ;;  %v3397_v9 = vld [vmem:[%s22812_s5 + $0x1db0] sm:$0xff] }
 0x5b7   :  { %9938 = vmatmul.mubr.bf16.vlgmr.msra.gmra.mrb[24].mxu1 %v18616_v57  ;;  %9783 = vmatpush1.bf16.msra.mxu0 %v14993_v20  ;;  %v3270_v57 = vld [vmem:[%s22812_s5 + $0x19b8] sm:$0xff]  ;;  %v3333_v20 = vld [vmem:[%s22812_s5 + $0x1bb0] sm:$0xff] }
 0x5b8   :  { %9814 = vmatprep.mubr.bf16.mxu0 %v18632_v1  ;;  %9947 = vmatpush1.bf16.msra.mxu1 %v14995_v33  ;;  %v15044_v56 = vcombine.high %v3270_v57, %v3278_v51  ;;  %v15043_v3 = vcombine.low %v3270_v57, %v3278_v51  ;;  %v3357_v57 = vld [vmem:[%s22812_s5 + $0x1c70] sm:$0xff]  ;;  %v3350_v51 = vld [vmem:[%s22812_s5 + $0x1c38] sm:$0xff] }
 0x5b9   :  { %9978 = vmatprep.mubr.bf16.mxu1 %v18632_v1  ;;  %9784 = vmatprep.subr.bf16.mxu0 %v15010_v37  ;;  %v15025_v1 = vcombine.low %v3253_v54, %v3261_v38  ;;  %v3334_v37 = vld [vmem:[%s22812_s5 + $0x1bb8] sm:$0xff] }
 0x5ba   :  { %9948 = vmatprep.subr.bf16.mxu1 %v15012_v42  ;;  %v3342_v54 = vld [vmem:[%s22812_s5 + $0x1bf8] sm:$0xff] }
 0x5bb   :  { %9785 = vmatpush1.bf16.msra.mxu0 %v15009_v30  ;;  %v15108_v48 = vcombine.high %v3334_v37, %v3342_v54 }
 0x5bc   :  { %9949 = vmatpush1.bf16.msra.mxu1 %v15011_v44  ;;  %9786 = vmatprep.subr.bf16.mxu0 %v15026_v45  ;;  %v15091_v44 = vcombine.low %v3318_v12, %v3326_v16  ;;  %v15106_v45 = vcombine.high %v3333_v20, %v3341_v31  ;;  %v3405_v12 = vld [vmem:[%s22812_s5 + $0x1df0] sm:$0xff]  ;;  %v3398_v16 = vld [vmem:[%s22812_s5 + $0x1db8] sm:$0xff] }
 0x5bd   :  { %9950 = vmatprep.subr.bf16.mxu1 %v15028_v46 }
 0x5bf   :  { %9787 = vmatpush1.bf16.msra.mxu0 %v15025_v1  ;;  %v3358_v1 = vld [vmem:[%s22812_s5 + $0x1c78] sm:$0xff] }
 0x5c0   :  { %9951 = vmatpush1.bf16.msra.mxu1 %v15027_v53  ;;  %9788 = vmatprep.subr.bf16.mxu0 %v15042_v55  ;;  %v15105_v53 = vcombine.low %v3333_v20, %v3341_v31  ;;  %v15107_v55 = vcombine.low %v3334_v37, %v3342_v54  ;;  %v15124_v59 = vcombine.high %v3350_v51, %v3358_v1  ;;  %v3413_v31 = vld [vmem:[%s22812_s5 + $0x1e30] sm:$0xff]  ;;  %v3414_v54 = vld [vmem:[%s22812_s5 + $0x1e38] sm:$0xff] }
 0x5c1   :  { %9952 = vmatprep.subr.bf16.mxu1 %v15044_v56  ;;  %v15122_v56 = vcombine.high %v3349_v49, %v3357_v57  ;;  %v3421_v37 = vld [vmem:[%s22812_s5 + $0x1e70] sm:$0xff] }
 0x5c3   :  { %9789 = vmatpush1.bf16.msra.mxu0 %v15041_v61  ;;  %v3374_v61 = vld [vmem:[%s22812_s5 + $0x1cf8] sm:$0xff] }
 0x5c4   :  { %9953 = vmatpush1.bf16.msra.mxu1 %v15043_v3  ;;  %9790 = vmatprep.subr.bf16.mxu0 %v15058_v50  ;;  %v15121_v3 = vcombine.low %v3349_v49, %v3357_v57  ;;  %v15123_v50 = vcombine.low %v3350_v51, %v3358_v1  ;;  %v15140_v58 = vcombine.high %v3366_v10, %v3374_v61  ;;  %v3438_v49 = vld [vmem:[%s22812_s5 + $0x1ef8] sm:$0xff] }
 0x5c5   :  { %9954 = vmatprep.subr.bf16.mxu1 %v15060_v62  ;;  %v15138_v62 = vcombine.high %v3365_v47, %v3373_v60  ;;  %v15185_v57 = vcombine.low %v3413_v31, %v3421_v37 }
 0x5c7   :  { %9791 = vmatpush1.bf16.msra.mxu0 %v15057_v4  ;;  %v3390_v4 = vld [vmem:[%s22812_s5 + $0x1d78] sm:$0xff] }
 0x5c8   :  { %9955 = vmatpush1.bf16.msra.mxu1 %v15059_v28  ;;  %9792 = vmatprep.subr.bf16.mxu0 %v15074_v6  ;;  %v15137_v28 = vcombine.low %v3365_v47, %v3373_v60  ;;  %v15139_v6 = vcombine.low %v3366_v10, %v3374_v61  ;;  %v15156_v35 = vcombine.high %v3382_v2, %v3390_v4  ;;  %v3454_v47 = vld [vmem:[%s22812_s5 + $0x1f78] sm:$0xff] }
 0x5c9   :  { %v21064_v23 = vpop.f32.mrb[20].mxu0  ;;  %9956 = vmatprep.subr.bf16.mxu1 %v15076_v7  ;;  %v15154_v7 = vcombine.high %v3381_v63, %v3389_v0 }
 0x5ca   :  { %v21072_v32 = vpop.f32.mrb[20].mxu1  ;;  %v21074_v33 = vpop.f32.mrb[21].mxu0 }
 0x5cb   :  { %v21082_v38 = vpop.f32.mrb[21].mxu1  ;;  %v9492_v42 = vpop.f32.mrb[22].mxu0  ;;  %9793 = vmatpush1.bf16.msra.mxu0 %v15073_v17  ;;  %v3406_v17 = vld [vmem:[%s22812_s5 + $0x1df8] sm:$0xff] }
 0x5cc   :  { %v9656_v14 = vpop.f32.mrb[22].mxu1  ;;  %9957 = vmatpush1.bf16.msra.mxu1 %v15075_v21  ;;  %v9493_v30 = vpop.f32.mrb[23].mxu0  ;;  %9794 = vmatprep.subr.bf16.mxu0 %v15090_v22  ;;  %v15153_v21 = vcombine.low %v3381_v63, %v3389_v0  ;;  %v15155_v22 = vcombine.low %v3382_v2, %v3390_v4  ;;  %v15172_v20 = vcombine.high %v3398_v16, %v3406_v17  ;;  %v3422_v42 = vld [vmem:[%s22812_s5 + $0x1e78] sm:$0xff]  ;;  %v21183_v0 = vld [vmem:[%s22813_s6] sm:$0xff] }
 0x5cd   :  { %v9657_v46 = vpop.f32.mrb[23].mxu1  ;;  %9958 = vmatprep.subr.bf16.mxu1 %v15092_v25  ;;  %v15170_v25 = vcombine.high %v3397_v9, %v3405_v12  ;;  %v15171_v14 = vcombine.low %v3398_v16, %v3406_v17  ;;  %v15186_v30 = vcombine.high %v3413_v31, %v3421_v37  ;;  %v15187_v51 = vcombine.low %v3414_v54, %v3422_v42  ;;  %v3470_v63 = vld [vmem:[%s22812_s5 + $0x1ff8] sm:$0xff]  ;;  %v16098_v31 = vld [vmem:[%s22814_s7 + $0x20] ss:$16 sps:$4 sm:$0xff]  }
 0x5ce   :  { %v3437_v46 = vld [vmem:[%s22812_s5 + $0x1ef0] sm:$0xff]  ;;  %v16097_v16 = vld [vmem:[%s22814_s7 + $0xc] ss:$16 sps:$4 sm:$0xff]   ;;  %v16101_v37 = vld [vmem:[%s22814_s7 + $0x28] ss:$16 sps:$4 sm:$0xff]  }
 0x5cf   :  { %9795 = vmatpush1.bf16.msra.mxu0 %v15089_v43  ;;  %v15169_v43 = vcombine.low %v3397_v9, %v3405_v12  ;;  %v16094_v12 = vld [vmem:[%s22814_s7 + $0x4] ss:$16 sps:$4 sm:$0xff]  }
 0x5d0   :  { %9959 = vmatpush1.bf16.msra.mxu1 %v15091_v44  ;;  %9796 = vmatprep.subr.bf16.mxu0 %v15106_v45  ;;  %v15188_v44 = vcombine.high %v3414_v54, %v3422_v42  ;;  %v3429_v45 = vld [vmem:[%s22812_s5 + $0x1eb0] sm:$0xff] }
 0x5d1   :  { %9960 = vmatprep.subr.bf16.mxu1 %v15108_v48  ;;  %v3430_v48 = vld [vmem:[%s22812_s5 + $0x1eb8] sm:$0xff]  ;;  %v15202_v1 = vcombine.high %v3429_v45, %v3437_v46  ;;  %v15201_v60 = vcombine.low %v3429_v45, %v3437_v46  ;;  %v16106_v54 = vld [vmem:[%s22814_s7 + $0x44] ss:$16 sps:$4 sm:$0xff]   ;;  %v16104_v42 = vld [vmem:[%s22814_s7 + $0x40] ss:$16 sps:$4 sm:$0xff]  }
 0x5d2   :  { %v15203_v10 = vcombine.low %v3430_v48, %v3438_v49  ;;  %v16113_v45 = vld [vmem:[%s22814_s7 + $0x68] ss:$16 sps:$4 sm:$0xff]   ;;  %v16118_v46 = vld [vmem:[%s22814_s7 + $0x84] ss:$16 sps:$4 sm:$0xff]  }
 0x5d3   :  { %9797 = vmatpush1.bf16.msra.mxu0 %v15105_v53  ;;  %v15204_v53 = vcombine.high %v3430_v48, %v3438_v49  ;;  %v16121_v48 = vld [vmem:[%s22814_s7 + $0x8c] ss:$16 sps:$4 sm:$0xff]   ;;  %v16116_v49 = vld [vmem:[%s22814_s7 + $0x80] ss:$16 sps:$4 sm:$0xff]  }
 0x5d4   :  { %9961 = vmatpush1.bf16.msra.mxu1 %v15107_v55  ;;  %9798 = vmatprep.subr.bf16.mxu0 %v15122_v56  ;;  %v3445_v55 = vld [vmem:[%s22812_s5 + $0x1f30] sm:$0xff] }
 0x5d5   :  { %9962 = vmatprep.subr.bf16.mxu1 %v15124_v59  ;;  %v3453_v56 = vld [vmem:[%s22812_s5 + $0x1f70] sm:$0xff]  ;;  %v3446_v59 = vld [vmem:[%s22812_s5 + $0x1f38] sm:$0xff] }
 0x5d6   :  { %v15218_v61 = vcombine.high %v3445_v55, %v3453_v56  ;;  %v15217_v2 = vcombine.low %v3445_v55, %v3453_v56  ;;  %v15219_v4 = vcombine.low %v3446_v59, %v3454_v47  ;;  %v16125_v55 = vld [vmem:[%s22814_s7 + $0xa8] ss:$16 sps:$4 sm:$0xff]   ;;  %v16130_v56 = vld [vmem:[%s22814_s7 + $0xc4] ss:$16 sps:$4 sm:$0xff]  }
 0x5d7   :  { %9799 = vmatpush1.bf16.msra.mxu0 %v15121_v3  ;;  %v15220_v3 = vcombine.high %v3446_v59, %v3454_v47  ;;  %v16133_v59 = vld [vmem:[%s22814_s7 + $0xcc] ss:$16 sps:$4 sm:$0xff]   ;;  %v16128_v47 = vld [vmem:[%s22814_s7 + $0xc0] ss:$16 sps:$4 sm:$0xff]  }
 0x5d8   :  { %9963 = vmatpush1.bf16.msra.mxu1 %v15123_v50  ;;  %9800 = vmatprep.subr.bf16.mxu0 %v15138_v62  ;;  %v3461_v50 = vld [vmem:[%s22812_s5 + $0x1fb0] sm:$0xff] }
 0x5d9   :  { %9964 = vmatprep.subr.bf16.mxu1 %v15140_v58  ;;  %v3469_v62 = vld [vmem:[%s22812_s5 + $0x1ff0] sm:$0xff]  ;;  %v3462_v58 = vld [vmem:[%s22812_s5 + $0x1fb8] sm:$0xff] }
 0x5da   :  { %v15235_v9 = vcombine.low %v3462_v58, %v3470_v63 }
 0x5db   :  { %9801 = vmatpush1.bf16.msra.mxu0 %v15137_v28  ;;  %v15234_v28 = vcombine.high %v3461_v50, %v3469_v62 }
 0x5dc   :  { %9965 = vmatpush1.bf16.msra.mxu1 %v15139_v6  ;;  %9802 = vmatprep.subr.bf16.mxu0 %v15154_v7  ;;  %v15236_v6 = vcombine.high %v3462_v58, %v3470_v63  ;;  %v3482_v7 = vrot.slane %v21183_v0, %v17358_v15  ;;  %v16145_v58 = vld [vmem:[%s22814_s7 + $0x10c] ss:$16 sps:$4 sm:$0xff]   ;;  %v16140_v63 = vld [vmem:[%s22814_s7 + $0x100] ss:$16 sps:$4 sm:$0xff]  }
 0x5dd   :  { %9966 = vmatprep.subr.bf16.mxu1 %v15156_v35  ;;  %v15233_v35 = vcombine.low %v3461_v50, %v3469_v62  ;;  %v16137_v50 = vld [vmem:[%s22814_s7 + $0xe8] ss:$16 sps:$4 sm:$0xff]   ;;  %v16142_v62 = vld [vmem:[%s22814_s7 + $0x104] ss:$16 sps:$4 sm:$0xff]  }
 0x5de   :  { %v15806_v17 = vadd.f32 %v19490_v39, %v3482_v7  ;;  %v16103_v39 = vld [vmem:[%s22814_s7 + $0x2c] ss:$16 sps:$4 sm:$0xff]   ;;  %v16149_v7 = vld [vmem:[%s22814_s7 + $0x128] ss:$16 sps:$4 sm:$0xff]  }
 0x5df   :  { %9803 = vmatpush1.bf16.msra.mxu0 %v15153_v21  ;;  %v16092_v21 = vld [vmem:[%s22814_s7] ss:$16 sps:$4 sm:$0xff]  }
 0x5e0   :  { %9967 = vmatpush1.bf16.msra.mxu1 %v15155_v22  ;;  %9804 = vmatprep.subr.bf16.mxu0 %v15170_v25  ;;  %v16095_v22 = vld [vmem:[%s22814_s7 + $0x8] ss:$16 sps:$4 sm:$0xff]   ;;  %v16100_v25 = vld [vmem:[%s22814_s7 + $0x24] ss:$16 sps:$4 sm:$0xff]  }
 0x5e1   :  { %9968 = vmatprep.subr.bf16.mxu1 %v15172_v20  ;;  %v15782_v20 = vpack.c.bf16 %v15806_v17, %v15806_v17  ;;  %v16160_v17 = vld [vmem:[%s22814_s7 + $0x164] ss:$16 sps:$4 sm:$0xff]  }
 0x5e3   :  { %9805 = vmatpush1.bf16.msra.mxu0 %v15169_v43  ;;  %v16107_v43 = vld [vmem:[%s22814_s7 + $0x48] ss:$16 sps:$4 sm:$0xff]  }
 0x5e4   :  { %9969 = vmatpush1.bf16.msra.mxu1 %v15171_v14  ;;  %9806 = vmatprep.subr.bf16.mxu0 %v15186_v30  ;;  %v16112_v14 = vld [vmem:[%s22814_s7 + $0x64] ss:$16 sps:$4 sm:$0xff]   ;;  %v16115_v30 = vld [vmem:[%s22814_s7 + $0x6c] ss:$16 sps:$4 sm:$0xff]  }
 0x5e5   :  { %9970 = vmatprep.subr.bf16.mxu1 %v15188_v44  ;;  %v16110_v44 = vld [vmem:[%s22814_s7 + $0x60] ss:$16 sps:$4 sm:$0xff]  }
 0x5e7   :  { %9807 = vmatpush1.bf16.msra.mxu0 %v15185_v57  ;;  %v16119_v57 = vld [vmem:[%s22814_s7 + $0x88] ss:$16 sps:$4 sm:$0xff]  }
 0x5e8   :  { %9971 = vmatpush1.bf16.msra.mxu1 %v15187_v51  ;;  %9808 = vmatprep.subr.bf16.mxu0 %v15202_v1  ;;  %v16124_v51 = vld [vmem:[%s22814_s7 + $0xa4] ss:$16 sps:$4 sm:$0xff]   ;;  %v16127_v1 = vld [vmem:[%s22814_s7 + $0xac] ss:$16 sps:$4 sm:$0xff]  }
 0x5e9   :  { %9972 = vmatprep.subr.bf16.mxu1 %v15204_v53  ;;  %v16122_v53 = vld [vmem:[%s22814_s7 + $0xa0] ss:$16 sps:$4 sm:$0xff]  }
 0x5eb   :  { %9809 = vmatpush1.bf16.msra.mxu0 %v15201_v60  ;;  %v16131_v60 = vld [vmem:[%s22814_s7 + $0xc8] ss:$16 sps:$4 sm:$0xff]  }
 0x5ec   :  { %9973 = vmatpush1.bf16.msra.mxu1 %v15203_v10  ;;  %9810 = vmatprep.subr.bf16.mxu0 %v15218_v61  ;;  %v16136_v10 = vld [vmem:[%s22814_s7 + $0xe4] ss:$16 sps:$4 sm:$0xff]   ;;  %v16139_v61 = vld [vmem:[%s22814_s7 + $0xec] ss:$16 sps:$4 sm:$0xff]  }
 0x5ed   :  { %9974 = vmatprep.subr.bf16.mxu1 %v15220_v3  ;;  %v16134_v3 = vld [vmem:[%s22814_s7 + $0xe0] ss:$16 sps:$4 sm:$0xff]  }
 0x5ef   :  { %9811 = vmatpush1.bf16.msra.mxu0 %v15217_v2  ;;  %v16143_v2 = vld [vmem:[%s22814_s7 + $0x108] ss:$16 sps:$4 sm:$0xff]  }
 0x5f0   :  { %9975 = vmatpush1.bf16.msra.mxu1 %v15219_v4  ;;  %9812 = vmatprep.subr.bf16.mxu0 %v15234_v28  ;;  %v16148_v4 = vld [vmem:[%s22814_s7 + $0x124] ss:$16 sps:$4 sm:$0xff]   ;;  %v16151_v28 = vld [vmem:[%s22814_s7 + $0x12c] ss:$16 sps:$4 sm:$0xff]  }
 0x5f1   :  { %9976 = vmatprep.subr.bf16.mxu1 %v15236_v6  ;;  %v16146_v6 = vld [vmem:[%s22814_s7 + $0x120] ss:$16 sps:$4 sm:$0xff]  }
 0x5f3   :  { %9813 = vmatpush1.bf16.msra.mxu0 %v15233_v35  ;;  %v16154_v35 = vld [vmem:[%s22814_s7 + $0x144] ss:$16 sps:$4 sm:$0xff]  }
 0x5f4   :  { %9977 = vmatpush1.bf16.msra.mxu1 %v15235_v9  ;;  %13217 = vmatprep.subr.bf16.mxu0 %v16094_v12  ;;  %v16157_v9 = vld [vmem:[%s22814_s7 + $0x14c] ss:$16 sps:$4 sm:$0xff]   ;;  %v16152_v12 = vld [vmem:[%s22814_s7 + $0x140] ss:$16 sps:$4 sm:$0xff]  }
 0x5f5   :  { %13545 = vmatprep.subr.bf16.mxu1 %v16097_v16  ;;  %v16155_v16 = vld [vmem:[%s22814_s7 + $0x148] ss:$16 sps:$4 sm:$0xff]  }
 0x5f6   :  { %9815 = vmatmul.mubr.bf16.vlgmr.msra.gmra.mrb[24].mxu0 %v18826_v40 }
 0x5f7   :  { %9979 = vmatmul.mubr.bf16.vlgmr.msra.gmra.mrb[24].mxu1 %v18826_v40  ;;  %13218 = vmatpush1.bf16.msra.mxu0 %v16092_v21  ;;  %v16109_v40 = vld [vmem:[%s22814_s7 + $0x4c] ss:$16 sps:$4 sm:$0xff]  }
 0x5f8   :  { %13249 = vmatprep.mubr.bf16.mxu0 %v15782_v20  ;;  %13546 = vmatpush1.bf16.msra.mxu1 %v16095_v22  ;;  %v16163_v21 = vld [vmem:[%s22814_s7 + $0x16c] ss:$16 sps:$4 sm:$0xff]   ;;  %v16158_v22 = vld [vmem:[%s22814_s7 + $0x160] ss:$16 sps:$4 sm:$0xff]  }
 0x5f9   :  { %13577 = vmatprep.mubr.bf16.mxu1 %v15782_v20  ;;  %13219 = vmatprep.subr.bf16.mxu0 %v16100_v25  ;;  %v16161_v25 = vld [vmem:[%s22814_s7 + $0x168] ss:$16 sps:$4 sm:$0xff]   ;;  %v16166_v20 = vld [vmem:[%s22814_s7 + $0x184] ss:$16 sps:$4 sm:$0xff]  }
 0x5fa   :  { %13547 = vmatprep.subr.bf16.mxu1 %v16103_v39  ;;  %v16169_v39 = vld [vmem:[%s22814_s7 + $0x18c] ss:$16 sps:$4 sm:$0xff]  }
 0x5fb   :  { %13220 = vmatpush1.bf16.msra.mxu0 %v16098_v31  ;;  %v16164_v31 = vld [vmem:[%s22814_s7 + $0x180] ss:$16 sps:$4 sm:$0xff]  }
 0x5fc   :  { %13548 = vmatpush1.bf16.msra.mxu1 %v16101_v37  ;;  %13221 = vmatprep.subr.bf16.mxu0 %v16106_v54  ;;  %v16167_v37 = vld [vmem:[%s22814_s7 + $0x188] ss:$16 sps:$4 sm:$0xff]   ;;  %v16172_v54 = vld [vmem:[%s22814_s7 + $0x1a4] ss:$16 sps:$4 sm:$0xff]  }
 0x5fd   :  { %13549 = vmatprep.subr.bf16.mxu1 %v16109_v40  ;;  %v16175_v40 = vld [vmem:[%s22814_s7 + $0x1ac] ss:$16 sps:$4 sm:$0xff]  }
 0x5ff   :  { %13222 = vmatpush1.bf16.msra.mxu0 %v16104_v42  ;;  %v16170_v42 = vld [vmem:[%s22814_s7 + $0x1a0] ss:$16 sps:$4 sm:$0xff]  }
 0x600   :  { %13550 = vmatpush1.bf16.msra.mxu1 %v16107_v43  ;;  %13223 = vmatprep.subr.bf16.mxu0 %v16112_v14  ;;  %v16173_v43 = vld [vmem:[%s22814_s7 + $0x1a8] ss:$16 sps:$4 sm:$0xff]   ;;  %v16178_v14 = vld [vmem:[%s22814_s7 + $0x1c4] ss:$16 sps:$4 sm:$0xff]  }
 0x601   :  { %13551 = vmatprep.subr.bf16.mxu1 %v16115_v30  ;;  %v16181_v30 = vld [vmem:[%s22814_s7 + $0x1cc] ss:$16 sps:$4 sm:$0xff]  }
 0x603   :  { %13224 = vmatpush1.bf16.msra.mxu0 %v16110_v44  ;;  %v16176_v44 = vld [vmem:[%s22814_s7 + $0x1c0] ss:$16 sps:$4 sm:$0xff]  }
 0x604   :  { %13552 = vmatpush1.bf16.msra.mxu1 %v16113_v45  ;;  %13225 = vmatprep.subr.bf16.mxu0 %v16118_v46  ;;  %v3478_v45 = vrot.slane %v21183_v0, %v17350_v13  ;;  %v16179_v46 = vld [vmem:[%s22814_s7 + $0x1c8] ss:$16 sps:$4 sm:$0xff]  }
 0x605   :  { %13553 = vmatprep.subr.bf16.mxu1 %v16121_v48  ;;  %v16184_v48 = vld [vmem:[%s22814_s7 + $0x1e4] ss:$16 sps:$4 sm:$0xff]  }
 0x607   :  { %13226 = vmatpush1.bf16.msra.mxu0 %v16116_v49  ;;  %v16187_v49 = vld [vmem:[%s22814_s7 + $0x1ec] ss:$16 sps:$4 sm:$0xff]  }
 0x608   :  { %13554 = vmatpush1.bf16.msra.mxu1 %v16119_v57  ;;  %13227 = vmatprep.subr.bf16.mxu0 %v16124_v51  ;;  %v3490_v57 = vrot.slane %v21183_v0, %v17421_v52  ;;  %v16182_v51 = vld [vmem:[%s22814_s7 + $0x1e0] ss:$16 sps:$4 sm:$0xff]  }
 0x609   :  { %13555 = vmatprep.subr.bf16.mxu1 %v16127_v1  ;;  %v15805_v1 = vadd.f32 %v19480_v34, %v3478_v45  ;;  %v16188_v34 = vld [vmem:[%s22814_s7 + $0x200] ss:$16 sps:$4 sm:$0xff]   ;;  %v16239_v45 = vld [vmem:[%s22814_s7 + $0x308] ss:$16 sps:$4 sm:$0xff]  }
 0x60b   :  { %13228 = vmatpush1.bf16.msra.mxu0 %v16122_v53  ;;  %v16185_v53 = vld [vmem:[%s22814_s7 + $0x1e8] ss:$16 sps:$4 sm:$0xff]  }
 0x60c   :  { %13556 = vmatpush1.bf16.msra.mxu1 %v16125_v55  ;;  %13229 = vmatprep.subr.bf16.mxu0 %v16130_v56  ;;  %v16190_v55 = vld [vmem:[%s22814_s7 + $0x204] ss:$16 sps:$4 sm:$0xff]   ;;  %v16193_v56 = vld [vmem:[%s22814_s7 + $0x20c] ss:$16 sps:$4 sm:$0xff]  }
 0x60d   :  { %13557 = vmatprep.subr.bf16.mxu1 %v16133_v59  ;;  %v15808_v59 = vadd.f32 %v19492_v41, %v3490_v57  ;;  %v16199_v41 = vld [vmem:[%s22814_s7 + $0x22c] ss:$16 sps:$4 sm:$0xff]   ;;  %v16245_v57 = vld [vmem:[%s22814_s7 + $0x328] ss:$16 sps:$4 sm:$0xff]  }
 0x60f   :  { %13230 = vmatpush1.bf16.msra.mxu0 %v16128_v47  ;;  %v15781_v47 = vpack.c.bf16 %v15805_v1, %v15805_v1  ;;  %v16253_v1 = vld [vmem:[%s22814_s7 + $0x34c] ss:$16 sps:$4 sm:$0xff]  }
 0x610   :  { %13558 = vmatpush1.bf16.msra.mxu1 %v16131_v60  ;;  %13231 = vmatprep.subr.bf16.mxu0 %v16136_v10  ;;  %v16191_v60 = vld [vmem:[%s22814_s7 + $0x208] ss:$16 sps:$4 sm:$0xff]   ;;  %v16196_v10 = vld [vmem:[%s22814_s7 + $0x224] ss:$16 sps:$4 sm:$0xff]  }
 0x611   :  { %13559 = vmatprep.subr.bf16.mxu1 %v16139_v61  ;;  %v15784_v61 = vpack.c.bf16 %v15808_v59, %v15808_v59  ;;  %v16259_v59 = vld [vmem:[%s22814_s7 + $0x36c] ss:$16 sps:$4 sm:$0xff]  }
 0x613   :  { %13232 = vmatpush1.bf16.msra.mxu0 %v16134_v3  ;;  %v16194_v3 = vld [vmem:[%s22814_s7 + $0x220] ss:$16 sps:$4 sm:$0xff]  }
 0x614   :  { %13560 = vmatpush1.bf16.msra.mxu1 %v16137_v50  ;;  %13233 = vmatprep.subr.bf16.mxu0 %v16142_v62  ;;  %v16197_v50 = vld [vmem:[%s22814_s7 + $0x228] ss:$16 sps:$4 sm:$0xff]   ;;  %v16202_v62 = vld [vmem:[%s22814_s7 + $0x244] ss:$16 sps:$4 sm:$0xff]  }
 0x615   :  { %13561 = vmatprep.subr.bf16.mxu1 %v16145_v58  ;;  %v16205_v58 = vld [vmem:[%s22814_s7 + $0x24c] ss:$16 sps:$4 sm:$0xff]  }
 0x617   :  { %13234 = vmatpush1.bf16.msra.mxu0 %v16140_v63  ;;  %v16200_v63 = vld [vmem:[%s22814_s7 + $0x240] ss:$16 sps:$4 sm:$0xff]  }
 0x618   :  { %13562 = vmatpush1.bf16.msra.mxu1 %v16143_v2  ;;  %13235 = vmatprep.subr.bf16.mxu0 %v16148_v4  ;;  %v16203_v2 = vld [vmem:[%s22814_s7 + $0x248] ss:$16 sps:$4 sm:$0xff]   ;;  %v16208_v4 = vld [vmem:[%s22814_s7 + $0x264] ss:$16 sps:$4 sm:$0xff]  }
 0x619   :  { %13563 = vmatprep.subr.bf16.mxu1 %v16151_v28  ;;  %v16211_v28 = vld [vmem:[%s22814_s7 + $0x26c] ss:$16 sps:$4 sm:$0xff]  }
 0x61b   :  { %13236 = vmatpush1.bf16.msra.mxu0 %v16146_v6  ;;  %v16206_v6 = vld [vmem:[%s22814_s7 + $0x260] ss:$16 sps:$4 sm:$0xff]  }
 0x61c   :  { %13564 = vmatpush1.bf16.msra.mxu1 %v16149_v7  ;;  %13237 = vmatprep.subr.bf16.mxu0 %v16154_v35  ;;  %v16209_v7 = vld [vmem:[%s22814_s7 + $0x268] ss:$16 sps:$4 sm:$0xff]   ;;  %v16214_v35 = vld [vmem:[%s22814_s7 + $0x284] ss:$16 sps:$4 sm:$0xff]  }
 0x61d   :  { %13565 = vmatprep.subr.bf16.mxu1 %v16157_v9  ;;  %v16217_v9 = vld [vmem:[%s22814_s7 + $0x28c] ss:$16 sps:$4 sm:$0xff]  }
 0x61f   :  { %13238 = vmatpush1.bf16.msra.mxu0 %v16152_v12  ;;  %v16212_v12 = vld [vmem:[%s22814_s7 + $0x280] ss:$16 sps:$4 sm:$0xff]  }
 0x620   :  { %13566 = vmatpush1.bf16.msra.mxu1 %v16155_v16  ;;  %13239 = vmatprep.subr.bf16.mxu0 %v16160_v17  ;;  %v16215_v16 = vld [vmem:[%s22814_s7 + $0x288] ss:$16 sps:$4 sm:$0xff]   ;;  %v16220_v17 = vld [vmem:[%s22814_s7 + $0x2a4] ss:$16 sps:$4 sm:$0xff]  }
 0x621   :  { %13567 = vmatprep.subr.bf16.mxu1 %v16163_v21  ;;  %v16223_v21 = vld [vmem:[%s22814_s7 + $0x2ac] ss:$16 sps:$4 sm:$0xff]  }
 0x623   :  { %13240 = vmatpush1.bf16.msra.mxu0 %v16158_v22  ;;  %v16218_v22 = vld [vmem:[%s22814_s7 + $0x2a0] ss:$16 sps:$4 sm:$0xff]  }
 0x624   :  { %13568 = vmatpush1.bf16.msra.mxu1 %v16161_v25  ;;  %13241 = vmatprep.subr.bf16.mxu0 %v16166_v20  ;;  %v16221_v25 = vld [vmem:[%s22814_s7 + $0x2a8] ss:$16 sps:$4 sm:$0xff]   ;;  %v16226_v20 = vld [vmem:[%s22814_s7 + $0x2c4] ss:$16 sps:$4 sm:$0xff]  }
 0x625   :  { %13569 = vmatprep.subr.bf16.mxu1 %v16169_v39  ;;  %v16229_v39 = vld [vmem:[%s22814_s7 + $0x2cc] ss:$16 sps:$4 sm:$0xff]  }
 0x627   :  { %13242 = vmatpush1.bf16.msra.mxu0 %v16164_v31  ;;  %v16224_v31 = vld [vmem:[%s22814_s7 + $0x2c0] ss:$16 sps:$4 sm:$0xff]  }
 0x628   :  { %13570 = vmatpush1.bf16.msra.mxu1 %v16167_v37  ;;  %13243 = vmatprep.subr.bf16.mxu0 %v16172_v54  ;;  %v16227_v37 = vld [vmem:[%s22814_s7 + $0x2c8] ss:$16 sps:$4 sm:$0xff]   ;;  %v16232_v54 = vld [vmem:[%s22814_s7 + $0x2e4] ss:$16 sps:$4 sm:$0xff]  }
 0x629   :  { %13571 = vmatprep.subr.bf16.mxu1 %v16175_v40  ;;  %v16235_v40 = vld [vmem:[%s22814_s7 + $0x2ec] ss:$16 sps:$4 sm:$0xff]  }
 0x62b   :  { %13244 = vmatpush1.bf16.msra.mxu0 %v16170_v42  ;;  %v16230_v42 = vld [vmem:[%s22814_s7 + $0x2e0] ss:$16 sps:$4 sm:$0xff]  }
 0x62c   :  { %13572 = vmatpush1.bf16.msra.mxu1 %v16173_v43  ;;  %13245 = vmatprep.subr.bf16.mxu0 %v16178_v14  ;;  %v16233_v43 = vld [vmem:[%s22814_s7 + $0x2e8] ss:$16 sps:$4 sm:$0xff]   ;;  %v16238_v14 = vld [vmem:[%s22814_s7 + $0x304] ss:$16 sps:$4 sm:$0xff]  }
 0x62d   :  { %13573 = vmatprep.subr.bf16.mxu1 %v16181_v30  ;;  %v16241_v30 = vld [vmem:[%s22814_s7 + $0x30c] ss:$16 sps:$4 sm:$0xff]  }
 0x62f   :  { %13246 = vmatpush1.bf16.msra.mxu0 %v16176_v44  ;;  %v16236_v44 = vld [vmem:[%s22814_s7 + $0x300] ss:$16 sps:$4 sm:$0xff]  }
 0x630   :  { %13574 = vmatpush1.bf16.msra.mxu1 %v16179_v46  ;;  %13247 = vmatprep.subr.bf16.mxu0 %v16184_v48  ;;  %v16244_v46 = vld [vmem:[%s22814_s7 + $0x324] ss:$16 sps:$4 sm:$0xff]   ;;  %v16247_v48 = vld [vmem:[%s22814_s7 + $0x32c] ss:$16 sps:$4 sm:$0xff]  }
 0x631   :  { %13575 = vmatprep.subr.bf16.mxu1 %v16187_v49  ;;  %v16242_v49 = vld [vmem:[%s22814_s7 + $0x320] ss:$16 sps:$4 sm:$0xff]  }
 0x633   :  { %13248 = vmatpush1.bf16.msra.mxu0 %v16182_v51  ;;  %v16250_v51 = vld [vmem:[%s22814_s7 + $0x344] ss:$16 sps:$4 sm:$0xff]  }
 0x634   :  { %13576 = vmatpush1.bf16.msra.mxu1 %v16185_v53  ;;  %13258 = vmatprep.subr.bf16.mxu0 %v16190_v55  ;;  %v16248_v53 = vld [vmem:[%s22814_s7 + $0x340] ss:$16 sps:$4 sm:$0xff]   ;;  %v16251_v55 = vld [vmem:[%s22814_s7 + $0x348] ss:$16 sps:$4 sm:$0xff]  }
 0x635   :  { %13586 = vmatprep.subr.bf16.mxu1 %v16193_v56  ;;  %v16256_v56 = vld [vmem:[%s22814_s7 + $0x364] ss:$16 sps:$4 sm:$0xff]  }
 0x636   :  { %13250 = vmatmul.mubr.bf16.vlgmr.msra.gmra.mrb[28].mxu0 %v15781_v47 }
 0x637   :  { %13578 = vmatmul.mubr.bf16.vlgmr.msra.gmra.mrb[28].mxu1 %v15781_v47  ;;  %13259 = vmatpush1.bf16.msra.mxu0 %v16188_v34  ;;  %v16254_v34 = vld [vmem:[%s22814_s7 + $0x360] ss:$16 sps:$4 sm:$0xff]   ;;  %v16257_v47 = vld [vmem:[%s22814_s7 + $0x368] ss:$16 sps:$4 sm:$0xff]  }
 0x638   :  { %13290 = vmatprep.mubr.bf16.mxu0 %v15784_v61  ;;  %13587 = vmatpush1.bf16.msra.mxu1 %v16191_v60  ;;  %v16262_v60 = vld [vmem:[%s22814_s7 + $0x384] ss:$16 sps:$4 sm:$0xff]  }
 0x639   :  { %13618 = vmatprep.mubr.bf16.mxu1 %v15784_v61  ;;  %13260 = vmatprep.subr.bf16.mxu0 %v16196_v10  ;;  %v16265_v10 = vld [vmem:[%s22814_s7 + $0x38c] ss:$16 sps:$4 sm:$0xff]   ;;  %v16260_v61 = vld [vmem:[%s22814_s7 + $0x380] ss:$16 sps:$4 sm:$0xff]  }
 0x63a   :  { %13588 = vmatprep.subr.bf16.mxu1 %v16199_v41  ;;  %v16263_v41 = vld [vmem:[%s22814_s7 + $0x388] ss:$16 sps:$4 sm:$0xff]  }
 0x63b   :  { %13261 = vmatpush1.bf16.msra.mxu0 %v16194_v3  ;;  %v16268_v3 = vld [vmem:[%s22814_s7 + $0x3a4] ss:$16 sps:$4 sm:$0xff]  }
 0x63c   :  { %13589 = vmatpush1.bf16.msra.mxu1 %v16197_v50  ;;  %13262 = vmatprep.subr.bf16.mxu0 %v16202_v62  ;;  %v16271_v50 = vld [vmem:[%s22814_s7 + $0x3ac] ss:$16 sps:$4 sm:$0xff]   ;;  %v16266_v62 = vld [vmem:[%s22814_s7 + $0x3a0] ss:$16 sps:$4 sm:$0xff]  }
 0x63d   :  { %13590 = vmatprep.subr.bf16.mxu1 %v16205_v58  ;;  %v16269_v58 = vld [vmem:[%s22814_s7 + $0x3a8] ss:$16 sps:$4 sm:$0xff]  }
 0x63f   :  { %13263 = vmatpush1.bf16.msra.mxu0 %v16200_v63  ;;  %v16274_v63 = vld [vmem:[%s22814_s7 + $0x3c4] ss:$16 sps:$4 sm:$0xff]  }
 0x640   :  { %13591 = vmatpush1.bf16.msra.mxu1 %v16203_v2  ;;  %13264 = vmatprep.subr.bf16.mxu0 %v16208_v4  ;;  %v16277_v2 = vld [vmem:[%s22814_s7 + $0x3cc] ss:$16 sps:$4 sm:$0xff]   ;;  %v16272_v4 = vld [vmem:[%s22814_s7 + $0x3c0] ss:$16 sps:$4 sm:$0xff]  }
 0x641   :  { %13592 = vmatprep.subr.bf16.mxu1 %v16211_v28  ;;  %v3486_v28 = vrot.slane %v21183_v0, %v17552_v27 }
 0x643   :  { %13265 = vmatpush1.bf16.msra.mxu0 %v16206_v6  ;;  %v16275_v6 = vld [vmem:[%s22814_s7 + $0x3c8] ss:$16 sps:$4 sm:$0xff]  }
 0x644   :  { %13593 = vmatpush1.bf16.msra.mxu1 %v16209_v7  ;;  %13266 = vmatprep.subr.bf16.mxu0 %v16214_v35  ;;  %v16280_v7 = vld [vmem:[%s22814_s7 + $0x3e4] ss:$16 sps:$4 sm:$0xff]   ;;  %v16283_v35 = vld [vmem:[%s22814_s7 + $0x3ec] ss:$16 sps:$4 sm:$0xff]  }
 0x645   :  { %13594 = vmatprep.subr.bf16.mxu1 %v16217_v9  ;;  %v3498_v9 = vrot.slane %v21183_v0, %v18568_v11 }
 0x647   :  { %13267 = vmatpush1.bf16.msra.mxu0 %v16212_v12  ;;  %v16278_v12 = vld [vmem:[%s22814_s7 + $0x3e0] ss:$16 sps:$4 sm:$0xff]  }
 0x648   :  { %13595 = vmatpush1.bf16.msra.mxu1 %v16215_v16  ;;  %13268 = vmatprep.subr.bf16.mxu0 %v16220_v17  ;;  %v15807_v16 = vadd.f32 %v19482_v36, %v3486_v28  ;;  %v16281_v17 = vld [vmem:[%s22814_s7 + $0x3e8] ss:$16 sps:$4 sm:$0xff]   ;;  %v16284_v36 = vld [vmem:[%s22814_s7 + $0x400] ss:$16 sps:$4 sm:$0xff]   ;;  %v16343_v28 = vld [vmem:[%s22814_s7 + $0x52c] ss:$16 sps:$4 sm:$0xff]  }
 0x649   :  { %13596 = vmatprep.subr.bf16.mxu1 %v16223_v21  ;;  %v16286_v21 = vld [vmem:[%s22814_s7 + $0x404] ss:$16 sps:$4 sm:$0xff]  }
 0x64b   :  { %13269 = vmatpush1.bf16.msra.mxu0 %v16218_v22  ;;  %v16289_v22 = vld [vmem:[%s22814_s7 + $0x40c] ss:$16 sps:$4 sm:$0xff]  }
 0x64c   :  { %13597 = vmatpush1.bf16.msra.mxu1 %v16221_v25  ;;  %13270 = vmatprep.subr.bf16.mxu0 %v16226_v20  ;;  %v15810_v25 = vadd.f32 %v20282_v29, %v3498_v9  ;;  %v15783_v20 = vpack.c.bf16 %v15807_v16, %v15807_v16  ;;  %v16295_v29 = vld [vmem:[%s22814_s7 + $0x42c] ss:$16 sps:$4 sm:$0xff]   ;;  %v16347_v16 = vld [vmem:[%s22814_s7 + $0x548] ss:$16 sps:$4 sm:$0xff]  }
 0x64d   :  { %13598 = vmatprep.subr.bf16.mxu1 %v16229_v39  ;;  %v16287_v39 = vld [vmem:[%s22814_s7 + $0x408] ss:$16 sps:$4 sm:$0xff]   ;;  %v16349_v9 = vld [vmem:[%s22814_s7 + $0x54c] ss:$16 sps:$4 sm:$0xff]  }
 0x64f   :  { %13271 = vmatpush1.bf16.msra.mxu0 %v16224_v31  ;;  %v16292_v31 = vld [vmem:[%s22814_s7 + $0x424] ss:$16 sps:$4 sm:$0xff]  }
 0x650   :  { %13599 = vmatpush1.bf16.msra.mxu1 %v16227_v37  ;;  %13272 = vmatprep.subr.bf16.mxu0 %v16232_v54  ;;  %v15786_v37 = vpack.c.bf16 %v15810_v25, %v15810_v25  ;;  %v16290_v54 = vld [vmem:[%s22814_s7 + $0x420] ss:$16 sps:$4 sm:$0xff]   ;;  %v16353_v25 = vld [vmem:[%s22814_s7 + $0x568] ss:$16 sps:$4 sm:$0xff]  }
 0x651   :  { %13600 = vmatprep.subr.bf16.mxu1 %v16235_v40  ;;  %v16293_v40 = vld [vmem:[%s22814_s7 + $0x428] ss:$16 sps:$4 sm:$0xff]  }
 0x653   :  { %13273 = vmatpush1.bf16.msra.mxu0 %v16230_v42  ;;  %v16298_v42 = vld [vmem:[%s22814_s7 + $0x444] ss:$16 sps:$4 sm:$0xff]  }
 0x654   :  { %13601 = vmatpush1.bf16.msra.mxu1 %v16233_v43  ;;  %13274 = vmatprep.subr.bf16.mxu0 %v16238_v14  ;;  %v16301_v43 = vld [vmem:[%s22814_s7 + $0x44c] ss:$16 sps:$4 sm:$0xff]   ;;  %v16296_v14 = vld [vmem:[%s22814_s7 + $0x440] ss:$16 sps:$4 sm:$0xff]  }
 0x655   :  { %13602 = vmatprep.subr.bf16.mxu1 %v16241_v30  ;;  %v16299_v30 = vld [vmem:[%s22814_s7 + $0x448] ss:$16 sps:$4 sm:$0xff]  }
 0x657   :  { %13275 = vmatpush1.bf16.msra.mxu0 %v16236_v44  ;;  %v16304_v44 = vld [vmem:[%s22814_s7 + $0x464] ss:$16 sps:$4 sm:$0xff]  }
 0x658   :  { %13603 = vmatpush1.bf16.msra.mxu1 %v16239_v45  ;;  %13276 = vmatprep.subr.bf16.mxu0 %v16244_v46  ;;  %v16307_v45 = vld [vmem:[%s22814_s7 + $0x46c] ss:$16 sps:$4 sm:$0xff]   ;;  %v16302_v46 = vld [vmem:[%s22814_s7 + $0x460] ss:$16 sps:$4 sm:$0xff]  }
 0x659   :  { %13604 = vmatprep.subr.bf16.mxu1 %v16247_v48  ;;  %v16305_v48 = vld [vmem:[%s22814_s7 + $0x468] ss:$16 sps:$4 sm:$0xff]  }
 0x65b   :  { %13277 = vmatpush1.bf16.msra.mxu0 %v16242_v49  ;;  %v16310_v49 = vld [vmem:[%s22814_s7 + $0x484] ss:$16 sps:$4 sm:$0xff]  }
 0x65c   :  { %13605 = vmatpush1.bf16.msra.mxu1 %v16245_v57  ;;  %13278 = vmatprep.subr.bf16.mxu0 %v16250_v51  ;;  %v16313_v57 = vld [vmem:[%s22814_s7 + $0x48c] ss:$16 sps:$4 sm:$0xff]   ;;  %v16308_v51 = vld [vmem:[%s22814_s7 + $0x480] ss:$16 sps:$4 sm:$0xff]  }
 0x65d   :  { %13606 = vmatprep.subr.bf16.mxu1 %v16253_v1  ;;  %v16311_v1 = vld [vmem:[%s22814_s7 + $0x488] ss:$16 sps:$4 sm:$0xff]  }
 0x65f   :  { %13279 = vmatpush1.bf16.msra.mxu0 %v16248_v53  ;;  %v16316_v53 = vld [vmem:[%s22814_s7 + $0x4a4] ss:$16 sps:$4 sm:$0xff]  }
 0x660   :  { %13607 = vmatpush1.bf16.msra.mxu1 %v16251_v55  ;;  %13280 = vmatprep.subr.bf16.mxu0 %v16256_v56  ;;  %v16319_v55 = vld [vmem:[%s22814_s7 + $0x4ac] ss:$16 sps:$4 sm:$0xff]   ;;  %v16314_v56 = vld [vmem:[%s22814_s7 + $0x4a0] ss:$16 sps:$4 sm:$0xff]  }
 0x661   :  { %13608 = vmatprep.subr.bf16.mxu1 %v16259_v59  ;;  %v16317_v59 = vld [vmem:[%s22814_s7 + $0x4a8] ss:$16 sps:$4 sm:$0xff]  }
 0x663   :  { %13281 = vmatpush1.bf16.msra.mxu0 %v16254_v34  ;;  %v16322_v34 = vld [vmem:[%s22814_s7 + $0x4c4] ss:$16 sps:$4 sm:$0xff]  }
 0x664   :  { %13609 = vmatpush1.bf16.msra.mxu1 %v16257_v47  ;;  %13282 = vmatprep.subr.bf16.mxu0 %v16262_v60  ;;  %v16325_v47 = vld [vmem:[%s22814_s7 + $0x4cc] ss:$16 sps:$4 sm:$0xff]   ;;  %v16320_v60 = vld [vmem:[%s22814_s7 + $0x4c0] ss:$16 sps:$4 sm:$0xff]  }
 0x665   :  { %13610 = vmatprep.subr.bf16.mxu1 %v16265_v10  ;;  %v16323_v10 = vld [vmem:[%s22814_s7 + $0x4c8] ss:$16 sps:$4 sm:$0xff]  }
 0x667   :  { %13283 = vmatpush1.bf16.msra.mxu0 %v16260_v61  ;;  %v16328_v61 = vld [vmem:[%s22814_s7 + $0x4e4] ss:$16 sps:$4 sm:$0xff]  }
 0x668   :  { %13611 = vmatpush1.bf16.msra.mxu1 %v16263_v41  ;;  %13284 = vmatprep.subr.bf16.mxu0 %v16268_v3  ;;  %v16331_v41 = vld [vmem:[%s22814_s7 + $0x4ec] ss:$16 sps:$4 sm:$0xff]   ;;  %v16326_v3 = vld [vmem:[%s22814_s7 + $0x4e0] ss:$16 sps:$4 sm:$0xff]  }
 0x669   :  { %13612 = vmatprep.subr.bf16.mxu1 %v16271_v50  ;;  %v16329_v50 = vld [vmem:[%s22814_s7 + $0x4e8] ss:$16 sps:$4 sm:$0xff]  }
 0x66b   :  { %13285 = vmatpush1.bf16.msra.mxu0 %v16266_v62  ;;  %v16334_v62 = vld [vmem:[%s22814_s7 + $0x504] ss:$16 sps:$4 sm:$0xff]  }
 0x66c   :  { %13613 = vmatpush1.bf16.msra.mxu1 %v16269_v58  ;;  %13286 = vmatprep.subr.bf16.mxu0 %v16274_v63  ;;  %v16337_v58 = vld [vmem:[%s22814_s7 + $0x50c] ss:$16 sps:$4 sm:$0xff]   ;;  %v16332_v63 = vld [vmem:[%s22814_s7 + $0x500] ss:$16 sps:$4 sm:$0xff]  }
 0x66d   :  { %13614 = vmatprep.subr.bf16.mxu1 %v16277_v2  ;;  %v16335_v2 = vld [vmem:[%s22814_s7 + $0x508] ss:$16 sps:$4 sm:$0xff]  }
 0x66f   :  { %13287 = vmatpush1.bf16.msra.mxu0 %v16272_v4  ;;  %v16340_v4 = vld [vmem:[%s22814_s7 + $0x524] ss:$16 sps:$4 sm:$0xff]  }
 0x670   :  { %13615 = vmatpush1.bf16.msra.mxu1 %v16275_v6  ;;  %13288 = vmatprep.subr.bf16.mxu0 %v16280_v7  ;;  %v16338_v6 = vld [vmem:[%s22814_s7 + $0x520] ss:$16 sps:$4 sm:$0xff]   ;;  %v16341_v7 = vld [vmem:[%s22814_s7 + $0x528] ss:$16 sps:$4 sm:$0xff]  }
 0x671   :  { %13616 = vmatprep.subr.bf16.mxu1 %v16283_v35  ;;  %v16346_v35 = vld [vmem:[%s22814_s7 + $0x544] ss:$16 sps:$4 sm:$0xff]  }
 0x673   :  { %13289 = vmatpush1.bf16.msra.mxu0 %v16278_v12  ;;  %v16344_v12 = vld [vmem:[%s22814_s7 + $0x540] ss:$16 sps:$4 sm:$0xff]  }
 0x674   :  { %13617 = vmatpush1.bf16.msra.mxu1 %v16281_v17  ;;  %13299 = vmatprep.subr.bf16.mxu0 %v16286_v21  ;;  %v16352_v17 = vld [vmem:[%s22814_s7 + $0x564] ss:$16 sps:$4 sm:$0xff]   ;;  %v16355_v21 = vld [vmem:[%s22814_s7 + $0x56c] ss:$16 sps:$4 sm:$0xff]  }
 0x675   :  { %13627 = vmatprep.subr.bf16.mxu1 %v16289_v22  ;;  %v16350_v22 = vld [vmem:[%s22814_s7 + $0x560] ss:$16 sps:$4 sm:$0xff]  }
 0x676   :  { %13291 = vmatmul.mubr.bf16.vlgmr.msra.gmra.mrb[28].mxu0 %v15783_v20 }
 0x677   :  { %13619 = vmatmul.mubr.bf16.vlgmr.msra.gmra.mrb[28].mxu1 %v15783_v20  ;;  %13300 = vmatpush1.bf16.msra.mxu0 %v16284_v36  ;;  %v16358_v36 = vld [vmem:[%s22814_s7 + $0x584] ss:$16 sps:$4 sm:$0xff]   ;;  %v16361_v20 = vld [vmem:[%s22814_s7 + $0x58c] ss:$16 sps:$4 sm:$0xff]  }
 0x678   :  { %13331 = vmatprep.mubr.bf16.mxu0 %v15786_v37  ;;  %13628 = vmatpush1.bf16.msra.mxu1 %v16287_v39  ;;  %v16356_v39 = vld [vmem:[%s22814_s7 + $0x580] ss:$16 sps:$4 sm:$0xff]  }
 0x679   :  { %13659 = vmatprep.mubr.bf16.mxu1 %v15786_v37  ;;  %13301 = vmatprep.subr.bf16.mxu0 %v16292_v31  ;;  %v16359_v31 = vld [vmem:[%s22814_s7 + $0x588] ss:$16 sps:$4 sm:$0xff]   ;;  %v16364_v37 = vld [vmem:[%s22814_s7 + $0x5a4] ss:$16 sps:$4 sm:$0xff]  }
 0x67a   :  { %13629 = vmatprep.subr.bf16.mxu1 %v16295_v29  ;;  %v16367_v29 = vld [vmem:[%s22814_s7 + $0x5ac] ss:$16 sps:$4 sm:$0xff]  }
 0x67b   :  { %13302 = vmatpush1.bf16.msra.mxu0 %v16290_v54  ;;  %v16362_v54 = vld [vmem:[%s22814_s7 + $0x5a0] ss:$16 sps:$4 sm:$0xff]  }
 0x67c   :  { %13630 = vmatpush1.bf16.msra.mxu1 %v16293_v40  ;;  %13303 = vmatprep.subr.bf16.mxu0 %v16298_v42  ;;  %v16365_v40 = vld [vmem:[%s22814_s7 + $0x5a8] ss:$16 sps:$4 sm:$0xff]   ;;  %v16370_v42 = vld [vmem:[%s22814_s7 + $0x5c4] ss:$16 sps:$4 sm:$0xff]  }
 0x67d   :  { %13631 = vmatprep.subr.bf16.mxu1 %v16301_v43  ;;  %v16373_v43 = vld [vmem:[%s22814_s7 + $0x5cc] ss:$16 sps:$4 sm:$0xff]  }
 0x67f   :  { %13304 = vmatpush1.bf16.msra.mxu0 %v16296_v14  ;;  %v16368_v14 = vld [vmem:[%s22814_s7 + $0x5c0] ss:$16 sps:$4 sm:$0xff]  }
 0x680   :  { %13632 = vmatpush1.bf16.msra.mxu1 %v16299_v30  ;;  %13305 = vmatprep.subr.bf16.mxu0 %v16304_v44  ;;  %v3494_v30 = vrot.slane %v21183_v0, %v18562_v8  ;;  %v16371_v44 = vld [vmem:[%s22814_s7 + $0x5c8] ss:$16 sps:$4 sm:$0xff]  }
 0x681   :  { %13633 = vmatprep.subr.bf16.mxu1 %v16307_v45  ;;  %v16376_v45 = vld [vmem:[%s22814_s7 + $0x5e4] ss:$16 sps:$4 sm:$0xff]  }
 0x683   :  { %13306 = vmatpush1.bf16.msra.mxu0 %v16302_v46  ;;  %v16379_v46 = vld [vmem:[%s22814_s7 + $0x5ec] ss:$16 sps:$4 sm:$0xff]  }
 0x684   :  { %13634 = vmatpush1.bf16.msra.mxu1 %v16305_v48  ;;  %13307 = vmatprep.subr.bf16.mxu0 %v16310_v49  ;;  %v3506_v48 = vrot.slane %v21183_v0, %v18580_v19  ;;  %v16374_v49 = vld [vmem:[%s22814_s7 + $0x5e0] ss:$16 sps:$4 sm:$0xff]   ;;  %v16385_v0 = vld [vmem:[%s22814_s7 + $0x60c] ss:$16 sps:$4 sm:$0xff]  }
 0x685   :  { %13635 = vmatprep.subr.bf16.mxu1 %v16313_v57  ;;  %v15809_v57 = vadd.f32 %v20272_v18, %v3494_v30  ;;  %v16380_v18 = vld [vmem:[%s22814_s7 + $0x600] ss:$16 sps:$4 sm:$0xff]   ;;  %v16430_v30 = vld [vmem:[%s22814_s7 + $0x704] ss:$16 sps:$4 sm:$0xff]  }
 0x687   :  { %13308 = vmatpush1.bf16.msra.mxu0 %v16308_v51  ;;  %v16377_v51 = vld [vmem:[%s22814_s7 + $0x5e8] ss:$16 sps:$4 sm:$0xff]  }
 0x688   :  { %13636 = vmatpush1.bf16.msra.mxu1 %v16311_v1  ;;  %13309 = vmatprep.subr.bf16.mxu0 %v16316_v53  ;;  %v16382_v1 = vld [vmem:[%s22814_s7 + $0x604] ss:$16 sps:$4 sm:$0xff]   ;;  %v15812_v53 = vadd.f32 %v20290_v26, %v3506_v48  ;;  %v16391_v26 = vld [vmem:[%s22814_s7 + $0x62c] ss:$16 sps:$4 sm:$0xff]  }
 0x689   :  { %13637 = vmatprep.subr.bf16.mxu1 %v16319_v55  ;;  %v15785_v55 = vpack.c.bf16 %v15809_v57, %v15809_v57  ;;  %v16436_v48 = vld [vmem:[%s22814_s7 + $0x724] ss:$16 sps:$4 sm:$0xff]   ;;  %v16434_v57 = vld [vmem:[%s22814_s7 + $0x720] ss:$16 sps:$4 sm:$0xff]  }
 0x68b   :  { %13310 = vmatpush1.bf16.msra.mxu0 %v16314_v56  ;;  %v16383_v56 = vld [vmem:[%s22814_s7 + $0x608] ss:$16 sps:$4 sm:$0xff]  }
 0x68c   :  { %13638 = vmatpush1.bf16.msra.mxu1 %v16317_v59  ;;  %13311 = vmatprep.subr.bf16.mxu0 %v16322_v34  ;;  %v16388_v59 = vld [vmem:[%s22814_s7 + $0x624] ss:$16 sps:$4 sm:$0xff]   ;;  %v15788_v34 = vpack.c.bf16 %v15812_v53, %v15812_v53  ;;  %v16440_v53 = vld [vmem:[%s22814_s7 + $0x740] ss:$16 sps:$4 sm:$0xff]  }
 0x68d   :  { %13639 = vmatprep.subr.bf16.mxu1 %v16325_v47  ;;  %v16386_v47 = vld [vmem:[%s22814_s7 + $0x620] ss:$16 sps:$4 sm:$0xff]  }
 0x68f   :  { %13312 = vmatpush1.bf16.msra.mxu0 %v16320_v60  ;;  %v16389_v60 = vld [vmem:[%s22814_s7 + $0x628] ss:$16 sps:$4 sm:$0xff]  }
 0x690   :  { %13640 = vmatpush1.bf16.msra.mxu1 %v16323_v10  ;;  %13313 = vmatprep.subr.bf16.mxu0 %v16328_v61  ;;  %v16394_v10 = vld [vmem:[%s22814_s7 + $0x644] ss:$16 sps:$4 sm:$0xff]   ;;  %v16397_v61 = vld [vmem:[%s22814_s7 + $0x64c] ss:$16 sps:$4 sm:$0xff]  }
 0x691   :  { %13641 = vmatprep.subr.bf16.mxu1 %v16331_v41  ;;  %v16392_v41 = vld [vmem:[%s22814_s7 + $0x640] ss:$16 sps:$4 sm:$0xff]  }
 0x693   :  { %13314 = vmatpush1.bf16.msra.mxu0 %v16326_v3  ;;  %v16395_v3 = vld [vmem:[%s22814_s7 + $0x648] ss:$16 sps:$4 sm:$0xff]  }
 0x694   :  { %13642 = vmatpush1.bf16.msra.mxu1 %v16329_v50  ;;  %13315 = vmatprep.subr.bf16.mxu0 %v16334_v62  ;;  %v16400_v50 = vld [vmem:[%s22814_s7 + $0x664] ss:$16 sps:$4 sm:$0xff]   ;;  %v16403_v62 = vld [vmem:[%s22814_s7 + $0x66c] ss:$16 sps:$4 sm:$0xff]  }
 0x695   :  { %13643 = vmatprep.subr.bf16.mxu1 %v16337_v58  ;;  %v16398_v58 = vld [vmem:[%s22814_s7 + $0x660] ss:$16 sps:$4 sm:$0xff]  }
 0x697   :  { %13316 = vmatpush1.bf16.msra.mxu0 %v16332_v63  ;;  %v16401_v63 = vld [vmem:[%s22814_s7 + $0x668] ss:$16 sps:$4 sm:$0xff]  }
 0x698   :  { %13644 = vmatpush1.bf16.msra.mxu1 %v16335_v2  ;;  %13317 = vmatprep.subr.bf16.mxu0 %v16340_v4  ;;  %v16406_v2 = vld [vmem:[%s22814_s7 + $0x684] ss:$16 sps:$4 sm:$0xff]   ;;  %v16409_v4 = vld [vmem:[%s22814_s7 + $0x68c] ss:$16 sps:$4 sm:$0xff]  }
 0x699   :  { %13645 = vmatprep.subr.bf16.mxu1 %v16343_v28  ;;  %v16404_v28 = vld [vmem:[%s22814_s7 + $0x680] ss:$16 sps:$4 sm:$0xff]  }
 0x69b   :  { %13318 = vmatpush1.bf16.msra.mxu0 %v16338_v6  ;;  %v16407_v6 = vld [vmem:[%s22814_s7 + $0x688] ss:$16 sps:$4 sm:$0xff]  }
 0x69c   :  { %13646 = vmatpush1.bf16.msra.mxu1 %v16341_v7  ;;  %13319 = vmatprep.subr.bf16.mxu0 %v16346_v35  ;;  %v16412_v7 = vld [vmem:[%s22814_s7 + $0x6a4] ss:$16 sps:$4 sm:$0xff]   ;;  %v16415_v35 = vld [vmem:[%s22814_s7 + $0x6ac] ss:$16 sps:$4 sm:$0xff]  }
 0x69d   :  { %13647 = vmatprep.subr.bf16.mxu1 %v16349_v9  ;;  %v16410_v9 = vld [vmem:[%s22814_s7 + $0x6a0] ss:$16 sps:$4 sm:$0xff]  }
 0x69f   :  { %13320 = vmatpush1.bf16.msra.mxu0 %v16344_v12  ;;  %v16413_v12 = vld [vmem:[%s22814_s7 + $0x6a8] ss:$16 sps:$4 sm:$0xff]  }
 0x6a0   :  { %13648 = vmatpush1.bf16.msra.mxu1 %v16347_v16  ;;  %13321 = vmatprep.subr.bf16.mxu0 %v16352_v17  ;;  %v16418_v16 = vld [vmem:[%s22814_s7 + $0x6c4] ss:$16 sps:$4 sm:$0xff]  }
 0x6a1   :  { %13649 = vmatprep.subr.bf16.mxu1 %v16355_v21  ;;  %v16421_v21 = vld [vmem:[%s22814_s7 + $0x6cc] ss:$16 sps:$4 sm:$0xff]  }
 0x6a3   :  { %13322 = vmatpush1.bf16.msra.mxu0 %v16350_v22 }
 0x6a4   :  { %13650 = vmatpush1.bf16.msra.mxu1 %v16353_v25  ;;  %13323 = vmatprep.subr.bf16.mxu0 %v16358_v36 }
 0x6a5   :  { %13651 = vmatprep.subr.bf16.mxu1 %v16361_v20 }
 0x6a7   :  { %13324 = vmatpush1.bf16.msra.mxu0 %v16356_v39  ;;  %v16416_v39 = vld [vmem:[%s22814_s7 + $0x6c0] ss:$16 sps:$4 sm:$0xff]  }
 0x6a8   :  { %13652 = vmatpush1.bf16.msra.mxu1 %v16359_v31  ;;  %13325 = vmatprep.subr.bf16.mxu0 %v16364_v37 }
 0x6a9   :  { %13653 = vmatprep.subr.bf16.mxu1 %v16367_v29  ;;  %v16419_v29 = vld [vmem:[%s22814_s7 + $0x6c8] ss:$16 sps:$4 sm:$0xff]  }
 0x6ab   :  { %13326 = vmatpush1.bf16.msra.mxu0 %v16362_v54  ;;  %v16424_v54 = vld [vmem:[%s22814_s7 + $0x6e4] ss:$16 sps:$4 sm:$0xff]  }
 0x6ac   :  { %13654 = vmatpush1.bf16.msra.mxu1 %v16365_v40  ;;  %13327 = vmatprep.subr.bf16.mxu0 %v16370_v42  ;;  %v16427_v42 = vld [vmem:[%s22814_s7 + $0x6ec] ss:$16 sps:$4 sm:$0xff]  }
 0x6ad   :  { %13655 = vmatprep.subr.bf16.mxu1 %v16373_v43  ;;  %v16422_v43 = vld [vmem:[%s22814_s7 + $0x6e0] ss:$16 sps:$4 sm:$0xff]  }
 0x6af   :  { %13328 = vmatpush1.bf16.msra.mxu0 %v16368_v14  ;;  %v16425_v14 = vld [vmem:[%s22814_s7 + $0x6e8] ss:$16 sps:$4 sm:$0xff]  }
 0x6b0   :  { %13656 = vmatpush1.bf16.msra.mxu1 %v16371_v44  ;;  %13329 = vmatprep.subr.bf16.mxu0 %v16376_v45  ;;  %v16433_v44 = vld [vmem:[%s22814_s7 + $0x70c] ss:$16 sps:$4 sm:$0xff]   ;;  %v16428_v45 = vld [vmem:[%s22814_s7 + $0x700] ss:$16 sps:$4 sm:$0xff]  }
 0x6b1   :  { %13657 = vmatprep.subr.bf16.mxu1 %v16379_v46  ;;  %v16431_v46 = vld [vmem:[%s22814_s7 + $0x708] ss:$16 sps:$4 sm:$0xff]  }
 0x6b3   :  { %13330 = vmatpush1.bf16.msra.mxu0 %v16374_v49  ;;  %v16439_v49 = vld [vmem:[%s22814_s7 + $0x72c] ss:$16 sps:$4 sm:$0xff]  }
 0x6b4   :  { %13658 = vmatpush1.bf16.msra.mxu1 %v16377_v51  ;;  %13340 = vmatprep.subr.bf16.mxu0 %v16382_v1  ;;  %v16437_v51 = vld [vmem:[%s22814_s7 + $0x728] ss:$16 sps:$4 sm:$0xff]   ;;  %v16442_v1 = vld [vmem:[%s22814_s7 + $0x744] ss:$16 sps:$4 sm:$0xff]  }
 0x6b5   :  { %13668 = vmatprep.subr.bf16.mxu1 %v16385_v0  ;;  %v16445_v0 = vld [vmem:[%s22814_s7 + $0x74c] ss:$16 sps:$4 sm:$0xff]  }
 0x6b6   :  { %13332 = vmatmul.mubr.bf16.vlgmr.msra.gmra.mrb[28].mxu0 %v15785_v55 }
 0x6b7   :  { %13660 = vmatmul.mubr.bf16.vlgmr.msra.gmra.mrb[28].mxu1 %v15785_v55  ;;  %13341 = vmatpush1.bf16.msra.mxu0 %v16380_v18  ;;  %v16443_v18 = vld [vmem:[%s22814_s7 + $0x748] ss:$16 sps:$4 sm:$0xff]   ;;  %v16448_v55 = vld [vmem:[%s22814_s7 + $0x764] ss:$16 sps:$4 sm:$0xff]  }
 0x6b8   :  { %13372 = vmatprep.mubr.bf16.mxu0 %v15788_v34  ;;  %13669 = vmatpush1.bf16.msra.mxu1 %v16383_v56  ;;  %v16451_v56 = vld [vmem:[%s22814_s7 + $0x76c] ss:$16 sps:$4 sm:$0xff]  }
 0x6b9   :  { %13700 = vmatprep.mubr.bf16.mxu1 %v15788_v34  ;;  %13342 = vmatprep.subr.bf16.mxu0 %v16388_v59  ;;  %v16446_v59 = vld [vmem:[%s22814_s7 + $0x760] ss:$16 sps:$4 sm:$0xff]   ;;  %v16449_v34 = vld [vmem:[%s22814_s7 + $0x768] ss:$16 sps:$4 sm:$0xff]  }
 0x6ba   :  { %13670 = vmatprep.subr.bf16.mxu1 %v16391_v26  ;;  %v16454_v26 = vld [vmem:[%s22814_s7 + $0x784] ss:$16 sps:$4 sm:$0xff]  }
 0x6bb   :  { %13343 = vmatpush1.bf16.msra.mxu0 %v16386_v47  ;;  %v16457_v47 = vld [vmem:[%s22814_s7 + $0x78c] ss:$16 sps:$4 sm:$0xff]  }
 0x6bc   :  { %13671 = vmatpush1.bf16.msra.mxu1 %v16389_v60  ;;  %13344 = vmatprep.subr.bf16.mxu0 %v16394_v10  ;;  %v16452_v60 = vld [vmem:[%s22814_s7 + $0x780] ss:$16 sps:$4 sm:$0xff]   ;;  %v16455_v10 = vld [vmem:[%s22814_s7 + $0x788] ss:$16 sps:$4 sm:$0xff]  }
 0x6bd   :  { %13672 = vmatprep.subr.bf16.mxu1 %v16397_v61  ;;  %v16460_v61 = vld [vmem:[%s22814_s7 + $0x7a4] ss:$16 sps:$4 sm:$0xff]  }
 0x6bf   :  { %13345 = vmatpush1.bf16.msra.mxu0 %v16392_v41  ;;  %v16463_v41 = vld [vmem:[%s22814_s7 + $0x7ac] ss:$16 sps:$4 sm:$0xff]  }
 0x6c0   :  { %13673 = vmatpush1.bf16.msra.mxu1 %v16395_v3  ;;  %13346 = vmatprep.subr.bf16.mxu0 %v16400_v50  ;;  %v16458_v3 = vld [vmem:[%s22814_s7 + $0x7a0] ss:$16 sps:$4 sm:$0xff]   ;;  %v16461_v50 = vld [vmem:[%s22814_s7 + $0x7a8] ss:$16 sps:$4 sm:$0xff]  }
 0x6c1   :  { %13674 = vmatprep.subr.bf16.mxu1 %v16403_v62  ;;  %v16466_v62 = vld [vmem:[%s22814_s7 + $0x7c4] ss:$16 sps:$4 sm:$0xff]  }
 0x6c3   :  { %13347 = vmatpush1.bf16.msra.mxu0 %v16398_v58  ;;  %v16469_v58 = vld [vmem:[%s22814_s7 + $0x7cc] ss:$16 sps:$4 sm:$0xff]  }
 0x6c4   :  { %13675 = vmatpush1.bf16.msra.mxu1 %v16401_v63  ;;  %13348 = vmatprep.subr.bf16.mxu0 %v16406_v2  ;;  %v21969_v63 = vld [vmem:[%s22813_s6 + $0x8] sm:$0xff]  ;;  %v16464_v2 = vld [vmem:[%s22814_s7 + $0x7c0] ss:$16 sps:$4 sm:$0xff]  }
 0x6c5   :  { %13676 = vmatprep.subr.bf16.mxu1 %v16409_v4  ;;  %v16861_v4 = vld [vmem:[%s22813_s6] sm:$0xff] }
 0x6c7   :  { %13349 = vmatpush1.bf16.msra.mxu0 %v16404_v28  ;;  %v3502_v28 = vrot.slane %v16861_v4, %v18783_v5  ;;  %v16532_v4 = vld [vmem:[%s22814_s7 + $0x924] ss:$16 sps:$4 sm:$0xff]  }
 0x6c8   :  { %13677 = vmatpush1.bf16.msra.mxu1 %v16407_v6  ;;  %13350 = vmatprep.subr.bf16.mxu0 %v16412_v7  ;;  %v16467_v6 = vld [vmem:[%s22814_s7 + $0x7c8] ss:$16 sps:$4 sm:$0xff]   ;;  %v16472_v7 = vld [vmem:[%s22814_s7 + $0x7e4] ss:$16 sps:$4 sm:$0xff]  }
 0x6c9   :  { %v21859_v17 = vpop.f32.mrb[24].mxu0  ;;  %13678 = vmatprep.subr.bf16.mxu1 %v16415_v35  ;;  %v16475_v35 = vld [vmem:[%s22814_s7 + $0x7ec] ss:$16 sps:$4 sm:$0xff]  }
 0x6ca   :  { %v21864_v22 = vpop.f32.mrb[24].mxu1  ;;  %v21866_v25 = vpop.f32.mrb[25].mxu0 }
 0x6cb   :  { %v21868_v36 = vpop.f32.mrb[25].mxu1  ;;  %v9820_v20 = vpop.f32.mrb[26].mxu0  ;;  %13351 = vmatpush1.bf16.msra.mxu0 %v16410_v9  ;;  %v3514_v9 = vrot.slane %v21969_v63, %v17358_v15 }
 0x6cc   :  { %v9984_v31 = vpop.f32.mrb[26].mxu1  ;;  %13679 = vmatpush1.bf16.msra.mxu1 %v16413_v12  ;;  %v9821_v37 = vpop.f32.mrb[27].mxu0  ;;  %13352 = vmatprep.subr.bf16.mxu0 %v16418_v16  ;;  %v16470_v12 = vld [vmem:[%s22814_s7 + $0x7e0] ss:$16 sps:$4 sm:$0xff]   ;;  %v15811_v16 = vadd.f32 %v20280_v24, %v3502_v28  ;;  %v16478_v20 = vld [vmem:[%s22814_s7 + $0x804] ss:$16 sps:$4 sm:$0xff]  }
 0x6cd   :  { %v9985_v40 = vpop.f32.mrb[27].mxu1  ;;  %13680 = vmatprep.subr.bf16.mxu1 %v16421_v21  ;;  %v16473_v21 = vld [vmem:[%s22814_s7 + $0x7e8] ss:$16 sps:$4 sm:$0xff]   ;;  %v15814_v31 = vadd.f32 %v21074_v33, %v3514_v9  ;;  %v16476_v24 = vld [vmem:[%s22814_s7 + $0x800] ss:$16 sps:$4 sm:$0xff]  }
 0x6ce   :  { %v15787_v37 = vpack.c.bf16 %v15811_v16, %v15811_v16  ;;  %v16487_v33 = vld [vmem:[%s22814_s7 + $0x82c] ss:$16 sps:$4 sm:$0xff]   ;;  %v16539_v16 = vld [vmem:[%s22814_s7 + $0x948] ss:$16 sps:$4 sm:$0xff]  }
 0x6cf   :  { %13353 = vmatpush1.bf16.msra.mxu0 %v16416_v39  ;;  %v16481_v39 = vld [vmem:[%s22814_s7 + $0x80c] ss:$16 sps:$4 sm:$0xff]   ;;  %v15790_v40 = vpack.c.bf16 %v15814_v31, %v15814_v31  ;;  %v16545_v31 = vld [vmem:[%s22814_s7 + $0x968] ss:$16 sps:$4 sm:$0xff]  }
 0x6d0   :  { %13681 = vmatpush1.bf16.msra.mxu1 %v16419_v29  ;;  %13354 = vmatprep.subr.bf16.mxu0 %v16424_v54  ;;  %v16479_v29 = vld [vmem:[%s22814_s7 + $0x808] ss:$16 sps:$4 sm:$0xff]   ;;  %v16484_v54 = vld [vmem:[%s22814_s7 + $0x824] ss:$16 sps:$4 sm:$0xff]   ;;  %v16535_v28 = vld [vmem:[%s22814_s7 + $0x92c] ss:$16 sps:$4 sm:$0xff]  }
 0x6d1   :  { %13682 = vmatprep.subr.bf16.mxu1 %v16427_v42  ;;  %v16482_v42 = vld [vmem:[%s22814_s7 + $0x820] ss:$16 sps:$4 sm:$0xff]   ;;  %v16541_v9 = vld [vmem:[%s22814_s7 + $0x94c] ss:$16 sps:$4 sm:$0xff]  }
 0x6d3   :  { %13355 = vmatpush1.bf16.msra.mxu0 %v16422_v43  ;;  %v16485_v43 = vld [vmem:[%s22814_s7 + $0x828] ss:$16 sps:$4 sm:$0xff]  }
 0x6d4   :  { %13683 = vmatpush1.bf16.msra.mxu1 %v16425_v14  ;;  %13356 = vmatprep.subr.bf16.mxu0 %v16430_v30  ;;  %v16490_v14 = vld [vmem:[%s22814_s7 + $0x844] ss:$16 sps:$4 sm:$0xff]   ;;  %v16493_v30 = vld [vmem:[%s22814_s7 + $0x84c] ss:$16 sps:$4 sm:$0xff]  }
 0x6d5   :  { %13684 = vmatprep.subr.bf16.mxu1 %v16433_v44  ;;  %v16488_v44 = vld [vmem:[%s22814_s7 + $0x840] ss:$16 sps:$4 sm:$0xff]  }
 0x6d7   :  { %13357 = vmatpush1.bf16.msra.mxu0 %v16428_v45  ;;  %v16491_v45 = vld [vmem:[%s22814_s7 + $0x848] ss:$16 sps:$4 sm:$0xff]  }
 0x6d8   :  { %13685 = vmatpush1.bf16.msra.mxu1 %v16431_v46  ;;  %13358 = vmatprep.subr.bf16.mxu0 %v16436_v48  ;;  %v16496_v46 = vld [vmem:[%s22814_s7 + $0x864] ss:$16 sps:$4 sm:$0xff]   ;;  %v16499_v48 = vld [vmem:[%s22814_s7 + $0x86c] ss:$16 sps:$4 sm:$0xff]  }
 0x6d9   :  { %13686 = vmatprep.subr.bf16.mxu1 %v16439_v49  ;;  %v16494_v49 = vld [vmem:[%s22814_s7 + $0x860] ss:$16 sps:$4 sm:$0xff]  }
 0x6db   :  { %13359 = vmatpush1.bf16.msra.mxu0 %v16434_v57  ;;  %v16497_v57 = vld [vmem:[%s22814_s7 + $0x868] ss:$16 sps:$4 sm:$0xff]  }
 0x6dc   :  { %13687 = vmatpush1.bf16.msra.mxu1 %v16437_v51  ;;  %13360 = vmatprep.subr.bf16.mxu0 %v16442_v1  ;;  %v16502_v51 = vld [vmem:[%s22814_s7 + $0x884] ss:$16 sps:$4 sm:$0xff]   ;;  %v16505_v1 = vld [vmem:[%s22814_s7 + $0x88c] ss:$16 sps:$4 sm:$0xff]  }
 0x6dd   :  { %13688 = vmatprep.subr.bf16.mxu1 %v16445_v0  ;;  %v16500_v0 = vld [vmem:[%s22814_s7 + $0x880] ss:$16 sps:$4 sm:$0xff]  }
 0x6df   :  { %13361 = vmatpush1.bf16.msra.mxu0 %v16440_v53  ;;  %v16503_v53 = vld [vmem:[%s22814_s7 + $0x888] ss:$16 sps:$4 sm:$0xff]  }
 0x6e0   :  { %13689 = vmatpush1.bf16.msra.mxu1 %v16443_v18  ;;  %13362 = vmatprep.subr.bf16.mxu0 %v16448_v55  ;;  %v16508_v18 = vld [vmem:[%s22814_s7 + $0x8a4] ss:$16 sps:$4 sm:$0xff]   ;;  %v16511_v55 = vld [vmem:[%s22814_s7 + $0x8ac] ss:$16 sps:$4 sm:$0xff]  }
 0x6e1   :  { %13690 = vmatprep.subr.bf16.mxu1 %v16451_v56  ;;  %v16506_v56 = vld [vmem:[%s22814_s7 + $0x8a0] ss:$16 sps:$4 sm:$0xff]  }
 0x6e3   :  { %13363 = vmatpush1.bf16.msra.mxu0 %v16446_v59  ;;  %v16509_v59 = vld [vmem:[%s22814_s7 + $0x8a8] ss:$16 sps:$4 sm:$0xff]  }
 0x6e4   :  { %13691 = vmatpush1.bf16.msra.mxu1 %v16449_v34  ;;  %13364 = vmatprep.subr.bf16.mxu0 %v16454_v26  ;;  %v16514_v34 = vld [vmem:[%s22814_s7 + $0x8c4] ss:$16 sps:$4 sm:$0xff]   ;;  %v16517_v26 = vld [vmem:[%s22814_s7 + $0x8cc] ss:$16 sps:$4 sm:$0xff]  }
 0x6e5   :  { %13692 = vmatprep.subr.bf16.mxu1 %v16457_v47  ;;  %v16512_v47 = vld [vmem:[%s22814_s7 + $0x8c0] ss:$16 sps:$4 sm:$0xff]  }
 0x6e7   :  { %13365 = vmatpush1.bf16.msra.mxu0 %v16452_v60  ;;  %v16515_v60 = vld [vmem:[%s22814_s7 + $0x8c8] ss:$16 sps:$4 sm:$0xff]  }
 0x6e8   :  { %13693 = vmatpush1.bf16.msra.mxu1 %v16455_v10  ;;  %13366 = vmatprep.subr.bf16.mxu0 %v16460_v61  ;;  %v16520_v10 = vld [vmem:[%s22814_s7 + $0x8e4] ss:$16 sps:$4 sm:$0xff]   ;;  %v16523_v61 = vld [vmem:[%s22814_s7 + $0x8ec] ss:$16 sps:$4 sm:$0xff]  }
 0x6e9   :  { %13694 = vmatprep.subr.bf16.mxu1 %v16463_v41  ;;  %v16518_v41 = vld [vmem:[%s22814_s7 + $0x8e0] ss:$16 sps:$4 sm:$0xff]  }
 0x6eb   :  { %13367 = vmatpush1.bf16.msra.mxu0 %v16458_v3  ;;  %v16521_v3 = vld [vmem:[%s22814_s7 + $0x8e8] ss:$16 sps:$4 sm:$0xff]  }
 0x6ec   :  { %13695 = vmatpush1.bf16.msra.mxu1 %v16461_v50  ;;  %13368 = vmatprep.subr.bf16.mxu0 %v16466_v62  ;;  %v16526_v50 = vld [vmem:[%s22814_s7 + $0x904] ss:$16 sps:$4 sm:$0xff]   ;;  %v16529_v62 = vld [vmem:[%s22814_s7 + $0x90c] ss:$16 sps:$4 sm:$0xff]  }
 0x6ed   :  { %13696 = vmatprep.subr.bf16.mxu1 %v16469_v58  ;;  %v16524_v58 = vld [vmem:[%s22814_s7 + $0x900] ss:$16 sps:$4 sm:$0xff]  }
 0x6ef   :  { %13369 = vmatpush1.bf16.msra.mxu0 %v16464_v2  ;;  %v16527_v2 = vld [vmem:[%s22814_s7 + $0x908] ss:$16 sps:$4 sm:$0xff]  }
 0x6f0   :  { %13697 = vmatpush1.bf16.msra.mxu1 %v16467_v6  ;;  %13370 = vmatprep.subr.bf16.mxu0 %v16472_v7  ;;  %v16530_v6 = vld [vmem:[%s22814_s7 + $0x920] ss:$16 sps:$4 sm:$0xff]   ;;  %v16533_v7 = vld [vmem:[%s22814_s7 + $0x928] ss:$16 sps:$4 sm:$0xff]  }
 0x6f1   :  { %13698 = vmatprep.subr.bf16.mxu1 %v16475_v35  ;;  %v16538_v35 = vld [vmem:[%s22814_s7 + $0x944] ss:$16 sps:$4 sm:$0xff]  }
 0x6f3   :  { %13371 = vmatpush1.bf16.msra.mxu0 %v16470_v12  ;;  %v16536_v12 = vld [vmem:[%s22814_s7 + $0x940] ss:$16 sps:$4 sm:$0xff]  }
 0x6f4   :  { %13699 = vmatpush1.bf16.msra.mxu1 %v16473_v21  ;;  %13381 = vmatprep.subr.bf16.mxu0 %v16478_v20  ;;  %v16544_v21 = vld [vmem:[%s22814_s7 + $0x964] ss:$16 sps:$4 sm:$0xff]   ;;  %v16547_v20 = vld [vmem:[%s22814_s7 + $0x96c] ss:$16 sps:$4 sm:$0xff]  }
 0x6f5   :  { %13709 = vmatprep.subr.bf16.mxu1 %v16481_v39  ;;  %v16542_v39 = vld [vmem:[%s22814_s7 + $0x960] ss:$16 sps:$4 sm:$0xff]  }
 0x6f6   :  { %13373 = vmatmul.mubr.bf16.vlgmr.msra.gmra.mrb[28].mxu0 %v15787_v37 }
 0x6f7   :  { %13701 = vmatmul.mubr.bf16.vlgmr.msra.gmra.mrb[28].mxu1 %v15787_v37  ;;  %13382 = vmatpush1.bf16.msra.mxu0 %v16476_v24  ;;  %v16550_v24 = vld [vmem:[%s22814_s7 + $0x984] ss:$16 sps:$4 sm:$0xff]   ;;  %v16553_v37 = vld [vmem:[%s22814_s7 + $0x98c] ss:$16 sps:$4 sm:$0xff]  }
 0x6f8   :  { %13413 = vmatprep.mubr.bf16.mxu0 %v15790_v40  ;;  %13710 = vmatpush1.bf16.msra.mxu1 %v16479_v29  ;;  %v16548_v29 = vld [vmem:[%s22814_s7 + $0x980] ss:$16 sps:$4 sm:$0xff]  }
 0x6f9   :  { %13741 = vmatprep.mubr.bf16.mxu1 %v15790_v40  ;;  %13383 = vmatprep.subr.bf16.mxu0 %v16484_v54  ;;  %v16551_v54 = vld [vmem:[%s22814_s7 + $0x988] ss:$16 sps:$4 sm:$0xff]   ;;  %v16556_v40 = vld [vmem:[%s22814_s7 + $0x9a4] ss:$16 sps:$4 sm:$0xff]  }
 0x6fa   :  { %13711 = vmatprep.subr.bf16.mxu1 %v16487_v33  ;;  %v16559_v33 = vld [vmem:[%s22814_s7 + $0x9ac] ss:$16 sps:$4 sm:$0xff]  }
 0x6fb   :  { %13384 = vmatpush1.bf16.msra.mxu0 %v16482_v42  ;;  %v16554_v42 = vld [vmem:[%s22814_s7 + $0x9a0] ss:$16 sps:$4 sm:$0xff]  }
 0x6fc   :  { %13712 = vmatpush1.bf16.msra.mxu1 %v16485_v43  ;;  %13385 = vmatprep.subr.bf16.mxu0 %v16490_v14  ;;  %v16557_v43 = vld [vmem:[%s22814_s7 + $0x9a8] ss:$16 sps:$4 sm:$0xff]   ;;  %v16562_v14 = vld [vmem:[%s22814_s7 + $0x9c4] ss:$16 sps:$4 sm:$0xff]  }
 0x6fd   :  { %13713 = vmatprep.subr.bf16.mxu1 %v16493_v30  ;;  %v16565_v30 = vld [vmem:[%s22814_s7 + $0x9cc] ss:$16 sps:$4 sm:$0xff]  }
 0x6ff   :  { %13386 = vmatpush1.bf16.msra.mxu0 %v16488_v44  ;;  %v16560_v44 = vld [vmem:[%s22814_s7 + $0x9c0] ss:$16 sps:$4 sm:$0xff]  }
 0x700   :  { %13714 = vmatpush1.bf16.msra.mxu1 %v16491_v45  ;;  %13387 = vmatprep.subr.bf16.mxu0 %v16496_v46  ;;  %v3510_v45 = vrot.slane %v21969_v63, %v17350_v13  ;;  %v16563_v46 = vld [vmem:[%s22814_s7 + $0x9c8] ss:$16 sps:$4 sm:$0xff]  }
 0x701   :  { %13715 = vmatprep.subr.bf16.mxu1 %v16499_v48  ;;  %v16568_v48 = vld [vmem:[%s22814_s7 + $0x9e4] ss:$16 sps:$4 sm:$0xff]  }
 0x703   :  { %13388 = vmatpush1.bf16.msra.mxu0 %v16494_v49  ;;  %v16571_v49 = vld [vmem:[%s22814_s7 + $0x9ec] ss:$16 sps:$4 sm:$0xff]  }
 0x704   :  { %13716 = vmatpush1.bf16.msra.mxu1 %v16497_v57  ;;  %13389 = vmatprep.subr.bf16.mxu0 %v16502_v51  ;;  %v3522_v57 = vrot.slane %v21969_v63, %v17421_v52  ;;  %v16566_v51 = vld [vmem:[%s22814_s7 + $0x9e0] ss:$16 sps:$4 sm:$0xff]  }
 0x705   :  { %13717 = vmatprep.subr.bf16.mxu1 %v16505_v1  ;;  %v15813_v1 = vadd.f32 %v21064_v23, %v3510_v45  ;;  %v16572_v23 = vld [vmem:[%s22814_s7 + $0xa00] ss:$16 sps:$4 sm:$0xff]   ;;  %v16629_v45 = vld [vmem:[%s22814_s7 + $0xb28] ss:$16 sps:$4 sm:$0xff]  }
 0x707   :  { %13390 = vmatpush1.bf16.msra.mxu0 %v16500_v0  ;;  %v16569_v0 = vld [vmem:[%s22814_s7 + $0x9e8] ss:$16 sps:$4 sm:$0xff]  }
 0x708   :  { %13718 = vmatpush1.bf16.msra.mxu1 %v16503_v53  ;;  %13391 = vmatprep.subr.bf16.mxu0 %v16508_v18  ;;  %v16574_v53 = vld [vmem:[%s22814_s7 + $0xa04] ss:$16 sps:$4 sm:$0xff]   ;;  %v16577_v18 = vld [vmem:[%s22814_s7 + $0xa0c] ss:$16 sps:$4 sm:$0xff]  }
 0x709   :  { %13719 = vmatprep.subr.bf16.mxu1 %v16511_v55  ;;  %v15816_v55 = vadd.f32 %v21082_v38, %v3522_v57  ;;  %v16583_v38 = vld [vmem:[%s22814_s7 + $0xa2c] ss:$16 sps:$4 sm:$0xff]   ;;  %v16635_v57 = vld [vmem:[%s22814_s7 + $0xb48] ss:$16 sps:$4 sm:$0xff]  }
 0x70b   :  { %13392 = vmatpush1.bf16.msra.mxu0 %v16506_v56  ;;  %v15789_v56 = vpack.c.bf16 %v15813_v1, %v15813_v1  ;;  %v16643_v1 = vld [vmem:[%s22814_s7 + $0xb6c] ss:$16 sps:$4 sm:$0xff]  }
 0x70c   :  { %13720 = vmatpush1.bf16.msra.mxu1 %v16509_v59  ;;  %13393 = vmatprep.subr.bf16.mxu0 %v16514_v34  ;;  %v16575_v59 = vld [vmem:[%s22814_s7 + $0xa08] ss:$16 sps:$4 sm:$0xff]   ;;  %v16580_v34 = vld [vmem:[%s22814_s7 + $0xa24] ss:$16 sps:$4 sm:$0xff]  }
 0x70d   :  { %13721 = vmatprep.subr.bf16.mxu1 %v16517_v26  ;;  %v15792_v26 = vpack.c.bf16 %v15816_v55, %v15816_v55  ;;  %v16649_v55 = vld [vmem:[%s22814_s7 + $0xb8c] ss:$16 sps:$4 sm:$0xff]  }
 0x70f   :  { %13394 = vmatpush1.bf16.msra.mxu0 %v16512_v47  ;;  %v16578_v47 = vld [vmem:[%s22814_s7 + $0xa20] ss:$16 sps:$4 sm:$0xff]  }
 0x710   :  { %13722 = vmatpush1.bf16.msra.mxu1 %v16515_v60  ;;  %13395 = vmatprep.subr.bf16.mxu0 %v16520_v10  ;;  %v16581_v60 = vld [vmem:[%s22814_s7 + $0xa28] ss:$16 sps:$4 sm:$0xff]   ;;  %v16586_v10 = vld [vmem:[%s22814_s7 + $0xa44] ss:$16 sps:$4 sm:$0xff]  }
 0x711   :  { %13723 = vmatprep.subr.bf16.mxu1 %v16523_v61  ;;  %v16589_v61 = vld [vmem:[%s22814_s7 + $0xa4c] ss:$16 sps:$4 sm:$0xff]  }
 0x713   :  { %13396 = vmatpush1.bf16.msra.mxu0 %v16518_v41  ;;  %v16584_v41 = vld [vmem:[%s22814_s7 + $0xa40] ss:$16 sps:$4 sm:$0xff]  }
 0x714   :  { %13724 = vmatpush1.bf16.msra.mxu1 %v16521_v3  ;;  %13397 = vmatprep.subr.bf16.mxu0 %v16526_v50  ;;  %v16587_v3 = vld [vmem:[%s22814_s7 + $0xa48] ss:$16 sps:$4 sm:$0xff]   ;;  %v16592_v50 = vld [vmem:[%s22814_s7 + $0xa64] ss:$16 sps:$4 sm:$0xff]  }
 0x715   :  { %13725 = vmatprep.subr.bf16.mxu1 %v16529_v62  ;;  %v16595_v62 = vld [vmem:[%s22814_s7 + $0xa6c] ss:$16 sps:$4 sm:$0xff]  }
 0x717   :  { %13398 = vmatpush1.bf16.msra.mxu0 %v16524_v58  ;;  %v16590_v58 = vld [vmem:[%s22814_s7 + $0xa60] ss:$16 sps:$4 sm:$0xff]  }
 0x718   :  { %13726 = vmatpush1.bf16.msra.mxu1 %v16527_v2  ;;  %13399 = vmatprep.subr.bf16.mxu0 %v16532_v4  ;;  %v16593_v2 = vld [vmem:[%s22814_s7 + $0xa68] ss:$16 sps:$4 sm:$0xff]   ;;  %v16598_v4 = vld [vmem:[%s22814_s7 + $0xa84] ss:$16 sps:$4 sm:$0xff]  }
 0x719   :  { %13727 = vmatprep.subr.bf16.mxu1 %v16535_v28  ;;  %v16601_v28 = vld [vmem:[%s22814_s7 + $0xa8c] ss:$16 sps:$4 sm:$0xff]  }
 0x71b   :  { %13400 = vmatpush1.bf16.msra.mxu0 %v16530_v6  ;;  %v16596_v6 = vld [vmem:[%s22814_s7 + $0xa80] ss:$16 sps:$4 sm:$0xff]  }
 0x71c   :  { %13728 = vmatpush1.bf16.msra.mxu1 %v16533_v7  ;;  %13401 = vmatprep.subr.bf16.mxu0 %v16538_v35  ;;  %v16599_v7 = vld [vmem:[%s22814_s7 + $0xa88] ss:$16 sps:$4 sm:$0xff]   ;;  %v16604_v35 = vld [vmem:[%s22814_s7 + $0xaa4] ss:$16 sps:$4 sm:$0xff]  }
 0x71d   :  { %13729 = vmatprep.subr.bf16.mxu1 %v16541_v9  ;;  %v16607_v9 = vld [vmem:[%s22814_s7 + $0xaac] ss:$16 sps:$4 sm:$0xff]  }
 0x71f   :  { %13402 = vmatpush1.bf16.msra.mxu0 %v16536_v12  ;;  %v16602_v12 = vld [vmem:[%s22814_s7 + $0xaa0] ss:$16 sps:$4 sm:$0xff]  }
 0x720   :  { %13730 = vmatpush1.bf16.msra.mxu1 %v16539_v16  ;;  %13403 = vmatprep.subr.bf16.mxu0 %v16544_v21  ;;  %v16605_v16 = vld [vmem:[%s22814_s7 + $0xaa8] ss:$16 sps:$4 sm:$0xff]   ;;  %v16610_v21 = vld [vmem:[%s22814_s7 + $0xac4] ss:$16 sps:$4 sm:$0xff]  }
 0x721   :  { %13731 = vmatprep.subr.bf16.mxu1 %v16547_v20  ;;  %v16613_v20 = vld [vmem:[%s22814_s7 + $0xacc] ss:$16 sps:$4 sm:$0xff]  }
 0x723   :  { %13404 = vmatpush1.bf16.msra.mxu0 %v16542_v39  ;;  %v16608_v39 = vld [vmem:[%s22814_s7 + $0xac0] ss:$16 sps:$4 sm:$0xff]  }
 0x724   :  { %13732 = vmatpush1.bf16.msra.mxu1 %v16545_v31  ;;  %13405 = vmatprep.subr.bf16.mxu0 %v16550_v24  ;;  %v16611_v31 = vld [vmem:[%s22814_s7 + $0xac8] ss:$16 sps:$4 sm:$0xff]   ;;  %v16616_v24 = vld [vmem:[%s22814_s7 + $0xae4] ss:$16 sps:$4 sm:$0xff]  }
 0x725   :  { %13733 = vmatprep.subr.bf16.mxu1 %v16553_v37  ;;  %v16619_v37 = vld [vmem:[%s22814_s7 + $0xaec] ss:$16 sps:$4 sm:$0xff]  }
 0x727   :  { %13406 = vmatpush1.bf16.msra.mxu0 %v16548_v29  ;;  %v16614_v29 = vld [vmem:[%s22814_s7 + $0xae0] ss:$16 sps:$4 sm:$0xff]  }
 0x728   :  { %13734 = vmatpush1.bf16.msra.mxu1 %v16551_v54  ;;  %13407 = vmatprep.subr.bf16.mxu0 %v16556_v40  ;;  %v16617_v54 = vld [vmem:[%s22814_s7 + $0xae8] ss:$16 sps:$4 sm:$0xff]   ;;  %v16622_v40 = vld [vmem:[%s22814_s7 + $0xb04] ss:$16 sps:$4 sm:$0xff]  }
 0x729   :  { %13735 = vmatprep.subr.bf16.mxu1 %v16559_v33  ;;  %v16625_v33 = vld [vmem:[%s22814_s7 + $0xb0c] ss:$16 sps:$4 sm:$0xff]  }
 0x72b   :  { %13408 = vmatpush1.bf16.msra.mxu0 %v16554_v42  ;;  %v16620_v42 = vld [vmem:[%s22814_s7 + $0xb00] ss:$16 sps:$4 sm:$0xff]  }
 0x72c   :  { %13736 = vmatpush1.bf16.msra.mxu1 %v16557_v43  ;;  %13409 = vmatprep.subr.bf16.mxu0 %v16562_v14  ;;  %v16623_v43 = vld [vmem:[%s22814_s7 + $0xb08] ss:$16 sps:$4 sm:$0xff]   ;;  %v16628_v14 = vld [vmem:[%s22814_s7 + $0xb24] ss:$16 sps:$4 sm:$0xff]  }
 0x72d   :  { %13737 = vmatprep.subr.bf16.mxu1 %v16565_v30  ;;  %v16631_v30 = vld [vmem:[%s22814_s7 + $0xb2c] ss:$16 sps:$4 sm:$0xff]  }
 0x72f   :  { %13410 = vmatpush1.bf16.msra.mxu0 %v16560_v44  ;;  %v16626_v44 = vld [vmem:[%s22814_s7 + $0xb20] ss:$16 sps:$4 sm:$0xff]  }
 0x730   :  { %13738 = vmatpush1.bf16.msra.mxu1 %v16563_v46  ;;  %13411 = vmatprep.subr.bf16.mxu0 %v16568_v48  ;;  %v16634_v46 = vld [vmem:[%s22814_s7 + $0xb44] ss:$16 sps:$4 sm:$0xff]   ;;  %v16637_v48 = vld [vmem:[%s22814_s7 + $0xb4c] ss:$16 sps:$4 sm:$0xff]  }
 0x731   :  { %13739 = vmatprep.subr.bf16.mxu1 %v16571_v49  ;;  %v16632_v49 = vld [vmem:[%s22814_s7 + $0xb40] ss:$16 sps:$4 sm:$0xff]  }
 0x733   :  { %13412 = vmatpush1.bf16.msra.mxu0 %v16566_v51  ;;  %v16640_v51 = vld [vmem:[%s22814_s7 + $0xb64] ss:$16 sps:$4 sm:$0xff]  }
 0x734   :  { %13740 = vmatpush1.bf16.msra.mxu1 %v16569_v0  ;;  %13422 = vmatprep.subr.bf16.mxu0 %v16574_v53  ;;  %v16638_v0 = vld [vmem:[%s22814_s7 + $0xb60] ss:$16 sps:$4 sm:$0xff]   ;;  %v16641_v53 = vld [vmem:[%s22814_s7 + $0xb68] ss:$16 sps:$4 sm:$0xff]  }
 0x735   :  { %13750 = vmatprep.subr.bf16.mxu1 %v16577_v18  ;;  %v16646_v18 = vld [vmem:[%s22814_s7 + $0xb84] ss:$16 sps:$4 sm:$0xff]  }
 0x736   :  { %13414 = vmatmul.mubr.bf16.vlgmr.msra.gmra.mrb[28].mxu0 %v15789_v56 }
 0x737   :  { %13742 = vmatmul.mubr.bf16.vlgmr.msra.gmra.mrb[28].mxu1 %v15789_v56  ;;  %13423 = vmatpush1.bf16.msra.mxu0 %v16572_v23  ;;  %v16644_v23 = vld [vmem:[%s22814_s7 + $0xb80] ss:$16 sps:$4 sm:$0xff]   ;;  %v16647_v56 = vld [vmem:[%s22814_s7 + $0xb88] ss:$16 sps:$4 sm:$0xff]  }
 0x738   :  { %13454 = vmatprep.mubr.bf16.mxu0 %v15792_v26  ;;  %13751 = vmatpush1.bf16.msra.mxu1 %v16575_v59  ;;  %v16652_v59 = vld [vmem:[%s22814_s7 + $0xba4] ss:$16 sps:$4 sm:$0xff]  }
 0x739   :  { %13782 = vmatprep.mubr.bf16.mxu1 %v15792_v26  ;;  %13424 = vmatprep.subr.bf16.mxu0 %v16580_v34  ;;  %v16655_v34 = vld [vmem:[%s22814_s7 + $0xbac] ss:$16 sps:$4 sm:$0xff]   ;;  %v16650_v26 = vld [vmem:[%s22814_s7 + $0xba0] ss:$16 sps:$4 sm:$0xff]  }
 0x73a   :  { %13752 = vmatprep.subr.bf16.mxu1 %v16583_v38  ;;  %v16653_v38 = vld [vmem:[%s22814_s7 + $0xba8] ss:$16 sps:$4 sm:$0xff]  }
 0x73b   :  { %13425 = vmatpush1.bf16.msra.mxu0 %v16578_v47  ;;  %v16658_v47 = vld [vmem:[%s22814_s7 + $0xbc4] ss:$16 sps:$4 sm:$0xff]  }
 0x73c   :  { %13753 = vmatpush1.bf16.msra.mxu1 %v16581_v60  ;;  %13426 = vmatprep.subr.bf16.mxu0 %v16586_v10  ;;  %v16661_v60 = vld [vmem:[%s22814_s7 + $0xbcc] ss:$16 sps:$4 sm:$0xff]   ;;  %v16656_v10 = vld [vmem:[%s22814_s7 + $0xbc0] ss:$16 sps:$4 sm:$0xff]  }
 0x73d   :  { %13754 = vmatprep.subr.bf16.mxu1 %v16589_v61  ;;  %v3518_v61 = vrot.slane %v21969_v63, %v17552_v27 }
 0x73f   :  { %13427 = vmatpush1.bf16.msra.mxu0 %v16584_v41  ;;  %v16659_v41 = vld [vmem:[%s22814_s7 + $0xbc8] ss:$16 sps:$4 sm:$0xff]  }
 0x740   :  { %13755 = vmatpush1.bf16.msra.mxu1 %v16587_v3  ;;  %13428 = vmatprep.subr.bf16.mxu0 %v16592_v50  ;;  %v16664_v3 = vld [vmem:[%s22814_s7 + $0xbe4] ss:$16 sps:$4 sm:$0xff]   ;;  %v16667_v50 = vld [vmem:[%s22814_s7 + $0xbec] ss:$16 sps:$4 sm:$0xff]  }
 0x741   :  { %13756 = vmatprep.subr.bf16.mxu1 %v16595_v62  ;;  %v3530_v62 = vrot.slane %v21969_v63, %v18568_v11  ;;  %v16673_v11 = vld [vmem:[%s22814_s7 + $0xc0c] ss:$16 sps:$4 sm:$0xff]  }
 0x743   :  { %13429 = vmatpush1.bf16.msra.mxu0 %v16590_v58  ;;  %v16662_v58 = vld [vmem:[%s22814_s7 + $0xbe0] ss:$16 sps:$4 sm:$0xff]  }
 0x744   :  { %13757 = vmatpush1.bf16.msra.mxu1 %v16593_v2  ;;  %13430 = vmatprep.subr.bf16.mxu0 %v16598_v4  ;;  %v15815_v2 = vadd.f32 %v21072_v32, %v3518_v61  ;;  %v16665_v4 = vld [vmem:[%s22814_s7 + $0xbe8] ss:$16 sps:$4 sm:$0xff]   ;;  %v16668_v32 = vld [vmem:[%s22814_s7 + $0xc00] ss:$16 sps:$4 sm:$0xff]  }
 0x745   :  { %13758 = vmatprep.subr.bf16.mxu1 %v16601_v28  ;;  %v16670_v28 = vld [vmem:[%s22814_s7 + $0xc04] ss:$16 sps:$4 sm:$0xff]   ;;  %v16728_v61 = vld [vmem:[%s22814_s7 + $0xd40] ss:$16 sps:$4 sm:$0xff]  }
 0x747   :  { %13431 = vmatpush1.bf16.msra.mxu0 %v16596_v6  ;;  %v15818_v6 = vadd.f32 %v21866_v25, %v3530_v62  ;;  %v16679_v25 = vld [vmem:[%s22814_s7 + $0xc2c] ss:$16 sps:$4 sm:$0xff]   ;;  %v16734_v62 = vld [vmem:[%s22814_s7 + $0xd60] ss:$16 sps:$4 sm:$0xff]  }
 0x748   :  { %13759 = vmatpush1.bf16.msra.mxu1 %v16599_v7  ;;  %13432 = vmatprep.subr.bf16.mxu0 %v16604_v35  ;;  %v15791_v7 = vpack.c.bf16 %v15815_v2, %v15815_v2  ;;  %v16671_v35 = vld [vmem:[%s22814_s7 + $0xc08] ss:$16 sps:$4 sm:$0xff]   ;;  %v16742_v2 = vld [vmem:[%s22814_s7 + $0xd84] ss:$16 sps:$4 sm:$0xff]  }
 0x749   :  { %13760 = vmatprep.subr.bf16.mxu1 %v16607_v9  ;;  %v16676_v9 = vld [vmem:[%s22814_s7 + $0xc24] ss:$16 sps:$4 sm:$0xff]  }
 0x74b   :  { %13433 = vmatpush1.bf16.msra.mxu0 %v16602_v12  ;;  %v15794_v12 = vpack.c.bf16 %v15818_v6, %v15818_v6  ;;  %v16748_v6 = vld [vmem:[%s22814_s7 + $0xda4] ss:$16 sps:$4 sm:$0xff]  }
 0x74c   :  { %13761 = vmatpush1.bf16.msra.mxu1 %v16605_v16  ;;  %13434 = vmatprep.subr.bf16.mxu0 %v16610_v21  ;;  %v16674_v16 = vld [vmem:[%s22814_s7 + $0xc20] ss:$16 sps:$4 sm:$0xff]   ;;  %v16677_v21 = vld [vmem:[%s22814_s7 + $0xc28] ss:$16 sps:$4 sm:$0xff]  }
 0x74d   :  { %13762 = vmatprep.subr.bf16.mxu1 %v16613_v20  ;;  %v16682_v20 = vld [vmem:[%s22814_s7 + $0xc44] ss:$16 sps:$4 sm:$0xff]  }
 0x74f   :  { %13435 = vmatpush1.bf16.msra.mxu0 %v16608_v39  ;;  %v16685_v39 = vld [vmem:[%s22814_s7 + $0xc4c] ss:$16 sps:$4 sm:$0xff]  }
 0x750   :  { %13763 = vmatpush1.bf16.msra.mxu1 %v16611_v31  ;;  %13436 = vmatprep.subr.bf16.mxu0 %v16616_v24  ;;  %v16680_v31 = vld [vmem:[%s22814_s7 + $0xc40] ss:$16 sps:$4 sm:$0xff]   ;;  %v16683_v24 = vld [vmem:[%s22814_s7 + $0xc48] ss:$16 sps:$4 sm:$0xff]  }
 0x751   :  { %13764 = vmatprep.subr.bf16.mxu1 %v16619_v37  ;;  %v16688_v37 = vld [vmem:[%s22814_s7 + $0xc64] ss:$16 sps:$4 sm:$0xff]  }
 0x753   :  { %13437 = vmatpush1.bf16.msra.mxu0 %v16614_v29  ;;  %v16691_v29 = vld [vmem:[%s22814_s7 + $0xc6c] ss:$16 sps:$4 sm:$0xff]  }
 0x754   :  { %13765 = vmatpush1.bf16.msra.mxu1 %v16617_v54  ;;  %13438 = vmatprep.subr.bf16.mxu0 %v16622_v40  ;;  %v16686_v54 = vld [vmem:[%s22814_s7 + $0xc60] ss:$16 sps:$4 sm:$0xff]   ;;  %v16689_v40 = vld [vmem:[%s22814_s7 + $0xc68] ss:$16 sps:$4 sm:$0xff]  }
 0x755   :  { %13766 = vmatprep.subr.bf16.mxu1 %v16625_v33  ;;  %v16694_v33 = vld [vmem:[%s22814_s7 + $0xc84] ss:$16 sps:$4 sm:$0xff]  }
 0x757   :  { %13439 = vmatpush1.bf16.msra.mxu0 %v16620_v42  ;;  %v16697_v42 = vld [vmem:[%s22814_s7 + $0xc8c] ss:$16 sps:$4 sm:$0xff]  }
 0x758   :  { %13767 = vmatpush1.bf16.msra.mxu1 %v16623_v43  ;;  %13440 = vmatprep.subr.bf16.mxu0 %v16628_v14  ;;  %v16692_v43 = vld [vmem:[%s22814_s7 + $0xc80] ss:$16 sps:$4 sm:$0xff]   ;;  %v16695_v14 = vld [vmem:[%s22814_s7 + $0xc88] ss:$16 sps:$4 sm:$0xff]  }
 0x759   :  { %13768 = vmatprep.subr.bf16.mxu1 %v16631_v30  ;;  %v16700_v30 = vld [vmem:[%s22814_s7 + $0xca4] ss:$16 sps:$4 sm:$0xff]  }
 0x75b   :  { %13441 = vmatpush1.bf16.msra.mxu0 %v16626_v44  ;;  %v16703_v44 = vld [vmem:[%s22814_s7 + $0xcac] ss:$16 sps:$4 sm:$0xff]  }
 0x75c   :  { %13769 = vmatpush1.bf16.msra.mxu1 %v16629_v45  ;;  %13442 = vmatprep.subr.bf16.mxu0 %v16634_v46  ;;  %v16698_v45 = vld [vmem:[%s22814_s7 + $0xca0] ss:$16 sps:$4 sm:$0xff]   ;;  %v16701_v46 = vld [vmem:[%s22814_s7 + $0xca8] ss:$16 sps:$4 sm:$0xff]  }
 0x75d   :  { %13770 = vmatprep.subr.bf16.mxu1 %v16637_v48  ;;  %v16706_v48 = vld [vmem:[%s22814_s7 + $0xcc4] ss:$16 sps:$4 sm:$0xff]  }
 0x75f   :  { %13443 = vmatpush1.bf16.msra.mxu0 %v16632_v49  ;;  %v16709_v49 = vld [vmem:[%s22814_s7 + $0xccc] ss:$16 sps:$4 sm:$0xff]  }
 0x760   :  { %13771 = vmatpush1.bf16.msra.mxu1 %v16635_v57  ;;  %13444 = vmatprep.subr.bf16.mxu0 %v16640_v51  ;;  %v16704_v57 = vld [vmem:[%s22814_s7 + $0xcc0] ss:$16 sps:$4 sm:$0xff]   ;;  %v16707_v51 = vld [vmem:[%s22814_s7 + $0xcc8] ss:$16 sps:$4 sm:$0xff]  }
 0x761   :  { %13772 = vmatprep.subr.bf16.mxu1 %v16643_v1  ;;  %v16712_v1 = vld [vmem:[%s22814_s7 + $0xce4] ss:$16 sps:$4 sm:$0xff]  }
 0x763   :  { %13445 = vmatpush1.bf16.msra.mxu0 %v16638_v0  ;;  %v16715_v0 = vld [vmem:[%s22814_s7 + $0xcec] ss:$16 sps:$4 sm:$0xff]  }
 0x764   :  { %13773 = vmatpush1.bf16.msra.mxu1 %v16641_v53  ;;  %13446 = vmatprep.subr.bf16.mxu0 %v16646_v18  ;;  %v16710_v53 = vld [vmem:[%s22814_s7 + $0xce0] ss:$16 sps:$4 sm:$0xff]   ;;  %v16713_v18 = vld [vmem:[%s22814_s7 + $0xce8] ss:$16 sps:$4 sm:$0xff]  }
 0x765   :  { %13774 = vmatprep.subr.bf16.mxu1 %v16649_v55  ;;  %v16718_v55 = vld [vmem:[%s22814_s7 + $0xd04] ss:$16 sps:$4 sm:$0xff]  }
 0x767   :  { %13447 = vmatpush1.bf16.msra.mxu0 %v16644_v23  ;;  %v16721_v23 = vld [vmem:[%s22814_s7 + $0xd0c] ss:$16 sps:$4 sm:$0xff]  }
 0x768   :  { %13775 = vmatpush1.bf16.msra.mxu1 %v16647_v56  ;;  %13448 = vmatprep.subr.bf16.mxu0 %v16652_v59  ;;  %v16716_v56 = vld [vmem:[%s22814_s7 + $0xd00] ss:$16 sps:$4 sm:$0xff]   ;;  %v16719_v59 = vld [vmem:[%s22814_s7 + $0xd08] ss:$16 sps:$4 sm:$0xff]  }
 0x769   :  { %13776 = vmatprep.subr.bf16.mxu1 %v16655_v34  ;;  %v16724_v34 = vld [vmem:[%s22814_s7 + $0xd24] ss:$16 sps:$4 sm:$0xff]  }
 0x76b   :  { %13449 = vmatpush1.bf16.msra.mxu0 %v16650_v26  ;;  %v16727_v26 = vld [vmem:[%s22814_s7 + $0xd2c] ss:$16 sps:$4 sm:$0xff]  }
 0x76c   :  { %13777 = vmatpush1.bf16.msra.mxu1 %v16653_v38  ;;  %13450 = vmatprep.subr.bf16.mxu0 %v16658_v47  ;;  %v16722_v38 = vld [vmem:[%s22814_s7 + $0xd20] ss:$16 sps:$4 sm:$0xff]   ;;  %v16725_v47 = vld [vmem:[%s22814_s7 + $0xd28] ss:$16 sps:$4 sm:$0xff]  }
 0x76d   :  { %13778 = vmatprep.subr.bf16.mxu1 %v16661_v60  ;;  %v16730_v60 = vld [vmem:[%s22814_s7 + $0xd44] ss:$16 sps:$4 sm:$0xff]  }
 0x76f   :  { %13451 = vmatpush1.bf16.msra.mxu0 %v16656_v10  ;;  %v16733_v10 = vld [vmem:[%s22814_s7 + $0xd4c] ss:$16 sps:$4 sm:$0xff]  }
 0x770   :  { %13779 = vmatpush1.bf16.msra.mxu1 %v16659_v41  ;;  %13452 = vmatprep.subr.bf16.mxu0 %v16664_v3  ;;  %v16731_v41 = vld [vmem:[%s22814_s7 + $0xd48] ss:$16 sps:$4 sm:$0xff]   ;;  %v16736_v3 = vld [vmem:[%s22814_s7 + $0xd64] ss:$16 sps:$4 sm:$0xff]  }
 0x771   :  { %13780 = vmatprep.subr.bf16.mxu1 %v16667_v50  ;;  %v16739_v50 = vld [vmem:[%s22814_s7 + $0xd6c] ss:$16 sps:$4 sm:$0xff]  }
 0x773   :  { %13453 = vmatpush1.bf16.msra.mxu0 %v16662_v58  ;;  %v16737_v58 = vld [vmem:[%s22814_s7 + $0xd68] ss:$16 sps:$4 sm:$0xff]  }
 0x774   :  { %13781 = vmatpush1.bf16.msra.mxu1 %v16665_v4  ;;  %13463 = vmatprep.subr.bf16.mxu0 %v16670_v28  ;;  %v16745_v4 = vld [vmem:[%s22814_s7 + $0xd8c] ss:$16 sps:$4 sm:$0xff]   ;;  %v16740_v28 = vld [vmem:[%s22814_s7 + $0xd80] ss:$16 sps:$4 sm:$0xff]  }
 0x775   :  { %13791 = vmatprep.subr.bf16.mxu1 %v16673_v11  ;;  %v16743_v11 = vld [vmem:[%s22814_s7 + $0xd88] ss:$16 sps:$4 sm:$0xff]  }
 0x776   :  { %13455 = vmatmul.mubr.bf16.vlgmr.msra.gmra.mrb[28].mxu0 %v15791_v7 }
 0x777   :  { %13783 = vmatmul.mubr.bf16.vlgmr.msra.gmra.mrb[28].mxu1 %v15791_v7  ;;  %13464 = vmatpush1.bf16.msra.mxu0 %v16668_v32  ;;  %v16751_v32 = vld [vmem:[%s22814_s7 + $0xdac] ss:$16 sps:$4 sm:$0xff]   ;;  %v16746_v7 = vld [vmem:[%s22814_s7 + $0xda0] ss:$16 sps:$4 sm:$0xff]  }
 0x778   :  { %13495 = vmatprep.mubr.bf16.mxu0 %v15794_v12  ;;  %13792 = vmatpush1.bf16.msra.mxu1 %v16671_v35  ;;  %v16749_v35 = vld [vmem:[%s22814_s7 + $0xda8] ss:$16 sps:$4 sm:$0xff]  }
 0x779   :  { %13823 = vmatprep.mubr.bf16.mxu1 %v15794_v12  ;;  %13465 = vmatprep.subr.bf16.mxu0 %v16676_v9  ;;  %v16754_v9 = vld [vmem:[%s22814_s7 + $0xdc4] ss:$16 sps:$4 sm:$0xff]   ;;  %v16757_v12 = vld [vmem:[%s22814_s7 + $0xdcc] ss:$16 sps:$4 sm:$0xff]  }
 0x77a   :  { %13793 = vmatprep.subr.bf16.mxu1 %v16679_v25  ;;  %v16752_v25 = vld [vmem:[%s22814_s7 + $0xdc0] ss:$16 sps:$4 sm:$0xff]  }
 0x77b   :  { %13466 = vmatpush1.bf16.msra.mxu0 %v16674_v16  ;;  %v3526_v16 = vrot.slane %v21969_v63, %v18562_v8  ;;  %v16758_v8 = vld [vmem:[%s22814_s7 + $0xde0] ss:$16 sps:$4 sm:$0xff]  }
 0x77c   :  { %13794 = vmatpush1.bf16.msra.mxu1 %v16677_v21  ;;  %13467 = vmatprep.subr.bf16.mxu0 %v16682_v20  ;;  %v16755_v21 = vld [vmem:[%s22814_s7 + $0xdc8] ss:$16 sps:$4 sm:$0xff]   ;;  %v16760_v20 = vld [vmem:[%s22814_s7 + $0xde4] ss:$16 sps:$4 sm:$0xff]  }
 0x77d   :  { %13795 = vmatprep.subr.bf16.mxu1 %v16685_v39  ;;  %v16763_v39 = vld [vmem:[%s22814_s7 + $0xdec] ss:$16 sps:$4 sm:$0xff]  }
 0x77f   :  { %13468 = vmatpush1.bf16.msra.mxu0 %v16680_v31  ;;  %v3538_v31 = vrot.slane %v21969_v63, %v18580_v19  ;;  %v16769_v19 = vld [vmem:[%s22814_s7 + $0xe0c] ss:$16 sps:$4 sm:$0xff]  }
 0x780   :  { %13796 = vmatpush1.bf16.msra.mxu1 %v16683_v24  ;;  %13469 = vmatprep.subr.bf16.mxu0 %v16688_v37  ;;  %v15817_v24 = vadd.f32 %v21859_v17, %v3526_v16  ;;  %v16761_v37 = vld [vmem:[%s22814_s7 + $0xde8] ss:$16 sps:$4 sm:$0xff]   ;;  %v16764_v17 = vld [vmem:[%s22814_s7 + $0xe00] ss:$16 sps:$4 sm:$0xff]  }
 0x781   :  { %13797 = vmatprep.subr.bf16.mxu1 %v16691_v29  ;;  %v16766_v29 = vld [vmem:[%s22814_s7 + $0xe04] ss:$16 sps:$4 sm:$0xff]   ;;  %v15820_v63 = vadd.f32 %v21868_v36, %v3538_v31  ;;  %v16775_v36 = vld [vmem:[%s22814_s7 + $0xe2c] ss:$16 sps:$4 sm:$0xff]   ;;  %v16833_v16 = vld [vmem:[%s22814_s7 + $0xf68] ss:$16 sps:$4 sm:$0xff]  }
 0x782   :  { %v16839_v31 = vld [vmem:[%s22814_s7 + $0xf88] ss:$16 sps:$4 sm:$0xff]  }
 0x783   :  { %13470 = vmatpush1.bf16.msra.mxu0 %v16686_v54  ;;  %v15793_v54 = vpack.c.bf16 %v15817_v24, %v15817_v24  ;;  %v16847_v24 = vld [vmem:[%s22814_s7 + $0xfac] ss:$16 sps:$4 sm:$0xff]  }
 0x784   :  { %13798 = vmatpush1.bf16.msra.mxu1 %v16689_v40  ;;  %13471 = vmatprep.subr.bf16.mxu0 %v16694_v33  ;;  %v16767_v40 = vld [vmem:[%s22814_s7 + $0xe08] ss:$16 sps:$4 sm:$0xff]   ;;  %v16772_v33 = vld [vmem:[%s22814_s7 + $0xe24] ss:$16 sps:$4 sm:$0xff]  }
 0x785   :  { %13799 = vmatprep.subr.bf16.mxu1 %v16697_v42  ;;  %v15796_v42 = vpack.c.bf16 %v15820_v63, %v15820_v63  ;;  %v16853_v63 = vld [vmem:[%s22814_s7 + $0xfcc] ss:$16 sps:$4 sm:$0xff]  }
 0x787   :  { %13472 = vmatpush1.bf16.msra.mxu0 %v16692_v43  ;;  %v16770_v43 = vld [vmem:[%s22814_s7 + $0xe20] ss:$16 sps:$4 sm:$0xff]  }
 0x788   :  { %13800 = vmatpush1.bf16.msra.mxu1 %v16695_v14  ;;  %13473 = vmatprep.subr.bf16.mxu0 %v16700_v30  ;;  %v16773_v14 = vld [vmem:[%s22814_s7 + $0xe28] ss:$16 sps:$4 sm:$0xff]   ;;  %v16778_v30 = vld [vmem:[%s22814_s7 + $0xe44] ss:$16 sps:$4 sm:$0xff]  }
 0x789   :  { %13801 = vmatprep.subr.bf16.mxu1 %v16703_v44  ;;  %v16781_v44 = vld [vmem:[%s22814_s7 + $0xe4c] ss:$16 sps:$4 sm:$0xff]  }
 0x78b   :  { %13474 = vmatpush1.bf16.msra.mxu0 %v16698_v45  ;;  %v16776_v45 = vld [vmem:[%s22814_s7 + $0xe40] ss:$16 sps:$4 sm:$0xff]  }
 0x78c   :  { %13802 = vmatpush1.bf16.msra.mxu1 %v16701_v46  ;;  %13475 = vmatprep.subr.bf16.mxu0 %v16706_v48  ;;  %v16779_v46 = vld [vmem:[%s22814_s7 + $0xe48] ss:$16 sps:$4 sm:$0xff]   ;;  %v16784_v48 = vld [vmem:[%s22814_s7 + $0xe64] ss:$16 sps:$4 sm:$0xff]  }
 0x78d   :  { %13803 = vmatprep.subr.bf16.mxu1 %v16709_v49  ;;  %v16787_v49 = vld [vmem:[%s22814_s7 + $0xe6c] ss:$16 sps:$4 sm:$0xff]  }
 0x78f   :  { %13476 = vmatpush1.bf16.msra.mxu0 %v16704_v57  ;;  %v16782_v57 = vld [vmem:[%s22814_s7 + $0xe60] ss:$16 sps:$4 sm:$0xff]  }
 0x790   :  { %13804 = vmatpush1.bf16.msra.mxu1 %v16707_v51  ;;  %13477 = vmatprep.subr.bf16.mxu0 %v16712_v1  ;;  %v16785_v51 = vld [vmem:[%s22814_s7 + $0xe68] ss:$16 sps:$4 sm:$0xff]   ;;  %v16790_v1 = vld [vmem:[%s22814_s7 + $0xe84] ss:$16 sps:$4 sm:$0xff]  }
 0x791   :  { %13805 = vmatprep.subr.bf16.mxu1 %v16715_v0  ;;  %v16793_v0 = vld [vmem:[%s22814_s7 + $0xe8c] ss:$16 sps:$4 sm:$0xff]  }
 0x793   :  { %13478 = vmatpush1.bf16.msra.mxu0 %v16710_v53  ;;  %v16788_v53 = vld [vmem:[%s22814_s7 + $0xe80] ss:$16 sps:$4 sm:$0xff]  }
 0x794   :  { %13806 = vmatpush1.bf16.msra.mxu1 %v16713_v18  ;;  %13479 = vmatprep.subr.bf16.mxu0 %v16718_v55  ;;  %v16791_v18 = vld [vmem:[%s22814_s7 + $0xe88] ss:$16 sps:$4 sm:$0xff]   ;;  %v16796_v55 = vld [vmem:[%s22814_s7 + $0xea4] ss:$16 sps:$4 sm:$0xff]  }
 0x795   :  { %13807 = vmatprep.subr.bf16.mxu1 %v16721_v23  ;;  %v16799_v23 = vld [vmem:[%s22814_s7 + $0xeac] ss:$16 sps:$4 sm:$0xff]  }
 0x797   :  { %13480 = vmatpush1.bf16.msra.mxu0 %v16716_v56  ;;  %v16794_v56 = vld [vmem:[%s22814_s7 + $0xea0] ss:$16 sps:$4 sm:$0xff]  }
 0x798   :  { %13808 = vmatpush1.bf16.msra.mxu1 %v16719_v59  ;;  %13481 = vmatprep.subr.bf16.mxu0 %v16724_v34  ;;  %v16797_v59 = vld [vmem:[%s22814_s7 + $0xea8] ss:$16 sps:$4 sm:$0xff]   ;;  %v16802_v34 = vld [vmem:[%s22814_s7 + $0xec4] ss:$16 sps:$4 sm:$0xff]  }
 0x799   :  { %13809 = vmatprep.subr.bf16.mxu1 %v16727_v26  ;;  %v16805_v26 = vld [vmem:[%s22814_s7 + $0xecc] ss:$16 sps:$4 sm:$0xff]  }
 0x79b   :  { %13482 = vmatpush1.bf16.msra.mxu0 %v16722_v38  ;;  %v16800_v38 = vld [vmem:[%s22814_s7 + $0xec0] ss:$16 sps:$4 sm:$0xff]  }
 0x79c   :  { %13810 = vmatpush1.bf16.msra.mxu1 %v16725_v47  ;;  %13483 = vmatprep.subr.bf16.mxu0 %v16730_v60  ;;  %v16803_v47 = vld [vmem:[%s22814_s7 + $0xec8] ss:$16 sps:$4 sm:$0xff]   ;;  %v16808_v60 = vld [vmem:[%s22814_s7 + $0xee4] ss:$16 sps:$4 sm:$0xff]  }
 0x79d   :  { %13811 = vmatprep.subr.bf16.mxu1 %v16733_v10  ;;  %v16811_v10 = vld [vmem:[%s22814_s7 + $0xeec] ss:$16 sps:$4 sm:$0xff]  }
 0x79f   :  { %13484 = vmatpush1.bf16.msra.mxu0 %v16728_v61  ;;  %v16806_v61 = vld [vmem:[%s22814_s7 + $0xee0] ss:$16 sps:$4 sm:$0xff]  }
 0x7a0   :  { %13812 = vmatpush1.bf16.msra.mxu1 %v16731_v41  ;;  %13485 = vmatprep.subr.bf16.mxu0 %v16736_v3  ;;  %v16809_v41 = vld [vmem:[%s22814_s7 + $0xee8] ss:$16 sps:$4 sm:$0xff]   ;;  %v16814_v3 = vld [vmem:[%s22814_s7 + $0xf04] ss:$16 sps:$4 sm:$0xff]  }
 0x7a1   :  { %13813 = vmatprep.subr.bf16.mxu1 %v16739_v50  ;;  %v16817_v50 = vld [vmem:[%s22814_s7 + $0xf0c] ss:$16 sps:$4 sm:$0xff]  }
 0x7a3   :  { %13486 = vmatpush1.bf16.msra.mxu0 %v16734_v62  ;;  %v16812_v62 = vld [vmem:[%s22814_s7 + $0xf00] ss:$16 sps:$4 sm:$0xff]  }
 0x7a4   :  { %13814 = vmatpush1.bf16.msra.mxu1 %v16737_v58  ;;  %13487 = vmatprep.subr.bf16.mxu0 %v16742_v2  ;;  %v16815_v58 = vld [vmem:[%s22814_s7 + $0xf08] ss:$16 sps:$4 sm:$0xff]   ;;  %v16820_v2 = vld [vmem:[%s22814_s7 + $0xf24] ss:$16 sps:$4 sm:$0xff]  }
 0x7a5   :  { %13815 = vmatprep.subr.bf16.mxu1 %v16745_v4  ;;  %v16823_v4 = vld [vmem:[%s22814_s7 + $0xf2c] ss:$16 sps:$4 sm:$0xff]  }
 0x7a7   :  { %13488 = vmatpush1.bf16.msra.mxu0 %v16740_v28  ;;  %v16818_v28 = vld [vmem:[%s22814_s7 + $0xf20] ss:$16 sps:$4 sm:$0xff]  }
 0x7a8   :  { %13816 = vmatpush1.bf16.msra.mxu1 %v16743_v11  ;;  %13489 = vmatprep.subr.bf16.mxu0 %v16748_v6  ;;  %v16821_v11 = vld [vmem:[%s22814_s7 + $0xf28] ss:$16 sps:$4 sm:$0xff]   ;;  %v16826_v6 = vld [vmem:[%s22814_s7 + $0xf44] ss:$16 sps:$4 sm:$0xff]  }
 0x7a9   :  { %13817 = vmatprep.subr.bf16.mxu1 %v16751_v32  ;;  %v16829_v32 = vld [vmem:[%s22814_s7 + $0xf4c] ss:$16 sps:$4 sm:$0xff]  }
 0x7ab   :  { %13490 = vmatpush1.bf16.msra.mxu0 %v16746_v7  ;;  %v16824_v7 = vld [vmem:[%s22814_s7 + $0xf40] ss:$16 sps:$4 sm:$0xff]  }
 0x7ac   :  { %13818 = vmatpush1.bf16.msra.mxu1 %v16749_v35  ;;  %13491 = vmatprep.subr.bf16.mxu0 %v16754_v9  ;;  %v16827_v35 = vld [vmem:[%s22814_s7 + $0xf48] ss:$16 sps:$4 sm:$0xff]   ;;  %v16832_v9 = vld [vmem:[%s22814_s7 + $0xf64] ss:$16 sps:$4 sm:$0xff]  }
 0x7ad   :  { %13819 = vmatprep.subr.bf16.mxu1 %v16757_v12  ;;  %v16835_v12 = vld [vmem:[%s22814_s7 + $0xf6c] ss:$16 sps:$4 sm:$0xff]  }
 0x7af   :  { %13492 = vmatpush1.bf16.msra.mxu0 %v16752_v25  ;;  %v16830_v25 = vld [vmem:[%s22814_s7 + $0xf60] ss:$16 sps:$4 sm:$0xff]  }
 0x7b0   :  { %13820 = vmatpush1.bf16.msra.mxu1 %v16755_v21  ;;  %13493 = vmatprep.subr.bf16.mxu0 %v16760_v20  ;;  %v16838_v21 = vld [vmem:[%s22814_s7 + $0xf84] ss:$16 sps:$4 sm:$0xff]   ;;  %v16841_v20 = vld [vmem:[%s22814_s7 + $0xf8c] ss:$16 sps:$4 sm:$0xff]  }
 0x7b1   :  { %13821 = vmatprep.subr.bf16.mxu1 %v16763_v39  ;;  %v16836_v39 = vld [vmem:[%s22814_s7 + $0xf80] ss:$16 sps:$4 sm:$0xff]  }
 0x7b3   :  { %13494 = vmatpush1.bf16.msra.mxu0 %v16758_v8  ;;  %v16844_v8 = vld [vmem:[%s22814_s7 + $0xfa4] ss:$16 sps:$4 sm:$0xff]  }
 0x7b4   :  { %13822 = vmatpush1.bf16.msra.mxu1 %v16761_v37  ;;  %13504 = vmatprep.subr.bf16.mxu0 %v16766_v29  ;;  %v16842_v37 = vld [vmem:[%s22814_s7 + $0xfa0] ss:$16 sps:$4 sm:$0xff]   ;;  %v16845_v29 = vld [vmem:[%s22814_s7 + $0xfa8] ss:$16 sps:$4 sm:$0xff]  }
 0x7b5   :  { %13832 = vmatprep.subr.bf16.mxu1 %v16769_v19  ;;  %v16850_v19 = vld [vmem:[%s22814_s7 + $0xfc4] ss:$16 sps:$4 sm:$0xff]  }
 0x7b6   :  { %13496 = vmatmul.mubr.bf16.vlgmr.msra.gmra.mrb[28].mxu0 %v15793_v54 }
 0x7b7   :  { %13824 = vmatmul.mubr.bf16.vlgmr.msra.gmra.mrb[28].mxu1 %v15793_v54  ;;  %13505 = vmatpush1.bf16.msra.mxu0 %v16764_v17  ;;  %v16848_v17 = vld [vmem:[%s22814_s7 + $0xfc0] ss:$16 sps:$4 sm:$0xff]   ;;  %v16862_v54 = vld [vmem:[%s22813_s6 + $0x8] sm:$0xff] }
 0x7b8   :  { %13536 = vmatprep.mubr.bf16.mxu0 %v15796_v42  ;;  %13833 = vmatpush1.bf16.msra.mxu1 %v16767_v40  ;;  %v3534_v40 = vrot.slane %v16862_v54, %v18783_v5  ;;  %v16854_v5 = vld [vmem:[%s22814_s7 + $0xfe0] ss:$16 sps:$4 sm:$0xff]  }
 0x7b9   :  { %13864 = vmatprep.mubr.bf16.mxu1 %v15796_v42  ;;  %13506 = vmatprep.subr.bf16.mxu0 %v16772_v33  ;;  %v16851_v33 = vld [vmem:[%s22814_s7 + $0xfc8] ss:$16 sps:$4 sm:$0xff]   ;;  %v16856_v42 = vld [vmem:[%s22814_s7 + $0xfe4] ss:$16 sps:$4 sm:$0xff]  }
 0x7ba   :  { %13834 = vmatprep.subr.bf16.mxu1 %v16775_v36  ;;  %v16859_v36 = vld [vmem:[%s22814_s7 + $0xfec] ss:$16 sps:$4 sm:$0xff]  }
 0x7bb   :  { %13507 = vmatpush1.bf16.msra.mxu0 %v16770_v43  ;;  %v15819_v43 = vadd.f32 %v21864_v22, %v3534_v40 }
 0x7bc   :  { %13835 = vmatpush1.bf16.msra.mxu1 %v16773_v14  ;;  %13508 = vmatprep.subr.bf16.mxu0 %v16778_v30  ;;  %v16857_v14 = vld [vmem:[%s22814_s7 + $0xfe8] ss:$16 sps:$4 sm:$0xff]   ;;  %s16887_s7 = smov [#allocation3]  }
 0x7bd   :  { %13836 = vmatprep.subr.bf16.mxu1 %v16781_v44  ;;  %v15795_v30 = vpack.c.bf16 %v15819_v43, %v15819_v43  ;;  %v10579_v44 = vld [vmem:[%s22815_s8] sm:$0xf]  ;;  %s13883_s1 = sshll.u32 %s16887_s7, 4  ;;  %s13884_s1 = int_to_ptr.vmem [resolvable:$true] %s13883_s1 }
 0x7be   :  { %v10592_v22 = vrot.slane %v10579_v44, %v17552_v27  ;;  %s16863_s8 = scalar_lea.vmem %s13884_s1, 512  ;;  %p16868_p1 = scmp.lt.s32.totalorder %s13884_s1, %s13884_s1 }
 0x7bf   :  { %13509 = vmatpush1.bf16.msra.mxu0 %v16776_v45  ;;  %v10584_v45 = vrot.slane %v10579_v44, %v17350_v13  ;;  %p16864_p0 = scmp.ne.s32.totalorder %s13884_s1, %s16863_s8  ;;  %p16869_p2 = scmp.lt.s32.totalorder %s16863_s8, %s16863_s8 }
 0x7c0   :  { %13837 = vmatpush1.bf16.msra.mxu1 %v16779_v46  ;;  %13510 = vmatprep.subr.bf16.mxu0 %v16784_v48  ;;  %v10588_v46 = vrot.slane %v10579_v44, %v17358_v15  ;;  %v10596_v48 = vrot.slane %v10579_v44, %v17421_v52 }
 0x7c1   :  { %13838 = vmatprep.subr.bf16.mxu1 %v16787_v49  ;;  %p16870_p3 = por %p16869_p2, %p16868_p1 }
 0x7c3   :  { %13511 = vmatpush1.bf16.msra.mxu0 %v16782_v57  ;;  %p16871_p4 = pnand %p16870_p3, %p16864_p0 }
 0x7c4   :  { %13839 = vmatpush1.bf16.msra.mxu1 %v16785_v51  ;;  %13512 = vmatprep.subr.bf16.mxu0 %v16790_v1 }
 0x7c5   :  { %13840 = vmatprep.subr.bf16.mxu1 %v16793_v0 }
 0x7c7   :  { %13513 = vmatpush1.bf16.msra.mxu0 %v16788_v53 }
 0x7c8   :  { %13841 = vmatpush1.bf16.msra.mxu1 %v16791_v18  ;;  %13514 = vmatprep.subr.bf16.mxu0 %v16796_v55 }
 0x7c9   :  { %13842 = vmatprep.subr.bf16.mxu1 %v16799_v23 }
 0x7cb   :  { %13515 = vmatpush1.bf16.msra.mxu0 %v16794_v56 }
 0x7cc   :  { %13843 = vmatpush1.bf16.msra.mxu1 %v16797_v59  ;;  %13516 = vmatprep.subr.bf16.mxu0 %v16802_v34 }
 0x7cd   :  { %13844 = vmatprep.subr.bf16.mxu1 %v16805_v26 }
 0x7cf   :  { %13517 = vmatpush1.bf16.msra.mxu0 %v16800_v38 }
 0x7d0   :  { %13845 = vmatpush1.bf16.msra.mxu1 %v16803_v47  ;;  %13518 = vmatprep.subr.bf16.mxu0 %v16808_v60 }
 0x7d1   :  { %13846 = vmatprep.subr.bf16.mxu1 %v16811_v10 }
 0x7d3   :  { %13519 = vmatpush1.bf16.msra.mxu0 %v16806_v61 }
 0x7d4   :  { %13847 = vmatpush1.bf16.msra.mxu1 %v16809_v41  ;;  %13520 = vmatprep.subr.bf16.mxu0 %v16814_v3 }
 0x7d5   :  { %13848 = vmatprep.subr.bf16.mxu1 %v16817_v50 }
 0x7d7   :  { %13521 = vmatpush1.bf16.msra.mxu0 %v16812_v62 }
 0x7d8   :  { %13849 = vmatpush1.bf16.msra.mxu1 %v16815_v58  ;;  %13522 = vmatprep.subr.bf16.mxu0 %v16820_v2 }
 0x7d9   :  { %13850 = vmatprep.subr.bf16.mxu1 %v16823_v4 }
 0x7db   :  { %13523 = vmatpush1.bf16.msra.mxu0 %v16818_v28 }
 0x7dc   :  { %13851 = vmatpush1.bf16.msra.mxu1 %v16821_v11  ;;  %13524 = vmatprep.subr.bf16.mxu0 %v16826_v6 }
 0x7dd   :  { %13852 = vmatprep.subr.bf16.mxu1 %v16829_v32 }
 0x7df   :  { %13525 = vmatpush1.bf16.msra.mxu0 %v16824_v7 }
 0x7e0   :  { %13853 = vmatpush1.bf16.msra.mxu1 %v16827_v35  ;;  %13526 = vmatprep.subr.bf16.mxu0 %v16832_v9 }
 0x7e1   :  { %13854 = vmatprep.subr.bf16.mxu1 %v16835_v12 }
 0x7e3   :  { %13527 = vmatpush1.bf16.msra.mxu0 %v16830_v25 }
 0x7e4   :  { %13855 = vmatpush1.bf16.msra.mxu1 %v16833_v16  ;;  %13528 = vmatprep.subr.bf16.mxu0 %v16838_v21 }
 0x7e5   :  { %13856 = vmatprep.subr.bf16.mxu1 %v16841_v20 }
 0x7e7   :  { %13529 = vmatpush1.bf16.msra.mxu0 %v16836_v39 }
 0x7e8   :  { %13857 = vmatpush1.bf16.msra.mxu1 %v16839_v31  ;;  %13530 = vmatprep.subr.bf16.mxu0 %v16844_v8 }
 0x7e9   :  { %13858 = vmatprep.subr.bf16.mxu1 %v16847_v24 }
 0x7eb   :  { %13531 = vmatpush1.bf16.msra.mxu0 %v16842_v37 }
 0x7ec   :  { %13859 = vmatpush1.bf16.msra.mxu1 %v16845_v29  ;;  %13532 = vmatprep.subr.bf16.mxu0 %v16850_v19 }
 0x7ed   :  { %13860 = vmatprep.subr.bf16.mxu1 %v16853_v63 }
 0x7ef   :  { %13533 = vmatpush1.bf16.msra.mxu0 %v16848_v17 }
 0x7f0   :  { %13861 = vmatpush1.bf16.msra.mxu1 %v16851_v33  ;;  %13534 = vmatprep.subr.bf16.mxu0 %v16856_v42 }
 0x7f1   :  { %13862 = vmatprep.subr.bf16.mxu1 %v16859_v36 }
 0x7f3   :  { %13535 = vmatpush1.bf16.msra.mxu0 %v16854_v5 }
 0x7f4   :  { %13863 = vmatpush1.bf16.msra.mxu1 %v16857_v14 }
 0x7f6   :  { %13537 = vmatmul.mubr.bf16.vlgmr.msra.gmra.mrb[28].mxu0 %v15795_v30 }
 0x7f7   :  { %13865 = vmatmul.mubr.bf16.vlgmr.msra.gmra.mrb[28].mxu1 %v15795_v30 }
 0x8c9   :  { %v13538_v49 = vpop.f32.mrb[28].mxu0 }
 0x8ca   :  { %v15821_v57 = vadd.f32 %v13538_v49, %v10584_v45  ;;  %v13866_v51 = vpop.f32.mrb[28].mxu1  ;;  %v13540_v1 = vpop.f32.mrb[29].mxu0 }
 0x8cb   :  { %v15823_v0 = vadd.f32 %v13866_v51, %v10592_v22  ;;  %v15822_v53 = vadd.f32 %v13540_v1, %v10588_v46  ;;  %v13868_v18 = vpop.f32.mrb[29].mxu1  ;;  %v13542_v55 = vpop.f32.mrb[30].mxu0 }
 0x8cc   :  { %13873 = vst [vmem:[#allocation3] sm:$0xff] %v15821_v57  ;;  %v15824_v23 = vadd.f32 %v13868_v18, %v10596_v48  ;;  %v13870_v56 = vpop.f32.mrb[30].mxu1  ;;  %v13543_v13 = vpop.f32.mrb[31].mxu0 }
 0x8cd   :  { %13875 = vst [vmem:[#allocation3 + $0x10] sm:$0xff] %v15823_v0  ;;  %13874 = vst [vmem:[#allocation3 + $0x8] sm:$0xff] %v15822_v53  ;;  %v13871_v15 = vpop.f32.mrb[31].mxu1 }
 0x8ce   :  { %13876 = vst [vmem:[#allocation3 + $0x18] sm:$0xff] %v15824_v23 }
 0x8cf   :  { %16874 = shalt.err (!%p16871_p4)
}
 0x8d0   :  { %s16875_s24 = scalar_lea.hbm %s22816_s9, 512 }
 0x8d1   :  { %p16876_p5 = scmp.ne.s32.totalorder %s22816_s9, %s16875_s24  ;;  %p16879_p6 = scmp.lt.u32.totalorder %s16875_s24, %s22816_s9 }
 0x8d3   :  { %p16881_p7 = pnand %p16879_p6, %p16876_p5 }
 0x8d5   :  { %16884 = shalt.err (!%p16881_p7)
}
 0x8d6   :  { %13886 = dma.vmem_to_hbm [thread:$0]  %s13884_s1, 512, %s22816_s9, [#allocation4]  }
 0x8d7   :  { %16885 = dma.done.wait [#allocation4], 512  }
 0x8d8   :  { %16886 = vsyncadd [#allocation4], 4294966784 }
 0x8d9   :  { %13890 = vsyncpa [#allocation4], 1 }

</bundles_post_ra>
